<compile_context>
chip_gen: v7x
topology: tpu7x:2x2x1
jax: 0.10.0
libtpu: 0.0.40
codegen_flags: <defaults>
</compile_context>

<pallas_src>
import numpy as np
import jax
import jax.numpy as jnp
from jax import lax
from jax.experimental import pallas as pl
from jax.experimental.pallas import tpu as pltpu


# ---------------------------------------------------------------------------
# Host-side 1-D constant matrices (tiny; built once per configuration)
# ---------------------------------------------------------------------------
def _pool1d(n_out, n_in, k):
    """(n_out, n_in) averaging matrix for AvgPool1d(kernel=stride=k)."""
    m = np.zeros((n_out, n_in), np.float32)
    for i in range(n_out):
        m[i, i * k:(i + 1) * k] = 1.0 / k
    return m


def _upsample1d(n_out, n_in):
    """(n_out, n_in) bilinear interpolation matrix, align_corners=True."""
    m = np.zeros((n_out, n_in), np.float32)
    if n_in == 1:
        m[:, 0] = 1.0
        return m
    for i in range(n_out):
        pos = i * (n_in - 1) / (n_out - 1)
        lo = int(np.floor(pos))
        hi = min(lo + 1, n_in - 1)
        frac = pos - lo
        m[i, lo] += 1.0 - frac
        m[i, hi] += frac
    return m


def _layer_sampling(dilations, ind):
    return 2 ** (dilations[ind % len(dilations)] - 1)


# ---------------------------------------------------------------------------
# Fused MSDSampBlock forward (single pallas_call)
# ---------------------------------------------------------------------------
def msd_samp_block_pallas(x_nchw, params, n_features, n_layers, dilations):
    """x_nchw: (N, C_in, H, W) f32  ->  (N, C_in + n_features*n_layers, H, W) f32."""
    N, C0, H, W = x_nchw.shape
    nf, L = n_features, n_layers
    C_TOT = C0 + nf * L

    max_span = 3 * 2 ** (max(dilations) - 1)
    pad_h_tot = (-H) % max_span
    pad_w_tot = (-W) % max_span
    pad_h = (pad_h_tot // 2, pad_h_tot - pad_h_tot // 2)
    pad_w = (pad_w_tot // 2, pad_w_tot - pad_w_tot // 2)
    # Faithful to the PyTorch quirk: ReplicationPad2d((*padding[-2], *padding[-1])) pads
    # W with the H-derived amounts and H with the W-derived amounts; the crop below uses
    # the original pairing (same as the reference module).
    xp = jnp.pad(x_nchw.astype(jnp.float32), ((0, 0), (0, 0), pad_w, pad_h), mode="edge")
    Hp, Wp = H + pad_w_tot, W + pad_h_tot
    # In-kernel layout: (H, C, W) -- H leading, channels on sublanes, W on lanes.
    xp = jnp.transpose(xp, (0, 2, 1, 3))                       # (N, Hp, C0, Wp)

    schedule = []
    for ii in range(L):
        s = _layer_sampling(dilations, ii)
        assert Hp % s == 0 and Wp % s == 0, "padded size must divide samp factor"
        schedule.append((C0 + nf * ii, s, Hp // s, Wp // s))   # (cin, samp, h, w)

    # Per-layer packed conv weights (9*nf, cin): row = tap*nf + f, tap = dy*3 + dx,
    # plus folded conv-bias + inference-mode BatchNorm scale/shift.
    wpacks = [jnp.transpose(p["w"], (0, 1, 3, 2)).reshape(9 * nf, C0 + nf * ii)
              .astype(jnp.float32) for ii, p in enumerate(params)]
    scales = jnp.stack([p["scale"] for p in params]).astype(jnp.float32).reshape(L, nf, 1)
    biases = jnp.stack([p["bias"] for p in params]).astype(jnp.float32).reshape(L, nf, 1)

    inputs = [xp] + wpacks + [scales, biases]
    samps_gt1 = sorted({s for (_, s, _, _) in schedule if s > 1})
    sw_pos, uw_pos = {}, {}
    for s in samps_gt1:
        w_ = Wp // s
        sw_pos[s] = len(inputs)
        inputs.append(jnp.asarray(_pool1d(w_, Wp, s).T))        # (Wp, w): W avg-pool
        uw_pos[s] = len(inputs)
        inputs.append(jnp.asarray(_upsample1d(Wp, w_).T))       # (w, Wp): W bilinear up
    n_in = len(inputs)

    # One zero-padded VMEM scratch per distinct samp factor, sized for the largest cin
    # using it.  Borders are zeroed each grid step; only interiors are ever written.
    scratch_pos, scratch_dims = {}, []
    for (cin, s, h, w_) in schedule:
        shp = (h + 2, cin, w_ + 2)
        if s not in scratch_pos:
            scratch_pos[s] = len(scratch_dims)
            scratch_dims.append(shp)
        else:
            i0 = scratch_pos[s]
            old = scratch_dims[i0]
            scratch_dims[i0] = (old[0], max(old[1], cin), old[2])
    scratch_shapes = [pltpu.VMEM(shp, jnp.float32) for shp in scratch_dims]

    def kernel(*refs):
        x_ref = refs[0]
        w_refs = refs[1:1 + L]
        scale_ref = refs[1 + L]
        bias_ref = refs[2 + L]
        o_ref = refs[n_in]
        scratch_refs = refs[n_in + 1:]
        f32 = jnp.float32

        # Zero the pad scratches (their borders provide the conv zero-padding).
        for sr in scratch_refs:
            sr[...] = jnp.zeros(sr.shape, f32)

        # Output rows [0, C0): the (replication-padded) input itself.
        o_ref[0, :, 0:C0, :] = x_ref[0]

        for ii, (cin, s, h, w) in enumerate(schedule):
            hq, wq = h + 2, w + 2
            off = C0 + nf * ii
            pad_ref = scratch_refs[scratch_pos[s]]

            if s == 1:
                # Special case: no pooling -> just copy the latent into the zero-padded
                # scratch (replaces the old O(P^2) 0/1-scatter matmul).
                pad_ref[1:Hp + 1, 0:cin, 1:Wp + 1] = o_ref[0, :, 0:cin, :]
            else:
                lat = o_ref[0, :, 0:cin, :]                             # (Hp, cin, Wp)
                # Separable avg-pool: W via a tiny batched matmul ...
                sw = refs[sw_pos[s]][...]                               # (Wp, w)
                swb = jnp.broadcast_to(sw, (Hp, Wp, w))
                tmp_w = jnp.einsum('acx,axj->acj', lat, swb,
                                   preferred_element_type=f32)          # (Hp, cin, w)
                # ... H via a free leading-dim reshape + s adds.
                x4 = tmp_w.reshape(h, s, cin, w)
                pooled = x4[:, 0]
                for r in range(1, s):
                    pooled = pooled + x4[:, r]
                pooled = pooled * (1.0 / s)                             # (h, cin, w)
                pad_ref[1:h + 1, 0:cin, 1:w + 1] = pooled

            # 3x3 conv: ONE batched MXU matmul (all 9 taps packed along sublanes),
            # channel-major intermediates throughout.
            xpad = pad_ref[0:hq, 0:cin, 0:wq]                           # (hq, cin, wq)
            wkb = jnp.broadcast_to(w_refs[ii][...], (hq, 9 * nf, cin))
            t = jnp.einsum('akc,acx->akx', wkb, xpad,
                           preferred_element_type=f32)                  # (hq, 9nf, wq)

            # Shift-and-add the 9 taps (leading / sublane / lane static slices).
            acc = t[0:h, 0:nf, 0:w]
            for tap in range(1, 9):
                dy, dx = divmod(tap, 3)
                acc = acc + t[dy:dy + h, tap * nf:(tap + 1) * nf, dx:dx + w]

            # Folded conv-bias + BatchNorm (inference) and LeakyReLU(0.2).
            y = acc * scale_ref[ii] + bias_ref[ii]                      # (h, nf, w)
            y = jnp.where(y > 0, y, 0.2 * y)

            if s == 1:
                o_ref[0, :, off:off + nf, :] = y                        # (Hp, nf, Wp)
            else:
                # Separable bilinear upsample (align_corners=True):
                # W via a tiny batched matmul, H via static per-row lerp.
                uw = refs[uw_pos[s]][...]                               # (w, Wp)
                uwb = jnp.broadcast_to(uw, (h, w, Wp))
                y_w = jnp.einsum('acj,ajX->acX', y, uwb,
                                 preferred_element_type=f32)            # (h, nf, Wp)
                for Y in range(Hp):
                    if h == 1:
                        row = y_w[0]
                    else:
                        pos = Y * (h - 1) / (Hp - 1)
                        lo = int(np.floor(pos))
                        hi = min(lo + 1, h - 1)
                        fr = pos - lo
                        if fr < 1e-9 or hi == lo:
                            row = y_w[lo]
                        else:
                            row = y_w[lo] * (1.0 - fr) + y_w[hi] * fr
                    o_ref[0, Y, off:off + nf, :] = row                  # (nf, Wp)

    def _const_spec(shape):
        nd = len(shape)
        return pl.BlockSpec(shape, lambda *args: (0,) * nd)

    in_specs = [pl.BlockSpec((1, Hp, C0, Wp), lambda n: (n, 0, 0, 0))]
    for a in inputs[1:]:
        in_specs.append(_const_spec(a.shape))

    grid_spec = pltpu.PrefetchScalarGridSpec(
        num_scalar_prefetch=0,
        grid=(N,),
        in_specs=in_specs,
        out_specs=pl.BlockSpec((1, Hp, C_TOT, Wp), lambda n: (n, 0, 0, 0)),
        scratch_shapes=scratch_shapes,
    )

    out = pl.pallas_call(
        kernel,
        out_shape=jax.ShapeDtypeStruct((N, Hp, C_TOT, Wp), jnp.float32),
        grid_spec=grid_spec,
        compiler_params=pltpu.CompilerParams(dimension_semantics=("parallel",)),
    )(*inputs)

    out = jnp.transpose(out, (0, 2, 1, 3))                     # (N, C_TOT, Hp, Wp)
    # Crop back to the original size (same index pairing as the PyTorch code).
    return out[:, :, pad_h[0]:pad_h[0] + H, pad_w[0]:pad_w[0] + W]


# ---------------------------------------------------------------------------
# Pure-JAX reference (mirrors the PyTorch forward; for the correctness check)
# ---------------------------------------------------------------------------
def _avg_pool_ref(x, k):
    n, h, w, c = x.shape
    hc, wc = (h // k) * k, (w // k) * k
    x = x[:, :hc, :wc, :]
    return x.reshape(n, hc // k, k, wc // k, k, c).mean(axis=(2, 4))


def _upsample_ref(x, k):
    n, h, w, c = x.shape
    ho, wo = h * k, w * k

    def src(out_size, in_size):
        if out_size <= 1 or in_size <= 1:
            return jnp.zeros((out_size,), jnp.float32)
        return jnp.arange(out_size, dtype=jnp.float32) * ((in_size - 1) / (out_size - 1))

    yc, xc = src(ho, h), src(wo, w)
    y0 = jnp.floor(yc).astype(jnp.int32); y1 = jnp.minimum(y0 + 1, h - 1)
    x0 = jnp.floor(xc).astype(jnp.int32); x1 = jnp.minimum(x0 + 1, w - 1)
    wy = (yc - y0)[None, :, None, None]
    wx = (xc - x0)[None, None, :, None]
    top = x[:, y0] * (1.0 - wy) + x[:, y1] * wy
    return top[:, :, x0] * (1.0 - wx) + top[:, :, x1] * wx


def _conv_bn_lrelu_ref(x, w, scale, bias):
    y = lax.conv_general_dilated(
        x, w, window_strides=(1, 1), padding=((1, 1), (1, 1)),
        dimension_numbers=("NHWC", "HWIO", "NHWC"),
        precision=lax.Precision.HIGHEST)
    y = y * scale + bias
    return jnp.where(y > 0, y, 0.2 * y)


def msd_samp_block_reference(x_nchw, params, n_features, n_layers, dilations):
    N, C, H, W = x_nchw.shape
    max_span = 3 * 2 ** (max(dilations) - 1)
    pad_h_tot = (-H) % max_span
    pad_w_tot = (-W) % max_span
    pad_h = (pad_h_tot // 2, pad_h_tot - pad_h_tot // 2)
    pad_w = (pad_w_tot // 2, pad_w_tot - pad_w_tot // 2)
    x = jnp.transpose(x_nchw, (0, 2, 3, 1))
    x = jnp.pad(x, ((0, 0), pad_w, pad_h, (0, 0)), mode="edge")
    latent = [x]
    for ii in range(n_layers):
        samp = _layer_sampling(dilations, ii)
        inp = jnp.concatenate(latent, axis=-1)
        if samp > 1:
            inp = _avg_pool_ref(inp, samp)
        p = params[ii]
        y = _conv_bn_lrelu_ref(inp, p["w"], p["scale"], p["bias"])
        if samp > 1:
            y = _upsample_ref(y, samp)
        latent.append(y)
    out = jnp.concatenate(latent, axis=-1)
    out = out[:, pad_h[0]:pad_h[0] + H, pad_w[0]:pad_w[0] + W, :]
    return jnp.transpose(out, (0, 3, 1, 2))


# ---------------------------------------------------------------------------
# Deterministic parameter initialization (BatchNorm folded in inference mode)
# ---------------------------------------------------------------------------
def init_params(key, n_ch_in, n_features, n_layers, eps=1e-5):
    params = []
    for ii in range(n_layers):
        cin = n_ch_in + n_features * ii
        k = jax.random.fold_in(key, ii)
        kw, kb, kg, kbe, km, kv = jax.random.split(k, 6)
        w = 0.1 * jax.random.normal(kw, (3, 3, cin, n_features), jnp.float32)   # HWIO
        conv_b = 0.05 * jax.random.normal(kb, (n_features,), jnp.float32)
        gamma = 1.0 + 0.1 * jax.random.normal(kg, (n_features,), jnp.float32)
        beta = 0.05 * jax.random.normal(kbe, (n_features,), jnp.float32)
        mean = 0.05 * jax.random.normal(km, (n_features,), jnp.float32)
        var = 0.5 + jax.random.uniform(kv, (n_features,), jnp.float32)
        scale = gamma / jnp.sqrt(var + eps)            # BN inference-mode scale
        bias = beta + scale * (conv_b - mean)          # conv bias + BN shift folded
        params.append({"w": w, "scale": scale, "bias": bias})
    return params


if __name__ == "__main__":
    n_ch_in, n_features, n_layers = 3, 4, 4
    dilations = (1, 2, 3)                              # samp factors per layer: 1, 2, 4, 1

    key = jax.random.PRNGKey(0)
    kx, kp = jax.random.split(key)
    x = jax.random.normal(kx, (2, n_ch_in, 16, 16), jnp.float32)   # NCHW like PyTorch
    params = init_params(kp, n_ch_in, n_features, n_layers)

    out = msd_samp_block_pallas(x, params, n_features, n_layers, dilations)
    out = jax.block_until_ready(out)

    ref = msd_samp_block_reference(x, params, n_features, n_layers, dilations)
    ref = jax.block_until_ready(ref)

    assert out.shape == (2, n_ch_in + n_features * n_layers, 16, 16), out.shape
    err = float(jnp.max(jnp.abs(out - ref)))
    assert err < 2e-3, f"max abs error {err}"
    print("KERNEL_OK")
</pallas_src>

<mosaic_0001>
module attributes {stable_mosaic.version = 11 : i64} {
  func.func @kernel(%arg0: i32, %arg1: memref<1x24x3x24xf32, #tpu.memory_space<vmem>>, %arg2: memref<36x3xf32, #tpu.memory_space<vmem>>, %arg3: memref<36x7xf32, #tpu.memory_space<vmem>>, %arg4: memref<36x11xf32, #tpu.memory_space<vmem>>, %arg5: memref<36x15xf32, #tpu.memory_space<vmem>>, %arg6: memref<4x4x1xf32, #tpu.memory_space<vmem>>, %arg7: memref<4x4x1xf32, #tpu.memory_space<vmem>>, %arg8: memref<24x12xf32, #tpu.memory_space<vmem>>, %arg9: memref<12x24xf32, #tpu.memory_space<vmem>>, %arg10: memref<24x6xf32, #tpu.memory_space<vmem>>, %arg11: memref<6x24xf32, #tpu.memory_space<vmem>>, %arg12: memref<1x24x19x24xf32, #tpu.memory_space<vmem>>, %arg13: memref<26x15x26xf32, #tpu.memory_space<vmem>>, %arg14: memref<14x7x14xf32, #tpu.memory_space<vmem>>, %arg15: memref<8x11x8xf32, #tpu.memory_space<vmem>>) attributes {dimension_semantics = [#tpu.dimension_semantics<parallel>], iteration_bounds = array<i64: 2>, scalar_prefetch = 0 : i64, scratch_operands = 3 : i64, tpu.core_type = #tpu.core_type<tc>, window_params = [{transform_indices = @transform_0, window_bounds = array<i64: 1, 24, 3, 24>}, {pipeline_mode = #tpu.pipeline_mode<synchronous>, transform_indices = @transform_1, window_bounds = array<i64: 36, 3>}, {pipeline_mode = #tpu.pipeline_mode<synchronous>, transform_indices = @transform_2, window_bounds = array<i64: 36, 7>}, {pipeline_mode = #tpu.pipeline_mode<synchronous>, transform_indices = @transform_3, window_bounds = array<i64: 36, 11>}, {pipeline_mode = #tpu.pipeline_mode<synchronous>, transform_indices = @transform_4, window_bounds = array<i64: 36, 15>}, {pipeline_mode = #tpu.pipeline_mode<synchronous>, transform_indices = @transform_5, window_bounds = array<i64: 4, 4, 1>}, {pipeline_mode = #tpu.pipeline_mode<synchronous>, transform_indices = @transform_6, window_bounds = array<i64: 4, 4, 1>}, {pipeline_mode = #tpu.pipeline_mode<synchronous>, transform_indices = @transform_7, window_bounds = array<i64: 24, 12>}, {pipeline_mode = #tpu.pipeline_mode<synchronous>, transform_indices = @transform_8, window_bounds = array<i64: 12, 24>}, {pipeline_mode = #tpu.pipeline_mode<synchronous>, transform_indices = @transform_9, window_bounds = array<i64: 24, 6>}, {pipeline_mode = #tpu.pipeline_mode<synchronous>, transform_indices = @transform_10, window_bounds = array<i64: 6, 24>}, {transform_indices = @transform_11, window_bounds = array<i64: 1, 24, 19, 24>}]} {
    %cst = arith.constant 0.000000e+00 : f32
    %0 = vector.broadcast %cst : f32 to vector<26x15x26xf32>
    %c0 = arith.constant 0 : index
    %c0_0 = arith.constant 0 : index
    %c0_1 = arith.constant 0 : index
    %1 = vector.load %arg13[%c0, %c0_0, %c0_1] : memref<26x15x26xf32, #tpu.memory_space<vmem>>, vector<26x15x26xf32>
    tpu.vector_store %arg13[%c0, %c0_0, %c0_1], %0 {strides = array<i32>} : memref<26x15x26xf32, #tpu.memory_space<vmem>>, vector<26x15x26xf32>,
    %cst_2 = arith.constant 0.000000e+00 : f32
    %2 = vector.broadcast %cst_2 : f32 to vector<14x7x14xf32>
    %c0_3 = arith.constant 0 : index
    %c0_4 = arith.constant 0 : index
    %c0_5 = arith.constant 0 : index
    %3 = vector.load %arg14[%c0_3, %c0_4, %c0_5] : memref<14x7x14xf32, #tpu.memory_space<vmem>>, vector<14x7x14xf32>
    tpu.vector_store %arg14[%c0_3, %c0_4, %c0_5], %2 {strides = array<i32>} : memref<14x7x14xf32, #tpu.memory_space<vmem>>, vector<14x7x14xf32>,
    %cst_6 = arith.constant 0.000000e+00 : f32
    %4 = vector.broadcast %cst_6 : f32 to vector<8x11x8xf32>
    %c0_7 = arith.constant 0 : index
    %c0_8 = arith.constant 0 : index
    %c0_9 = arith.constant 0 : index
    %5 = vector.load %arg15[%c0_7, %c0_8, %c0_9] : memref<8x11x8xf32, #tpu.memory_space<vmem>>, vector<8x11x8xf32>
    tpu.vector_store %arg15[%c0_7, %c0_8, %c0_9], %4 {strides = array<i32>} : memref<8x11x8xf32, #tpu.memory_space<vmem>>, vector<8x11x8xf32>,
    %c0_10 = arith.constant 0 : index
    %c0_11 = arith.constant 0 : index
    %c0_12 = arith.constant 0 : index
    %c0_13 = arith.constant 0 : index
    %6 = vector.load %arg1[%c0_10, %c0_11, %c0_12, %c0_13] : memref<1x24x3x24xf32, #tpu.memory_space<vmem>>, vector<1x24x3x24xf32>
    %7 = vector.shape_cast %6 : vector<1x24x3x24xf32> to vector<24x3x24xf32>
    %c0_14 = arith.constant 0 : index
    %c0_15 = arith.constant 0 : index
    %c0_16 = arith.constant 0 : index
    %c0_17 = arith.constant 0 : index
    %8 = vector.load %arg12[%c0_14, %c0_15, %c0_16, %c0_17] : memref<1x24x19x24xf32, #tpu.memory_space<vmem>>, vector<1x24x3x24xf32>
    %9 = vector.shape_cast %8 : vector<1x24x3x24xf32> to vector<24x3x24xf32>
    %10 = vector.shape_cast %7 : vector<24x3x24xf32> to vector<1x24x3x24xf32>
    tpu.vector_store %arg12[%c0_14, %c0_15, %c0_16, %c0_17], %10 {strides = array<i32>} : memref<1x24x19x24xf32, #tpu.memory_space<vmem>>, vector<1x24x3x24xf32>,
    %c0_18 = arith.constant 0 : index
    %c0_19 = arith.constant 0 : index
    %c0_20 = arith.constant 0 : index
    %c0_21 = arith.constant 0 : index
    %11 = vector.load %arg12[%c0_18, %c0_19, %c0_20, %c0_21] : memref<1x24x19x24xf32, #tpu.memory_space<vmem>>, vector<1x24x3x24xf32>
    %12 = vector.shape_cast %11 : vector<1x24x3x24xf32> to vector<24x3x24xf32>
    %c1 = arith.constant 1 : index
    %c0_22 = arith.constant 0 : index
    %c1_23 = arith.constant 1 : index
    %13 = vector.load %arg13[%c1, %c0_22, %c1_23] : memref<26x15x26xf32, #tpu.memory_space<vmem>>, vector<24x3x24xf32>
    tpu.vector_store %arg13[%c1, %c0_22, %c1_23], %12 {strides = array<i32>} : memref<26x15x26xf32, #tpu.memory_space<vmem>>, vector<24x3x24xf32>,
    %c0_24 = arith.constant 0 : index
    %c0_25 = arith.constant 0 : index
    %c0_26 = arith.constant 0 : index
    %14 = vector.load %arg13[%c0_24, %c0_25, %c0_26] : memref<26x15x26xf32, #tpu.memory_space<vmem>>, vector<26x3x26xf32>
    %c0_27 = arith.constant 0 : index
    %c0_28 = arith.constant 0 : index
    %15 = vector.load %arg2[%c0_27, %c0_28] : memref<36x3xf32, #tpu.memory_space<vmem>>, vector<36x3xf32>
    %16 = vector.shape_cast %15 : vector<36x3xf32> to vector<1x36x3xf32>
    %17 = vector.broadcast %16 : vector<1x36x3xf32> to vector<26x36x3xf32>
    "tpu.trace_start"() <{level = 10 : i32, message = "akc,acx->akx"}> : () -> ()
    %cst_29 = arith.constant dense<0.000000e+00> : vector<26x36x26xf32>
    %18 = tpu.matmul %17, %14, %cst_29 {dimension_numbers = #tpu.dot_dimension_numbers<[2], [1], [1], [2], [0, 0, 0, 1, 1, 2], [0], [0]>} : vector<26x36x3xf32>, vector<26x3x26xf32>, vector<26x36x26xf32> -> vector<26x36x26xf32>
    "tpu.trace_stop"() : () -> ()
    %19 = vector.extract_strided_slice %18 {offsets = [0, 0, 0], sizes = [24, 4, 24], strides = [1, 1, 1]} : vector<26x36x26xf32> to vector<24x4x24xf32>
    %20 = vector.extract_strided_slice %18 {offsets = [0, 4, 1], sizes = [24, 4, 24], strides = [1, 1, 1]} : vector<26x36x26xf32> to vector<24x4x24xf32>
    %21 = arith.addf %19, %20 : vector<24x4x24xf32>
    %22 = vector.extract_strided_slice %18 {offsets = [0, 8, 2], sizes = [24, 4, 24], strides = [1, 1, 1]} : vector<26x36x26xf32> to vector<24x4x24xf32>
    %23 = arith.addf %21, %22 : vector<24x4x24xf32>
    %24 = vector.extract_strided_slice %18 {offsets = [1, 12, 0], sizes = [24, 4, 24], strides = [1, 1, 1]} : vector<26x36x26xf32> to vector<24x4x24xf32>
    %25 = arith.addf %23, %24 : vector<24x4x24xf32>
    %26 = vector.extract_strided_slice %18 {offsets = [1, 16, 1], sizes = [24, 4, 24], strides = [1, 1, 1]} : vector<26x36x26xf32> to vector<24x4x24xf32>
    %27 = arith.addf %25, %26 : vector<24x4x24xf32>
    %28 = vector.extract_strided_slice %18 {offsets = [1, 20, 2], sizes = [24, 4, 24], strides = [1, 1, 1]} : vector<26x36x26xf32> to vector<24x4x24xf32>
    %29 = arith.addf %27, %28 : vector<24x4x24xf32>
    %30 = vector.extract_strided_slice %18 {offsets = [2, 24, 0], sizes = [24, 4, 24], strides = [1, 1, 1]} : vector<26x36x26xf32> to vector<24x4x24xf32>
    %31 = arith.addf %29, %30 : vector<24x4x24xf32>
    %32 = vector.extract_strided_slice %18 {offsets = [2, 28, 1], sizes = [24, 4, 24], strides = [1, 1, 1]} : vector<26x36x26xf32> to vector<24x4x24xf32>
    %33 = arith.addf %31, %32 : vector<24x4x24xf32>
    %34 = vector.extract_strided_slice %18 {offsets = [2, 32, 2], sizes = [24, 4, 24], strides = [1, 1, 1]} : vector<26x36x26xf32> to vector<24x4x24xf32>
    %35 = arith.addf %33, %34 : vector<24x4x24xf32>
    %c0_30 = arith.constant 0 : index
    %c0_31 = arith.constant 0 : index
    %c0_32 = arith.constant 0 : index
    %36 = vector.load %arg6[%c0_30, %c0_31, %c0_32] : memref<4x4x1xf32, #tpu.memory_space<vmem>>, vector<1x4x1xf32>
    %37 = vector.shape_cast %36 : vector<1x4x1xf32> to vector<4x1xf32>
    %38 = vector.shape_cast %37 : vector<4x1xf32> to vector<1x4x1xf32>
    %39 = vector.broadcast %38 : vector<1x4x1xf32> to vector<24x4x24xf32>
    %40 = arith.mulf %35, %39 : vector<24x4x24xf32>
    %c0_33 = arith.constant 0 : index
    %c0_34 = arith.constant 0 : index
    %c0_35 = arith.constant 0 : index
    %41 = vector.load %arg7[%c0_33, %c0_34, %c0_35] : memref<4x4x1xf32, #tpu.memory_space<vmem>>, vector<1x4x1xf32>
    %42 = vector.shape_cast %41 : vector<1x4x1xf32> to vector<4x1xf32>
    %43 = vector.shape_cast %42 : vector<4x1xf32> to vector<1x4x1xf32>
    %44 = vector.broadcast %43 : vector<1x4x1xf32> to vector<24x4x24xf32>
    %45 = arith.addf %40, %44 : vector<24x4x24xf32>
    %cst_36 = arith.constant 0.000000e+00 : f32
    %46 = vector.broadcast %cst_36 : f32 to vector<24x4x24xf32>
    %47 = arith.cmpf ogt, %45, %46 : vector<24x4x24xf32>
    %cst_37 = arith.constant 2.000000e-01 : f32
    %48 = vector.broadcast %cst_37 : f32 to vector<24x4x24xf32>
    %49 = arith.mulf %48, %45 : vector<24x4x24xf32>
    %50 = arith.select %47, %45, %49 : vector<24x4x24xi1>, vector<24x4x24xf32>
    %c0_38 = arith.constant 0 : index
    %c0_39 = arith.constant 0 : index
    %c3 = arith.constant 3 : index
    %c0_40 = arith.constant 0 : index
    %51 = vector.load %arg12[%c0_38, %c0_39, %c3, %c0_40] : memref<1x24x19x24xf32, #tpu.memory_space<vmem>>, vector<1x24x4x24xf32>
    %52 = vector.shape_cast %51 : vector<1x24x4x24xf32> to vector<24x4x24xf32>
    %53 = vector.shape_cast %50 : vector<24x4x24xf32> to vector<1x24x4x24xf32>
    tpu.vector_store %arg12[%c0_38, %c0_39, %c3, %c0_40], %53 {strides = array<i32>} : memref<1x24x19x24xf32, #tpu.memory_space<vmem>>, vector<1x24x4x24xf32>,
    %c0_41 = arith.constant 0 : index
    %c0_42 = arith.constant 0 : index
    %c0_43 = arith.constant 0 : index
    %c0_44 = arith.constant 0 : index
    %54 = vector.load %arg12[%c0_41, %c0_42, %c0_43, %c0_44] : memref<1x24x19x24xf32, #tpu.memory_space<vmem>>, vector<1x24x7x24xf32>
    %55 = vector.shape_cast %54 : vector<1x24x7x24xf32> to vector<24x7x24xf32>
    %c0_45 = arith.constant 0 : index
    %c0_46 = arith.constant 0 : index
    %56 = vector.load %arg8[%c0_45, %c0_46] : memref<24x12xf32, #tpu.memory_space<vmem>>, vector<24x12xf32>
    %57 = vector.shape_cast %56 : vector<24x12xf32> to vector<1x24x12xf32>
    %58 = vector.broadcast %57 : vector<1x24x12xf32> to vector<24x24x12xf32>
    "tpu.trace_start"() <{level = 10 : i32, message = "acx,axj->acj"}> : () -> ()
    %cst_47 = arith.constant dense<0.000000e+00> : vector<24x7x12xf32>
    %59 = tpu.matmul %55, %58, %cst_47 {dimension_numbers = #tpu.dot_dimension_numbers<[2], [1], [1], [2], [0, 0, 0, 1, 1, 2], [0], [0]>} : vector<24x7x24xf32>, vector<24x24x12xf32>, vector<24x7x12xf32> -> vector<24x7x12xf32>
    "tpu.trace_stop"() : () -> ()
    %60 = vector.shape_cast %59 : vector<24x7x12xf32> to vector<12x2x7x12xf32>
    %61 = vector.extract_strided_slice %60 {offsets = [0, 0, 0, 0], sizes = [12, 1, 7, 12], strides = [1, 1, 1, 1]} : vector<12x2x7x12xf32> to vector<12x1x7x12xf32>
    %62 = vector.shape_cast %61 : vector<12x1x7x12xf32> to vector<12x7x12xf32>
    %63 = vector.extract_strided_slice %60 {offsets = [0, 1, 0, 0], sizes = [12, 1, 7, 12], strides = [1, 1, 1, 1]} : vector<12x2x7x12xf32> to vector<12x1x7x12xf32>
    %64 = vector.shape_cast %63 : vector<12x1x7x12xf32> to vector<12x7x12xf32>
    %65 = arith.addf %62, %64 : vector<12x7x12xf32>
    %cst_48 = arith.constant 5.000000e-01 : f32
    %66 = vector.broadcast %cst_48 : f32 to vector<12x7x12xf32>
    %67 = arith.mulf %65, %66 : vector<12x7x12xf32>
    %c1_49 = arith.constant 1 : index
    %c0_50 = arith.constant 0 : index
    %c1_51 = arith.constant 1 : index
    %68 = vector.load %arg14[%c1_49, %c0_50, %c1_51] : memref<14x7x14xf32, #tpu.memory_space<vmem>>, vector<12x7x12xf32>
    tpu.vector_store %arg14[%c1_49, %c0_50, %c1_51], %67 {strides = array<i32>} : memref<14x7x14xf32, #tpu.memory_space<vmem>>, vector<12x7x12xf32>,
    %c0_52 = arith.constant 0 : index
    %c0_53 = arith.constant 0 : index
    %c0_54 = arith.constant 0 : index
    %69 = vector.load %arg14[%c0_52, %c0_53, %c0_54] : memref<14x7x14xf32, #tpu.memory_space<vmem>>, vector<14x7x14xf32>
    %c0_55 = arith.constant 0 : index
    %c0_56 = arith.constant 0 : index
    %70 = vector.load %arg3[%c0_55, %c0_56] : memref<36x7xf32, #tpu.memory_space<vmem>>, vector<36x7xf32>
    %71 = vector.shape_cast %70 : vector<36x7xf32> to vector<1x36x7xf32>
    %72 = vector.broadcast %71 : vector<1x36x7xf32> to vector<14x36x7xf32>
    "tpu.trace_start"() <{level = 10 : i32, message = "akc,acx->akx"}> : () -> ()
    %cst_57 = arith.constant dense<0.000000e+00> : vector<14x36x14xf32>
    %73 = tpu.matmul %72, %69, %cst_57 {dimension_numbers = #tpu.dot_dimension_numbers<[2], [1], [1], [2], [0, 0, 0, 1, 1, 2], [0], [0]>} : vector<14x36x7xf32>, vector<14x7x14xf32>, vector<14x36x14xf32> -> vector<14x36x14xf32>
    "tpu.trace_stop"() : () -> ()
    %74 = vector.extract_strided_slice %73 {offsets = [0, 0, 0], sizes = [12, 4, 12], strides = [1, 1, 1]} : vector<14x36x14xf32> to vector<12x4x12xf32>
    %75 = vector.extract_strided_slice %73 {offsets = [0, 4, 1], sizes = [12, 4, 12], strides = [1, 1, 1]} : vector<14x36x14xf32> to vector<12x4x12xf32>
    %76 = arith.addf %74, %75 : vector<12x4x12xf32>
    %77 = vector.extract_strided_slice %73 {offsets = [0, 8, 2], sizes = [12, 4, 12], strides = [1, 1, 1]} : vector<14x36x14xf32> to vector<12x4x12xf32>
    %78 = arith.addf %76, %77 : vector<12x4x12xf32>
    %79 = vector.extract_strided_slice %73 {offsets = [1, 12, 0], sizes = [12, 4, 12], strides = [1, 1, 1]} : vector<14x36x14xf32> to vector<12x4x12xf32>
    %80 = arith.addf %78, %79 : vector<12x4x12xf32>
    %81 = vector.extract_strided_slice %73 {offsets = [1, 16, 1], sizes = [12, 4, 12], strides = [1, 1, 1]} : vector<14x36x14xf32> to vector<12x4x12xf32>
    %82 = arith.addf %80, %81 : vector<12x4x12xf32>
    %83 = vector.extract_strided_slice %73 {offsets = [1, 20, 2], sizes = [12, 4, 12], strides = [1, 1, 1]} : vector<14x36x14xf32> to vector<12x4x12xf32>
    %84 = arith.addf %82, %83 : vector<12x4x12xf32>
    %85 = vector.extract_strided_slice %73 {offsets = [2, 24, 0], sizes = [12, 4, 12], strides = [1, 1, 1]} : vector<14x36x14xf32> to vector<12x4x12xf32>
    %86 = arith.addf %84, %85 : vector<12x4x12xf32>
    %87 = vector.extract_strided_slice %73 {offsets = [2, 28, 1], sizes = [12, 4, 12], strides = [1, 1, 1]} : vector<14x36x14xf32> to vector<12x4x12xf32>
    %88 = arith.addf %86, %87 : vector<12x4x12xf32>
    %89 = vector.extract_strided_slice %73 {offsets = [2, 32, 2], sizes = [12, 4, 12], strides = [1, 1, 1]} : vector<14x36x14xf32> to vector<12x4x12xf32>
    %90 = arith.addf %88, %89 : vector<12x4x12xf32>
    %c1_58 = arith.constant 1 : index
    %c0_59 = arith.constant 0 : index
    %c0_60 = arith.constant 0 : index
    %91 = vector.load %arg6[%c1_58, %c0_59, %c0_60] : memref<4x4x1xf32, #tpu.memory_space<vmem>>, vector<1x4x1xf32>
    %92 = vector.shape_cast %91 : vector<1x4x1xf32> to vector<4x1xf32>
    %93 = vector.shape_cast %92 : vector<4x1xf32> to vector<1x4x1xf32>
    %94 = vector.broadcast %93 : vector<1x4x1xf32> to vector<12x4x12xf32>
    %95 = arith.mulf %90, %94 : vector<12x4x12xf32>
    %c1_61 = arith.constant 1 : index
    %c0_62 = arith.constant 0 : index
    %c0_63 = arith.constant 0 : index
    %96 = vector.load %arg7[%c1_61, %c0_62, %c0_63] : memref<4x4x1xf32, #tpu.memory_space<vmem>>, vector<1x4x1xf32>
    %97 = vector.shape_cast %96 : vector<1x4x1xf32> to vector<4x1xf32>
    %98 = vector.shape_cast %97 : vector<4x1xf32> to vector<1x4x1xf32>
    %99 = vector.broadcast %98 : vector<1x4x1xf32> to vector<12x4x12xf32>
    %100 = arith.addf %95, %99 : vector<12x4x12xf32>
    %cst_64 = arith.constant 0.000000e+00 : f32
    %101 = vector.broadcast %cst_64 : f32 to vector<12x4x12xf32>
    %102 = arith.cmpf ogt, %100, %101 : vector<12x4x12xf32>
    %cst_65 = arith.constant 2.000000e-01 : f32
    %103 = vector.broadcast %cst_65 : f32 to vector<12x4x12xf32>
    %104 = arith.mulf %103, %100 : vector<12x4x12xf32>
    %105 = arith.select %102, %100, %104 : vector<12x4x12xi1>, vector<12x4x12xf32>
    %c0_66 = arith.constant 0 : index
    %c0_67 = arith.constant 0 : index
    %106 = vector.load %arg9[%c0_66, %c0_67] : memref<12x24xf32, #tpu.memory_space<vmem>>, vector<12x24xf32>
    %107 = vector.shape_cast %106 : vector<12x24xf32> to vector<1x12x24xf32>
    %108 = vector.broadcast %107 : vector<1x12x24xf32> to vector<12x12x24xf32>
    "tpu.trace_start"() <{level = 10 : i32, message = "acj,ajX->acX"}> : () -> ()
    %cst_68 = arith.constant dense<0.000000e+00> : vector<12x4x24xf32>
    %109 = tpu.matmul %105, %108, %cst_68 {dimension_numbers = #tpu.dot_dimension_numbers<[2], [1], [1], [2], [0, 0, 0, 1, 1, 2], [0], [0]>} : vector<12x4x12xf32>, vector<12x12x24xf32>, vector<12x4x24xf32> -> vector<12x4x24xf32>
    "tpu.trace_stop"() : () -> ()
    %110 = vector.extract_strided_slice %109 {offsets = [0, 0, 0], sizes = [1, 4, 24], strides = [1, 1, 1]} : vector<12x4x24xf32> to vector<1x4x24xf32>
    %111 = vector.shape_cast %110 : vector<1x4x24xf32> to vector<4x24xf32>
    %c0_69 = arith.constant 0 : index
    %c0_70 = arith.constant 0 : index
    %c7 = arith.constant 7 : index
    %c0_71 = arith.constant 0 : index
    %112 = vector.load %arg12[%c0_69, %c0_70, %c7, %c0_71] : memref<1x24x19x24xf32, #tpu.memory_space<vmem>>, vector<1x1x4x24xf32>
    %113 = vector.shape_cast %112 : vector<1x1x4x24xf32> to vector<4x24xf32>
    %114 = vector.shape_cast %111 : vector<4x24xf32> to vector<1x1x4x24xf32>
    tpu.vector_store %arg12[%c0_69, %c0_70, %c7, %c0_71], %114 {strides = array<i32>} : memref<1x24x19x24xf32, #tpu.memory_space<vmem>>, vector<1x1x4x24xf32>,
    %115 = vector.extract_strided_slice %109 {offsets = [0, 0, 0], sizes = [1, 4, 24], strides = [1, 1, 1]} : vector<12x4x24xf32> to vector<1x4x24xf32>
    %116 = vector.shape_cast %115 : vector<1x4x24xf32> to vector<4x24xf32>
    %cst_72 = arith.constant 0.521739125 : f32
    %117 = vector.broadcast %cst_72 : f32 to vector<4x24xf32>
    %118 = arith.mulf %116, %117 : vector<4x24xf32>
    %119 = vector.extract_strided_slice %109 {offsets = [1, 0, 0], sizes = [1, 4, 24], strides = [1, 1, 1]} : vector<12x4x24xf32> to vector<1x4x24xf32>
    %120 = vector.shape_cast %119 : vector<1x4x24xf32> to vector<4x24xf32>
    %cst_73 = arith.constant 0.478260875 : f32
    %121 = vector.broadcast %cst_73 : f32 to vector<4x24xf32>
    %122 = arith.mulf %120, %121 : vector<4x24xf32>
    %123 = arith.addf %118, %122 : vector<4x24xf32>
    %c0_74 = arith.constant 0 : index
    %c1_75 = arith.constant 1 : index
    %c7_76 = arith.constant 7 : index
    %c0_77 = arith.constant 0 : index
    %124 = vector.load %arg12[%c0_74, %c1_75, %c7_76, %c0_77] : memref<1x24x19x24xf32, #tpu.memory_space<vmem>>, vector<1x1x4x24xf32>
    %125 = vector.shape_cast %124 : vector<1x1x4x24xf32> to vector<4x24xf32>
    %126 = vector.shape_cast %123 : vector<4x24xf32> to vector<1x1x4x24xf32>
    tpu.vector_store %arg12[%c0_74, %c1_75, %c7_76, %c0_77], %126 {strides = array<i32>} : memref<1x24x19x24xf32, #tpu.memory_space<vmem>>, vector<1x1x4x24xf32>,
    %127 = vector.extract_strided_slice %109 {offsets = [0, 0, 0], sizes = [1, 4, 24], strides = [1, 1, 1]} : vector<12x4x24xf32> to vector<1x4x24xf32>
    %128 = vector.shape_cast %127 : vector<1x4x24xf32> to vector<4x24xf32>
    %cst_78 = arith.constant 0.0434782617 : f32
    %129 = vector.broadcast %cst_78 : f32 to vector<4x24xf32>
    %130 = arith.mulf %128, %129 : vector<4x24xf32>
    %131 = vector.extract_strided_slice %109 {offsets = [1, 0, 0], sizes = [1, 4, 24], strides = [1, 1, 1]} : vector<12x4x24xf32> to vector<1x4x24xf32>
    %132 = vector.shape_cast %131 : vector<1x4x24xf32> to vector<4x24xf32>
    %cst_79 = arith.constant 0.956521749 : f32
    %133 = vector.broadcast %cst_79 : f32 to vector<4x24xf32>
    %134 = arith.mulf %132, %133 : vector<4x24xf32>
    %135 = arith.addf %130, %134 : vector<4x24xf32>
    %c0_80 = arith.constant 0 : index
    %c2 = arith.constant 2 : index
    %c7_81 = arith.constant 7 : index
    %c0_82 = arith.constant 0 : index
    %136 = vector.load %arg12[%c0_80, %c2, %c7_81, %c0_82] : memref<1x24x19x24xf32, #tpu.memory_space<vmem>>, vector<1x1x4x24xf32>
    %137 = vector.shape_cast %136 : vector<1x1x4x24xf32> to vector<4x24xf32>
    %138 = vector.shape_cast %135 : vector<4x24xf32> to vector<1x1x4x24xf32>
    tpu.vector_store %arg12[%c0_80, %c2, %c7_81, %c0_82], %138 {strides = array<i32>} : memref<1x24x19x24xf32, #tpu.memory_space<vmem>>, vector<1x1x4x24xf32>,
    %139 = vector.extract_strided_slice %109 {offsets = [1, 0, 0], sizes = [1, 4, 24], strides = [1, 1, 1]} : vector<12x4x24xf32> to vector<1x4x24xf32>
    %140 = vector.shape_cast %139 : vector<1x4x24xf32> to vector<4x24xf32>
    %cst_83 = arith.constant 0.565217376 : f32
    %141 = vector.broadcast %cst_83 : f32 to vector<4x24xf32>
    %142 = arith.mulf %140, %141 : vector<4x24xf32>
    %143 = vector.extract_strided_slice %109 {offsets = [2, 0, 0], sizes = [1, 4, 24], strides = [1, 1, 1]} : vector<12x4x24xf32> to vector<1x4x24xf32>
    %144 = vector.shape_cast %143 : vector<1x4x24xf32> to vector<4x24xf32>
    %cst_84 = arith.constant 0.434782594 : f32
    %145 = vector.broadcast %cst_84 : f32 to vector<4x24xf32>
    %146 = arith.mulf %144, %145 : vector<4x24xf32>
    %147 = arith.addf %142, %146 : vector<4x24xf32>
    %c0_85 = arith.constant 0 : index
    %c3_86 = arith.constant 3 : index
    %c7_87 = arith.constant 7 : index
    %c0_88 = arith.constant 0 : index
    %148 = vector.load %arg12[%c0_85, %c3_86, %c7_87, %c0_88] : memref<1x24x19x24xf32, #tpu.memory_space<vmem>>, vector<1x1x4x24xf32>
    %149 = vector.shape_cast %148 : vector<1x1x4x24xf32> to vector<4x24xf32>
    %150 = vector.shape_cast %147 : vector<4x24xf32> to vector<1x1x4x24xf32>
    tpu.vector_store %arg12[%c0_85, %c3_86, %c7_87, %c0_88], %150 {strides = array<i32>} : memref<1x24x19x24xf32, #tpu.memory_space<vmem>>, vector<1x1x4x24xf32>,
    %151 = vector.extract_strided_slice %109 {offsets = [1, 0, 0], sizes = [1, 4, 24], strides = [1, 1, 1]} : vector<12x4x24xf32> to vector<1x4x24xf32>
    %152 = vector.shape_cast %151 : vector<1x4x24xf32> to vector<4x24xf32>
    %cst_89 = arith.constant 0.0869565233 : f32
    %153 = vector.broadcast %cst_89 : f32 to vector<4x24xf32>
    %154 = arith.mulf %152, %153 : vector<4x24xf32>
    %155 = vector.extract_strided_slice %109 {offsets = [2, 0, 0], sizes = [1, 4, 24], strides = [1, 1, 1]} : vector<12x4x24xf32> to vector<1x4x24xf32>
    %156 = vector.shape_cast %155 : vector<1x4x24xf32> to vector<4x24xf32>
    %cst_90 = arith.constant 0.913043498 : f32
    %157 = vector.broadcast %cst_90 : f32 to vector<4x24xf32>
    %158 = arith.mulf %156, %157 : vector<4x24xf32>
    %159 = arith.addf %154, %158 : vector<4x24xf32>
    %c0_91 = arith.constant 0 : index
    %c4 = arith.constant 4 : index
    %c7_92 = arith.constant 7 : index
    %c0_93 = arith.constant 0 : index
    %160 = vector.load %arg12[%c0_91, %c4, %c7_92, %c0_93] : memref<1x24x19x24xf32, #tpu.memory_space<vmem>>, vector<1x1x4x24xf32>
    %161 = vector.shape_cast %160 : vector<1x1x4x24xf32> to vector<4x24xf32>
    %162 = vector.shape_cast %159 : vector<4x24xf32> to vector<1x1x4x24xf32>
    tpu.vector_store %arg12[%c0_91, %c4, %c7_92, %c0_93], %162 {strides = array<i32>} : memref<1x24x19x24xf32, #tpu.memory_space<vmem>>, vector<1x1x4x24xf32>,
    %163 = vector.extract_strided_slice %109 {offsets = [2, 0, 0], sizes = [1, 4, 24], strides = [1, 1, 1]} : vector<12x4x24xf32> to vector<1x4x24xf32>
    %164 = vector.shape_cast %163 : vector<1x4x24xf32> to vector<4x24xf32>
    %cst_94 = arith.constant 0.608695626 : f32
    %165 = vector.broadcast %cst_94 : f32 to vector<4x24xf32>
    %166 = arith.mulf %164, %165 : vector<4x24xf32>
    %167 = vector.extract_strided_slice %109 {offsets = [3, 0, 0], sizes = [1, 4, 24], strides = [1, 1, 1]} : vector<12x4x24xf32> to vector<1x4x24xf32>
    %168 = vector.shape_cast %167 : vector<1x4x24xf32> to vector<4x24xf32>
    %cst_95 = arith.constant 0.391304344 : f32
    %169 = vector.broadcast %cst_95 : f32 to vector<4x24xf32>
    %170 = arith.mulf %168, %169 : vector<4x24xf32>
    %171 = arith.addf %166, %170 : vector<4x24xf32>
    %c0_96 = arith.constant 0 : index
    %c5 = arith.constant 5 : index
    %c7_97 = arith.constant 7 : index
    %c0_98 = arith.constant 0 : index
    %172 = vector.load %arg12[%c0_96, %c5, %c7_97, %c0_98] : memref<1x24x19x24xf32, #tpu.memory_space<vmem>>, vector<1x1x4x24xf32>
    %173 = vector.shape_cast %172 : vector<1x1x4x24xf32> to vector<4x24xf32>
    %174 = vector.shape_cast %171 : vector<4x24xf32> to vector<1x1x4x24xf32>
    tpu.vector_store %arg12[%c0_96, %c5, %c7_97, %c0_98], %174 {strides = array<i32>} : memref<1x24x19x24xf32, #tpu.memory_space<vmem>>, vector<1x1x4x24xf32>,
    %175 = vector.extract_strided_slice %109 {offsets = [2, 0, 0], sizes = [1, 4, 24], strides = [1, 1, 1]} : vector<12x4x24xf32> to vector<1x4x24xf32>
    %176 = vector.shape_cast %175 : vector<1x4x24xf32> to vector<4x24xf32>
    %cst_99 = arith.constant 0.130434781 : f32
    %177 = vector.broadcast %cst_99 : f32 to vector<4x24xf32>
    %178 = arith.mulf %176, %177 : vector<4x24xf32>
    %179 = vector.extract_strided_slice %109 {offsets = [3, 0, 0], sizes = [1, 4, 24], strides = [1, 1, 1]} : vector<12x4x24xf32> to vector<1x4x24xf32>
    %180 = vector.shape_cast %179 : vector<1x4x24xf32> to vector<4x24xf32>
    %cst_100 = arith.constant 0.869565188 : f32
    %181 = vector.broadcast %cst_100 : f32 to vector<4x24xf32>
    %182 = arith.mulf %180, %181 : vector<4x24xf32>
    %183 = arith.addf %178, %182 : vector<4x24xf32>
    %c0_101 = arith.constant 0 : index
    %c6 = arith.constant 6 : index
    %c7_102 = arith.constant 7 : index
    %c0_103 = arith.constant 0 : index
    %184 = vector.load %arg12[%c0_101, %c6, %c7_102, %c0_103] : memref<1x24x19x24xf32, #tpu.memory_space<vmem>>, vector<1x1x4x24xf32>
    %185 = vector.shape_cast %184 : vector<1x1x4x24xf32> to vector<4x24xf32>
    %186 = vector.shape_cast %183 : vector<4x24xf32> to vector<1x1x4x24xf32>
    tpu.vector_store %arg12[%c0_101, %c6, %c7_102, %c0_103], %186 {strides = array<i32>} : memref<1x24x19x24xf32, #tpu.memory_space<vmem>>, vector<1x1x4x24xf32>,
    %187 = vector.extract_strided_slice %109 {offsets = [3, 0, 0], sizes = [1, 4, 24], strides = [1, 1, 1]} : vector<12x4x24xf32> to vector<1x4x24xf32>
    %188 = vector.shape_cast %187 : vector<1x4x24xf32> to vector<4x24xf32>
    %cst_104 = arith.constant 0.652173936 : f32
    %189 = vector.broadcast %cst_104 : f32 to vector<4x24xf32>
    %190 = arith.mulf %188, %189 : vector<4x24xf32>
    %191 = vector.extract_strided_slice %109 {offsets = [4, 0, 0], sizes = [1, 4, 24], strides = [1, 1, 1]} : vector<12x4x24xf32> to vector<1x4x24xf32>
    %192 = vector.shape_cast %191 : vector<1x4x24xf32> to vector<4x24xf32>
    %cst_105 = arith.constant 0.347826093 : f32
    %193 = vector.broadcast %cst_105 : f32 to vector<4x24xf32>
    %194 = arith.mulf %192, %193 : vector<4x24xf32>
    %195 = arith.addf %190, %194 : vector<4x24xf32>
    %c0_106 = arith.constant 0 : index
    %c7_107 = arith.constant 7 : index
    %c7_108 = arith.constant 7 : index
    %c0_109 = arith.constant 0 : index
    %196 = vector.load %arg12[%c0_106, %c7_107, %c7_108, %c0_109] : memref<1x24x19x24xf32, #tpu.memory_space<vmem>>, vector<1x1x4x24xf32>
    %197 = vector.shape_cast %196 : vector<1x1x4x24xf32> to vector<4x24xf32>
    %198 = vector.shape_cast %195 : vector<4x24xf32> to vector<1x1x4x24xf32>
    tpu.vector_store %arg12[%c0_106, %c7_107, %c7_108, %c0_109], %198 {strides = array<i32>} : memref<1x24x19x24xf32, #tpu.memory_space<vmem>>, vector<1x1x4x24xf32>,
    %199 = vector.extract_strided_slice %109 {offsets = [3, 0, 0], sizes = [1, 4, 24], strides = [1, 1, 1]} : vector<12x4x24xf32> to vector<1x4x24xf32>
    %200 = vector.shape_cast %199 : vector<1x4x24xf32> to vector<4x24xf32>
    %cst_110 = arith.constant 0.173913047 : f32
    %201 = vector.broadcast %cst_110 : f32 to vector<4x24xf32>
    %202 = arith.mulf %200, %201 : vector<4x24xf32>
    %203 = vector.extract_strided_slice %109 {offsets = [4, 0, 0], sizes = [1, 4, 24], strides = [1, 1, 1]} : vector<12x4x24xf32> to vector<1x4x24xf32>
    %204 = vector.shape_cast %203 : vector<1x4x24xf32> to vector<4x24xf32>
    %cst_111 = arith.constant 0.826086938 : f32
    %205 = vector.broadcast %cst_111 : f32 to vector<4x24xf32>
    %206 = arith.mulf %204, %205 : vector<4x24xf32>
    %207 = arith.addf %202, %206 : vector<4x24xf32>
    %c0_112 = arith.constant 0 : index
    %c8 = arith.constant 8 : index
    %c7_113 = arith.constant 7 : index
    %c0_114 = arith.constant 0 : index
    %208 = vector.load %arg12[%c0_112, %c8, %c7_113, %c0_114] : memref<1x24x19x24xf32, #tpu.memory_space<vmem>>, vector<1x1x4x24xf32>
    %209 = vector.shape_cast %208 : vector<1x1x4x24xf32> to vector<4x24xf32>
    %210 = vector.shape_cast %207 : vector<4x24xf32> to vector<1x1x4x24xf32>
    tpu.vector_store %arg12[%c0_112, %c8, %c7_113, %c0_114], %210 {strides = array<i32>} : memref<1x24x19x24xf32, #tpu.memory_space<vmem>>, vector<1x1x4x24xf32>,
    %211 = vector.extract_strided_slice %109 {offsets = [4, 0, 0], sizes = [1, 4, 24], strides = [1, 1, 1]} : vector<12x4x24xf32> to vector<1x4x24xf32>
    %212 = vector.shape_cast %211 : vector<1x4x24xf32> to vector<4x24xf32>
    %cst_115 = arith.constant 0.695652186 : f32
    %213 = vector.broadcast %cst_115 : f32 to vector<4x24xf32>
    %214 = arith.mulf %212, %213 : vector<4x24xf32>
    %215 = vector.extract_strided_slice %109 {offsets = [5, 0, 0], sizes = [1, 4, 24], strides = [1, 1, 1]} : vector<12x4x24xf32> to vector<1x4x24xf32>
    %216 = vector.shape_cast %215 : vector<1x4x24xf32> to vector<4x24xf32>
    %cst_116 = arith.constant 0.304347813 : f32
    %217 = vector.broadcast %cst_116 : f32 to vector<4x24xf32>
    %218 = arith.mulf %216, %217 : vector<4x24xf32>
    %219 = arith.addf %214, %218 : vector<4x24xf32>
    %c0_117 = arith.constant 0 : index
    %c9 = arith.constant 9 : index
    %c7_118 = arith.constant 7 : index
    %c0_119 = arith.constant 0 : index
    %220 = vector.load %arg12[%c0_117, %c9, %c7_118, %c0_119] : memref<1x24x19x24xf32, #tpu.memory_space<vmem>>, vector<1x1x4x24xf32>
    %221 = vector.shape_cast %220 : vector<1x1x4x24xf32> to vector<4x24xf32>
    %222 = vector.shape_cast %219 : vector<4x24xf32> to vector<1x1x4x24xf32>
    tpu.vector_store %arg12[%c0_117, %c9, %c7_118, %c0_119], %222 {strides = array<i32>} : memref<1x24x19x24xf32, #tpu.memory_space<vmem>>, vector<1x1x4x24xf32>,
    %223 = vector.extract_strided_slice %109 {offsets = [4, 0, 0], sizes = [1, 4, 24], strides = [1, 1, 1]} : vector<12x4x24xf32> to vector<1x4x24xf32>
    %224 = vector.shape_cast %223 : vector<1x4x24xf32> to vector<4x24xf32>
    %cst_120 = arith.constant 0.217391297 : f32
    %225 = vector.broadcast %cst_120 : f32 to vector<4x24xf32>
    %226 = arith.mulf %224, %225 : vector<4x24xf32>
    %227 = vector.extract_strided_slice %109 {offsets = [5, 0, 0], sizes = [1, 4, 24], strides = [1, 1, 1]} : vector<12x4x24xf32> to vector<1x4x24xf32>
    %228 = vector.shape_cast %227 : vector<1x4x24xf32> to vector<4x24xf32>
    %cst_121 = arith.constant 0.782608687 : f32
    %229 = vector.broadcast %cst_121 : f32 to vector<4x24xf32>
    %230 = arith.mulf %228, %229 : vector<4x24xf32>
    %231 = arith.addf %226, %230 : vector<4x24xf32>
    %c0_122 = arith.constant 0 : index
    %c10 = arith.constant 10 : index
    %c7_123 = arith.constant 7 : index
    %c0_124 = arith.constant 0 : index
    %232 = vector.load %arg12[%c0_122, %c10, %c7_123, %c0_124] : memref<1x24x19x24xf32, #tpu.memory_space<vmem>>, vector<1x1x4x24xf32>
    %233 = vector.shape_cast %232 : vector<1x1x4x24xf32> to vector<4x24xf32>
    %234 = vector.shape_cast %231 : vector<4x24xf32> to vector<1x1x4x24xf32>
    tpu.vector_store %arg12[%c0_122, %c10, %c7_123, %c0_124], %234 {strides = array<i32>} : memref<1x24x19x24xf32, #tpu.memory_space<vmem>>, vector<1x1x4x24xf32>,
    %235 = vector.extract_strided_slice %109 {offsets = [5, 0, 0], sizes = [1, 4, 24], strides = [1, 1, 1]} : vector<12x4x24xf32> to vector<1x4x24xf32>
    %236 = vector.shape_cast %235 : vector<1x4x24xf32> to vector<4x24xf32>
    %cst_125 = arith.constant 0.739130437 : f32
    %237 = vector.broadcast %cst_125 : f32 to vector<4x24xf32>
    %238 = arith.mulf %236, %237 : vector<4x24xf32>
    %239 = vector.extract_strided_slice %109 {offsets = [6, 0, 0], sizes = [1, 4, 24], strides = [1, 1, 1]} : vector<12x4x24xf32> to vector<1x4x24xf32>
    %240 = vector.shape_cast %239 : vector<1x4x24xf32> to vector<4x24xf32>
    %cst_126 = arith.constant 0.260869563 : f32
    %241 = vector.broadcast %cst_126 : f32 to vector<4x24xf32>
    %242 = arith.mulf %240, %241 : vector<4x24xf32>
    %243 = arith.addf %238, %242 : vector<4x24xf32>
    %c0_127 = arith.constant 0 : index
    %c11 = arith.constant 11 : index
    %c7_128 = arith.constant 7 : index
    %c0_129 = arith.constant 0 : index
    %244 = vector.load %arg12[%c0_127, %c11, %c7_128, %c0_129] : memref<1x24x19x24xf32, #tpu.memory_space<vmem>>, vector<1x1x4x24xf32>
    %245 = vector.shape_cast %244 : vector<1x1x4x24xf32> to vector<4x24xf32>
    %246 = vector.shape_cast %243 : vector<4x24xf32> to vector<1x1x4x24xf32>
    tpu.vector_store %arg12[%c0_127, %c11, %c7_128, %c0_129], %246 {strides = array<i32>} : memref<1x24x19x24xf32, #tpu.memory_space<vmem>>, vector<1x1x4x24xf32>,
    %247 = vector.extract_strided_slice %109 {offsets = [5, 0, 0], sizes = [1, 4, 24], strides = [1, 1, 1]} : vector<12x4x24xf32> to vector<1x4x24xf32>
    %248 = vector.shape_cast %247 : vector<1x4x24xf32> to vector<4x24xf32>
    %cst_130 = arith.constant 0.260869563 : f32
    %249 = vector.broadcast %cst_130 : f32 to vector<4x24xf32>
    %250 = arith.mulf %248, %249 : vector<4x24xf32>
    %251 = vector.extract_strided_slice %109 {offsets = [6, 0, 0], sizes = [1, 4, 24], strides = [1, 1, 1]} : vector<12x4x24xf32> to vector<1x4x24xf32>
    %252 = vector.shape_cast %251 : vector<1x4x24xf32> to vector<4x24xf32>
    %cst_131 = arith.constant 0.739130437 : f32
    %253 = vector.broadcast %cst_131 : f32 to vector<4x24xf32>
    %254 = arith.mulf %252, %253 : vector<4x24xf32>
    %255 = arith.addf %250, %254 : vector<4x24xf32>
    %c0_132 = arith.constant 0 : index
    %c12 = arith.constant 12 : index
    %c7_133 = arith.constant 7 : index
    %c0_134 = arith.constant 0 : index
    %256 = vector.load %arg12[%c0_132, %c12, %c7_133, %c0_134] : memref<1x24x19x24xf32, #tpu.memory_space<vmem>>, vector<1x1x4x24xf32>
    %257 = vector.shape_cast %256 : vector<1x1x4x24xf32> to vector<4x24xf32>
    %258 = vector.shape_cast %255 : vector<4x24xf32> to vector<1x1x4x24xf32>
    tpu.vector_store %arg12[%c0_132, %c12, %c7_133, %c0_134], %258 {strides = array<i32>} : memref<1x24x19x24xf32, #tpu.memory_space<vmem>>, vector<1x1x4x24xf32>,
    %259 = vector.extract_strided_slice %109 {offsets = [6, 0, 0], sizes = [1, 4, 24], strides = [1, 1, 1]} : vector<12x4x24xf32> to vector<1x4x24xf32>
    %260 = vector.shape_cast %259 : vector<1x4x24xf32> to vector<4x24xf32>
    %cst_135 = arith.constant 0.782608687 : f32
    %261 = vector.broadcast %cst_135 : f32 to vector<4x24xf32>
    %262 = arith.mulf %260, %261 : vector<4x24xf32>
    %263 = vector.extract_strided_slice %109 {offsets = [7, 0, 0], sizes = [1, 4, 24], strides = [1, 1, 1]} : vector<12x4x24xf32> to vector<1x4x24xf32>
    %264 = vector.shape_cast %263 : vector<1x4x24xf32> to vector<4x24xf32>
    %cst_136 = arith.constant 0.217391297 : f32
    %265 = vector.broadcast %cst_136 : f32 to vector<4x24xf32>
    %266 = arith.mulf %264, %265 : vector<4x24xf32>
    %267 = arith.addf %262, %266 : vector<4x24xf32>
    %c0_137 = arith.constant 0 : index
    %c13 = arith.constant 13 : index
    %c7_138 = arith.constant 7 : index
    %c0_139 = arith.constant 0 : index
    %268 = vector.load %arg12[%c0_137, %c13, %c7_138, %c0_139] : memref<1x24x19x24xf32, #tpu.memory_space<vmem>>, vector<1x1x4x24xf32>
    %269 = vector.shape_cast %268 : vector<1x1x4x24xf32> to vector<4x24xf32>
    %270 = vector.shape_cast %267 : vector<4x24xf32> to vector<1x1x4x24xf32>
    tpu.vector_store %arg12[%c0_137, %c13, %c7_138, %c0_139], %270 {strides = array<i32>} : memref<1x24x19x24xf32, #tpu.memory_space<vmem>>, vector<1x1x4x24xf32>,
    %271 = vector.extract_strided_slice %109 {offsets = [6, 0, 0], sizes = [1, 4, 24], strides = [1, 1, 1]} : vector<12x4x24xf32> to vector<1x4x24xf32>
    %272 = vector.shape_cast %271 : vector<1x4x24xf32> to vector<4x24xf32>
    %cst_140 = arith.constant 0.304347813 : f32
    %273 = vector.broadcast %cst_140 : f32 to vector<4x24xf32>
    %274 = arith.mulf %272, %273 : vector<4x24xf32>
    %275 = vector.extract_strided_slice %109 {offsets = [7, 0, 0], sizes = [1, 4, 24], strides = [1, 1, 1]} : vector<12x4x24xf32> to vector<1x4x24xf32>
    %276 = vector.shape_cast %275 : vector<1x4x24xf32> to vector<4x24xf32>
    %cst_141 = arith.constant 0.695652186 : f32
    %277 = vector.broadcast %cst_141 : f32 to vector<4x24xf32>
    %278 = arith.mulf %276, %277 : vector<4x24xf32>
    %279 = arith.addf %274, %278 : vector<4x24xf32>
    %c0_142 = arith.constant 0 : index
    %c14 = arith.constant 14 : index
    %c7_143 = arith.constant 7 : index
    %c0_144 = arith.constant 0 : index
    %280 = vector.load %arg12[%c0_142, %c14, %c7_143, %c0_144] : memref<1x24x19x24xf32, #tpu.memory_space<vmem>>, vector<1x1x4x24xf32>
    %281 = vector.shape_cast %280 : vector<1x1x4x24xf32> to vector<4x24xf32>
    %282 = vector.shape_cast %279 : vector<4x24xf32> to vector<1x1x4x24xf32>
    tpu.vector_store %arg12[%c0_142, %c14, %c7_143, %c0_144], %282 {strides = array<i32>} : memref<1x24x19x24xf32, #tpu.memory_space<vmem>>, vector<1x1x4x24xf32>,
    %283 = vector.extract_strided_slice %109 {offsets = [7, 0, 0], sizes = [1, 4, 24], strides = [1, 1, 1]} : vector<12x4x24xf32> to vector<1x4x24xf32>
    %284 = vector.shape_cast %283 : vector<1x4x24xf32> to vector<4x24xf32>
    %cst_145 = arith.constant 0.826086938 : f32
    %285 = vector.broadcast %cst_145 : f32 to vector<4x24xf32>
    %286 = arith.mulf %284, %285 : vector<4x24xf32>
    %287 = vector.extract_strided_slice %109 {offsets = [8, 0, 0], sizes = [1, 4, 24], strides = [1, 1, 1]} : vector<12x4x24xf32> to vector<1x4x24xf32>
    %288 = vector.shape_cast %287 : vector<1x4x24xf32> to vector<4x24xf32>
    %cst_146 = arith.constant 0.173913047 : f32
    %289 = vector.broadcast %cst_146 : f32 to vector<4x24xf32>
    %290 = arith.mulf %288, %289 : vector<4x24xf32>
    %291 = arith.addf %286, %290 : vector<4x24xf32>
    %c0_147 = arith.constant 0 : index
    %c15 = arith.constant 15 : index
    %c7_148 = arith.constant 7 : index
    %c0_149 = arith.constant 0 : index
    %292 = vector.load %arg12[%c0_147, %c15, %c7_148, %c0_149] : memref<1x24x19x24xf32, #tpu.memory_space<vmem>>, vector<1x1x4x24xf32>
    %293 = vector.shape_cast %292 : vector<1x1x4x24xf32> to vector<4x24xf32>
    %294 = vector.shape_cast %291 : vector<4x24xf32> to vector<1x1x4x24xf32>
    tpu.vector_store %arg12[%c0_147, %c15, %c7_148, %c0_149], %294 {strides = array<i32>} : memref<1x24x19x24xf32, #tpu.memory_space<vmem>>, vector<1x1x4x24xf32>,
    %295 = vector.extract_strided_slice %109 {offsets = [7, 0, 0], sizes = [1, 4, 24], strides = [1, 1, 1]} : vector<12x4x24xf32> to vector<1x4x24xf32>
    %296 = vector.shape_cast %295 : vector<1x4x24xf32> to vector<4x24xf32>
    %cst_150 = arith.constant 0.347826093 : f32
    %297 = vector.broadcast %cst_150 : f32 to vector<4x24xf32>
    %298 = arith.mulf %296, %297 : vector<4x24xf32>
    %299 = vector.extract_strided_slice %109 {offsets = [8, 0, 0], sizes = [1, 4, 24], strides = [1, 1, 1]} : vector<12x4x24xf32> to vector<1x4x24xf32>
    %300 = vector.shape_cast %299 : vector<1x4x24xf32> to vector<4x24xf32>
    %cst_151 = arith.constant 0.652173936 : f32
    %301 = vector.broadcast %cst_151 : f32 to vector<4x24xf32>
    %302 = arith.mulf %300, %301 : vector<4x24xf32>
    %303 = arith.addf %298, %302 : vector<4x24xf32>
    %c0_152 = arith.constant 0 : index
    %c16 = arith.constant 16 : index
    %c7_153 = arith.constant 7 : index
    %c0_154 = arith.constant 0 : index
    %304 = vector.load %arg12[%c0_152, %c16, %c7_153, %c0_154] : memref<1x24x19x24xf32, #tpu.memory_space<vmem>>, vector<1x1x4x24xf32>
    %305 = vector.shape_cast %304 : vector<1x1x4x24xf32> to vector<4x24xf32>
    %306 = vector.shape_cast %303 : vector<4x24xf32> to vector<1x1x4x24xf32>
    tpu.vector_store %arg12[%c0_152, %c16, %c7_153, %c0_154], %306 {strides = array<i32>} : memref<1x24x19x24xf32, #tpu.memory_space<vmem>>, vector<1x1x4x24xf32>,
    %307 = vector.extract_strided_slice %109 {offsets = [8, 0, 0], sizes = [1, 4, 24], strides = [1, 1, 1]} : vector<12x4x24xf32> to vector<1x4x24xf32>
    %308 = vector.shape_cast %307 : vector<1x4x24xf32> to vector<4x24xf32>
    %cst_155 = arith.constant 0.869565188 : f32
    %309 = vector.broadcast %cst_155 : f32 to vector<4x24xf32>
    %310 = arith.mulf %308, %309 : vector<4x24xf32>
    %311 = vector.extract_strided_slice %109 {offsets = [9, 0, 0], sizes = [1, 4, 24], strides = [1, 1, 1]} : vector<12x4x24xf32> to vector<1x4x24xf32>
    %312 = vector.shape_cast %311 : vector<1x4x24xf32> to vector<4x24xf32>
    %cst_156 = arith.constant 0.130434781 : f32
    %313 = vector.broadcast %cst_156 : f32 to vector<4x24xf32>
    %314 = arith.mulf %312, %313 : vector<4x24xf32>
    %315 = arith.addf %310, %314 : vector<4x24xf32>
    %c0_157 = arith.constant 0 : index
    %c17 = arith.constant 17 : index
    %c7_158 = arith.constant 7 : index
    %c0_159 = arith.constant 0 : index
    %316 = vector.load %arg12[%c0_157, %c17, %c7_158, %c0_159] : memref<1x24x19x24xf32, #tpu.memory_space<vmem>>, vector<1x1x4x24xf32>
    %317 = vector.shape_cast %316 : vector<1x1x4x24xf32> to vector<4x24xf32>
    %318 = vector.shape_cast %315 : vector<4x24xf32> to vector<1x1x4x24xf32>
    tpu.vector_store %arg12[%c0_157, %c17, %c7_158, %c0_159], %318 {strides = array<i32>} : memref<1x24x19x24xf32, #tpu.memory_space<vmem>>, vector<1x1x4x24xf32>,
    %319 = vector.extract_strided_slice %109 {offsets = [8, 0, 0], sizes = [1, 4, 24], strides = [1, 1, 1]} : vector<12x4x24xf32> to vector<1x4x24xf32>
    %320 = vector.shape_cast %319 : vector<1x4x24xf32> to vector<4x24xf32>
    %cst_160 = arith.constant 0.391304344 : f32
    %321 = vector.broadcast %cst_160 : f32 to vector<4x24xf32>
    %322 = arith.mulf %320, %321 : vector<4x24xf32>
    %323 = vector.extract_strided_slice %109 {offsets = [9, 0, 0], sizes = [1, 4, 24], strides = [1, 1, 1]} : vector<12x4x24xf32> to vector<1x4x24xf32>
    %324 = vector.shape_cast %323 : vector<1x4x24xf32> to vector<4x24xf32>
    %cst_161 = arith.constant 0.608695626 : f32
    %325 = vector.broadcast %cst_161 : f32 to vector<4x24xf32>
    %326 = arith.mulf %324, %325 : vector<4x24xf32>
    %327 = arith.addf %322, %326 : vector<4x24xf32>
    %c0_162 = arith.constant 0 : index
    %c18 = arith.constant 18 : index
    %c7_163 = arith.constant 7 : index
    %c0_164 = arith.constant 0 : index
    %328 = vector.load %arg12[%c0_162, %c18, %c7_163, %c0_164] : memref<1x24x19x24xf32, #tpu.memory_space<vmem>>, vector<1x1x4x24xf32>
    %329 = vector.shape_cast %328 : vector<1x1x4x24xf32> to vector<4x24xf32>
    %330 = vector.shape_cast %327 : vector<4x24xf32> to vector<1x1x4x24xf32>
    tpu.vector_store %arg12[%c0_162, %c18, %c7_163, %c0_164], %330 {strides = array<i32>} : memref<1x24x19x24xf32, #tpu.memory_space<vmem>>, vector<1x1x4x24xf32>,
    %331 = vector.extract_strided_slice %109 {offsets = [9, 0, 0], sizes = [1, 4, 24], strides = [1, 1, 1]} : vector<12x4x24xf32> to vector<1x4x24xf32>
    %332 = vector.shape_cast %331 : vector<1x4x24xf32> to vector<4x24xf32>
    %cst_165 = arith.constant 0.913043498 : f32
    %333 = vector.broadcast %cst_165 : f32 to vector<4x24xf32>
    %334 = arith.mulf %332, %333 : vector<4x24xf32>
    %335 = vector.extract_strided_slice %109 {offsets = [10, 0, 0], sizes = [1, 4, 24], strides = [1, 1, 1]} : vector<12x4x24xf32> to vector<1x4x24xf32>
    %336 = vector.shape_cast %335 : vector<1x4x24xf32> to vector<4x24xf32>
    %cst_166 = arith.constant 0.0869565233 : f32
    %337 = vector.broadcast %cst_166 : f32 to vector<4x24xf32>
    %338 = arith.mulf %336, %337 : vector<4x24xf32>
    %339 = arith.addf %334, %338 : vector<4x24xf32>
    %c0_167 = arith.constant 0 : index
    %c19 = arith.constant 19 : index
    %c7_168 = arith.constant 7 : index
    %c0_169 = arith.constant 0 : index
    %340 = vector.load %arg12[%c0_167, %c19, %c7_168, %c0_169] : memref<1x24x19x24xf32, #tpu.memory_space<vmem>>, vector<1x1x4x24xf32>
    %341 = vector.shape_cast %340 : vector<1x1x4x24xf32> to vector<4x24xf32>
    %342 = vector.shape_cast %339 : vector<4x24xf32> to vector<1x1x4x24xf32>
    tpu.vector_store %arg12[%c0_167, %c19, %c7_168, %c0_169], %342 {strides = array<i32>} : memref<1x24x19x24xf32, #tpu.memory_space<vmem>>, vector<1x1x4x24xf32>,
    %343 = vector.extract_strided_slice %109 {offsets = [9, 0, 0], sizes = [1, 4, 24], strides = [1, 1, 1]} : vector<12x4x24xf32> to vector<1x4x24xf32>
    %344 = vector.shape_cast %343 : vector<1x4x24xf32> to vector<4x24xf32>
    %cst_170 = arith.constant 0.434782594 : f32
    %345 = vector.broadcast %cst_170 : f32 to vector<4x24xf32>
    %346 = arith.mulf %344, %345 : vector<4x24xf32>
    %347 = vector.extract_strided_slice %109 {offsets = [10, 0, 0], sizes = [1, 4, 24], strides = [1, 1, 1]} : vector<12x4x24xf32> to vector<1x4x24xf32>
    %348 = vector.shape_cast %347 : vector<1x4x24xf32> to vector<4x24xf32>
    %cst_171 = arith.constant 0.565217376 : f32
    %349 = vector.broadcast %cst_171 : f32 to vector<4x24xf32>
    %350 = arith.mulf %348, %349 : vector<4x24xf32>
    %351 = arith.addf %346, %350 : vector<4x24xf32>
    %c0_172 = arith.constant 0 : index
    %c20 = arith.constant 20 : index
    %c7_173 = arith.constant 7 : index
    %c0_174 = arith.constant 0 : index
    %352 = vector.load %arg12[%c0_172, %c20, %c7_173, %c0_174] : memref<1x24x19x24xf32, #tpu.memory_space<vmem>>, vector<1x1x4x24xf32>
    %353 = vector.shape_cast %352 : vector<1x1x4x24xf32> to vector<4x24xf32>
    %354 = vector.shape_cast %351 : vector<4x24xf32> to vector<1x1x4x24xf32>
    tpu.vector_store %arg12[%c0_172, %c20, %c7_173, %c0_174], %354 {strides = array<i32>} : memref<1x24x19x24xf32, #tpu.memory_space<vmem>>, vector<1x1x4x24xf32>,
    %355 = vector.extract_strided_slice %109 {offsets = [10, 0, 0], sizes = [1, 4, 24], strides = [1, 1, 1]} : vector<12x4x24xf32> to vector<1x4x24xf32>
    %356 = vector.shape_cast %355 : vector<1x4x24xf32> to vector<4x24xf32>
    %cst_175 = arith.constant 0.956521749 : f32
    %357 = vector.broadcast %cst_175 : f32 to vector<4x24xf32>
    %358 = arith.mulf %356, %357 : vector<4x24xf32>
    %359 = vector.extract_strided_slice %109 {offsets = [11, 0, 0], sizes = [1, 4, 24], strides = [1, 1, 1]} : vector<12x4x24xf32> to vector<1x4x24xf32>
    %360 = vector.shape_cast %359 : vector<1x4x24xf32> to vector<4x24xf32>
    %cst_176 = arith.constant 0.0434782617 : f32
    %361 = vector.broadcast %cst_176 : f32 to vector<4x24xf32>
    %362 = arith.mulf %360, %361 : vector<4x24xf32>
    %363 = arith.addf %358, %362 : vector<4x24xf32>
    %c0_177 = arith.constant 0 : index
    %c21 = arith.constant 21 : index
    %c7_178 = arith.constant 7 : index
    %c0_179 = arith.constant 0 : index
    %364 = vector.load %arg12[%c0_177, %c21, %c7_178, %c0_179] : memref<1x24x19x24xf32, #tpu.memory_space<vmem>>, vector<1x1x4x24xf32>
    %365 = vector.shape_cast %364 : vector<1x1x4x24xf32> to vector<4x24xf32>
    %366 = vector.shape_cast %363 : vector<4x24xf32> to vector<1x1x4x24xf32>
    tpu.vector_store %arg12[%c0_177, %c21, %c7_178, %c0_179], %366 {strides = array<i32>} : memref<1x24x19x24xf32, #tpu.memory_space<vmem>>, vector<1x1x4x24xf32>,
    %367 = vector.extract_strided_slice %109 {offsets = [10, 0, 0], sizes = [1, 4, 24], strides = [1, 1, 1]} : vector<12x4x24xf32> to vector<1x4x24xf32>
    %368 = vector.shape_cast %367 : vector<1x4x24xf32> to vector<4x24xf32>
    %cst_180 = arith.constant 0.478260875 : f32
    %369 = vector.broadcast %cst_180 : f32 to vector<4x24xf32>
    %370 = arith.mulf %368, %369 : vector<4x24xf32>
    %371 = vector.extract_strided_slice %109 {offsets = [11, 0, 0], sizes = [1, 4, 24], strides = [1, 1, 1]} : vector<12x4x24xf32> to vector<1x4x24xf32>
    %372 = vector.shape_cast %371 : vector<1x4x24xf32> to vector<4x24xf32>
    %cst_181 = arith.constant 0.521739125 : f32
    %373 = vector.broadcast %cst_181 : f32 to vector<4x24xf32>
    %374 = arith.mulf %372, %373 : vector<4x24xf32>
    %375 = arith.addf %370, %374 : vector<4x24xf32>
    %c0_182 = arith.constant 0 : index
    %c22 = arith.constant 22 : index
    %c7_183 = arith.constant 7 : index
    %c0_184 = arith.constant 0 : index
    %376 = vector.load %arg12[%c0_182, %c22, %c7_183, %c0_184] : memref<1x24x19x24xf32, #tpu.memory_space<vmem>>, vector<1x1x4x24xf32>
    %377 = vector.shape_cast %376 : vector<1x1x4x24xf32> to vector<4x24xf32>
    %378 = vector.shape_cast %375 : vector<4x24xf32> to vector<1x1x4x24xf32>
    tpu.vector_store %arg12[%c0_182, %c22, %c7_183, %c0_184], %378 {strides = array<i32>} : memref<1x24x19x24xf32, #tpu.memory_space<vmem>>, vector<1x1x4x24xf32>,
    %379 = vector.extract_strided_slice %109 {offsets = [11, 0, 0], sizes = [1, 4, 24], strides = [1, 1, 1]} : vector<12x4x24xf32> to vector<1x4x24xf32>
    %380 = vector.shape_cast %379 : vector<1x4x24xf32> to vector<4x24xf32>
    %c0_185 = arith.constant 0 : index
    %c23 = arith.constant 23 : index
    %c7_186 = arith.constant 7 : index
    %c0_187 = arith.constant 0 : index
    %381 = vector.load %arg12[%c0_185, %c23, %c7_186, %c0_187] : memref<1x24x19x24xf32, #tpu.memory_space<vmem>>, vector<1x1x4x24xf32>
    %382 = vector.shape_cast %381 : vector<1x1x4x24xf32> to vector<4x24xf32>
    %383 = vector.shape_cast %380 : vector<4x24xf32> to vector<1x1x4x24xf32>
    tpu.vector_store %arg12[%c0_185, %c23, %c7_186, %c0_187], %383 {strides = array<i32>} : memref<1x24x19x24xf32, #tpu.memory_space<vmem>>, vector<1x1x4x24xf32>,
    %c0_188 = arith.constant 0 : index
    %c0_189 = arith.constant 0 : index
    %c0_190 = arith.constant 0 : index
    %c0_191 = arith.constant 0 : index
    %384 = vector.load %arg12[%c0_188, %c0_189, %c0_190, %c0_191] : memref<1x24x19x24xf32, #tpu.memory_space<vmem>>, vector<1x24x11x24xf32>
    %385 = vector.shape_cast %384 : vector<1x24x11x24xf32> to vector<24x11x24xf32>
    %c0_192 = arith.constant 0 : index
    %c0_193 = arith.constant 0 : index
    %386 = vector.load %arg10[%c0_192, %c0_193] : memref<24x6xf32, #tpu.memory_space<vmem>>, vector<24x6xf32>
    %387 = vector.shape_cast %386 : vector<24x6xf32> to vector<1x24x6xf32>
    %388 = vector.broadcast %387 : vector<1x24x6xf32> to vector<24x24x6xf32>
    "tpu.trace_start"() <{level = 10 : i32, message = "acx,axj->acj"}> : () -> ()
    %cst_194 = arith.constant dense<0.000000e+00> : vector<24x11x6xf32>
    %389 = tpu.matmul %385, %388, %cst_194 {dimension_numbers = #tpu.dot_dimension_numbers<[2], [1], [1], [2], [0, 0, 0, 1, 1, 2], [0], [0]>} : vector<24x11x24xf32>, vector<24x24x6xf32>, vector<24x11x6xf32> -> vector<24x11x6xf32>
    "tpu.trace_stop"() : () -> ()
    %390 = vector.shape_cast %389 : vector<24x11x6xf32> to vector<6x4x11x6xf32>
    %391 = vector.extract_strided_slice %390 {offsets = [0, 0, 0, 0], sizes = [6, 1, 11, 6], strides = [1, 1, 1, 1]} : vector<6x4x11x6xf32> to vector<6x1x11x6xf32>
    %392 = vector.shape_cast %391 : vector<6x1x11x6xf32> to vector<6x11x6xf32>
    %393 = vector.extract_strided_slice %390 {offsets = [0, 1, 0, 0], sizes = [6, 1, 11, 6], strides = [1, 1, 1, 1]} : vector<6x4x11x6xf32> to vector<6x1x11x6xf32>
    %394 = vector.shape_cast %393 : vector<6x1x11x6xf32> to vector<6x11x6xf32>
    %395 = arith.addf %392, %394 : vector<6x11x6xf32>
    %396 = vector.extract_strided_slice %390 {offsets = [0, 2, 0, 0], sizes = [6, 1, 11, 6], strides = [1, 1, 1, 1]} : vector<6x4x11x6xf32> to vector<6x1x11x6xf32>
    %397 = vector.shape_cast %396 : vector<6x1x11x6xf32> to vector<6x11x6xf32>
    %398 = arith.addf %395, %397 : vector<6x11x6xf32>
    %399 = vector.extract_strided_slice %390 {offsets = [0, 3, 0, 0], sizes = [6, 1, 11, 6], strides = [1, 1, 1, 1]} : vector<6x4x11x6xf32> to vector<6x1x11x6xf32>
    %400 = vector.shape_cast %399 : vector<6x1x11x6xf32> to vector<6x11x6xf32>
    %401 = arith.addf %398, %400 : vector<6x11x6xf32>
    %cst_195 = arith.constant 2.500000e-01 : f32
    %402 = vector.broadcast %cst_195 : f32 to vector<6x11x6xf32>
    %403 = arith.mulf %401, %402 : vector<6x11x6xf32>
    %c1_196 = arith.constant 1 : index
    %c0_197 = arith.constant 0 : index
    %c1_198 = arith.constant 1 : index
    %404 = vector.load %arg15[%c1_196, %c0_197, %c1_198] : memref<8x11x8xf32, #tpu.memory_space<vmem>>, vector<6x11x6xf32>
    tpu.vector_store %arg15[%c1_196, %c0_197, %c1_198], %403 {strides = array<i32>} : memref<8x11x8xf32, #tpu.memory_space<vmem>>, vector<6x11x6xf32>,
    %c0_199 = arith.constant 0 : index
    %c0_200 = arith.constant 0 : index
    %c0_201 = arith.constant 0 : index
    %405 = vector.load %arg15[%c0_199, %c0_200, %c0_201] : memref<8x11x8xf32, #tpu.memory_space<vmem>>, vector<8x11x8xf32>
    %c0_202 = arith.constant 0 : index
    %c0_203 = arith.constant 0 : index
    %406 = vector.load %arg4[%c0_202, %c0_203] : memref<36x11xf32, #tpu.memory_space<vmem>>, vector<36x11xf32>
    %407 = vector.shape_cast %406 : vector<36x11xf32> to vector<1x36x11xf32>
    %408 = vector.broadcast %407 : vector<1x36x11xf32> to vector<8x36x11xf32>
    "tpu.trace_start"() <{level = 10 : i32, message = "akc,acx->akx"}> : () -> ()
    %cst_204 = arith.constant dense<0.000000e+00> : vector<8x36x8xf32>
    %409 = tpu.matmul %408, %405, %cst_204 {dimension_numbers = #tpu.dot_dimension_numbers<[2], [1], [1], [2], [0, 0, 0, 1, 1, 2], [0], [0]>} : vector<8x36x11xf32>, vector<8x11x8xf32>, vector<8x36x8xf32> -> vector<8x36x8xf32>
    "tpu.trace_stop"() : () -> ()
    %410 = vector.extract_strided_slice %409 {offsets = [0, 0, 0], sizes = [6, 4, 6], strides = [1, 1, 1]} : vector<8x36x8xf32> to vector<6x4x6xf32>
    %411 = vector.extract_strided_slice %409 {offsets = [0, 4, 1], sizes = [6, 4, 6], strides = [1, 1, 1]} : vector<8x36x8xf32> to vector<6x4x6xf32>
    %412 = arith.addf %410, %411 : vector<6x4x6xf32>
    %413 = vector.extract_strided_slice %409 {offsets = [0, 8, 2], sizes = [6, 4, 6], strides = [1, 1, 1]} : vector<8x36x8xf32> to vector<6x4x6xf32>
    %414 = arith.addf %412, %413 : vector<6x4x6xf32>
    %415 = vector.extract_strided_slice %409 {offsets = [1, 12, 0], sizes = [6, 4, 6], strides = [1, 1, 1]} : vector<8x36x8xf32> to vector<6x4x6xf32>
    %416 = arith.addf %414, %415 : vector<6x4x6xf32>
    %417 = vector.extract_strided_slice %409 {offsets = [1, 16, 1], sizes = [6, 4, 6], strides = [1, 1, 1]} : vector<8x36x8xf32> to vector<6x4x6xf32>
    %418 = arith.addf %416, %417 : vector<6x4x6xf32>
    %419 = vector.extract_strided_slice %409 {offsets = [1, 20, 2], sizes = [6, 4, 6], strides = [1, 1, 1]} : vector<8x36x8xf32> to vector<6x4x6xf32>
    %420 = arith.addf %418, %419 : vector<6x4x6xf32>
    %421 = vector.extract_strided_slice %409 {offsets = [2, 24, 0], sizes = [6, 4, 6], strides = [1, 1, 1]} : vector<8x36x8xf32> to vector<6x4x6xf32>
    %422 = arith.addf %420, %421 : vector<6x4x6xf32>
    %423 = vector.extract_strided_slice %409 {offsets = [2, 28, 1], sizes = [6, 4, 6], strides = [1, 1, 1]} : vector<8x36x8xf32> to vector<6x4x6xf32>
    %424 = arith.addf %422, %423 : vector<6x4x6xf32>
    %425 = vector.extract_strided_slice %409 {offsets = [2, 32, 2], sizes = [6, 4, 6], strides = [1, 1, 1]} : vector<8x36x8xf32> to vector<6x4x6xf32>
    %426 = arith.addf %424, %425 : vector<6x4x6xf32>
    %c2_205 = arith.constant 2 : index
    %c0_206 = arith.constant 0 : index
    %c0_207 = arith.constant 0 : index
    %427 = vector.load %arg6[%c2_205, %c0_206, %c0_207] : memref<4x4x1xf32, #tpu.memory_space<vmem>>, vector<1x4x1xf32>
    %428 = vector.shape_cast %427 : vector<1x4x1xf32> to vector<4x1xf32>
    %429 = vector.shape_cast %428 : vector<4x1xf32> to vector<1x4x1xf32>
    %430 = vector.broadcast %429 : vector<1x4x1xf32> to vector<6x4x6xf32>
    %431 = arith.mulf %426, %430 : vector<6x4x6xf32>
    %c2_208 = arith.constant 2 : index
    %c0_209 = arith.constant 0 : index
    %c0_210 = arith.constant 0 : index
    %432 = vector.load %arg7[%c2_208, %c0_209, %c0_210] : memref<4x4x1xf32, #tpu.memory_space<vmem>>, vector<1x4x1xf32>
    %433 = vector.shape_cast %432 : vector<1x4x1xf32> to vector<4x1xf32>
    %434 = vector.shape_cast %433 : vector<4x1xf32> to vector<1x4x1xf32>
    %435 = vector.broadcast %434 : vector<1x4x1xf32> to vector<6x4x6xf32>
    %436 = arith.addf %431, %435 : vector<6x4x6xf32>
    %cst_211 = arith.constant 0.000000e+00 : f32
    %437 = vector.broadcast %cst_211 : f32 to vector<6x4x6xf32>
    %438 = arith.cmpf ogt, %436, %437 : vector<6x4x6xf32>
    %cst_212 = arith.constant 2.000000e-01 : f32
    %439 = vector.broadcast %cst_212 : f32 to vector<6x4x6xf32>
    %440 = arith.mulf %439, %436 : vector<6x4x6xf32>
    %441 = arith.select %438, %436, %440 : vector<6x4x6xi1>, vector<6x4x6xf32>
    %c0_213 = arith.constant 0 : index
    %c0_214 = arith.constant 0 : index
    %442 = vector.load %arg11[%c0_213, %c0_214] : memref<6x24xf32, #tpu.memory_space<vmem>>, vector<6x24xf32>
    %443 = vector.shape_cast %442 : vector<6x24xf32> to vector<1x6x24xf32>
    %444 = vector.broadcast %443 : vector<1x6x24xf32> to vector<6x6x24xf32>
    "tpu.trace_start"() <{level = 10 : i32, message = "acj,ajX->acX"}> : () -> ()
    %cst_215 = arith.constant dense<0.000000e+00> : vector<6x4x24xf32>
    %445 = tpu.matmul %441, %444, %cst_215 {dimension_numbers = #tpu.dot_dimension_numbers<[2], [1], [1], [2], [0, 0, 0, 1, 1, 2], [0], [0]>} : vector<6x4x6xf32>, vector<6x6x24xf32>, vector<6x4x24xf32> -> vector<6x4x24xf32>
    "tpu.trace_stop"() : () -> ()
    %446 = vector.extract_strided_slice %445 {offsets = [0, 0, 0], sizes = [1, 4, 24], strides = [1, 1, 1]} : vector<6x4x24xf32> to vector<1x4x24xf32>
    %447 = vector.shape_cast %446 : vector<1x4x24xf32> to vector<4x24xf32>
    %c0_216 = arith.constant 0 : index
    %c0_217 = arith.constant 0 : index
    %c11_218 = arith.constant 11 : index
    %c0_219 = arith.constant 0 : index
    %448 = vector.load %arg12[%c0_216, %c0_217, %c11_218, %c0_219] : memref<1x24x19x24xf32, #tpu.memory_space<vmem>>, vector<1x1x4x24xf32>
    %449 = vector.shape_cast %448 : vector<1x1x4x24xf32> to vector<4x24xf32>
    %450 = vector.shape_cast %447 : vector<4x24xf32> to vector<1x1x4x24xf32>
    tpu.vector_store %arg12[%c0_216, %c0_217, %c11_218, %c0_219], %450 {strides = array<i32>} : memref<1x24x19x24xf32, #tpu.memory_space<vmem>>, vector<1x1x4x24xf32>,
    %451 = vector.extract_strided_slice %445 {offsets = [0, 0, 0], sizes = [1, 4, 24], strides = [1, 1, 1]} : vector<6x4x24xf32> to vector<1x4x24xf32>
    %452 = vector.shape_cast %451 : vector<1x4x24xf32> to vector<4x24xf32>
    %cst_220 = arith.constant 0.782608687 : f32
    %453 = vector.broadcast %cst_220 : f32 to vector<4x24xf32>
    %454 = arith.mulf %452, %453 : vector<4x24xf32>
    %455 = vector.extract_strided_slice %445 {offsets = [1, 0, 0], sizes = [1, 4, 24], strides = [1, 1, 1]} : vector<6x4x24xf32> to vector<1x4x24xf32>
    %456 = vector.shape_cast %455 : vector<1x4x24xf32> to vector<4x24xf32>
    %cst_221 = arith.constant 0.217391297 : f32
    %457 = vector.broadcast %cst_221 : f32 to vector<4x24xf32>
    %458 = arith.mulf %456, %457 : vector<4x24xf32>
    %459 = arith.addf %454, %458 : vector<4x24xf32>
    %c0_222 = arith.constant 0 : index
    %c1_223 = arith.constant 1 : index
    %c11_224 = arith.constant 11 : index
    %c0_225 = arith.constant 0 : index
    %460 = vector.load %arg12[%c0_222, %c1_223, %c11_224, %c0_225] : memref<1x24x19x24xf32, #tpu.memory_space<vmem>>, vector<1x1x4x24xf32>
    %461 = vector.shape_cast %460 : vector<1x1x4x24xf32> to vector<4x24xf32>
    %462 = vector.shape_cast %459 : vector<4x24xf32> to vector<1x1x4x24xf32>
    tpu.vector_store %arg12[%c0_222, %c1_223, %c11_224, %c0_225], %462 {strides = array<i32>} : memref<1x24x19x24xf32, #tpu.memory_space<vmem>>, vector<1x1x4x24xf32>,
    %463 = vector.extract_strided_slice %445 {offsets = [0, 0, 0], sizes = [1, 4, 24], strides = [1, 1, 1]} : vector<6x4x24xf32> to vector<1x4x24xf32>
    %464 = vector.shape_cast %463 : vector<1x4x24xf32> to vector<4x24xf32>
    %cst_226 = arith.constant 0.565217376 : f32
    %465 = vector.broadcast %cst_226 : f32 to vector<4x24xf32>
    %466 = arith.mulf %464, %465 : vector<4x24xf32>
    %467 = vector.extract_strided_slice %445 {offsets = [1, 0, 0], sizes = [1, 4, 24], strides = [1, 1, 1]} : vector<6x4x24xf32> to vector<1x4x24xf32>
    %468 = vector.shape_cast %467 : vector<1x4x24xf32> to vector<4x24xf32>
    %cst_227 = arith.constant 0.434782594 : f32
    %469 = vector.broadcast %cst_227 : f32 to vector<4x24xf32>
    %470 = arith.mulf %468, %469 : vector<4x24xf32>
    %471 = arith.addf %466, %470 : vector<4x24xf32>
    %c0_228 = arith.constant 0 : index
    %c2_229 = arith.constant 2 : index
    %c11_230 = arith.constant 11 : index
    %c0_231 = arith.constant 0 : index
    %472 = vector.load %arg12[%c0_228, %c2_229, %c11_230, %c0_231] : memref<1x24x19x24xf32, #tpu.memory_space<vmem>>, vector<1x1x4x24xf32>
    %473 = vector.shape_cast %472 : vector<1x1x4x24xf32> to vector<4x24xf32>
    %474 = vector.shape_cast %471 : vector<4x24xf32> to vector<1x1x4x24xf32>
    tpu.vector_store %arg12[%c0_228, %c2_229, %c11_230, %c0_231], %474 {strides = array<i32>} : memref<1x24x19x24xf32, #tpu.memory_space<vmem>>, vector<1x1x4x24xf32>,
    %475 = vector.extract_strided_slice %445 {offsets = [0, 0, 0], sizes = [1, 4, 24], strides = [1, 1, 1]} : vector<6x4x24xf32> to vector<1x4x24xf32>
    %476 = vector.shape_cast %475 : vector<1x4x24xf32> to vector<4x24xf32>
    %cst_232 = arith.constant 0.347826093 : f32
    %477 = vector.broadcast %cst_232 : f32 to vector<4x24xf32>
    %478 = arith.mulf %476, %477 : vector<4x24xf32>
    %479 = vector.extract_strided_slice %445 {offsets = [1, 0, 0], sizes = [1, 4, 24], strides = [1, 1, 1]} : vector<6x4x24xf32> to vector<1x4x24xf32>
    %480 = vector.shape_cast %479 : vector<1x4x24xf32> to vector<4x24xf32>
    %cst_233 = arith.constant 0.652173936 : f32
    %481 = vector.broadcast %cst_233 : f32 to vector<4x24xf32>
    %482 = arith.mulf %480, %481 : vector<4x24xf32>
    %483 = arith.addf %478, %482 : vector<4x24xf32>
    %c0_234 = arith.constant 0 : index
    %c3_235 = arith.constant 3 : index
    %c11_236 = arith.constant 11 : index
    %c0_237 = arith.constant 0 : index
    %484 = vector.load %arg12[%c0_234, %c3_235, %c11_236, %c0_237] : memref<1x24x19x24xf32, #tpu.memory_space<vmem>>, vector<1x1x4x24xf32>
    %485 = vector.shape_cast %484 : vector<1x1x4x24xf32> to vector<4x24xf32>
    %486 = vector.shape_cast %483 : vector<4x24xf32> to vector<1x1x4x24xf32>
    tpu.vector_store %arg12[%c0_234, %c3_235, %c11_236, %c0_237], %486 {strides = array<i32>} : memref<1x24x19x24xf32, #tpu.memory_space<vmem>>, vector<1x1x4x24xf32>,
    %487 = vector.extract_strided_slice %445 {offsets = [0, 0, 0], sizes = [1, 4, 24], strides = [1, 1, 1]} : vector<6x4x24xf32> to vector<1x4x24xf32>
    %488 = vector.shape_cast %487 : vector<1x4x24xf32> to vector<4x24xf32>
    %cst_238 = arith.constant 0.130434781 : f32
    %489 = vector.broadcast %cst_238 : f32 to vector<4x24xf32>
    %490 = arith.mulf %488, %489 : vector<4x24xf32>
    %491 = vector.extract_strided_slice %445 {offsets = [1, 0, 0], sizes = [1, 4, 24], strides = [1, 1, 1]} : vector<6x4x24xf32> to vector<1x4x24xf32>
    %492 = vector.shape_cast %491 : vector<1x4x24xf32> to vector<4x24xf32>
    %cst_239 = arith.constant 0.869565188 : f32
    %493 = vector.broadcast %cst_239 : f32 to vector<4x24xf32>
    %494 = arith.mulf %492, %493 : vector<4x24xf32>
    %495 = arith.addf %490, %494 : vector<4x24xf32>
    %c0_240 = arith.constant 0 : index
    %c4_241 = arith.constant 4 : index
    %c11_242 = arith.constant 11 : index
    %c0_243 = arith.constant 0 : index
    %496 = vector.load %arg12[%c0_240, %c4_241, %c11_242, %c0_243] : memref<1x24x19x24xf32, #tpu.memory_space<vmem>>, vector<1x1x4x24xf32>
    %497 = vector.shape_cast %496 : vector<1x1x4x24xf32> to vector<4x24xf32>
    %498 = vector.shape_cast %495 : vector<4x24xf32> to vector<1x1x4x24xf32>
    tpu.vector_store %arg12[%c0_240, %c4_241, %c11_242, %c0_243], %498 {strides = array<i32>} : memref<1x24x19x24xf32, #tpu.memory_space<vmem>>, vector<1x1x4x24xf32>,
    %499 = vector.extract_strided_slice %445 {offsets = [1, 0, 0], sizes = [1, 4, 24], strides = [1, 1, 1]} : vector<6x4x24xf32> to vector<1x4x24xf32>
    %500 = vector.shape_cast %499 : vector<1x4x24xf32> to vector<4x24xf32>
    %cst_244 = arith.constant 0.913043498 : f32
    %501 = vector.broadcast %cst_244 : f32 to vector<4x24xf32>
    %502 = arith.mulf %500, %501 : vector<4x24xf32>
    %503 = vector.extract_strided_slice %445 {offsets = [2, 0, 0], sizes = [1, 4, 24], strides = [1, 1, 1]} : vector<6x4x24xf32> to vector<1x4x24xf32>
    %504 = vector.shape_cast %503 : vector<1x4x24xf32> to vector<4x24xf32>
    %cst_245 = arith.constant 0.0869565233 : f32
    %505 = vector.broadcast %cst_245 : f32 to vector<4x24xf32>
    %506 = arith.mulf %504, %505 : vector<4x24xf32>
    %507 = arith.addf %502, %506 : vector<4x24xf32>
    %c0_246 = arith.constant 0 : index
    %c5_247 = arith.constant 5 : index
    %c11_248 = arith.constant 11 : index
    %c0_249 = arith.constant 0 : index
    %508 = vector.load %arg12[%c0_246, %c5_247, %c11_248, %c0_249] : memref<1x24x19x24xf32, #tpu.memory_space<vmem>>, vector<1x1x4x24xf32>
    %509 = vector.shape_cast %508 : vector<1x1x4x24xf32> to vector<4x24xf32>
    %510 = vector.shape_cast %507 : vector<4x24xf32> to vector<1x1x4x24xf32>
    tpu.vector_store %arg12[%c0_246, %c5_247, %c11_248, %c0_249], %510 {strides = array<i32>} : memref<1x24x19x24xf32, #tpu.memory_space<vmem>>, vector<1x1x4x24xf32>,
    %511 = vector.extract_strided_slice %445 {offsets = [1, 0, 0], sizes = [1, 4, 24], strides = [1, 1, 1]} : vector<6x4x24xf32> to vector<1x4x24xf32>
    %512 = vector.shape_cast %511 : vector<1x4x24xf32> to vector<4x24xf32>
    %cst_250 = arith.constant 0.695652186 : f32
    %513 = vector.broadcast %cst_250 : f32 to vector<4x24xf32>
    %514 = arith.mulf %512, %513 : vector<4x24xf32>
    %515 = vector.extract_strided_slice %445 {offsets = [2, 0, 0], sizes = [1, 4, 24], strides = [1, 1, 1]} : vector<6x4x24xf32> to vector<1x4x24xf32>
    %516 = vector.shape_cast %515 : vector<1x4x24xf32> to vector<4x24xf32>
    %cst_251 = arith.constant 0.304347813 : f32
    %517 = vector.broadcast %cst_251 : f32 to vector<4x24xf32>
    %518 = arith.mulf %516, %517 : vector<4x24xf32>
    %519 = arith.addf %514, %518 : vector<4x24xf32>
    %c0_252 = arith.constant 0 : index
    %c6_253 = arith.constant 6 : index
    %c11_254 = arith.constant 11 : index
    %c0_255 = arith.constant 0 : index
    %520 = vector.load %arg12[%c0_252, %c6_253, %c11_254, %c0_255] : memref<1x24x19x24xf32, #tpu.memory_space<vmem>>, vector<1x1x4x24xf32>
    %521 = vector.shape_cast %520 : vector<1x1x4x24xf32> to vector<4x24xf32>
    %522 = vector.shape_cast %519 : vector<4x24xf32> to vector<1x1x4x24xf32>
    tpu.vector_store %arg12[%c0_252, %c6_253, %c11_254, %c0_255], %522 {strides = array<i32>} : memref<1x24x19x24xf32, #tpu.memory_space<vmem>>, vector<1x1x4x24xf32>,
    %523 = vector.extract_strided_slice %445 {offsets = [1, 0, 0], sizes = [1, 4, 24], strides = [1, 1, 1]} : vector<6x4x24xf32> to vector<1x4x24xf32>
    %524 = vector.shape_cast %523 : vector<1x4x24xf32> to vector<4x24xf32>
    %cst_256 = arith.constant 0.478260875 : f32
    %525 = vector.broadcast %cst_256 : f32 to vector<4x24xf32>
    %526 = arith.mulf %524, %525 : vector<4x24xf32>
    %527 = vector.extract_strided_slice %445 {offsets = [2, 0, 0], sizes = [1, 4, 24], strides = [1, 1, 1]} : vector<6x4x24xf32> to vector<1x4x24xf32>
    %528 = vector.shape_cast %527 : vector<1x4x24xf32> to vector<4x24xf32>
    %cst_257 = arith.constant 0.521739125 : f32
    %529 = vector.broadcast %cst_257 : f32 to vector<4x24xf32>
    %530 = arith.mulf %528, %529 : vector<4x24xf32>
    %531 = arith.addf %526, %530 : vector<4x24xf32>
    %c0_258 = arith.constant 0 : index
    %c7_259 = arith.constant 7 : index
    %c11_260 = arith.constant 11 : index
    %c0_261 = arith.constant 0 : index
    %532 = vector.load %arg12[%c0_258, %c7_259, %c11_260, %c0_261] : memref<1x24x19x24xf32, #tpu.memory_space<vmem>>, vector<1x1x4x24xf32>
    %533 = vector.shape_cast %532 : vector<1x1x4x24xf32> to vector<4x24xf32>
    %534 = vector.shape_cast %531 : vector<4x24xf32> to vector<1x1x4x24xf32>
    tpu.vector_store %arg12[%c0_258, %c7_259, %c11_260, %c0_261], %534 {strides = array<i32>} : memref<1x24x19x24xf32, #tpu.memory_space<vmem>>, vector<1x1x4x24xf32>,
    %535 = vector.extract_strided_slice %445 {offsets = [1, 0, 0], sizes = [1, 4, 24], strides = [1, 1, 1]} : vector<6x4x24xf32> to vector<1x4x24xf32>
    %536 = vector.shape_cast %535 : vector<1x4x24xf32> to vector<4x24xf32>
    %cst_262 = arith.constant 0.260869563 : f32
    %537 = vector.broadcast %cst_262 : f32 to vector<4x24xf32>
    %538 = arith.mulf %536, %537 : vector<4x24xf32>
    %539 = vector.extract_strided_slice %445 {offsets = [2, 0, 0], sizes = [1, 4, 24], strides = [1, 1, 1]} : vector<6x4x24xf32> to vector<1x4x24xf32>
    %540 = vector.shape_cast %539 : vector<1x4x24xf32> to vector<4x24xf32>
    %cst_263 = arith.constant 0.739130437 : f32
    %541 = vector.broadcast %cst_263 : f32 to vector<4x24xf32>
    %542 = arith.mulf %540, %541 : vector<4x24xf32>
    %543 = arith.addf %538, %542 : vector<4x24xf32>
    %c0_264 = arith.constant 0 : index
    %c8_265 = arith.constant 8 : index
    %c11_266 = arith.constant 11 : index
    %c0_267 = arith.constant 0 : index
    %544 = vector.load %arg12[%c0_264, %c8_265, %c11_266, %c0_267] : memref<1x24x19x24xf32, #tpu.memory_space<vmem>>, vector<1x1x4x24xf32>
    %545 = vector.shape_cast %544 : vector<1x1x4x24xf32> to vector<4x24xf32>
    %546 = vector.shape_cast %543 : vector<4x24xf32> to vector<1x1x4x24xf32>
    tpu.vector_store %arg12[%c0_264, %c8_265, %c11_266, %c0_267], %546 {strides = array<i32>} : memref<1x24x19x24xf32, #tpu.memory_space<vmem>>, vector<1x1x4x24xf32>,
    %547 = vector.extract_strided_slice %445 {offsets = [1, 0, 0], sizes = [1, 4, 24], strides = [1, 1, 1]} : vector<6x4x24xf32> to vector<1x4x24xf32>
    %548 = vector.shape_cast %547 : vector<1x4x24xf32> to vector<4x24xf32>
    %cst_268 = arith.constant 0.0434782617 : f32
    %549 = vector.broadcast %cst_268 : f32 to vector<4x24xf32>
    %550 = arith.mulf %548, %549 : vector<4x24xf32>
    %551 = vector.extract_strided_slice %445 {offsets = [2, 0, 0], sizes = [1, 4, 24], strides = [1, 1, 1]} : vector<6x4x24xf32> to vector<1x4x24xf32>
    %552 = vector.shape_cast %551 : vector<1x4x24xf32> to vector<4x24xf32>
    %cst_269 = arith.constant 0.956521749 : f32
    %553 = vector.broadcast %cst_269 : f32 to vector<4x24xf32>
    %554 = arith.mulf %552, %553 : vector<4x24xf32>
    %555 = arith.addf %550, %554 : vector<4x24xf32>
    %c0_270 = arith.constant 0 : index
    %c9_271 = arith.constant 9 : index
    %c11_272 = arith.constant 11 : index
    %c0_273 = arith.constant 0 : index
    %556 = vector.load %arg12[%c0_270, %c9_271, %c11_272, %c0_273] : memref<1x24x19x24xf32, #tpu.memory_space<vmem>>, vector<1x1x4x24xf32>
    %557 = vector.shape_cast %556 : vector<1x1x4x24xf32> to vector<4x24xf32>
    %558 = vector.shape_cast %555 : vector<4x24xf32> to vector<1x1x4x24xf32>
    tpu.vector_store %arg12[%c0_270, %c9_271, %c11_272, %c0_273], %558 {strides = array<i32>} : memref<1x24x19x24xf32, #tpu.memory_space<vmem>>, vector<1x1x4x24xf32>,
    %559 = vector.extract_strided_slice %445 {offsets = [2, 0, 0], sizes = [1, 4, 24], strides = [1, 1, 1]} : vector<6x4x24xf32> to vector<1x4x24xf32>
    %560 = vector.shape_cast %559 : vector<1x4x24xf32> to vector<4x24xf32>
    %cst_274 = arith.constant 0.826086938 : f32
    %561 = vector.broadcast %cst_274 : f32 to vector<4x24xf32>
    %562 = arith.mulf %560, %561 : vector<4x24xf32>
    %563 = vector.extract_strided_slice %445 {offsets = [3, 0, 0], sizes = [1, 4, 24], strides = [1, 1, 1]} : vector<6x4x24xf32> to vector<1x4x24xf32>
    %564 = vector.shape_cast %563 : vector<1x4x24xf32> to vector<4x24xf32>
    %cst_275 = arith.constant 0.173913047 : f32
    %565 = vector.broadcast %cst_275 : f32 to vector<4x24xf32>
    %566 = arith.mulf %564, %565 : vector<4x24xf32>
    %567 = arith.addf %562, %566 : vector<4x24xf32>
    %c0_276 = arith.constant 0 : index
    %c10_277 = arith.constant 10 : index
    %c11_278 = arith.constant 11 : index
    %c0_279 = arith.constant 0 : index
    %568 = vector.load %arg12[%c0_276, %c10_277, %c11_278, %c0_279] : memref<1x24x19x24xf32, #tpu.memory_space<vmem>>, vector<1x1x4x24xf32>
    %569 = vector.shape_cast %568 : vector<1x1x4x24xf32> to vector<4x24xf32>
    %570 = vector.shape_cast %567 : vector<4x24xf32> to vector<1x1x4x24xf32>
    tpu.vector_store %arg12[%c0_276, %c10_277, %c11_278, %c0_279], %570 {strides = array<i32>} : memref<1x24x19x24xf32, #tpu.memory_space<vmem>>, vector<1x1x4x24xf32>,
    %571 = vector.extract_strided_slice %445 {offsets = [2, 0, 0], sizes = [1, 4, 24], strides = [1, 1, 1]} : vector<6x4x24xf32> to vector<1x4x24xf32>
    %572 = vector.shape_cast %571 : vector<1x4x24xf32> to vector<4x24xf32>
    %cst_280 = arith.constant 0.608695626 : f32
    %573 = vector.broadcast %cst_280 : f32 to vector<4x24xf32>
    %574 = arith.mulf %572, %573 : vector<4x24xf32>
    %575 = vector.extract_strided_slice %445 {offsets = [3, 0, 0], sizes = [1, 4, 24], strides = [1, 1, 1]} : vector<6x4x24xf32> to vector<1x4x24xf32>
    %576 = vector.shape_cast %575 : vector<1x4x24xf32> to vector<4x24xf32>
    %cst_281 = arith.constant 0.391304344 : f32
    %577 = vector.broadcast %cst_281 : f32 to vector<4x24xf32>
    %578 = arith.mulf %576, %577 : vector<4x24xf32>
    %579 = arith.addf %574, %578 : vector<4x24xf32>
    %c0_282 = arith.constant 0 : index
    %c11_283 = arith.constant 11 : index
    %c11_284 = arith.constant 11 : index
    %c0_285 = arith.constant 0 : index
    %580 = vector.load %arg12[%c0_282, %c11_283, %c11_284, %c0_285] : memref<1x24x19x24xf32, #tpu.memory_space<vmem>>, vector<1x1x4x24xf32>
    %581 = vector.shape_cast %580 : vector<1x1x4x24xf32> to vector<4x24xf32>
    %582 = vector.shape_cast %579 : vector<4x24xf32> to vector<1x1x4x24xf32>
    tpu.vector_store %arg12[%c0_282, %c11_283, %c11_284, %c0_285], %582 {strides = array<i32>} : memref<1x24x19x24xf32, #tpu.memory_space<vmem>>, vector<1x1x4x24xf32>,
    %583 = vector.extract_strided_slice %445 {offsets = [2, 0, 0], sizes = [1, 4, 24], strides = [1, 1, 1]} : vector<6x4x24xf32> to vector<1x4x24xf32>
    %584 = vector.shape_cast %583 : vector<1x4x24xf32> to vector<4x24xf32>
    %cst_286 = arith.constant 0.391304344 : f32
    %585 = vector.broadcast %cst_286 : f32 to vector<4x24xf32>
    %586 = arith.mulf %584, %585 : vector<4x24xf32>
    %587 = vector.extract_strided_slice %445 {offsets = [3, 0, 0], sizes = [1, 4, 24], strides = [1, 1, 1]} : vector<6x4x24xf32> to vector<1x4x24xf32>
    %588 = vector.shape_cast %587 : vector<1x4x24xf32> to vector<4x24xf32>
    %cst_287 = arith.constant 0.608695626 : f32
    %589 = vector.broadcast %cst_287 : f32 to vector<4x24xf32>
    %590 = arith.mulf %588, %589 : vector<4x24xf32>
    %591 = arith.addf %586, %590 : vector<4x24xf32>
    %c0_288 = arith.constant 0 : index
    %c12_289 = arith.constant 12 : index
    %c11_290 = arith.constant 11 : index
    %c0_291 = arith.constant 0 : index
    %592 = vector.load %arg12[%c0_288, %c12_289, %c11_290, %c0_291] : memref<1x24x19x24xf32, #tpu.memory_space<vmem>>, vector<1x1x4x24xf32>
    %593 = vector.shape_cast %592 : vector<1x1x4x24xf32> to vector<4x24xf32>
    %594 = vector.shape_cast %591 : vector<4x24xf32> to vector<1x1x4x24xf32>
    tpu.vector_store %arg12[%c0_288, %c12_289, %c11_290, %c0_291], %594 {strides = array<i32>} : memref<1x24x19x24xf32, #tpu.memory_space<vmem>>, vector<1x1x4x24xf32>,
    %595 = vector.extract_strided_slice %445 {offsets = [2, 0, 0], sizes = [1, 4, 24], strides = [1, 1, 1]} : vector<6x4x24xf32> to vector<1x4x24xf32>
    %596 = vector.shape_cast %595 : vector<1x4x24xf32> to vector<4x24xf32>
    %cst_292 = arith.constant 0.173913047 : f32
    %597 = vector.broadcast %cst_292 : f32 to vector<4x24xf32>
    %598 = arith.mulf %596, %597 : vector<4x24xf32>
    %599 = vector.extract_strided_slice %445 {offsets = [3, 0, 0], sizes = [1, 4, 24], strides = [1, 1, 1]} : vector<6x4x24xf32> to vector<1x4x24xf32>
    %600 = vector.shape_cast %599 : vector<1x4x24xf32> to vector<4x24xf32>
    %cst_293 = arith.constant 0.826086938 : f32
    %601 = vector.broadcast %cst_293 : f32 to vector<4x24xf32>
    %602 = arith.mulf %600, %601 : vector<4x24xf32>
    %603 = arith.addf %598, %602 : vector<4x24xf32>
    %c0_294 = arith.constant 0 : index
    %c13_295 = arith.constant 13 : index
    %c11_296 = arith.constant 11 : index
    %c0_297 = arith.constant 0 : index
    %604 = vector.load %arg12[%c0_294, %c13_295, %c11_296, %c0_297] : memref<1x24x19x24xf32, #tpu.memory_space<vmem>>, vector<1x1x4x24xf32>
    %605 = vector.shape_cast %604 : vector<1x1x4x24xf32> to vector<4x24xf32>
    %606 = vector.shape_cast %603 : vector<4x24xf32> to vector<1x1x4x24xf32>
    tpu.vector_store %arg12[%c0_294, %c13_295, %c11_296, %c0_297], %606 {strides = array<i32>} : memref<1x24x19x24xf32, #tpu.memory_space<vmem>>, vector<1x1x4x24xf32>,
    %607 = vector.extract_strided_slice %445 {offsets = [3, 0, 0], sizes = [1, 4, 24], strides = [1, 1, 1]} : vector<6x4x24xf32> to vector<1x4x24xf32>
    %608 = vector.shape_cast %607 : vector<1x4x24xf32> to vector<4x24xf32>
    %cst_298 = arith.constant 0.956521749 : f32
    %609 = vector.broadcast %cst_298 : f32 to vector<4x24xf32>
    %610 = arith.mulf %608, %609 : vector<4x24xf32>
    %611 = vector.extract_strided_slice %445 {offsets = [4, 0, 0], sizes = [1, 4, 24], strides = [1, 1, 1]} : vector<6x4x24xf32> to vector<1x4x24xf32>
    %612 = vector.shape_cast %611 : vector<1x4x24xf32> to vector<4x24xf32>
    %cst_299 = arith.constant 0.0434782617 : f32
    %613 = vector.broadcast %cst_299 : f32 to vector<4x24xf32>
    %614 = arith.mulf %612, %613 : vector<4x24xf32>
    %615 = arith.addf %610, %614 : vector<4x24xf32>
    %c0_300 = arith.constant 0 : index
    %c14_301 = arith.constant 14 : index
    %c11_302 = arith.constant 11 : index
    %c0_303 = arith.constant 0 : index
    %616 = vector.load %arg12[%c0_300, %c14_301, %c11_302, %c0_303] : memref<1x24x19x24xf32, #tpu.memory_space<vmem>>, vector<1x1x4x24xf32>
    %617 = vector.shape_cast %616 : vector<1x1x4x24xf32> to vector<4x24xf32>
    %618 = vector.shape_cast %615 : vector<4x24xf32> to vector<1x1x4x24xf32>
    tpu.vector_store %arg12[%c0_300, %c14_301, %c11_302, %c0_303], %618 {strides = array<i32>} : memref<1x24x19x24xf32, #tpu.memory_space<vmem>>, vector<1x1x4x24xf32>,
    %619 = vector.extract_strided_slice %445 {offsets = [3, 0, 0], sizes = [1, 4, 24], strides = [1, 1, 1]} : vector<6x4x24xf32> to vector<1x4x24xf32>
    %620 = vector.shape_cast %619 : vector<1x4x24xf32> to vector<4x24xf32>
    %cst_304 = arith.constant 0.739130437 : f32
    %621 = vector.broadcast %cst_304 : f32 to vector<4x24xf32>
    %622 = arith.mulf %620, %621 : vector<4x24xf32>
    %623 = vector.extract_strided_slice %445 {offsets = [4, 0, 0], sizes = [1, 4, 24], strides = [1, 1, 1]} : vector<6x4x24xf32> to vector<1x4x24xf32>
    %624 = vector.shape_cast %623 : vector<1x4x24xf32> to vector<4x24xf32>
    %cst_305 = arith.constant 0.260869563 : f32
    %625 = vector.broadcast %cst_305 : f32 to vector<4x24xf32>
    %626 = arith.mulf %624, %625 : vector<4x24xf32>
    %627 = arith.addf %622, %626 : vector<4x24xf32>
    %c0_306 = arith.constant 0 : index
    %c15_307 = arith.constant 15 : index
    %c11_308 = arith.constant 11 : index
    %c0_309 = arith.constant 0 : index
    %628 = vector.load %arg12[%c0_306, %c15_307, %c11_308, %c0_309] : memref<1x24x19x24xf32, #tpu.memory_space<vmem>>, vector<1x1x4x24xf32>
    %629 = vector.shape_cast %628 : vector<1x1x4x24xf32> to vector<4x24xf32>
    %630 = vector.shape_cast %627 : vector<4x24xf32> to vector<1x1x4x24xf32>
    tpu.vector_store %arg12[%c0_306, %c15_307, %c11_308, %c0_309], %630 {strides = array<i32>} : memref<1x24x19x24xf32, #tpu.memory_space<vmem>>, vector<1x1x4x24xf32>,
    %631 = vector.extract_strided_slice %445 {offsets = [3, 0, 0], sizes = [1, 4, 24], strides = [1, 1, 1]} : vector<6x4x24xf32> to vector<1x4x24xf32>
    %632 = vector.shape_cast %631 : vector<1x4x24xf32> to vector<4x24xf32>
    %cst_310 = arith.constant 0.521739125 : f32
    %633 = vector.broadcast %cst_310 : f32 to vector<4x24xf32>
    %634 = arith.mulf %632, %633 : vector<4x24xf32>
    %635 = vector.extract_strided_slice %445 {offsets = [4, 0, 0], sizes = [1, 4, 24], strides = [1, 1, 1]} : vector<6x4x24xf32> to vector<1x4x24xf32>
    %636 = vector.shape_cast %635 : vector<1x4x24xf32> to vector<4x24xf32>
    %cst_311 = arith.constant 0.478260875 : f32
    %637 = vector.broadcast %cst_311 : f32 to vector<4x24xf32>
    %638 = arith.mulf %636, %637 : vector<4x24xf32>
    %639 = arith.addf %634, %638 : vector<4x24xf32>
    %c0_312 = arith.constant 0 : index
    %c16_313 = arith.constant 16 : index
    %c11_314 = arith.constant 11 : index
    %c0_315 = arith.constant 0 : index
    %640 = vector.load %arg12[%c0_312, %c16_313, %c11_314, %c0_315] : memref<1x24x19x24xf32, #tpu.memory_space<vmem>>, vector<1x1x4x24xf32>
    %641 = vector.shape_cast %640 : vector<1x1x4x24xf32> to vector<4x24xf32>
    %642 = vector.shape_cast %639 : vector<4x24xf32> to vector<1x1x4x24xf32>
    tpu.vector_store %arg12[%c0_312, %c16_313, %c11_314, %c0_315], %642 {strides = array<i32>} : memref<1x24x19x24xf32, #tpu.memory_space<vmem>>, vector<1x1x4x24xf32>,
    %643 = vector.extract_strided_slice %445 {offsets = [3, 0, 0], sizes = [1, 4, 24], strides = [1, 1, 1]} : vector<6x4x24xf32> to vector<1x4x24xf32>
    %644 = vector.shape_cast %643 : vector<1x4x24xf32> to vector<4x24xf32>
    %cst_316 = arith.constant 0.304347813 : f32
    %645 = vector.broadcast %cst_316 : f32 to vector<4x24xf32>
    %646 = arith.mulf %644, %645 : vector<4x24xf32>
    %647 = vector.extract_strided_slice %445 {offsets = [4, 0, 0], sizes = [1, 4, 24], strides = [1, 1, 1]} : vector<6x4x24xf32> to vector<1x4x24xf32>
    %648 = vector.shape_cast %647 : vector<1x4x24xf32> to vector<4x24xf32>
    %cst_317 = arith.constant 0.695652186 : f32
    %649 = vector.broadcast %cst_317 : f32 to vector<4x24xf32>
    %650 = arith.mulf %648, %649 : vector<4x24xf32>
    %651 = arith.addf %646, %650 : vector<4x24xf32>
    %c0_318 = arith.constant 0 : index
    %c17_319 = arith.constant 17 : index
    %c11_320 = arith.constant 11 : index
    %c0_321 = arith.constant 0 : index
    %652 = vector.load %arg12[%c0_318, %c17_319, %c11_320, %c0_321] : memref<1x24x19x24xf32, #tpu.memory_space<vmem>>, vector<1x1x4x24xf32>
    %653 = vector.shape_cast %652 : vector<1x1x4x24xf32> to vector<4x24xf32>
    %654 = vector.shape_cast %651 : vector<4x24xf32> to vector<1x1x4x24xf32>
    tpu.vector_store %arg12[%c0_318, %c17_319, %c11_320, %c0_321], %654 {strides = array<i32>} : memref<1x24x19x24xf32, #tpu.memory_space<vmem>>, vector<1x1x4x24xf32>,
    %655 = vector.extract_strided_slice %445 {offsets = [3, 0, 0], sizes = [1, 4, 24], strides = [1, 1, 1]} : vector<6x4x24xf32> to vector<1x4x24xf32>
    %656 = vector.shape_cast %655 : vector<1x4x24xf32> to vector<4x24xf32>
    %cst_322 = arith.constant 0.0869565233 : f32
    %657 = vector.broadcast %cst_322 : f32 to vector<4x24xf32>
    %658 = arith.mulf %656, %657 : vector<4x24xf32>
    %659 = vector.extract_strided_slice %445 {offsets = [4, 0, 0], sizes = [1, 4, 24], strides = [1, 1, 1]} : vector<6x4x24xf32> to vector<1x4x24xf32>
    %660 = vector.shape_cast %659 : vector<1x4x24xf32> to vector<4x24xf32>
    %cst_323 = arith.constant 0.913043498 : f32
    %661 = vector.broadcast %cst_323 : f32 to vector<4x24xf32>
    %662 = arith.mulf %660, %661 : vector<4x24xf32>
    %663 = arith.addf %658, %662 : vector<4x24xf32>
    %c0_324 = arith.constant 0 : index
    %c18_325 = arith.constant 18 : index
    %c11_326 = arith.constant 11 : index
    %c0_327 = arith.constant 0 : index
    %664 = vector.load %arg12[%c0_324, %c18_325, %c11_326, %c0_327] : memref<1x24x19x24xf32, #tpu.memory_space<vmem>>, vector<1x1x4x24xf32>
    %665 = vector.shape_cast %664 : vector<1x1x4x24xf32> to vector<4x24xf32>
    %666 = vector.shape_cast %663 : vector<4x24xf32> to vector<1x1x4x24xf32>
    tpu.vector_store %arg12[%c0_324, %c18_325, %c11_326, %c0_327], %666 {strides = array<i32>} : memref<1x24x19x24xf32, #tpu.memory_space<vmem>>, vector<1x1x4x24xf32>,
    %667 = vector.extract_strided_slice %445 {offsets = [4, 0, 0], sizes = [1, 4, 24], strides = [1, 1, 1]} : vector<6x4x24xf32> to vector<1x4x24xf32>
    %668 = vector.shape_cast %667 : vector<1x4x24xf32> to vector<4x24xf32>
    %cst_328 = arith.constant 0.869565188 : f32
    %669 = vector.broadcast %cst_328 : f32 to vector<4x24xf32>
    %670 = arith.mulf %668, %669 : vector<4x24xf32>
    %671 = vector.extract_strided_slice %445 {offsets = [5, 0, 0], sizes = [1, 4, 24], strides = [1, 1, 1]} : vector<6x4x24xf32> to vector<1x4x24xf32>
    %672 = vector.shape_cast %671 : vector<1x4x24xf32> to vector<4x24xf32>
    %cst_329 = arith.constant 0.130434781 : f32
    %673 = vector.broadcast %cst_329 : f32 to vector<4x24xf32>
    %674 = arith.mulf %672, %673 : vector<4x24xf32>
    %675 = arith.addf %670, %674 : vector<4x24xf32>
    %c0_330 = arith.constant 0 : index
    %c19_331 = arith.constant 19 : index
    %c11_332 = arith.constant 11 : index
    %c0_333 = arith.constant 0 : index
    %676 = vector.load %arg12[%c0_330, %c19_331, %c11_332, %c0_333] : memref<1x24x19x24xf32, #tpu.memory_space<vmem>>, vector<1x1x4x24xf32>
    %677 = vector.shape_cast %676 : vector<1x1x4x24xf32> to vector<4x24xf32>
    %678 = vector.shape_cast %675 : vector<4x24xf32> to vector<1x1x4x24xf32>
    tpu.vector_store %arg12[%c0_330, %c19_331, %c11_332, %c0_333], %678 {strides = array<i32>} : memref<1x24x19x24xf32, #tpu.memory_space<vmem>>, vector<1x1x4x24xf32>,
    %679 = vector.extract_strided_slice %445 {offsets = [4, 0, 0], sizes = [1, 4, 24], strides = [1, 1, 1]} : vector<6x4x24xf32> to vector<1x4x24xf32>
    %680 = vector.shape_cast %679 : vector<1x4x24xf32> to vector<4x24xf32>
    %cst_334 = arith.constant 0.652173936 : f32
    %681 = vector.broadcast %cst_334 : f32 to vector<4x24xf32>
    %682 = arith.mulf %680, %681 : vector<4x24xf32>
    %683 = vector.extract_strided_slice %445 {offsets = [5, 0, 0], sizes = [1, 4, 24], strides = [1, 1, 1]} : vector<6x4x24xf32> to vector<1x4x24xf32>
    %684 = vector.shape_cast %683 : vector<1x4x24xf32> to vector<4x24xf32>
    %cst_335 = arith.constant 0.347826093 : f32
    %685 = vector.broadcast %cst_335 : f32 to vector<4x24xf32>
    %686 = arith.mulf %684, %685 : vector<4x24xf32>
    %687 = arith.addf %682, %686 : vector<4x24xf32>
    %c0_336 = arith.constant 0 : index
    %c20_337 = arith.constant 20 : index
    %c11_338 = arith.constant 11 : index
    %c0_339 = arith.constant 0 : index
    %688 = vector.load %arg12[%c0_336, %c20_337, %c11_338, %c0_339] : memref<1x24x19x24xf32, #tpu.memory_space<vmem>>, vector<1x1x4x24xf32>
    %689 = vector.shape_cast %688 : vector<1x1x4x24xf32> to vector<4x24xf32>
    %690 = vector.shape_cast %687 : vector<4x24xf32> to vector<1x1x4x24xf32>
    tpu.vector_store %arg12[%c0_336, %c20_337, %c11_338, %c0_339], %690 {strides = array<i32>} : memref<1x24x19x24xf32, #tpu.memory_space<vmem>>, vector<1x1x4x24xf32>,
    %691 = vector.extract_strided_slice %445 {offsets = [4, 0, 0], sizes = [1, 4, 24], strides = [1, 1, 1]} : vector<6x4x24xf32> to vector<1x4x24xf32>
    %692 = vector.shape_cast %691 : vector<1x4x24xf32> to vector<4x24xf32>
    %cst_340 = arith.constant 0.434782594 : f32
    %693 = vector.broadcast %cst_340 : f32 to vector<4x24xf32>
    %694 = arith.mulf %692, %693 : vector<4x24xf32>
    %695 = vector.extract_strided_slice %445 {offsets = [5, 0, 0], sizes = [1, 4, 24], strides = [1, 1, 1]} : vector<6x4x24xf32> to vector<1x4x24xf32>
    %696 = vector.shape_cast %695 : vector<1x4x24xf32> to vector<4x24xf32>
    %cst_341 = arith.constant 0.565217376 : f32
    %697 = vector.broadcast %cst_341 : f32 to vector<4x24xf32>
    %698 = arith.mulf %696, %697 : vector<4x24xf32>
    %699 = arith.addf %694, %698 : vector<4x24xf32>
    %c0_342 = arith.constant 0 : index
    %c21_343 = arith.constant 21 : index
    %c11_344 = arith.constant 11 : index
    %c0_345 = arith.constant 0 : index
    %700 = vector.load %arg12[%c0_342, %c21_343, %c11_344, %c0_345] : memref<1x24x19x24xf32, #tpu.memory_space<vmem>>, vector<1x1x4x24xf32>
    %701 = vector.shape_cast %700 : vector<1x1x4x24xf32> to vector<4x24xf32>
    %702 = vector.shape_cast %699 : vector<4x24xf32> to vector<1x1x4x24xf32>
    tpu.vector_store %arg12[%c0_342, %c21_343, %c11_344, %c0_345], %702 {strides = array<i32>} : memref<1x24x19x24xf32, #tpu.memory_space<vmem>>, vector<1x1x4x24xf32>,
    %703 = vector.extract_strided_slice %445 {offsets = [4, 0, 0], sizes = [1, 4, 24], strides = [1, 1, 1]} : vector<6x4x24xf32> to vector<1x4x24xf32>
    %704 = vector.shape_cast %703 : vector<1x4x24xf32> to vector<4x24xf32>
    %cst_346 = arith.constant 0.217391297 : f32
    %705 = vector.broadcast %cst_346 : f32 to vector<4x24xf32>
    %706 = arith.mulf %704, %705 : vector<4x24xf32>
    %707 = vector.extract_strided_slice %445 {offsets = [5, 0, 0], sizes = [1, 4, 24], strides = [1, 1, 1]} : vector<6x4x24xf32> to vector<1x4x24xf32>
    %708 = vector.shape_cast %707 : vector<1x4x24xf32> to vector<4x24xf32>
    %cst_347 = arith.constant 0.782608687 : f32
    %709 = vector.broadcast %cst_347 : f32 to vector<4x24xf32>
    %710 = arith.mulf %708, %709 : vector<4x24xf32>
    %711 = arith.addf %706, %710 : vector<4x24xf32>
    %c0_348 = arith.constant 0 : index
    %c22_349 = arith.constant 22 : index
    %c11_350 = arith.constant 11 : index
    %c0_351 = arith.constant 0 : index
    %712 = vector.load %arg12[%c0_348, %c22_349, %c11_350, %c0_351] : memref<1x24x19x24xf32, #tpu.memory_space<vmem>>, vector<1x1x4x24xf32>
    %713 = vector.shape_cast %712 : vector<1x1x4x24xf32> to vector<4x24xf32>
    %714 = vector.shape_cast %711 : vector<4x24xf32> to vector<1x1x4x24xf32>
    tpu.vector_store %arg12[%c0_348, %c22_349, %c11_350, %c0_351], %714 {strides = array<i32>} : memref<1x24x19x24xf32, #tpu.memory_space<vmem>>, vector<1x1x4x24xf32>,
    %715 = vector.extract_strided_slice %445 {offsets = [5, 0, 0], sizes = [1, 4, 24], strides = [1, 1, 1]} : vector<6x4x24xf32> to vector<1x4x24xf32>
    %716 = vector.shape_cast %715 : vector<1x4x24xf32> to vector<4x24xf32>
    %c0_352 = arith.constant 0 : index
    %c23_353 = arith.constant 23 : index
    %c11_354 = arith.constant 11 : index
    %c0_355 = arith.constant 0 : index
    %717 = vector.load %arg12[%c0_352, %c23_353, %c11_354, %c0_355] : memref<1x24x19x24xf32, #tpu.memory_space<vmem>>, vector<1x1x4x24xf32>
    %718 = vector.shape_cast %717 : vector<1x1x4x24xf32> to vector<4x24xf32>
    %719 = vector.shape_cast %716 : vector<4x24xf32> to vector<1x1x4x24xf32>
    tpu.vector_store %arg12[%c0_352, %c23_353, %c11_354, %c0_355], %719 {strides = array<i32>} : memref<1x24x19x24xf32, #tpu.memory_space<vmem>>, vector<1x1x4x24xf32>,
    %c0_356 = arith.constant 0 : index
    %c0_357 = arith.constant 0 : index
    %c0_358 = arith.constant 0 : index
    %c0_359 = arith.constant 0 : index
    %720 = vector.load %arg12[%c0_356, %c0_357, %c0_358, %c0_359] : memref<1x24x19x24xf32, #tpu.memory_space<vmem>>, vector<1x24x15x24xf32>
    %721 = vector.shape_cast %720 : vector<1x24x15x24xf32> to vector<24x15x24xf32>
    %c1_360 = arith.constant 1 : index
    %c0_361 = arith.constant 0 : index
    %c1_362 = arith.constant 1 : index
    %722 = vector.load %arg13[%c1_360, %c0_361, %c1_362] : memref<26x15x26xf32, #tpu.memory_space<vmem>>, vector<24x15x24xf32>
    tpu.vector_store %arg13[%c1_360, %c0_361, %c1_362], %721 {strides = array<i32>} : memref<26x15x26xf32, #tpu.memory_space<vmem>>, vector<24x15x24xf32>,
    %c0_363 = arith.constant 0 : index
    %c0_364 = arith.constant 0 : index
    %c0_365 = arith.constant 0 : index
    %723 = vector.load %arg13[%c0_363, %c0_364, %c0_365] : memref<26x15x26xf32, #tpu.memory_space<vmem>>, vector<26x15x26xf32>
    %c0_366 = arith.constant 0 : index
    %c0_367 = arith.constant 0 : index
    %724 = vector.load %arg5[%c0_366, %c0_367] : memref<36x15xf32, #tpu.memory_space<vmem>>, vector<36x15xf32>
    %725 = vector.shape_cast %724 : vector<36x15xf32> to vector<1x36x15xf32>
    %726 = vector.broadcast %725 : vector<1x36x15xf32> to vector<26x36x15xf32>
    "tpu.trace_start"() <{level = 10 : i32, message = "akc,acx->akx"}> : () -> ()
    %cst_368 = arith.constant dense<0.000000e+00> : vector<26x36x26xf32>
    %727 = tpu.matmul %726, %723, %cst_368 {dimension_numbers = #tpu.dot_dimension_numbers<[2], [1], [1], [2], [0, 0, 0, 1, 1, 2], [0], [0]>} : vector<26x36x15xf32>, vector<26x15x26xf32>, vector<26x36x26xf32> -> vector<26x36x26xf32>
    "tpu.trace_stop"() : () -> ()
    %728 = vector.extract_strided_slice %727 {offsets = [0, 0, 0], sizes = [24, 4, 24], strides = [1, 1, 1]} : vector<26x36x26xf32> to vector<24x4x24xf32>
    %729 = vector.extract_strided_slice %727 {offsets = [0, 4, 1], sizes = [24, 4, 24], strides = [1, 1, 1]} : vector<26x36x26xf32> to vector<24x4x24xf32>
    %730 = arith.addf %728, %729 : vector<24x4x24xf32>
    %731 = vector.extract_strided_slice %727 {offsets = [0, 8, 2], sizes = [24, 4, 24], strides = [1, 1, 1]} : vector<26x36x26xf32> to vector<24x4x24xf32>
    %732 = arith.addf %730, %731 : vector<24x4x24xf32>
    %733 = vector.extract_strided_slice %727 {offsets = [1, 12, 0], sizes = [24, 4, 24], strides = [1, 1, 1]} : vector<26x36x26xf32> to vector<24x4x24xf32>
    %734 = arith.addf %732, %733 : vector<24x4x24xf32>
    %735 = vector.extract_strided_slice %727 {offsets = [1, 16, 1], sizes = [24, 4, 24], strides = [1, 1, 1]} : vector<26x36x26xf32> to vector<24x4x24xf32>
    %736 = arith.addf %734, %735 : vector<24x4x24xf32>
    %737 = vector.extract_strided_slice %727 {offsets = [1, 20, 2], sizes = [24, 4, 24], strides = [1, 1, 1]} : vector<26x36x26xf32> to vector<24x4x24xf32>
    %738 = arith.addf %736, %737 : vector<24x4x24xf32>
    %739 = vector.extract_strided_slice %727 {offsets = [2, 24, 0], sizes = [24, 4, 24], strides = [1, 1, 1]} : vector<26x36x26xf32> to vector<24x4x24xf32>
    %740 = arith.addf %738, %739 : vector<24x4x24xf32>
    %741 = vector.extract_strided_slice %727 {offsets = [2, 28, 1], sizes = [24, 4, 24], strides = [1, 1, 1]} : vector<26x36x26xf32> to vector<24x4x24xf32>
    %742 = arith.addf %740, %741 : vector<24x4x24xf32>
    %743 = vector.extract_strided_slice %727 {offsets = [2, 32, 2], sizes = [24, 4, 24], strides = [1, 1, 1]} : vector<26x36x26xf32> to vector<24x4x24xf32>
    %744 = arith.addf %742, %743 : vector<24x4x24xf32>
    %c3_369 = arith.constant 3 : index
    %c0_370 = arith.constant 0 : index
    %c0_371 = arith.constant 0 : index
    %745 = vector.load %arg6[%c3_369, %c0_370, %c0_371] : memref<4x4x1xf32, #tpu.memory_space<vmem>>, vector<1x4x1xf32>
    %746 = vector.shape_cast %745 : vector<1x4x1xf32> to vector<4x1xf32>
    %747 = vector.shape_cast %746 : vector<4x1xf32> to vector<1x4x1xf32>
    %748 = vector.broadcast %747 : vector<1x4x1xf32> to vector<24x4x24xf32>
    %749 = arith.mulf %744, %748 : vector<24x4x24xf32>
    %c3_372 = arith.constant 3 : index
    %c0_373 = arith.constant 0 : index
    %c0_374 = arith.constant 0 : index
    %750 = vector.load %arg7[%c3_372, %c0_373, %c0_374] : memref<4x4x1xf32, #tpu.memory_space<vmem>>, vector<1x4x1xf32>
    %751 = vector.shape_cast %750 : vector<1x4x1xf32> to vector<4x1xf32>
    %752 = vector.shape_cast %751 : vector<4x1xf32> to vector<1x4x1xf32>
    %753 = vector.broadcast %752 : vector<1x4x1xf32> to vector<24x4x24xf32>
    %754 = arith.addf %749, %753 : vector<24x4x24xf32>
    %cst_375 = arith.constant 0.000000e+00 : f32
    %755 = vector.broadcast %cst_375 : f32 to vector<24x4x24xf32>
    %756 = arith.cmpf ogt, %754, %755 : vector<24x4x24xf32>
    %cst_376 = arith.constant 2.000000e-01 : f32
    %757 = vector.broadcast %cst_376 : f32 to vector<24x4x24xf32>
    %758 = arith.mulf %757, %754 : vector<24x4x24xf32>
    %759 = arith.select %756, %754, %758 : vector<24x4x24xi1>, vector<24x4x24xf32>
    %c0_377 = arith.constant 0 : index
    %c0_378 = arith.constant 0 : index
    %c15_379 = arith.constant 15 : index
    %c0_380 = arith.constant 0 : index
    %760 = vector.load %arg12[%c0_377, %c0_378, %c15_379, %c0_380] : memref<1x24x19x24xf32, #tpu.memory_space<vmem>>, vector<1x24x4x24xf32>
    %761 = vector.shape_cast %760 : vector<1x24x4x24xf32> to vector<24x4x24xf32>
    %762 = vector.shape_cast %759 : vector<24x4x24xf32> to vector<1x24x4x24xf32>
    tpu.vector_store %arg12[%c0_377, %c0_378, %c15_379, %c0_380], %762 {strides = array<i32>} : memref<1x24x19x24xf32, #tpu.memory_space<vmem>>, vector<1x24x4x24xf32>,
    return
  }
  func.func @transform_0(%arg0: i32) -> (i32, i32, i32, i32) {
    %c0_i32 = arith.constant 0 : i32
    %c0_i32_0 = arith.constant 0 : i32
    %c0_i32_1 = arith.constant 0 : i32
    %c0_i32_2 = arith.constant 0 : i32
    return %arg0, %c0_i32, %c0_i32_0, %c0_i32_1 : i32, i32, i32, i32
  }
  func.func @transform_1(%arg0: i32) -> (i32, i32) {
    %c0_i32 = arith.constant 0 : i32
    %c0_i32_0 = arith.constant 0 : i32
    %c0_i32_1 = arith.constant 0 : i32
    return %c0_i32, %c0_i32_0 : i32, i32
  }
  func.func @transform_2(%arg0: i32) -> (i32, i32) {
    %c0_i32 = arith.constant 0 : i32
    %c0_i32_0 = arith.constant 0 : i32
    %c0_i32_1 = arith.constant 0 : i32
    return %c0_i32, %c0_i32_0 : i32, i32
  }
  func.func @transform_3(%arg0: i32) -> (i32, i32) {
    %c0_i32 = arith.constant 0 : i32
    %c0_i32_0 = arith.constant 0 : i32
    %c0_i32_1 = arith.constant 0 : i32
    return %c0_i32, %c0_i32_0 : i32, i32
  }
  func.func @transform_4(%arg0: i32) -> (i32, i32) {
    %c0_i32 = arith.constant 0 : i32
    %c0_i32_0 = arith.constant 0 : i32
    %c0_i32_1 = arith.constant 0 : i32
    return %c0_i32, %c0_i32_0 : i32, i32
  }
  func.func @transform_5(%arg0: i32) -> (i32, i32, i32) {
    %c0_i32 = arith.constant 0 : i32
    %c0_i32_0 = arith.constant 0 : i32
    %c0_i32_1 = arith.constant 0 : i32
    %c0_i32_2 = arith.constant 0 : i32
    return %c0_i32, %c0_i32_0, %c0_i32_1 : i32, i32, i32
  }
  func.func @transform_6(%arg0: i32) -> (i32, i32, i32) {
    %c0_i32 = arith.constant 0 : i32
    %c0_i32_0 = arith.constant 0 : i32
    %c0_i32_1 = arith.constant 0 : i32
    %c0_i32_2 = arith.constant 0 : i32
    return %c0_i32, %c0_i32_0, %c0_i32_1 : i32, i32, i32
  }
  func.func @transform_7(%arg0: i32) -> (i32, i32) {
    %c0_i32 = arith.constant 0 : i32
    %c0_i32_0 = arith.constant 0 : i32
    %c0_i32_1 = arith.constant 0 : i32
    return %c0_i32, %c0_i32_0 : i32, i32
  }
  func.func @transform_8(%arg0: i32) -> (i32, i32) {
    %c0_i32 = arith.constant 0 : i32
    %c0_i32_0 = arith.constant 0 : i32
    %c0_i32_1 = arith.constant 0 : i32
    return %c0_i32, %c0_i32_0 : i32, i32
  }
  func.func @transform_9(%arg0: i32) -> (i32, i32) {
    %c0_i32 = arith.constant 0 : i32
    %c0_i32_0 = arith.constant 0 : i32
    %c0_i32_1 = arith.constant 0 : i32
    return %c0_i32, %c0_i32_0 : i32, i32
  }
  func.func @transform_10(%arg0: i32) -> (i32, i32) {
    %c0_i32 = arith.constant 0 : i32
    %c0_i32_0 = arith.constant 0 : i32
    %c0_i32_1 = arith.constant 0 : i32
    return %c0_i32, %c0_i32_0 : i32, i32
  }
  func.func @transform_11(%arg0: i32) -> (i32, i32, i32, i32) {
    %c0_i32 = arith.constant 0 : i32
    %c0_i32_0 = arith.constant 0 : i32
    %c0_i32_1 = arith.constant 0 : i32
    %c0_i32_2 = arith.constant 0 : i32
    return %arg0, %c0_i32, %c0_i32_0, %c0_i32_1 : i32, i32, i32, i32
  }
}

</mosaic_0001>

<bundles_post_ra>
// kernel: tpu_custom_call.1
= control target key start
LH: loop header
LB: loop body
LE: loop exit
PB: predicated region body
PF: predicated region fallthrough
CT: control target
= control target key end

     0   :  { %s20117_s17 = smov 0   ;;  %s24828_s0 = inlined_call_operand.vmem [shape: f32[2,24,3,24], index: 0, kind: input, shape index: {}]   ;;  %s24829_s1 = inlined_call_operand.vmem [shape: f32[36,3], index: 1, kind: input, shape index: {}]   ;;  %s24830_s2 = inlined_call_operand.vmem [shape: f32[36,7], index: 2, kind: input, shape index: {}]   ;;  %s24831_s3 = inlined_call_operand.vmem [shape: f32[36,11], index: 3, kind: input, shape index: {}]   ;;  %s24832_s4 = inlined_call_operand.vmem [shape: f32[36,15], index: 4, kind: input, shape index: {}]   ;;  %s24833_s5 = inlined_call_operand.vmem [shape: f32[4,4,1], index: 5, kind: input, shape index: {}]   ;;  %s24834_s6 = inlined_call_operand.vmem [shape: f32[4,4,1], index: 6, kind: input, shape index: {}]   ;;  %s24835_s7 = inlined_call_operand.vmem [shape: f32[24,12], index: 7, kind: input, shape index: {}]   ;;  %s24836_s8 = inlined_call_operand.vmem [shape: f32[12,24], index: 8, kind: input, shape index: {}]   ;;  %s24837_s9 = inlined_call_operand.vmem [shape: f32[24,6], index: 9, kind: input, shape index: {}]   ;;  %s24838_s10 = inlined_call_operand.vmem [shape: f32[6,24], index: 10, kind: input, shape index: {}]   ;;  %s24839_s11 = inlined_call_operand.vmem [shape: f32[2,24,19,24], index: 11, kind: output, shape index: {}]  }
   0x1 LB: > { %s16369_s18 = sadd.s32 4294967295, %s20047_s17   ;;  %p16373_p0 = scmp.ge.s32.totalorder %s20047_s17, 1  ;;  %s20047_s17 = sphi %s20117_s17, %s21_s17  }
   0x2   : > { %p337_p1 = scmp.lt.s32.totalorder %s20047_s17, 3 }
   0x4   : > { %p338_p2 = pnand %p16373_p0, %p337_p1 }
   0x6   : > { %341 = sbr.rel (%p338_p2) target bundleno = 3292 (0xcdc), region = 64 }
   0xd   : > { %vm387_vm0 = vcmask 211968   ;;  %v24842_v0 = vmov 0.0   ;;  %vm20050_vm1 = vmmov 0   ;;  %p377_p3 = scmp.lt.s32.totalorder %s16369_s18, 1  ;;  %vm716_vm2 = vcmask 1042432   ;;  %v20190_v1 = vld [vmem:[%s24829_s1] sm:$0xff] }
   0xe   : > { %17724 = vmatprep.subr.mxu0 %v24842_v0  ;;  %388 = vst.msk [vmem:[#allocation2] sm:$0xff] %vm387_vm0, %v24842_v0  ;;  %391 = vst.msk [vmem:[#allocation2 + $0x10] sm:$0xff] %vm387_vm0, %v24842_v0  ;;  %17726 = vmatprep.mubr.msk.f32.mxu0 %vm20050_vm1, %v24842_v0  ;;  %vm498_vm3 = vcmask 190464   ;;  %vm700_vm4 = vcmask 23552   ;;  %v20208_v5 = vld [vmem:[%s24829_s1 + $0x8] sm:$0xff]  ;;  %v20256_v16 = vld [vmem:[%s24829_s1 + $0x10] sm:$0xff] }
   0xf   : > { %393 = vst.msk [vmem:[#allocation2 + $0x20] sm:$0xff] %vm387_vm0, %v24842_v0  ;;  %395 = vst.msk [vmem:[#allocation2 + $0x30] sm:$0xff] %vm387_vm0, %v24842_v0  ;;  %17741 = vmatprep.subr.mxu1 %v24842_v0  ;;  %17743 = vmatprep.mubr.msk.f32.mxu1 %vm20050_vm1, %v24842_v0  ;;  %s24885_s18 = smov (!%p377_p3, %s16369_s18), 1  ;;  %s20051_s14 = smov 1   ;;  %v20271_v21 = vld [vmem:[%s24829_s1 + $0x18] sm:$0xff]  ;;  %v20052_v46 = vmov 0  }
  0x10   : > { %397 = vst.msk [vmem:[#allocation2 + $0x40] sm:$0xff] %vm387_vm0, %v24842_v0  ;;  %399 = vst.msk [vmem:[#allocation2 + $0x50] sm:$0xff] %vm387_vm0, %v24842_v0  ;;  %s20008_s19 = smul.u32 96, %s24885_s18  ;;  %v20287_v25 = vld [vmem:[%s24829_s1 + $0x20] sm:$0xf]  ;;  %20026 = vset.pattern.permute.xlu1 %v20052_v46  ;;  %20027 = vset.pattern.permute.xlu0 %v20052_v46  ;;  %vm644_vm5 = vcmask 198664  }
  0x11   : > { %401 = vst.msk [vmem:[#allocation2 + $0x60] sm:$0xff] %vm387_vm0, %v24842_v0  ;;  %403 = vst.msk [vmem:[#allocation2 + $0x70] sm:$0xff] %vm387_vm0, %v24842_v0  ;;  %s20009_s20 = smul.u32 576, %s24885_s18  ;;  %v3991_v51 = vld [vmem:[%s24833_s5] sm:$0xf]  ;;  %s20053_s24 = smov 127  }
  0x12   : > { %405 = vst.msk [vmem:[#allocation2 + $0x80] sm:$0xff] %vm387_vm0, %v24842_v0  ;;  %407 = vst.msk [vmem:[#allocation2 + $0x90] sm:$0xff] %vm387_vm0, %v24842_v0  ;;  %s20195_s25 = scalar_lea.vmem %s24828_s0, %s20008_s19  ;;  %v4021_v53 = vld [vmem:[%s24834_s6] sm:$0xf]  ;;  %vm4123_vm6 = vcmask 191488   ;;  %vm4175_vm8 = vcmask 195584  }
  0x13   : > { %409 = vst.msk [vmem:[#allocation2 + $0xa0] sm:$0xff] %vm387_vm0, %v24842_v0  ;;  %411 = vst.msk [vmem:[#allocation2 + $0xb0] sm:$0xff] %vm387_vm0, %v24842_v0  ;;  %s20200_s28 = scalar_lea.vmem %s24839_s11, %s20009_s20  ;;  %v474_v3 = vld [vmem:[%s20195_s25] sm:$0x7]  ;;  %v475_v4 = vld [vmem:[%s20195_s25 + $0x4] sm:$0x7] }
  0x14   : > { %413 = vst.msk [vmem:[#allocation2 + $0xc0] sm:$0xff] %vm387_vm0, %v24842_v0  ;;  %415 = vst.msk [vmem:[#allocation2 + $0xd0] sm:$0xff] %vm387_vm0, %v24842_v0  ;;  %v476_v6 = vld [vmem:[%s20195_s25 + $0x8] sm:$0x7]  ;;  %v477_v7 = vld [vmem:[%s20195_s25 + $0xc] sm:$0x7] }
  0x15   : > { %417 = vst.msk [vmem:[#allocation2 + $0xe0] sm:$0xff] %vm387_vm0, %v24842_v0  ;;  %419 = vst.msk [vmem:[#allocation2 + $0xf0] sm:$0xff] %vm387_vm0, %v24842_v0  ;;  %v669_v2 = vld [vmem:[#allocation2] sm:$0x7]  ;;  %v478_v8 = vld [vmem:[%s20195_s25 + $0x10] sm:$0x7] }
  0x16   : > { %421 = vst.msk [vmem:[#allocation2 + $0x100] sm:$0xff] %vm387_vm0, %v24842_v0  ;;  %423 = vst.msk [vmem:[#allocation2 + $0x110] sm:$0xff] %vm387_vm0, %v24842_v0  ;;  %17725 = vmatpush3.msk.msra.mxu0 %vm716_vm2, %v669_v2  ;;  %v479_v9 = vld [vmem:[%s20195_s25 + $0x14] sm:$0x7]  ;;  %v480_v10 = vld [vmem:[%s20195_s25 + $0x18] sm:$0x7] }
  0x17   : > { %425 = vst.msk [vmem:[#allocation2 + $0x120] sm:$0xff] %vm387_vm0, %v24842_v0  ;;  %427 = vst.msk [vmem:[#allocation2 + $0x130] sm:$0xff] %vm387_vm0, %v24842_v0  ;;  %17727 = vmatmul.mubr.msk.f32.vlgmr.msra.gmra.mrb[0].mxu0 %vm700_vm4, %v20190_v1  ;;  %v481_v11 = vld [vmem:[%s20195_s25 + $0x1c] sm:$0x7]  ;;  %17758 = vmatprep.subr.mxu0 %v24842_v0  ;;  %v482_v12 = vld [vmem:[%s20195_s25 + $0x20] sm:$0x7] }
  0x18   : > { %429 = vst.msk [vmem:[#allocation2 + $0x140] sm:$0xff] %vm387_vm0, %v24842_v0  ;;  %431 = vst.msk [vmem:[#allocation2 + $0x150] sm:$0xff] %vm387_vm0, %v24842_v0  ;;  %17729 = vmatprep.mubr.msk.f32.mxu0 %vm20050_vm1, %v24842_v0  ;;  %v483_v13 = vld [vmem:[%s20195_s25 + $0x24] sm:$0x7]  ;;  %v484_v14 = vld [vmem:[%s20195_s25 + $0x28] sm:$0x7] }
  0x19   : > { %433 = vst.msk [vmem:[#allocation2 + $0x160] sm:$0xff] %vm387_vm0, %v24842_v0  ;;  %435 = vst.msk [vmem:[#allocation2 + $0x170] sm:$0xff] %vm387_vm0, %v24842_v0  ;;  %v485_v15 = vld [vmem:[%s20195_s25 + $0x2c] sm:$0x7]  ;;  %v486_v22 = vld [vmem:[%s20195_s25 + $0x30] sm:$0x7] }
  0x1a   : > { %437 = vst.msk [vmem:[#allocation2 + $0x180] sm:$0xff] %vm387_vm0, %v24842_v0  ;;  %439 = vst.msk [vmem:[#allocation2 + $0x190] sm:$0xff] %vm387_vm0, %v24842_v0  ;;  %v487_v26 = vld [vmem:[%s20195_s25 + $0x34] sm:$0x7]  ;;  %v488_v35 = vld [vmem:[%s20195_s25 + $0x38] sm:$0x7] }
  0x1b   : > { %499 = vst.msk [vmem:[%s20200_s28] sm:$0x7] %vm498_vm3, %v474_v3  ;;  %500 = vst.msk [vmem:[%s20200_s28 + $0x18] sm:$0x7] %vm498_vm3, %v475_v4  ;;  %17730 = vmatmul.mubr.msk.f32.gmra.mrb[2].mxu0 %vm700_vm4, %v20208_v5  ;;  %v489_v36 = vld [vmem:[%s20195_s25 + $0x3c] sm:$0x7] }
  0x1c   : > { %501 = vst.msk [vmem:[%s20200_s28 + $0x30] sm:$0x7] %vm498_vm3, %v476_v6  ;;  %502 = vst.msk [vmem:[%s20200_s28 + $0x48] sm:$0x7] %vm498_vm3, %v477_v7  ;;  %17732 = vmatprep.mubr.msk.f32.mxu0 %vm20050_vm1, %v24842_v0  ;;  %v491_v37 = vld [vmem:[%s20195_s25 + $0x44] sm:$0x7] }
  0x1d   : > { %503 = vst.msk [vmem:[%s20200_s28 + $0x60] sm:$0x7] %vm498_vm3, %v478_v8  ;;  %504 = vst.msk [vmem:[%s20200_s28 + $0x78] sm:$0x7] %vm498_vm3, %v479_v9  ;;  %v493_v40 = vld [vmem:[%s20195_s25 + $0x4c] sm:$0x7] }
  0x1e   : > { %505 = vst.msk [vmem:[%s20200_s28 + $0x90] sm:$0x7] %vm498_vm3, %v480_v10  ;;  %506 = vst.msk [vmem:[%s20200_s28 + $0xa8] sm:$0x7] %vm498_vm3, %v481_v11  ;;  %v495_v42 = vld [vmem:[%s20195_s25 + $0x54] sm:$0x7] }
  0x1f   : > { %507 = vst.msk [vmem:[%s20200_s28 + $0xc0] sm:$0x7] %vm498_vm3, %v482_v12  ;;  %508 = vst.msk [vmem:[%s20200_s28 + $0xd8] sm:$0x7] %vm498_vm3, %v483_v13  ;;  %17733 = vmatmul.mubr.msk.f32.gmra.mrb[4].mxu0 %vm700_vm4, %v20256_v16  ;;  %v497_v44 = vld [vmem:[%s20195_s25 + $0x5c] sm:$0x7] }
  0x20   : > { %509 = vst.msk [vmem:[%s20200_s28 + $0xf0] sm:$0x7] %vm498_vm3, %v484_v14  ;;  %510 = vst.msk [vmem:[%s20200_s28 + $0x108] sm:$0x7] %vm498_vm3, %v485_v15  ;;  %17735 = vmatprep.mubr.msk.f32.mxu0 %vm20050_vm1, %v24842_v0  ;;  %v490_v45 = vld [vmem:[%s20195_s25 + $0x40] sm:$0x7] }
  0x21   : > { %511 = vst.msk [vmem:[%s20200_s28 + $0x120] sm:$0x7] %vm498_vm3, %v486_v22  ;;  %512 = vst.msk [vmem:[%s20200_s28 + $0x138] sm:$0x7] %vm498_vm3, %v487_v26  ;;  %v492_v50 = vld [vmem:[%s20195_s25 + $0x48] sm:$0x7] }
  0x22   : > { %v523_v17 = vld [vmem:[%s20200_s28] sm:$0x7]  ;;  %v524_v19 = vld [vmem:[%s20200_s28 + $0x18] sm:$0x7]  ;;  %513 = vst.msk [vmem:[%s20200_s28 + $0x150] sm:$0x7] %vm498_vm3, %v488_v35 }
  0x23   : > { %571 = vrot.lane.b32.xlu0 %v523_v17, %s20051_s14  ;;  %v525_v18 = vld [vmem:[%s20200_s28 + $0x30] sm:$0x7]  ;;  %v526_v20 = vld [vmem:[%s20200_s28 + $0x48] sm:$0x7]  ;;  %17736 = vmatmul.mubr.msk.f32.gmra.mrb[6].mxu0 %vm700_vm4, %v20271_v21  ;;  %514 = vst.msk [vmem:[%s20200_s28 + $0x168] sm:$0x7] %vm498_vm3, %v489_v36 }
  0x24   : > { %575 = vrot.lane.b32.xlu1 %v525_v18, %s20051_s14  ;;  %v527_v23 = vld [vmem:[%s20200_s28 + $0x60] sm:$0x7]  ;;  %v528_v24 = vld [vmem:[%s20200_s28 + $0x78] sm:$0x7]  ;;  %17738 = vmatprep.mubr.msk.f32.mxu0 %vm20050_vm1, %v24842_v0  ;;  %516 = vst.msk [vmem:[%s20200_s28 + $0x198] sm:$0x7] %vm498_vm3, %v491_v37 }
  0x25   : > { %v529_v27 = vld [vmem:[%s20200_s28 + $0x90] sm:$0x7]  ;;  %v530_v28 = vld [vmem:[%s20200_s28 + $0xa8] sm:$0x7]  ;;  %518 = vst.msk [vmem:[%s20200_s28 + $0x1c8] sm:$0x7] %vm498_vm3, %v493_v40 }
  0x26   : > { %v531_v29 = vld [vmem:[%s20200_s28 + $0xc0] sm:$0x7]  ;;  %v532_v30 = vld [vmem:[%s20200_s28 + $0xd8] sm:$0x7]  ;;  %520 = vst.msk [vmem:[%s20200_s28 + $0x1f8] sm:$0x7] %vm498_vm3, %v495_v42 }
  0x27   : > { %573 = vrot.lane.b32.xlu0 %v524_v19, %s20051_s14  ;;  %17739 = vmatmul.mubr.msk.f32.gmra.mrb[8].mxu0 %vm700_vm4, %v20287_v25  ;;  %v533_v31 = vld [vmem:[%s20200_s28 + $0xf0] sm:$0x7]  ;;  %v534_v32 = vld [vmem:[%s20200_s28 + $0x108] sm:$0x7]  ;;  %522 = vst.msk [vmem:[%s20200_s28 + $0x228] sm:$0x7] %vm498_vm3, %v497_v44 }
  0x28   : > { %577 = vrot.lane.b32.xlu1 %v526_v20, %s20051_s14  ;;  %17760 = vmatprep.mubr.msk.f32.mxu0 %vm20050_vm1, %v24842_v0  ;;  %v535_v33 = vld [vmem:[%s20200_s28 + $0x120] sm:$0x7]  ;;  %v536_v34 = vld [vmem:[%s20200_s28 + $0x138] sm:$0x7]  ;;  %515 = vst.msk [vmem:[%s20200_s28 + $0x180] sm:$0x7] %vm498_vm3, %v490_v45 }
  0x29   : > { %v537_v38 = vld [vmem:[%s20200_s28 + $0x150] sm:$0x7]  ;;  %517 = vst.msk [vmem:[%s20200_s28 + $0x1b0] sm:$0x7] %vm498_vm3, %v492_v50  ;;  %v496_v55 = vld [vmem:[%s20195_s25 + $0x58] sm:$0x7] }
  0x2a   : > { %v538_v39 = vld [vmem:[%s20200_s28 + $0x168] sm:$0x7]  ;;  %v494_v52 = vld [vmem:[%s20195_s25 + $0x50] sm:$0x7]  ;;  %521 = vst.msk [vmem:[%s20200_s28 + $0x210] sm:$0x7] %vm498_vm3, %v496_v55 }
  0x2b   : > { %579 = vrot.lane.b32.xlu0 %v527_v23, %s20051_s14  ;;  %v540_v41 = vld [vmem:[%s20200_s28 + $0x198] sm:$0x7]  ;;  %519 = vst.msk [vmem:[%s20200_s28 + $0x1e0] sm:$0x7] %vm498_vm3, %v494_v52  ;;  %s20054_s25 = smov 126  }
  0x2c   : > { %581 = vrot.lane.b32.xlu1 %v528_v24, %s20051_s14  ;;  %v542_v43 = vld [vmem:[%s20200_s28 + $0x1c8] sm:$0x7] }
  0x2d   : > { %v544_v47 = vld [vmem:[%s20200_s28 + $0x1f8] sm:$0x7] }
  0x2e   : > { %v546_v48 = vld [vmem:[%s20200_s28 + $0x228] sm:$0x7] }
  0x2f   : > { %583 = vrot.lane.b32.xlu0 %v529_v27, %s20051_s14  ;;  %v539_v49 = vld [vmem:[%s20200_s28 + $0x180] sm:$0x7] }
  0x30   : > { %585 = vrot.lane.b32.xlu1 %v530_v28, %s20051_s14  ;;  %v541_v54 = vld [vmem:[%s20200_s28 + $0x1b0] sm:$0x7] }
  0x31   : > { %v545_v57 = vld [vmem:[%s20200_s28 + $0x210] sm:$0x7] }
  0x32   : > { %v543_v56 = vld [vmem:[%s20200_s28 + $0x1e0] sm:$0x7] }
  0x33   : > { %587 = vrot.lane.b32.xlu0 %v531_v29, %s20051_s14 }
  0x34   : > { %589 = vrot.lane.b32.xlu1 %v532_v30, %s20051_s14 }
  0x37   : > { %591 = vrot.lane.b32.xlu0 %v533_v31, %s20051_s14 }
  0x38   : > { %593 = vrot.lane.b32.xlu1 %v534_v32, %s20051_s14 }
  0x3b   : > { %595 = vrot.lane.b32.xlu0 %v535_v33, %s20051_s14 }
  0x3c   : > { %597 = vrot.lane.b32.xlu1 %v536_v34, %s20051_s14 }
  0x3f   : > { %599 = vrot.lane.b32.xlu0 %v537_v38, %s20051_s14 }
  0x40   : > { %601 = vrot.lane.b32.xlu1 %v538_v39, %s20051_s14 }
  0x43   : > { %603 = vrot.lane.b32.xlu0 %v539_v49, %s20051_s14 }
  0x44   : > { %605 = vrot.lane.b32.xlu1 %v540_v41, %s20051_s14 }
  0x47   : > { %607 = vrot.lane.b32.xlu0 %v541_v54, %s20051_s14 }
  0x48   : > { %609 = vrot.lane.b32.xlu1 %v542_v43, %s20051_s14 }
  0x4b   : > { %611 = vrot.lane.b32.xlu0 %v543_v56, %s20051_s14 }
  0x4c   : > { %613 = vrot.lane.b32.xlu1 %v544_v47, %s20051_s14 }
  0x4f   : > { %615 = vrot.lane.b32.xlu0 %v545_v57, %s20051_s14 }
  0x50   : > { %617 = vrot.lane.b32.xlu1 %v546_v48, %s20051_s14 }
  0x54   : > { %3994 = vperm.xlu1 %20026, %v3991_v51  }
  0x58   : > { %4024 = vperm.xlu1 %20026, %v4021_v53  }
  0x95   : > { %v572_v58 = vpop.permute.xlu0 %571 }
  0x96   : > { %645 = vst.msk [vmem:[#allocation2 + $0x10] sm:$0x7] %vm644_vm5, %v572_v58  ;;  %v576_v59 = vpop.permute.xlu1 %575 }
  0x97   : > { %647 = vst.msk [vmem:[#allocation2 + $0x30] sm:$0x7] %vm644_vm5, %v576_v59 }
  0x99   : > { %v574_v60 = vpop.permute.xlu0 %573 }
  0x9a   : > { %646 = vst.msk [vmem:[#allocation2 + $0x20] sm:$0x7] %vm644_vm5, %v574_v60  ;;  %v578_v61 = vpop.permute.xlu1 %577 }
  0x9b   : > { %648 = vst.msk [vmem:[#allocation2 + $0x40] sm:$0x7] %vm644_vm5, %v578_v61 }
  0x9d   : > { %v670_v62 = vld [vmem:[#allocation2 + $0x10] sm:$0x7]  ;;  %v580_v63 = vpop.permute.xlu0 %579 }
  0x9e   : > { %17742 = vmatpush3.msk.msra.mxu1 %vm716_vm2, %v670_v62  ;;  %v672_v2 = vld [vmem:[#allocation2 + $0x30] sm:$0x7]  ;;  %649 = vst.msk [vmem:[#allocation2 + $0x50] sm:$0x7] %vm644_vm5, %v580_v63  ;;  %v582_v3 = vpop.permute.xlu1 %581 }
  0x9f   : > { %17744 = vmatmul.mubr.msk.f32.vlgmr.msra.gmra.mrb[0].mxu1 %vm700_vm4, %v20190_v1  ;;  %17775 = vmatprep.subr.mxu1 %v24842_v0  ;;  %650 = vst.msk [vmem:[#allocation2 + $0x60] sm:$0x7] %vm644_vm5, %v582_v3 }
  0xa0   : > { %17746 = vmatprep.mubr.msk.f32.mxu1 %vm20050_vm1, %v24842_v0  ;;  %17776 = vmatpush3.msk.msra.mxu1 %vm716_vm2, %v672_v2 }
  0xa1   : > { %v671_v4 = vld [vmem:[#allocation2 + $0x20] sm:$0x7]  ;;  %17809 = vmatprep.subr.mxu1 %v24842_v0  ;;  %v584_v6 = vpop.permute.xlu0 %583 }
  0xa2   : > { %17759 = vmatpush3.msk.msra.mxu0 %vm716_vm2, %v671_v4  ;;  %651 = vst.msk [vmem:[#allocation2 + $0x70] sm:$0x7] %vm644_vm5, %v584_v6  ;;  %v586_v7 = vpop.permute.xlu1 %585  ;;  %v673_v8 = vld [vmem:[#allocation2 + $0x40] sm:$0x7] }
  0xa3   : > { %17747 = vmatmul.mubr.msk.f32.gmra.mrb[2].mxu1 %vm700_vm4, %v20208_v5  ;;  %17761 = vmatmul.mubr.msk.f32.vlgmr.msra.gmra.mrb[10].mxu0 %vm700_vm4, %v20190_v1  ;;  %652 = vst.msk [vmem:[#allocation2 + $0x80] sm:$0x7] %vm644_vm5, %v586_v7 }
  0xa4   : > { %17763 = vmatprep.mubr.msk.f32.mxu0 %vm20050_vm1, %v24842_v0  ;;  %17749 = vmatprep.mubr.msk.f32.mxu1 %vm20050_vm1, %v24842_v0 }
  0xa5   : > { %17792 = vmatprep.subr.mxu0 %v24842_v0  ;;  %v588_v9 = vpop.permute.xlu0 %587  ;;  %v674_v15 = vld [vmem:[#allocation2 + $0x50] sm:$0x7] }
  0xa6   : > { %17793 = vmatpush3.msk.msra.mxu0 %vm716_vm2, %v673_v8  ;;  %653 = vst.msk [vmem:[#allocation2 + $0x90] sm:$0x7] %vm644_vm5, %v588_v9  ;;  %v590_v10 = vpop.permute.xlu1 %589  ;;  %v675_v17 = vld [vmem:[#allocation2 + $0x60] sm:$0x7] }
  0xa7   : > { %17764 = vmatmul.mubr.msk.f32.gmra.mrb[12].mxu0 %vm700_vm4, %v20208_v5  ;;  %17750 = vmatmul.mubr.msk.f32.gmra.mrb[4].mxu1 %vm700_vm4, %v20256_v16  ;;  %654 = vst.msk [vmem:[#allocation2 + $0xa0] sm:$0x7] %vm644_vm5, %v590_v10 }
  0xa8   : > { %17766 = vmatprep.mubr.msk.f32.mxu0 %vm20050_vm1, %v24842_v0  ;;  %17752 = vmatprep.mubr.msk.f32.mxu1 %vm20050_vm1, %v24842_v0 }
  0xa9   : > { %17826 = vmatprep.subr.mxu0 %v24842_v0  ;;  %v592_v11 = vpop.permute.xlu0 %591  ;;  %v676_v22 = vld [vmem:[#allocation2 + $0x70] sm:$0x7] }
  0xaa   : > { %655 = vst.msk [vmem:[#allocation2 + $0xb0] sm:$0x7] %vm644_vm5, %v592_v11  ;;  %v594_v12 = vpop.permute.xlu1 %593  ;;  %v677_v24 = vld [vmem:[#allocation2 + $0x80] sm:$0x7] }
  0xab   : > { %17767 = vmatmul.mubr.msk.f32.gmra.mrb[14].mxu0 %vm700_vm4, %v20256_v16  ;;  %17753 = vmatmul.mubr.msk.f32.gmra.mrb[6].mxu1 %vm700_vm4, %v20271_v21  ;;  %656 = vst.msk [vmem:[#allocation2 + $0xc0] sm:$0x7] %vm644_vm5, %v594_v12 }
  0xac   : > { %17769 = vmatprep.mubr.msk.f32.mxu0 %vm20050_vm1, %v24842_v0  ;;  %17755 = vmatprep.mubr.msk.f32.mxu1 %vm20050_vm1, %v24842_v0 }
  0xad   : > { %v596_v13 = vpop.permute.xlu0 %595  ;;  %v678_v30 = vld [vmem:[#allocation2 + $0x90] sm:$0x7] }
  0xae   : > { %657 = vst.msk [vmem:[#allocation2 + $0xd0] sm:$0x7] %vm644_vm5, %v596_v13  ;;  %v598_v14 = vpop.permute.xlu1 %597  ;;  %v679_v32 = vld [vmem:[#allocation2 + $0xa0] sm:$0x7] }
  0xaf   : > { %17770 = vmatmul.mubr.msk.f32.gmra.mrb[16].mxu0 %vm700_vm4, %v20271_v21  ;;  %17756 = vmatmul.mubr.msk.f32.gmra.mrb[8].mxu1 %vm700_vm4, %v20287_v25  ;;  %658 = vst.msk [vmem:[#allocation2 + $0xe0] sm:$0x7] %vm644_vm5, %v598_v14 }
  0xb0   : > { %17772 = vmatprep.mubr.msk.f32.mxu0 %vm20050_vm1, %v24842_v0  ;;  %17777 = vmatprep.mubr.msk.f32.mxu1 %vm20050_vm1, %v24842_v0 }
  0xb1   : > { %v600_v18 = vpop.permute.xlu0 %599  ;;  %v680_v34 = vld [vmem:[#allocation2 + $0xb0] sm:$0x7] }
  0xb2   : > { %659 = vst.msk [vmem:[#allocation2 + $0xf0] sm:$0x7] %vm644_vm5, %v600_v18  ;;  %v602_v19 = vpop.permute.xlu1 %601  ;;  %v681_v38 = vld [vmem:[#allocation2 + $0xc0] sm:$0x7] }
  0xb3   : > { %17773 = vmatmul.mubr.msk.f32.gmra.mrb[18].mxu0 %vm700_vm4, %v20287_v25  ;;  %17778 = vmatmul.mubr.msk.f32.vlgmr.msra.gmra.mrb[10].mxu1 %vm700_vm4, %v20190_v1  ;;  %660 = vst.msk [vmem:[#allocation2 + $0x100] sm:$0x7] %vm644_vm5, %v602_v19 }
  0xb4   : > { %17794 = vmatprep.mubr.msk.f32.mxu0 %vm20050_vm1, %v24842_v0  ;;  %17780 = vmatprep.mubr.msk.f32.mxu1 %vm20050_vm1, %v24842_v0 }
  0xb5   : > { %17810 = vmatpush3.msk.msra.mxu1 %vm716_vm2, %v674_v15  ;;  %v604_v28 = vpop.permute.xlu0 %603  ;;  %v682_v47 = vld [vmem:[#allocation2 + $0xd0] sm:$0x7] }
  0xb6   : > { %17843 = vmatprep.subr.mxu1 %v24842_v0  ;;  %v606_v20 = vpop.permute.xlu1 %605  ;;  %661 = vst.msk [vmem:[#allocation2 + $0x110] sm:$0x7] %vm644_vm5, %v604_v28  ;;  %v683_v48 = vld [vmem:[#allocation2 + $0xe0] sm:$0x7] }
  0xb7   : > { %17795 = vmatmul.mubr.msk.f32.vlgmr.msra.gmra.mrb[20].mxu0 %vm700_vm4, %v20190_v1  ;;  %17781 = vmatmul.mubr.msk.f32.gmra.mrb[12].mxu1 %vm700_vm4, %v20208_v5  ;;  %662 = vst.msk [vmem:[#allocation2 + $0x120] sm:$0x7] %vm644_vm5, %v606_v20 }
  0xb8   : > { %17797 = vmatprep.mubr.msk.f32.mxu0 %vm20050_vm1, %v24842_v0  ;;  %17783 = vmatprep.mubr.msk.f32.mxu1 %vm20050_vm1, %v24842_v0 }
  0xb9   : > { %17827 = vmatpush3.msk.msra.mxu0 %vm716_vm2, %v675_v17  ;;  %v608_v29 = vpop.permute.xlu0 %607  ;;  %v684_v49 = vld [vmem:[#allocation2 + $0xf0] sm:$0x7] }
  0xba   : > { %17860 = vmatprep.subr.mxu0 %v24842_v0  ;;  %v610_v23 = vpop.permute.xlu1 %609  ;;  %663 = vst.msk [vmem:[#allocation2 + $0x130] sm:$0x7] %vm644_vm5, %v608_v29  ;;  %v685_v50 = vld [vmem:[#allocation2 + $0x100] sm:$0x7]  ;;  %v694_v17 = vld [vmem:[#allocation2 + $0x190] sm:$0x7] }
  0xbb   : > { %17798 = vmatmul.mubr.msk.f32.gmra.mrb[22].mxu0 %vm700_vm4, %v20208_v5  ;;  %17784 = vmatmul.mubr.msk.f32.gmra.mrb[14].mxu1 %vm700_vm4, %v20256_v16  ;;  %664 = vst.msk [vmem:[#allocation2 + $0x140] sm:$0x7] %vm644_vm5, %v610_v23 }
  0xbc   : > { %17800 = vmatprep.mubr.msk.f32.mxu0 %vm20050_vm1, %v24842_v0  ;;  %17786 = vmatprep.mubr.msk.f32.mxu1 %vm20050_vm1, %v24842_v0 }
  0xbd   : > { %v612_v31 = vpop.permute.xlu0 %611  ;;  %v686_v51 = vld [vmem:[#allocation2 + $0x110] sm:$0x7] }
  0xbe   : > { %v614_v26 = vpop.permute.xlu1 %613  ;;  %665 = vst.msk [vmem:[#allocation2 + $0x150] sm:$0x7] %vm644_vm5, %v612_v31  ;;  %v687_v52 = vld [vmem:[#allocation2 + $0x120] sm:$0x7]  ;;  %v20029_v31 = vld [vmem:[%s24829_s1 + $0x8] sm:$0xff] }
  0xbf   : > { %17801 = vmatmul.mubr.msk.f32.gmra.mrb[24].mxu0 %vm700_vm4, %v20256_v16  ;;  %17787 = vmatmul.mubr.msk.f32.gmra.mrb[16].mxu1 %vm700_vm4, %v20271_v21  ;;  %666 = vst.msk [vmem:[#allocation2 + $0x160] sm:$0x7] %vm644_vm5, %v614_v26  ;;  %v20028_v26 = vld [vmem:[%s24829_s1] sm:$0xff] }
  0xc0   : > { %17803 = vmatprep.mubr.msk.f32.mxu0 %vm20050_vm1, %v24842_v0  ;;  %17789 = vmatprep.mubr.msk.f32.mxu1 %vm20050_vm1, %v24842_v0 }
  0xc1   : > { %v616_v33 = vpop.permute.xlu0 %615  ;;  %v688_v53 = vld [vmem:[#allocation2 + $0x130] sm:$0x7] }
  0xc2   : > { %v618_v27 = vpop.permute.xlu1 %617  ;;  %667 = vst.msk [vmem:[#allocation2 + $0x170] sm:$0x7] %vm644_vm5, %v616_v33  ;;  %v689_v54 = vld [vmem:[#allocation2 + $0x140] sm:$0x7] }
  0xc3   : > { %17804 = vmatmul.mubr.msk.f32.gmra.mrb[26].mxu0 %vm700_vm4, %v20271_v21  ;;  %17790 = vmatmul.mubr.msk.f32.gmra.mrb[18].mxu1 %vm700_vm4, %v20287_v25  ;;  %668 = vst.msk [vmem:[#allocation2 + $0x180] sm:$0x7] %vm644_vm5, %v618_v27 }
  0xc4   : > { %17806 = vmatprep.mubr.msk.f32.mxu0 %vm20050_vm1, %v24842_v0  ;;  %17811 = vmatprep.mubr.msk.f32.mxu1 %vm20050_vm1, %v24842_v0 }
  0xc5   : > { %v690_v55 = vld [vmem:[#allocation2 + $0x150] sm:$0x7] }
  0xc6   : > { %v691_v56 = vld [vmem:[#allocation2 + $0x160] sm:$0x7] }
  0xc7   : > { %17807 = vmatmul.mubr.msk.f32.gmra.mrb[28].mxu0 %vm700_vm4, %v20287_v25  ;;  %17812 = vmatmul.mubr.msk.f32.vlgmr.msra.gmra.mrb[20].mxu1 %vm700_vm4, %v20190_v1 }
  0xc8   : > { %17828 = vmatprep.mubr.msk.f32.mxu0 %vm20050_vm1, %v24842_v0  ;;  %17814 = vmatprep.mubr.msk.f32.mxu1 %vm20050_vm1, %v24842_v0 }
  0xc9   : > { %17844 = vmatpush3.msk.msra.mxu1 %vm716_vm2, %v676_v22  ;;  %v692_v57 = vld [vmem:[#allocation2 + $0x170] sm:$0x7] }
  0xca   : > { %17877 = vmatprep.subr.mxu1 %v24842_v0  ;;  %v693_v59 = vld [vmem:[#allocation2 + $0x180] sm:$0x7] }
  0xcb   : > { %17829 = vmatmul.mubr.msk.f32.vlgmr.msra.gmra.mrb[30].mxu0 %vm700_vm4, %v20190_v1  ;;  %17815 = vmatmul.mubr.msk.f32.gmra.mrb[22].mxu1 %vm700_vm4, %v20208_v5 }
  0xcc   : > { %17831 = vmatprep.mubr.msk.f32.mxu0 %vm20050_vm1, %v24842_v0  ;;  %17817 = vmatprep.mubr.msk.f32.mxu1 %vm20050_vm1, %v24842_v0 }
  0xcd   : > { %17861 = vmatpush3.msk.msra.mxu0 %vm716_vm2, %v677_v24 }
  0xce   : > { %17894 = vmatprep.subr.mxu0 %v24842_v0 }
  0xcf   : > { %17832 = vmatmul.mubr.msk.f32.gmra.mrb[32].mxu0 %vm700_vm4, %v20208_v5  ;;  %17818 = vmatmul.mubr.msk.f32.gmra.mrb[24].mxu1 %vm700_vm4, %v20256_v16 }
  0xd0   : > { %17834 = vmatprep.mubr.msk.f32.mxu0 %vm20050_vm1, %v24842_v0  ;;  %17820 = vmatprep.mubr.msk.f32.mxu1 %vm20050_vm1, %v24842_v0 }
  0xd3   : > { %17835 = vmatmul.mubr.msk.f32.gmra.mrb[34].mxu0 %vm700_vm4, %v20256_v16  ;;  %17821 = vmatmul.mubr.msk.f32.gmra.mrb[26].mxu1 %vm700_vm4, %v20271_v21  ;;  %v20843_v58 = vpop.permute.xlu1 %3994 }
  0xd4   : > { %17837 = vmatprep.mubr.msk.f32.mxu0 %vm20050_vm1, %v24842_v0  ;;  %17823 = vmatprep.mubr.msk.f32.mxu1 %vm20050_vm1, %v24842_v0 }
  0xd7   : > { %17838 = vmatmul.mubr.msk.f32.gmra.mrb[36].mxu0 %vm700_vm4, %v20271_v21  ;;  %17824 = vmatmul.mubr.msk.f32.gmra.mrb[28].mxu1 %vm700_vm4, %v20287_v25  ;;  %v20860_v60 = vpop.permute.xlu1 %4024 }
  0xd8   : > { %17840 = vmatprep.mubr.msk.f32.mxu0 %vm20050_vm1, %v24842_v0  ;;  %17845 = vmatprep.mubr.msk.f32.mxu1 %vm20050_vm1, %v24842_v0 }
  0xdb   : > { %17841 = vmatmul.mubr.msk.f32.gmra.mrb[38].mxu0 %vm700_vm4, %v20287_v25  ;;  %17846 = vmatmul.mubr.msk.f32.vlgmr.msra.gmra.mrb[30].mxu1 %vm700_vm4, %v20190_v1 }
  0xdc   : > { %17862 = vmatprep.mubr.msk.f32.mxu0 %vm20050_vm1, %v24842_v0  ;;  %17848 = vmatprep.mubr.msk.f32.mxu1 %vm20050_vm1, %v24842_v0 }
  0xdd   : > { %17878 = vmatpush3.msk.msra.mxu1 %vm716_vm2, %v678_v30 }
  0xde   : > { %17911 = vmatprep.subr.mxu1 %v24842_v0 }
  0xdf   : > { %17863 = vmatmul.mubr.msk.f32.vlgmr.msra.gmra.mrb[40].mxu0 %vm700_vm4, %v20190_v1  ;;  %17849 = vmatmul.mubr.msk.f32.gmra.mrb[32].mxu1 %vm700_vm4, %v20208_v5 }
  0xe0   : > { %17865 = vmatprep.mubr.msk.f32.mxu0 %vm20050_vm1, %v24842_v0  ;;  %17851 = vmatprep.mubr.msk.f32.mxu1 %vm20050_vm1, %v24842_v0 }
  0xe1   : > { %17895 = vmatpush3.msk.msra.mxu0 %vm716_vm2, %v679_v32 }
  0xe2   : > { %17928 = vmatprep.subr.mxu0 %v24842_v0 }
  0xe3   : > { %17866 = vmatmul.mubr.msk.f32.gmra.mrb[42].mxu0 %vm700_vm4, %v20208_v5  ;;  %17852 = vmatmul.mubr.msk.f32.gmra.mrb[34].mxu1 %vm700_vm4, %v20256_v16 }
  0xe4   : > { %17868 = vmatprep.mubr.msk.f32.mxu0 %vm20050_vm1, %v24842_v0  ;;  %17854 = vmatprep.mubr.msk.f32.mxu1 %vm20050_vm1, %v24842_v0 }
  0xe7   : > { %17869 = vmatmul.mubr.msk.f32.gmra.mrb[44].mxu0 %vm700_vm4, %v20256_v16  ;;  %17855 = vmatmul.mubr.msk.f32.gmra.mrb[36].mxu1 %vm700_vm4, %v20271_v21 }
  0xe8   : > { %17871 = vmatprep.mubr.msk.f32.mxu0 %vm20050_vm1, %v24842_v0  ;;  %17857 = vmatprep.mubr.msk.f32.mxu1 %vm20050_vm1, %v24842_v0 }
  0xea   : > { %v20570_v35 = vpop.f32.mrb[0].mxu0 }
  0xeb   : > { %17872 = vmatmul.mubr.msk.f32.gmra.mrb[46].mxu0 %vm700_vm4, %v20271_v21  ;;  %17858 = vmatmul.mubr.msk.f32.gmra.mrb[38].mxu1 %vm700_vm4, %v20287_v25  ;;  %v17728_v36 = vpop.f32.mrb[1].mxu0  ;;  %v3150_v37 = vrot.slane %v20570_v35, 4 }
  0xec   : > { %17874 = vmatprep.mubr.msk.f32.mxu0 %vm20050_vm1, %v24842_v0  ;;  %17879 = vmatprep.mubr.msk.f32.mxu1 %vm20050_vm1, %v24842_v0 }
  0xed   : > { %3174 = vrot.lane.b32.xlu0 %v3150_v37, %s20053_s24 }
  0xee   : > { %v791_v39 = vpop.f32.mrb[2].mxu0 }
  0xef   : > { %17875 = vmatmul.mubr.msk.f32.gmra.mrb[48].mxu0 %vm700_vm4, %v20287_v25  ;;  %17880 = vmatmul.mubr.msk.f32.vlgmr.msra.gmra.mrb[40].mxu1 %vm700_vm4, %v20190_v1  ;;  %v17731_v40 = vpop.f32.mrb[3].mxu0 }
  0xf0   : > { %17896 = vmatprep.mubr.msk.f32.mxu0 %vm20050_vm1, %v24842_v0  ;;  %17882 = vmatprep.mubr.msk.f32.mxu1 %vm20050_vm1, %v24842_v0 }
  0xf1   : > { %17912 = vmatpush3.msk.msra.mxu1 %vm716_vm2, %v680_v34  ;;  %3294 = vrot.lane.b32.xlu1 %v791_v39, %s20054_s25 }
  0xf2   : > { %17945 = vmatprep.subr.mxu1 %v24842_v0  ;;  %v796_v41 = vpop.f32.mrb[4].mxu0 }
  0xf3   : > { %17897 = vmatmul.mubr.msk.f32.vlgmr.msra.gmra.mrb[50].mxu0 %vm700_vm4, %v20190_v1  ;;  %17883 = vmatmul.mubr.msk.f32.gmra.mrb[42].mxu1 %vm700_vm4, %v20208_v5  ;;  %v17734_v42 = vpop.f32.mrb[5].mxu0 }
  0xf4   : > { %17899 = vmatprep.mubr.msk.f32.mxu0 %vm20050_vm1, %v24842_v0  ;;  %17885 = vmatprep.mubr.msk.f32.mxu1 %vm20050_vm1, %v24842_v0  ;;  %v4173_v42 = vld [vmem:[%s24835_s7 + $0x8] sm:$0xff] }
  0xf5   : > { %17929 = vmatpush3.msk.msra.mxu0 %vm716_vm2, %v681_v38 }
  0xf6   : > { %17962 = vmatprep.subr.mxu0 %v24842_v0  ;;  %v800_v43 = vpop.f32.mrb[6].mxu0 }
  0xf7   : > { %17900 = vmatmul.mubr.msk.f32.gmra.mrb[52].mxu0 %vm700_vm4, %v20208_v5  ;;  %17886 = vmatmul.mubr.msk.f32.gmra.mrb[44].mxu1 %vm700_vm4, %v20256_v16  ;;  %v17737_v44 = vpop.f32.mrb[7].mxu0 }
  0xf8   : > { %17902 = vmatprep.mubr.msk.f32.mxu0 %vm20050_vm1, %v24842_v0  ;;  %17888 = vmatprep.mubr.msk.f32.mxu1 %vm20050_vm1, %v24842_v0 }
  0xfa   : > { %v804_v45 = vpop.f32.mrb[8].mxu0 }
  0xfb   : > { %17903 = vmatmul.mubr.msk.f32.gmra.mrb[54].mxu0 %vm700_vm4, %v20256_v16  ;;  %17889 = vmatmul.mubr.msk.f32.gmra.mrb[46].mxu1 %vm700_vm4, %v20271_v21  ;;  %v17740_v46 = vpop.f32.mrb[9].mxu0 }
  0xfc   : > { %17905 = vmatprep.mubr.msk.f32.mxu0 %vm20050_vm1, %v24842_v0  ;;  %17891 = vmatprep.mubr.msk.f32.mxu1 %vm20050_vm1, %v24842_v0 }
  0xff   : > { %17906 = vmatmul.mubr.msk.f32.gmra.mrb[56].mxu0 %vm700_vm4, %v20271_v21  ;;  %17892 = vmatmul.mubr.msk.f32.gmra.mrb[48].mxu1 %vm700_vm4, %v20287_v25 }
 0x100   : > { %17908 = vmatprep.mubr.msk.f32.mxu0 %vm20050_vm1, %v24842_v0  ;;  %17913 = vmatprep.mubr.msk.f32.mxu1 %vm20050_vm1, %v24842_v0 }
 0x103   : > { %17909 = vmatmul.mubr.msk.f32.gmra.mrb[58].mxu0 %vm700_vm4, %v20287_v25  ;;  %17914 = vmatmul.mubr.msk.f32.vlgmr.msra.gmra.mrb[50].mxu1 %vm700_vm4, %v20190_v1 }
 0x104   : > { %17930 = vmatprep.mubr.msk.f32.mxu0 %vm20050_vm1, %v24842_v0  ;;  %17916 = vmatprep.mubr.msk.f32.mxu1 %vm20050_vm1, %v24842_v0 }
 0x105   : > { %17946 = vmatpush3.msk.msra.mxu1 %vm716_vm2, %v682_v47  ;;  %v24840_v47 = vmov 0.0|0.0  }
 0x106   : > { %17979 = vmatprep.subr.mxu1 %v24842_v0 }
 0x107   : > { %17931 = vmatmul.mubr.msk.f32.vlgmr.msra.gmra.mrb[60].mxu0 %vm700_vm4, %v20190_v1  ;;  %17917 = vmatmul.mubr.msk.f32.gmra.mrb[52].mxu1 %vm700_vm4, %v20208_v5 }
 0x108   : > { %17933 = vmatprep.mubr.msk.f32.mxu0 %vm20050_vm1, %v24842_v0  ;;  %17919 = vmatprep.mubr.msk.f32.mxu1 %vm20050_vm1, %v24842_v0 }
 0x109   : > { %17963 = vmatpush3.msk.msra.mxu0 %vm716_vm2, %v683_v48 }
 0x10a   : > { %17996 = vmatprep.subr.mxu0 %v24842_v0 }
 0x10b   : > { %17934 = vmatmul.mubr.msk.f32.gmra.mrb[62].mxu0 %vm700_vm4, %v20208_v5  ;;  %17920 = vmatmul.mubr.msk.f32.gmra.mrb[54].mxu1 %vm700_vm4, %v20256_v16 }
 0x10c   : > { %17936 = vmatprep.mubr.msk.f32.mxu0 %vm20050_vm1, %v24842_v0  ;;  %17922 = vmatprep.mubr.msk.f32.mxu1 %vm20050_vm1, %v24842_v0 }
 0x10f   : > { %17937 = vmatmul.mubr.msk.f32.gmra.mrb[64].mxu0 %vm700_vm4, %v20256_v16  ;;  %17923 = vmatmul.mubr.msk.f32.gmra.mrb[56].mxu1 %vm700_vm4, %v20271_v21 }
 0x110   : > { %17925 = vmatprep.mubr.msk.f32.mxu1 %vm20050_vm1, %v24842_v0  ;;  %17939 = vmatprep.mubr.msk.f32.mxu0 %vm20050_vm1, %v24842_v0 }
 0x113   : > { %17926 = vmatmul.mubr.msk.f32.gmra.mrb[58].mxu1 %vm700_vm4, %v20287_v25  ;;  %17940 = vmatmul.mubr.msk.f32.gmra.mrb[66].mxu0 %vm700_vm4, %v20271_v21 }
 0x114   : > { %17942 = vmatprep.mubr.msk.f32.mxu0 %vm20050_vm1, %v24842_v0  ;;  %17947 = vmatprep.mubr.msk.f32.mxu1 %vm20050_vm1, %v24842_v0 }
 0x117   : > { %17943 = vmatmul.mubr.msk.f32.gmra.mrb[68].mxu0 %vm700_vm4, %v20287_v25  ;;  %17948 = vmatmul.mubr.msk.f32.vlgmr.msra.gmra.mrb[60].mxu1 %vm700_vm4, %v20190_v1 }
 0x118   : > { %17950 = vmatprep.mubr.msk.f32.mxu1 %vm20050_vm1, %v24842_v0  ;;  %17964 = vmatprep.mubr.msk.f32.mxu0 %vm20050_vm1, %v24842_v0 }
 0x119   : > { %17980 = vmatpush3.msk.msra.mxu1 %vm716_vm2, %v684_v49 }
 0x11a   : > { %18013 = vmatprep.subr.mxu1 %v24842_v0 }
 0x11b   : > { %17951 = vmatmul.mubr.msk.f32.gmra.mrb[62].mxu1 %vm700_vm4, %v20208_v5  ;;  %17965 = vmatmul.mubr.msk.f32.vlgmr.msra.gmra.mrb[70].mxu0 %vm700_vm4, %v20190_v1 }
 0x11c   : > { %17953 = vmatprep.mubr.msk.f32.mxu1 %vm20050_vm1, %v24842_v0  ;;  %17967 = vmatprep.mubr.msk.f32.mxu0 %vm20050_vm1, %v24842_v0 }
 0x11d   : > { %17997 = vmatpush3.msk.msra.mxu0 %vm716_vm2, %v685_v50 }
 0x11e   : > { %18030 = vmatprep.subr.mxu0 %v24842_v0 }
 0x11f   : > { %17954 = vmatmul.mubr.msk.f32.gmra.mrb[64].mxu1 %vm700_vm4, %v20256_v16  ;;  %17968 = vmatmul.mubr.msk.f32.gmra.mrb[72].mxu0 %vm700_vm4, %v20208_v5 }
 0x120   : > { %17970 = vmatprep.mubr.msk.f32.mxu0 %vm20050_vm1, %v24842_v0  ;;  %17956 = vmatprep.mubr.msk.f32.mxu1 %vm20050_vm1, %v24842_v0 }
 0x123   : > { %17971 = vmatmul.mubr.msk.f32.gmra.mrb[74].mxu0 %vm700_vm4, %v20256_v16  ;;  %17957 = vmatmul.mubr.msk.f32.gmra.mrb[66].mxu1 %vm700_vm4, %v20271_v21 }
 0x124   : > { %17973 = vmatprep.mubr.msk.f32.mxu0 %vm20050_vm1, %v24842_v0  ;;  %17959 = vmatprep.mubr.msk.f32.mxu1 %vm20050_vm1, %v24842_v0 }
 0x127   : > { %17974 = vmatmul.mubr.msk.f32.gmra.mrb[76].mxu0 %vm700_vm4, %v20271_v21  ;;  %17960 = vmatmul.mubr.msk.f32.gmra.mrb[68].mxu1 %vm700_vm4, %v20287_v25 }
 0x128   : > { %17981 = vmatprep.mubr.msk.f32.mxu1 %vm20050_vm1, %v24842_v0  ;;  %17976 = vmatprep.mubr.msk.f32.mxu0 %vm20050_vm1, %v24842_v0 }
 0x12b   : > { %17982 = vmatmul.mubr.msk.f32.vlgmr.msra.gmra.mrb[70].mxu1 %vm700_vm4, %v20190_v1  ;;  %17977 = vmatmul.mubr.msk.f32.gmra.mrb[78].mxu0 %vm700_vm4, %v20287_v25 }
 0x12c   : > { %17984 = vmatprep.mubr.msk.f32.mxu1 %vm20050_vm1, %v24842_v0  ;;  %17998 = vmatprep.mubr.msk.f32.mxu0 %vm20050_vm1, %v24842_v0 }
 0x12d   : > { %18014 = vmatpush3.msk.msra.mxu1 %vm716_vm2, %v686_v51  ;;  %v20992_v51 = vld [vmem:[%s24835_s7 + $0x10] sm:$0xff] }
 0x12e   : > { %18047 = vmatprep.subr.mxu1 %v24842_v0 }
 0x12f   : > { %17985 = vmatmul.mubr.msk.f32.gmra.mrb[72].mxu1 %vm700_vm4, %v20208_v5  ;;  %17999 = vmatmul.mubr.msk.f32.vlgmr.msra.gmra.mrb[80].mxu0 %vm700_vm4, %v20190_v1 }
 0x130   : > { %17987 = vmatprep.mubr.msk.f32.mxu1 %vm20050_vm1, %v24842_v0  ;;  %18001 = vmatprep.mubr.msk.f32.mxu0 %vm20050_vm1, %v24842_v0 }
 0x131   : > { %18031 = vmatpush3.msk.msra.mxu0 %vm716_vm2, %v687_v52 }
 0x132   : > { %18064 = vmatprep.subr.mxu0 %v24842_v0 }
 0x133   : > { %17988 = vmatmul.mubr.msk.f32.gmra.mrb[74].mxu1 %vm700_vm4, %v20256_v16  ;;  %18002 = vmatmul.mubr.msk.f32.gmra.mrb[82].mxu0 %vm700_vm4, %v20208_v5 }
 0x134   : > { %17990 = vmatprep.mubr.msk.f32.mxu1 %vm20050_vm1, %v24842_v0  ;;  %18004 = vmatprep.mubr.msk.f32.mxu0 %vm20050_vm1, %v24842_v0 }
 0x137   : > { %17991 = vmatmul.mubr.msk.f32.gmra.mrb[76].mxu1 %vm700_vm4, %v20271_v21  ;;  %18005 = vmatmul.mubr.msk.f32.gmra.mrb[84].mxu0 %vm700_vm4, %v20256_v16 }
 0x138   : > { %18007 = vmatprep.mubr.msk.f32.mxu0 %vm20050_vm1, %v24842_v0  ;;  %17993 = vmatprep.mubr.msk.f32.mxu1 %vm20050_vm1, %v24842_v0 }
 0x13b   : > { %18008 = vmatmul.mubr.msk.f32.gmra.mrb[86].mxu0 %vm700_vm4, %v20271_v21  ;;  %17994 = vmatmul.mubr.msk.f32.gmra.mrb[78].mxu1 %vm700_vm4, %v20287_v25 }
 0x13c   : > { %18010 = vmatprep.mubr.msk.f32.mxu0 %vm20050_vm1, %v24842_v0  ;;  %18015 = vmatprep.mubr.msk.f32.mxu1 %vm20050_vm1, %v24842_v0 }
 0x13f   : > { %18011 = vmatmul.mubr.msk.f32.gmra.mrb[88].mxu0 %vm700_vm4, %v20287_v25  ;;  %18016 = vmatmul.mubr.msk.f32.vlgmr.msra.gmra.mrb[80].mxu1 %vm700_vm4, %v20190_v1 }
 0x140   : > { %18018 = vmatprep.mubr.msk.f32.mxu1 %vm20050_vm1, %v24842_v0  ;;  %18032 = vmatprep.mubr.msk.f32.mxu0 %vm20050_vm1, %v24842_v0 }
 0x141   : > { %18048 = vmatpush3.msk.msra.mxu1 %vm716_vm2, %v688_v53 }
 0x142   : > { %18081 = vmatprep.subr.mxu1 %v24842_v0 }
 0x143   : > { %18019 = vmatmul.mubr.msk.f32.gmra.mrb[82].mxu1 %vm700_vm4, %v20208_v5  ;;  %18033 = vmatmul.mubr.msk.f32.vlgmr.msra.gmra.mrb[90].mxu0 %vm700_vm4, %v20190_v1 }
 0x144   : > { %18021 = vmatprep.mubr.msk.f32.mxu1 %vm20050_vm1, %v24842_v0  ;;  %18035 = vmatprep.mubr.msk.f32.mxu0 %vm20050_vm1, %v24842_v0 }
 0x145   : > { %18065 = vmatpush3.msk.msra.mxu0 %vm716_vm2, %v689_v54 }
 0x146   : > { %18098 = vmatprep.subr.mxu0 %v24842_v0 }
 0x147   : > { %18022 = vmatmul.mubr.msk.f32.gmra.mrb[84].mxu1 %vm700_vm4, %v20256_v16  ;;  %18036 = vmatmul.mubr.msk.f32.gmra.mrb[92].mxu0 %vm700_vm4, %v20208_v5 }
 0x148   : > { %18024 = vmatprep.mubr.msk.f32.mxu1 %vm20050_vm1, %v24842_v0  ;;  %18038 = vmatprep.mubr.msk.f32.mxu0 %vm20050_vm1, %v24842_v0 }
 0x14b   : > { %18025 = vmatmul.mubr.msk.f32.gmra.mrb[86].mxu1 %vm700_vm4, %v20271_v21  ;;  %18039 = vmatmul.mubr.msk.f32.gmra.mrb[94].mxu0 %vm700_vm4, %v20256_v16 }
 0x14c   : > { %18027 = vmatprep.mubr.msk.f32.mxu1 %vm20050_vm1, %v24842_v0  ;;  %18041 = vmatprep.mubr.msk.f32.mxu0 %vm20050_vm1, %v24842_v0 }
 0x14f   : > { %18028 = vmatmul.mubr.msk.f32.gmra.mrb[88].mxu1 %vm700_vm4, %v20287_v25  ;;  %18042 = vmatmul.mubr.msk.f32.gmra.mrb[96].mxu0 %vm700_vm4, %v20271_v21 }
 0x150   : > { %18049 = vmatprep.mubr.msk.f32.mxu1 %vm20050_vm1, %v24842_v0  ;;  %18044 = vmatprep.mubr.msk.f32.mxu0 %vm20050_vm1, %v24842_v0 }
 0x153   : > { %18050 = vmatmul.mubr.msk.f32.vlgmr.msra.gmra.mrb[90].mxu1 %vm700_vm4, %v20190_v1  ;;  %18045 = vmatmul.mubr.msk.f32.gmra.mrb[98].mxu0 %vm700_vm4, %v20287_v25 }
 0x154   : > { %18052 = vmatprep.mubr.msk.f32.mxu1 %vm20050_vm1, %v24842_v0  ;;  %18066 = vmatprep.mubr.msk.f32.mxu0 %vm20050_vm1, %v24842_v0 }
 0x155   : > { %18082 = vmatpush3.msk.msra.mxu1 %vm716_vm2, %v690_v55 }
 0x156   : > { %18115 = vmatprep.subr.mxu1 %v24842_v0 }
 0x157   : > { %18053 = vmatmul.mubr.msk.f32.gmra.mrb[92].mxu1 %vm700_vm4, %v20208_v5  ;;  %18067 = vmatmul.mubr.msk.f32.vlgmr.msra.gmra.mrb[100].mxu0 %vm700_vm4, %v20190_v1 }
 0x158   : > { %18055 = vmatprep.mubr.msk.f32.mxu1 %vm20050_vm1, %v24842_v0  ;;  %18069 = vmatprep.mubr.msk.f32.mxu0 %vm20050_vm1, %v24842_v0 }
 0x159   : > { %18099 = vmatpush3.msk.msra.mxu0 %vm716_vm2, %v691_v56 }
 0x15a   : > { %18132 = vmatprep.subr.mxu0 %v24842_v0 }
 0x15b   : > { %18056 = vmatmul.mubr.msk.f32.gmra.mrb[94].mxu1 %vm700_vm4, %v20256_v16  ;;  %18070 = vmatmul.mubr.msk.f32.gmra.mrb[102].mxu0 %vm700_vm4, %v20208_v5 }
 0x15c   : > { %18058 = vmatprep.mubr.msk.f32.mxu1 %vm20050_vm1, %v24842_v0  ;;  %18072 = vmatprep.mubr.msk.f32.mxu0 %vm20050_vm1, %v24842_v0 }
 0x15f   : > { %18059 = vmatmul.mubr.msk.f32.gmra.mrb[96].mxu1 %vm700_vm4, %v20271_v21  ;;  %18073 = vmatmul.mubr.msk.f32.gmra.mrb[104].mxu0 %vm700_vm4, %v20256_v16  ;;  %v3175_v61 = vpop.permute.xlu0 %3174 }
 0x160   : > { %18061 = vmatprep.mubr.msk.f32.mxu1 %vm20050_vm1, %v24842_v0  ;;  %18075 = vmatprep.mubr.msk.f32.mxu0 %vm20050_vm1, %v24842_v0  ;;  %v3246_v63 = vadd.f32 %v3175_v61, %v20570_v35 }
 0x163   : > { %18062 = vmatmul.mubr.msk.f32.gmra.mrb[98].mxu1 %vm700_vm4, %v20287_v25  ;;  %18076 = vmatmul.mubr.msk.f32.gmra.mrb[106].mxu0 %vm700_vm4, %v20271_v21  ;;  %v3295_v4 = vpop.permute.xlu1 %3294 }
 0x164   : > { %18083 = vmatprep.mubr.msk.f32.mxu1 %vm20050_vm1, %v24842_v0  ;;  %18078 = vmatprep.mubr.msk.f32.mxu0 %vm20050_vm1, %v24842_v0  ;;  %v3366_v8 = vadd.f32 %v3295_v4, %v3246_v63 }
 0x167   : > { %18084 = vmatmul.mubr.msk.f32.vlgmr.msra.gmra.mrb[100].mxu1 %vm700_vm4, %v20190_v1  ;;  %18079 = vmatmul.mubr.msk.f32.gmra.mrb[108].mxu0 %vm700_vm4, %v20287_v25 }
 0x168   : > { %18086 = vmatprep.mubr.msk.f32.mxu1 %vm20050_vm1, %v24842_v0  ;;  %18100 = vmatprep.mubr.msk.f32.mxu0 %vm20050_vm1, %v24842_v0 }
 0x169   : > { %18116 = vmatpush3.msk.msra.mxu1 %vm716_vm2, %v692_v57 }
 0x16a   : > { %18149 = vmatprep.subr.mxu1 %v24842_v0 }
 0x16b   : > { %18087 = vmatmul.mubr.msk.f32.gmra.mrb[102].mxu1 %vm700_vm4, %v20208_v5  ;;  %18101 = vmatmul.mubr.msk.f32.vlgmr.msra.gmra.mrb[110].mxu0 %vm700_vm4, %v20190_v1 }
 0x16c   : > { %18089 = vmatprep.mubr.msk.f32.mxu1 %vm20050_vm1, %v24842_v0  ;;  %18103 = vmatprep.mubr.msk.f32.mxu0 %vm20050_vm1, %v24842_v0 }
 0x16d   : > { %18133 = vmatpush3.msk.msra.mxu0 %vm716_vm2, %v693_v59  ;;  %v20030_v59 = vld [vmem:[%s24829_s1 + $0x10] sm:$0xff] }
 0x16e   : > { %19596 = vmatprep.subr.bf16.mxu0 %v24840_v47 }
 0x16f   : > { %18090 = vmatmul.mubr.msk.f32.gmra.mrb[104].mxu1 %vm700_vm4, %v20256_v16  ;;  %18104 = vmatmul.mubr.msk.f32.gmra.mrb[112].mxu0 %vm700_vm4, %v20208_v5 }
 0x170   : > { %18092 = vmatprep.mubr.msk.f32.mxu1 %vm20050_vm1, %v24842_v0  ;;  %18106 = vmatprep.mubr.msk.f32.mxu0 %vm20050_vm1, %v24842_v0 }
 0x172   : > { %v20870_v62 = vpop.f32.mrb[0].mxu1 }
 0x173   : > { %v3151_v2 = vrot.slane %v20870_v62, 4  ;;  %v17745_v3 = vpop.f32.mrb[1].mxu1  ;;  %18093 = vmatmul.mubr.msk.f32.gmra.mrb[106].mxu1 %vm700_vm4, %v20271_v21  ;;  %18107 = vmatmul.mubr.msk.f32.gmra.mrb[114].mxu0 %vm700_vm4, %v20256_v16 }
 0x174   : > { %18095 = vmatprep.mubr.msk.f32.mxu1 %vm20050_vm1, %v24842_v0  ;;  %18109 = vmatprep.mubr.msk.f32.mxu0 %vm20050_vm1, %v24842_v0 }
 0x175   : > { %3176 = vrot.lane.b32.xlu1 %v3151_v2, %s20053_s24 }
 0x176   : > { %v881_v6 = vpop.f32.mrb[2].mxu1  ;;  %v20883_v7 = vpop.f32.mrb[10].mxu0 }
 0x177   : > { %v17762_v9 = vpop.f32.mrb[11].mxu0  ;;  %v3152_v10 = vrot.slane %v20883_v7, 4  ;;  %v17748_v11 = vpop.f32.mrb[3].mxu1  ;;  %18096 = vmatmul.mubr.msk.f32.gmra.mrb[108].mxu1 %vm700_vm4, %v20287_v25  ;;  %18110 = vmatmul.mubr.msk.f32.gmra.mrb[116].mxu0 %vm700_vm4, %v20271_v21  ;;  %v3391_v12 = vrot.slane %v881_v6, 4 }
 0x178   : > { %18117 = vmatprep.mubr.msk.f32.mxu1 %vm20050_vm1, %v24842_v0  ;;  %18112 = vmatprep.mubr.msk.f32.mxu0 %vm20050_vm1, %v24842_v0 }
 0x179   : > { %3178 = vrot.lane.b32.xlu0 %v3152_v10, %s20053_s24  ;;  %v20895_v13 = vadd.f32 %v3391_v12, %v3366_v8  ;;  %v20031_v8 = vld [vmem:[%s24829_s1 + $0x18] sm:$0xff] }
 0x17a   : > { %v20897_v14 = vpop.f32.mrb[12].mxu0  ;;  %v886_v15 = vpop.f32.mrb[4].mxu1 }
 0x17b   : > { %v17765_v18 = vpop.f32.mrb[13].mxu0  ;;  %v17751_v19 = vpop.f32.mrb[5].mxu1  ;;  %18118 = vmatmul.mubr.msk.f32.vlgmr.msra.gmra.mrb[110].mxu1 %vm700_vm4, %v20190_v1  ;;  %18113 = vmatmul.mubr.msk.f32.gmra.mrb[118].mxu0 %vm700_vm4, %v20287_v25  ;;  %v3583_v34 = vrot.slane %v886_v15, 4 }
 0x17c   : > { %18120 = vmatprep.mubr.msk.f32.mxu1 %vm20050_vm1, %v24842_v0  ;;  %18134 = vmatprep.mubr.msk.f32.mxu0 %vm20050_vm1, %v24842_v0 }
 0x17d   : > { %3296 = vrot.lane.b32.xlu0 %v881_v6, %s20054_s25  ;;  %18150 = vmatpush3.msk.msra.mxu1 %vm716_vm2, %v694_v17  ;;  %v20032_v17 = vld [vmem:[%s24829_s1 + $0x20] sm:$0xf] }
 0x17e   : > { %v977_v20 = vpop.f32.mrb[14].mxu0  ;;  %v891_v22 = vpop.f32.mrb[6].mxu1  ;;  %19602 = vmatprep.subr.bf16.mxu1 %v24840_v47 }
 0x17f   : > { %3489 = vrot.lane.b32.xlu1 %v977_v20, %s20053_s24  ;;  %v17768_v23 = vpop.f32.mrb[15].mxu0  ;;  %v3584_v24 = vrot.slane %v977_v20, 4  ;;  %v17754_v1 = vpop.f32.mrb[7].mxu1  ;;  %18121 = vmatmul.mubr.msk.f32.gmra.mrb[112].mxu1 %vm700_vm4, %v20208_v5 }
 0x180   : > { %18123 = vmatprep.mubr.msk.f32.mxu1 %vm20050_vm1, %v24842_v0  ;;  %18135 = vmatmul.mubr.msk.f32.vlgmr.msra.gmra.mrb[120].mxu0 %vm700_vm4, %v20028_v26 }
 0x181   : > { %3298 = vrot.lane.b32.xlu0 %v20897_v14, %s20054_s25  ;;  %18137 = vmatprep.mubr.msk.f32.mxu0 %vm20050_vm1, %v24842_v0 }
 0x182   : > { %v20922_v27 = vpop.f32.mrb[16].mxu0  ;;  %v895_v28 = vpop.f32.mrb[8].mxu1 }
 0x183   : > { %3609 = vrot.lane.b32.xlu1 %v3584_v24, %s20054_s25  ;;  %v17771_v5 = vpop.f32.mrb[17].mxu0  ;;  %v17757_v29 = vpop.f32.mrb[9].mxu1  ;;  %v3751_v30 = vrot.slane %v20922_v27, 4  ;;  %18124 = vmatmul.mubr.msk.f32.gmra.mrb[114].mxu1 %vm700_vm4, %v20256_v16 }
 0x184   : > { %18126 = vmatprep.mubr.msk.f32.mxu1 %vm20050_vm1, %v24842_v0  ;;  %18138 = vmatmul.mubr.msk.f32.gmra.mrb[122].mxu0 %vm700_vm4, %v20029_v31 }
 0x185   : > { %3487 = vrot.lane.b32.xlu0 %v886_v15, %s20053_s24  ;;  %18140 = vmatprep.mubr.msk.f32.mxu0 %vm20050_vm1, %v24842_v0 }
 0x186   : > { %v20937_v32 = vpop.f32.mrb[10].mxu1  ;;  %v987_v33 = vpop.f32.mrb[18].mxu0 }
 0x187   : > { %3775 = vrot.lane.b32.xlu1 %v3751_v30, %s20053_s24  ;;  %v17774_v35 = vpop.f32.mrb[19].mxu0  ;;  %v3153_v36 = vrot.slane %v20937_v32, 4  ;;  %v17779_v37 = vpop.f32.mrb[11].mxu1  ;;  %18127 = vmatmul.mubr.msk.f32.gmra.mrb[116].mxu1 %vm700_vm4, %v20271_v21 }
 0x188   : > { %18129 = vmatprep.mubr.msk.f32.mxu1 %vm20050_vm1, %v24842_v0  ;;  %18141 = vmatmul.mubr.msk.f32.gmra.mrb[124].mxu0 %vm700_vm4, %v20256_v16  ;;  %v4172_v16 = vld [vmem:[%s24835_s7] sm:$0xff] }
 0x189   : > { %3607 = vrot.lane.b32.xlu0 %v3583_v34, %s20054_s25  ;;  %18143 = vmatprep.mubr.msk.f32.mxu0 %vm20050_vm1, %v24842_v0  ;;  %v20971_v44 = vpack.c.bf16 %v4173_v42, %v4172_v16 }
 0x18a   : > { %v20950_v38 = vpop.f32.mrb[20].mxu0  ;;  %v20952_v39 = vpop.f32.mrb[12].mxu1 }
 0x18b   : > { %3180 = vrot.lane.b32.xlu1 %v3153_v36, %s20053_s24  ;;  %v17796_v40 = vpop.f32.mrb[21].mxu0  ;;  %v17782_v41 = vpop.f32.mrb[13].mxu1  ;;  %18130 = vmatmul.mubr.msk.f32.gmra.mrb[118].mxu1 %vm700_vm4, %v20287_v25  ;;  %v3154_v43 = vrot.slane %v20950_v38, 4 }
 0x18c   : > { %18151 = vmatprep.mubr.msk.f32.mxu1 %vm20050_vm1, %v24842_v0  ;;  %18144 = vmatmul.mubr.msk.f32.gmra.mrb[126].mxu0 %vm700_vm4, %v20271_v21 }
 0x18d   : > { %3895 = vrot.lane.b32.xlu0 %v987_v33, %s20054_s25  ;;  %18146 = vmatprep.mubr.msk.f32.mxu0 %vm20050_vm1, %v24842_v0 }
 0x18e   : > { %v20973_v45 = vpop.f32.mrb[22].mxu0  ;;  %v1070_v46 = vpop.f32.mrb[14].mxu1  ;;  %19598 = vmatpush3.bf16.msra.mxu0 %v20971_v44 }
 0x18f   : > { %3300 = vrot.lane.b32.xlu1 %v20952_v39, %s20054_s25  ;;  %v17799_v21 = vpop.f32.mrb[23].mxu0  ;;  %v17785_v48 = vpop.f32.mrb[15].mxu1  ;;  %18152 = vmatmul.mubr.msk.f32.vlgmr.msra.gmra.mrb[120].mxu1 %vm700_vm4, %v20028_v26  ;;  %v3585_v52 = vrot.slane %v1070_v46, 4 }
 0x190   : > { %18154 = vmatprep.mubr.msk.f32.mxu1 %vm20050_vm1, %v24842_v0  ;;  %18147 = vmatmul.mubr.msk.f32.gmra.mrb[128].mxu0 %vm700_vm4, %v20287_v25 }
 0x191   : > { %3182 = vrot.lane.b32.xlu0 %v3154_v43, %s20053_s24  ;;  %18170 = vmatprep.subr.mxu0 %v24842_v0 }
 0x192   : > { %v1163_v49 = vpop.f32.mrb[24].mxu0  ;;  %v20986_v50 = vpop.f32.mrb[16].mxu1  ;;  %18172 = vmatprep.mubr.msk.f32.mxu0 %vm20050_vm1, %v24842_v0  ;;  %19604 = vmatpush3.bf16.msra.mxu1 %v20971_v44 }
 0x193   : > { %3493 = vrot.lane.b32.xlu1 %v1163_v49, %s20053_s24  ;;  %v17802_v25 = vpop.f32.mrb[25].mxu0  ;;  %v17788_v53 = vpop.f32.mrb[17].mxu1  ;;  %18155 = vmatmul.mubr.msk.f32.gmra.mrb[122].mxu1 %vm700_vm4, %v20029_v31  ;;  %v3586_v61 = vrot.slane %v1163_v49, 4  ;;  %v3752_v63 = vrot.slane %v20986_v50, 4 }
 0x194   : > { %18157 = vmatprep.mubr.msk.f32.mxu1 %vm20050_vm1, %v24842_v0  ;;  %18171 = vmatpush3.msra.mxu0 %v20992_v51 }
 0x195   : > { %3302 = vrot.lane.b32.xlu0 %v20973_v45, %s20054_s25  ;;  %19599 = vmatprep.subr.bf16.mxu0 %v24840_v47 }
 0x196   : > { %v1080_v54 = vpop.f32.mrb[18].mxu1  ;;  %v21004_v55 = vpop.f32.mrb[26].mxu0  ;;  %18188 = vmatprep.subr.mxu1 %v24842_v0 }
 0x197   : > { %3611 = vrot.lane.b32.xlu1 %v3585_v52, %s20054_s25  ;;  %v17791_v56 = vpop.f32.mrb[19].mxu1  ;;  %v17805_v57 = vpop.f32.mrb[27].mxu0  ;;  %18158 = vmatmul.mubr.msk.f32.gmra.mrb[124].mxu1 %vm700_vm4, %v20030_v59  ;;  %v3753_v9 = vrot.slane %v21004_v55, 4 }
 0x198   : > { %18160 = vmatprep.mubr.msk.f32.mxu1 %vm20050_vm1, %v24842_v0  ;;  %18189 = vmatpush3.msra.mxu1 %v20992_v51 }
 0x199   : > { %3491 = vrot.lane.b32.xlu0 %v1070_v46, %s20053_s24  ;;  %19605 = vmatprep.subr.bf16.mxu1 %v24840_v47 }
 0x19a   : > { %v1173_v2 = vpop.f32.mrb[28].mxu0  ;;  %v21019_v3 = vpop.f32.mrb[20].mxu1 }
 0x19b   : > { %3613 = vrot.lane.b32.xlu1 %v3586_v61, %s20054_s25  ;;  %v17808_v4 = vpop.f32.mrb[29].mxu0  ;;  %v17813_v6 = vpop.f32.mrb[21].mxu1  ;;  %18161 = vmatmul.mubr.msk.f32.gmra.mrb[126].mxu1 %vm700_vm4, %v20031_v8  ;;  %v3155_v18 = vrot.slane %v21019_v3, 4 }
 0x19c   : > { %18163 = vmatprep.mubr.msk.f32.mxu1 %vm20050_vm1, %v24842_v0 }
 0x19d   : > { %3777 = vrot.lane.b32.xlu0 %v3752_v63, %s20053_s24 }
 0x19e   : > { %v21030_v10 = vpop.f32.mrb[30].mxu0  ;;  %v21032_v11 = vpop.f32.mrb[22].mxu1 }
 0x19f   : > { %3897 = vrot.lane.b32.xlu1 %v1080_v54, %s20054_s25  ;;  %v17830_v12 = vpop.f32.mrb[31].mxu0  ;;  %v17816_v15 = vpop.f32.mrb[23].mxu1  ;;  %18164 = vmatmul.mubr.msk.f32.gmra.mrb[128].mxu1 %vm700_vm4, %v20032_v17  ;;  %v3156_v24 = vrot.slane %v21030_v10, 4 }
 0x1a0   : > { %18190 = vmatprep.mubr.msk.f32.mxu1 %vm20050_vm1, %v24842_v0 }
 0x1a1   : > { %3779 = vrot.lane.b32.xlu0 %v3753_v9, %s20053_s24 }
 0x1a2   : > { %v21043_v19 = vpop.f32.mrb[32].mxu0  ;;  %v1256_v20 = vpop.f32.mrb[24].mxu1 }
 0x1a3   : > { %3899 = vrot.lane.b32.xlu1 %v1173_v2, %s20054_s25  ;;  %v17833_v22 = vpop.f32.mrb[33].mxu0  ;;  %v17819_v23 = vpop.f32.mrb[25].mxu1  ;;  %v3587_v43 = vrot.slane %v1256_v20, 4 }
 0x1a5   : > { %3184 = vrot.lane.b32.xlu0 %v3155_v18, %s20053_s24 }
 0x1a6   : > { %v1349_v1 = vpop.f32.mrb[34].mxu0  ;;  %v21048_v26 = vpop.f32.mrb[26].mxu1 }
 0x1a7   : > { %3304 = vrot.lane.b32.xlu1 %v21032_v11, %s20054_s25  ;;  %v17836_v28 = vpop.f32.mrb[35].mxu0  ;;  %v17822_v5 = vpop.f32.mrb[27].mxu1  ;;  %v3588_v31 = vrot.slane %v1349_v1, 4  ;;  %v3754_v37 = vrot.slane %v21048_v26, 4 }
 0x1a9   : > { %3186 = vrot.lane.b32.xlu0 %v3156_v24, %s20053_s24 }
 0x1aa   : > { %v21053_v29 = vpop.f32.mrb[36].mxu0  ;;  %v1266_v30 = vpop.f32.mrb[28].mxu1 }
 0x1ab   : > { %3306 = vrot.lane.b32.xlu1 %v21043_v19, %s20054_s25  ;;  %v17839_v33 = vpop.f32.mrb[37].mxu0  ;;  %v17825_v34 = vpop.f32.mrb[29].mxu1  ;;  %v3755_v48 = vrot.slane %v21053_v29, 4 }
 0x1ad   : > { %3495 = vrot.lane.b32.xlu0 %v1256_v20, %s20053_s24 }
 0x1ae   : > { %v21058_v35 = vpop.f32.mrb[30].mxu1  ;;  %v1359_v36 = vpop.f32.mrb[38].mxu0 }
 0x1af   : > { %3617 = vrot.lane.b32.xlu1 %v3588_v31, %s20054_s25  ;;  %v17842_v40 = vpop.f32.mrb[39].mxu0  ;;  %v17847_v41 = vpop.f32.mrb[31].mxu1  ;;  %v3157_v52 = vrot.slane %v21058_v35, 4 }
 0x1b1   : > { %3497 = vrot.lane.b32.xlu0 %v1349_v1, %s20053_s24 }
 0x1b2   : > { %v21063_v16 = vpop.f32.mrb[40].mxu0  ;;  %v21065_v42 = vpop.f32.mrb[32].mxu1 }
 0x1b3   : > { %3781 = vrot.lane.b32.xlu1 %v3754_v37, %s20053_s24  ;;  %v17864_v46 = vpop.f32.mrb[41].mxu0  ;;  %v17850_v21 = vpop.f32.mrb[33].mxu1  ;;  %v3158_v63 = vrot.slane %v21063_v16, 4 }
 0x1b5   : > { %3615 = vrot.lane.b32.xlu0 %v3587_v43, %s20054_s25 }
 0x1b6   : > { %v21070_v49 = vpop.f32.mrb[42].mxu0  ;;  %v1442_v25 = vpop.f32.mrb[34].mxu1 }
 0x1b7   : > { %3901 = vrot.lane.b32.xlu1 %v1266_v30, %s20054_s25  ;;  %v17867_v53 = vpop.f32.mrb[43].mxu0  ;;  %v17853_v54 = vpop.f32.mrb[35].mxu1  ;;  %v3589_v15 = vrot.slane %v1442_v25, 4 }
 0x1b9   : > { %3783 = vrot.lane.b32.xlu0 %v3755_v48, %s20053_s24 }
 0x1ba   : > { %v1535_v56 = vpop.f32.mrb[44].mxu0  ;;  %v21075_v57 = vpop.f32.mrb[36].mxu1 }
 0x1bb   : > { %3188 = vrot.lane.b32.xlu1 %v3157_v52, %s20053_s24  ;;  %v17870_v59 = vpop.f32.mrb[45].mxu0  ;;  %v17856_v61 = vpop.f32.mrb[37].mxu1  ;;  %v3590_v1 = vrot.slane %v1535_v56, 4  ;;  %v3756_v28 = vrot.slane %v21075_v57, 4 }
 0x1bd   : > { %3903 = vrot.lane.b32.xlu0 %v1359_v36, %s20054_s25 }
 0x1be   : > { %v21080_v2 = vpop.f32.mrb[46].mxu0  ;;  %v1452_v4 = vpop.f32.mrb[38].mxu1 }
 0x1bf   : > { %3308 = vrot.lane.b32.xlu1 %v21065_v42, %s20054_s25  ;;  %v17859_v6 = vpop.f32.mrb[39].mxu1  ;;  %v17873_v8 = vpop.f32.mrb[47].mxu0  ;;  %v3757_v34 = vrot.slane %v21080_v2, 4 }
 0x1c1   : > { %3190 = vrot.lane.b32.xlu0 %v3158_v63, %s20053_s24 }
 0x1c2   : > { %v1545_v9 = vpop.f32.mrb[48].mxu0  ;;  %v21085_v12 = vpop.f32.mrb[40].mxu1 }
 0x1c3   : > { %3501 = vrot.lane.b32.xlu1 %v1535_v56, %s20053_s24  ;;  %v17876_v17 = vpop.f32.mrb[49].mxu0  ;;  %v17881_v18 = vpop.f32.mrb[41].mxu1  ;;  %v3159_v43 = vrot.slane %v21085_v12, 4 }
 0x1c5   : > { %3310 = vrot.lane.b32.xlu0 %v21070_v49, %s20054_s25 }
 0x1c6   : > { %v21090_v20 = vpop.f32.mrb[50].mxu0  ;;  %v21092_v22 = vpop.f32.mrb[42].mxu1 }
 0x1c7   : > { %3619 = vrot.lane.b32.xlu1 %v3589_v15, %s20054_s25  ;;  %v17898_v23 = vpop.f32.mrb[51].mxu0  ;;  %v17884_v24 = vpop.f32.mrb[43].mxu1  ;;  %v3160_v52 = vrot.slane %v21090_v20, 4 }
 0x1c9   : > { %3499 = vrot.lane.b32.xlu0 %v1442_v25, %s20053_s24 }
 0x1ca   : > { %v21097_v5 = vpop.f32.mrb[52].mxu0  ;;  %v1628_v30 = vpop.f32.mrb[44].mxu1 }
 0x1cb   : > { %3621 = vrot.lane.b32.xlu1 %v3590_v1, %s20054_s25  ;;  %v17901_v31 = vpop.f32.mrb[53].mxu0  ;;  %v17887_v33 = vpop.f32.mrb[45].mxu1 }
 0x1cd   : > { %3785 = vrot.lane.b32.xlu0 %v3756_v28, %s20053_s24  ;;  %v3591_v28 = vrot.slane %v1628_v30, 4 }
 0x1ce   : > { %v1721_v36 = vpop.f32.mrb[54].mxu0  ;;  %v21102_v37 = vpop.f32.mrb[46].mxu1 }
 0x1cf   : > { %3905 = vrot.lane.b32.xlu1 %v1452_v4, %s20054_s25  ;;  %v17904_v40 = vpop.f32.mrb[55].mxu0  ;;  %v17890_v41 = vpop.f32.mrb[47].mxu1  ;;  %v3592_v4 = vrot.slane %v1721_v36, 4  ;;  %v3758_v17 = vrot.slane %v21102_v37, 4 }
 0x1d1   : > { %3787 = vrot.lane.b32.xlu0 %v3757_v34, %s20053_s24 }
 0x1d2   : > { %v21107_v46 = vpop.f32.mrb[56].mxu0  ;;  %v1638_v21 = vpop.f32.mrb[48].mxu1 }
 0x1d3   : > { %3907 = vrot.lane.b32.xlu1 %v1545_v9, %s20054_s25  ;;  %v17907_v48 = vpop.f32.mrb[57].mxu0  ;;  %v17893_v25 = vpop.f32.mrb[49].mxu1  ;;  %v3759_v34 = vrot.slane %v21107_v46, 4 }
 0x1d5   : > { %3192 = vrot.lane.b32.xlu0 %v3159_v43, %s20053_s24 }
 0x1d6   : > { %v21112_v53 = vpop.f32.mrb[50].mxu1  ;;  %v1731_v54 = vpop.f32.mrb[58].mxu0 }
 0x1d7   : > { %3312 = vrot.lane.b32.xlu1 %v21092_v22, %s20054_s25  ;;  %v17910_v56 = vpop.f32.mrb[59].mxu0  ;;  %v17915_v59 = vpop.f32.mrb[51].mxu1 }
 0x1d9   : > { %3194 = vrot.lane.b32.xlu0 %v3160_v52, %s20053_s24 }
 0x1da   : > { %v21117_v61 = vpop.f32.mrb[60].mxu0  ;;  %v21119_v63 = vpop.f32.mrb[52].mxu1 }
 0x1db   : > { %3314 = vrot.lane.b32.xlu1 %v21097_v5, %s20054_s25  ;;  %v17932_v6 = vpop.f32.mrb[61].mxu0  ;;  %v17918_v8 = vpop.f32.mrb[53].mxu1 }
 0x1dd   : > { %3503 = vrot.lane.b32.xlu0 %v1628_v30, %s20053_s24 }
 0x1de   : > { %v21124_v9 = vpop.f32.mrb[62].mxu0  ;;  %v21126_v15 = vpop.f32.mrb[54].mxu1 }
 0x1df   : > { %3625 = vrot.lane.b32.xlu1 %v3592_v4, %s20054_s25  ;;  %v17935_v18 = vpop.f32.mrb[63].mxu0  ;;  %v17921_v23 = vpop.f32.mrb[55].mxu1 }
 0x1e1   : > { %3505 = vrot.lane.b32.xlu0 %v1721_v36, %s20053_s24  ;;  %v3161_v36 = vrot.slane %v21112_v53, 4 }
 0x1e2   : > { %v21131_v24 = vpop.f32.mrb[64].mxu0  ;;  %v21133_v1 = vpop.f32.mrb[56].mxu1 }
 0x1e3   : > { %3789 = vrot.lane.b32.xlu1 %v3758_v17, %s20053_s24  ;;  %v17938_v31 = vpop.f32.mrb[65].mxu0  ;;  %v17924_v33 = vpop.f32.mrb[57].mxu1 }
 0x1e4   : > { %v3392_v31 = vrot.slane %v20897_v14, 4 }
 0x1e5   : > { %3623 = vrot.lane.b32.xlu0 %v3591_v28, %s20054_s25 }
 0x1e6   : > { %v21138_v40 = vpop.f32.mrb[66].mxu0  ;;  %v21140_v41 = vpop.f32.mrb[58].mxu1 }
 0x1e7   : > { %3909 = vrot.lane.b32.xlu1 %v1638_v21, %s20054_s25  ;;  %v17927_v43 = vpop.f32.mrb[59].mxu1  ;;  %v17941_v48 = vpop.f32.mrb[67].mxu0  ;;  %v3162_v21 = vrot.slane %v21117_v61, 4 }
 0x1e8   : > { %v3177_v25 = vpop.permute.xlu1 %3176 }
 0x1e9   : > { %3791 = vrot.lane.b32.xlu0 %v3759_v34, %s20053_s24  ;;  %v3247_v6 = vadd.f32 %v3177_v25, %v20870_v62  ;;  %v3593_v25 = vrot.slane %v21126_v15, 4 }
 0x1ea   : > { %v21145_v30 = vpop.f32.mrb[68].mxu0  ;;  %v21147_v52 = vpop.f32.mrb[60].mxu1 }
 0x1eb   : > { %3196 = vrot.lane.b32.xlu1 %v3161_v36, %s20053_s24  ;;  %v3179_v56 = vpop.permute.xlu0 %3178  ;;  %v17944_v59 = vpop.f32.mrb[69].mxu0 }
 0x1ec   : > { %v17949_v4 = vpop.f32.mrb[61].mxu1 }
 0x1ed   : > { %3911 = vrot.lane.b32.xlu0 %v1731_v54, %s20054_s25  ;;  %v3248_v54 = vadd.f32 %v3179_v56, %v20883_v7 }
 0x1ee   : > { %v21153_v8 = vpop.f32.mrb[70].mxu0  ;;  %v21155_v17 = vpop.f32.mrb[62].mxu1 }
 0x1ef   : > { %3316 = vrot.lane.b32.xlu1 %v21119_v63, %s20054_s25  ;;  %v3297_v18 = vpop.permute.xlu0 %3296  ;;  %v17952_v23 = vpop.f32.mrb[63].mxu1 }
 0x1f0   : > { %v3367_v28 = vadd.f32 %v3297_v18, %v3247_v6  ;;  %v17966_v33 = vpop.f32.mrb[71].mxu0  ;;  %v3393_v18 = vrot.slane %v20952_v39, 4 }
 0x1f1   : > { %v3490_v34 = vpop.permute.xlu1 %3489  ;;  %3198 = vrot.lane.b32.xlu0 %v3162_v21, %s20053_s24 }
 0x1f2   : > { %v3440_v36 = vadd.f32 %v3392_v31, %v3367_v28  ;;  %v21162_v62 = vpop.f32.mrb[72].mxu0  ;;  %v21164_v43 = vpop.f32.mrb[64].mxu1 }
 0x1f3   : > { %3509 = vrot.lane.b32.xlu1 %v21131_v24, %s20053_s24  ;;  %v3299_v48 = vpop.permute.xlu0 %3298  ;;  %v17955_v59 = vpop.f32.mrb[65].mxu1 }
 0x1f4   : > { %v3560_v4 = vadd.f32 %v3490_v34, %v3440_v36  ;;  %v3368_v14 = vadd.f32 %v3299_v48, %v3248_v54  ;;  %v17969_v6 = vpop.f32.mrb[73].mxu0  ;;  %v3594_v36 = vrot.slane %v21131_v24, 4 }
 0x1f5   : > { %v3610_v21 = vpop.permute.xlu1 %3609  ;;  %3318 = vrot.lane.b32.xlu0 %v21124_v9, %s20054_s25 }
 0x1f6   : > { %v3680_v7 = vadd.f32 %v3610_v21, %v3560_v4  ;;  %v21172_v56 = vpop.f32.mrb[74].mxu0  ;;  %v21174_v23 = vadd.f32 %v3393_v18, %v3368_v14  ;;  %v21176_v28 = vpop.f32.mrb[66].mxu1  ;;  %v3760_v14 = vrot.slane %v21133_v1, 4 }
 0x1f7   : > { %3627 = vrot.lane.b32.xlu1 %v3593_v25, %s20054_s25  ;;  %v3488_v31 = vpop.permute.xlu0 %3487  ;;  %v17972_v33 = vpop.f32.mrb[75].mxu0 }
 0x1f8   : > { %v21180_v34 = vadd.f32 %v3680_v7, %v20986_v50  ;;  %v17958_v54 = vpop.f32.mrb[67].mxu1  ;;  %v3559_v48 = vadd.f32 %v3488_v31, %v20895_v13  ;;  %v3761_v31 = vrot.slane %v21138_v40, 4 }
 0x1f9   : > { %v3776_v39 = vpop.permute.xlu1 %3775  ;;  %3507 = vrot.lane.b32.xlu0 %v21126_v15, %s20053_s24 }
 0x1fa   : > { %v21186_v59 = vpop.f32.mrb[76].mxu0  ;;  %v21188_v4 = vpop.f32.mrb[68].mxu1 }
 0x1fb   : > { %3629 = vrot.lane.b32.xlu1 %v3594_v36, %s20054_s25  ;;  %v3608_v25 = vpop.permute.xlu0 %3607  ;;  %v17975_v50 = vpop.f32.mrb[77].mxu0 }
 0x1fc   : > { %v3679_v6 = vadd.f32 %v3608_v25, %v3559_v48  ;;  %v17961_v18 = vpop.f32.mrb[69].mxu1  ;;  %v3394_v50 = vrot.slane %v20973_v45, 4 }
 0x1fd   : > { %v3181_v21 = vpop.permute.xlu1 %3180  ;;  %3793 = vrot.lane.b32.xlu0 %v3760_v14, %s20053_s24 }
 0x1fe   : > { %v3703_v15 = vadd.f32 %v3679_v6, %v20922_v27  ;;  %v21194_v24 = vpop.f32.mrb[70].mxu1  ;;  %v21196_v13 = vpop.f32.mrb[78].mxu0  ;;  %v3249_v54 = vadd.f32 %v3181_v21, %v20937_v32  ;;  %v3163_v32 = vrot.slane %v21147_v52, 4 }
 0x1ff   : > { %24854 = vst [vmem:[#allocation5_spill] sm:$0xff] %v21194_v24  ;;  %3913 = vrot.lane.b32.xlu1 %v21140_v41, %s20054_s25  ;;  %v3896_v7 = vpop.permute.xlu0 %3895  ;;  %v17978_v33 = vpop.f32.mrb[79].mxu0  ;;  %v3164_v41 = vrot.slane %v21153_v8, 4 }
 0x200   : > { %v3847_v36 = vadd.f32 %v3776_v39, %v3703_v15  ;;  %v17983_v48 = vpop.f32.mrb[71].mxu1 }
 0x201   : > { %v3301_v25 = vpop.permute.xlu1 %3300  ;;  %3795 = vrot.lane.b32.xlu0 %v3761_v31, %s20053_s24 }
 0x202   : > { %v3967_v14 = vadd.f32 %v3896_v7, %v3847_v36  ;;  %v3369_v27 = vadd.f32 %v3301_v25, %v3249_v54  ;;  %v21204_v6 = vpop.f32.mrb[80].mxu0  ;;  %v21206_v18 = vpop.f32.mrb[72].mxu1 }
 0x203   : > { %24855 = vst [vmem:[#allocation6_spill] sm:$0xff] %v21204_v6  ;;  %3915 = vrot.lane.b32.xlu1 %v21145_v30, %s20054_s25  ;;  %v3183_v33 = vpop.permute.xlu0 %3182  ;;  %v17986_v39 = vpop.f32.mrb[73].mxu1 }
 0x204   : > { %v3997_v21 = vmul.f32 %v20843_v58, %v3967_v14  ;;  %v3442_v15 = vadd.f32 %v3394_v50, %v3369_v27  ;;  %v18000_v7 = vpop.f32.mrb[81].mxu0  ;;  %v3250_v54 = vadd.f32 %v3183_v33, %v20950_v38  ;;  %v3395_v50 = vrot.slane %v21032_v11, 4 }
 0x205   : > { %v3494_v31 = vpop.permute.xlu1 %3493  ;;  %3200 = vrot.lane.b32.xlu0 %v3163_v32, %s20053_s24 }
 0x206   : > { %v4027_v45 = vadd.f32 %v20860_v60, %v3997_v21  ;;  %v21216_v36 = vpop.f32.mrb[82].mxu0  ;;  %v21218_v48 = vpop.f32.mrb[74].mxu1  ;;  %v3562_v11 = vadd.f32 %v3494_v31, %v3442_v15 }
 0x207   : > { %24856 = vst [vmem:[#allocation7_spill] sm:$0xff] %v21216_v36  ;;  %3202 = vrot.lane.b32.xlu1 %v3164_v41, %s20053_s24  ;;  %v3303_v30 = vpop.permute.xlu0 %3302  ;;  %v17989_v25 = vpop.f32.mrb[75].mxu1 }
 0x208   : > { %vm4051_vm7 = vcmp.gt.f32.partialorder %v4027_v45, 0.0  ;;  %v4075_v14 = vmul.f32 0.2, %v4027_v45  ;;  %v3370_v27 = vadd.f32 %v3303_v30, %v3250_v54  ;;  %v18003_v32 = vpop.f32.mrb[83].mxu0 }
 0x209   : > { %v3612_v39 = vpop.permute.xlu1 %3611  ;;  %3511 = vrot.lane.b32.xlu0 %v21164_v43, %s20053_s24 }
 0x20a   : > { %v4099_v38 = vsel %vm4051_vm7, %v4027_v45, %v4075_v14  ;;  %v21224_v33 = vadd.f32 %v3395_v50, %v3370_v27  ;;  %v21226_v21 = vpop.f32.mrb[84].mxu0  ;;  %v21228_v7 = vpop.f32.mrb[76].mxu1 }
 0x20b   : > { %24857 = vst [vmem:[#allocation8_spill] sm:$0xff] %v21228_v7  ;;  %4124 = vst.msk [vmem:[%s20200_s28 + $0x3] sm:$0xf] %vm4123_vm6, %v4099_v38  ;;  %3320 = vrot.lane.b32.xlu1 %v21155_v17, %s20054_s25  ;;  %v3492_v41 = vpop.permute.xlu0 %3491  ;;  %v17992_v54 = vpop.f32.mrb[77].mxu1  ;;  %v3595_v38 = vrot.slane %v21164_v43, 4 }
 0x20c   : > { %v3561_v30 = vadd.f32 %v3492_v41, %v21174_v23  ;;  %v18006_v25 = vpop.f32.mrb[85].mxu0  ;;  %v3763_v23 = vrot.slane %v21186_v59, 4 }
 0x20d   : > { %v3614_v32 = vpop.permute.xlu1 %3613  ;;  %3513 = vrot.lane.b32.xlu0 %v21172_v56, %s20053_s24 }
 0x20e   : > { %v3681_v45 = vadd.f32 %v3612_v39, %v3561_v30  ;;  %v3682_v14 = vadd.f32 %v3614_v32, %v3562_v11  ;;  %v21237_v27 = vpop.f32.mrb[86].mxu0  ;;  %v21239_v50 = vpop.f32.mrb[78].mxu1 }
 0x20f   : > { %24858 = vst [vmem:[#allocation9_spill] sm:$0xff] %v21237_v27  ;;  %3322 = vrot.lane.b32.xlu1 %v21162_v62, %s20054_s25  ;;  %v3778_v15 = vpop.permute.xlu0 %3777  ;;  %v18009_v31 = vpop.f32.mrb[87].mxu0 }
 0x210   : > { %v3848_v41 = vadd.f32 %v3778_v15, %v21180_v34  ;;  %v3705_v39 = vadd.f32 %v3681_v45, %v21004_v55  ;;  %v21248_v54 = vadd.f32 %v3682_v14, %v21048_v26  ;;  %v17995_v11 = vpop.f32.mrb[79].mxu1  ;;  %v3596_v31 = vrot.slane %v21172_v56, 4 }
 0x211   : > { %v3898_v30 = vpop.permute.xlu1 %3897  ;;  %3631 = vrot.lane.b32.xlu0 %v3595_v38, %s20054_s25 }
 0x212   : > { %v3968_v43 = vadd.f32 %v3898_v30, %v3848_v41  ;;  %v4148_v25 = vld [vmem:[%s20200_s28] sm:$0x7f]  ;;  %v21252_v32 = vpop.f32.mrb[80].mxu1  ;;  %v21254_v47 = vpop.f32.mrb[88].mxu0  ;;  %v3165_v30 = vrot.slane %v21194_v24, 4 }
 0x213   : > { %24859 = vst [vmem:[#allocation10_spill] sm:$0xff] %v21252_v32  ;;  %3799 = vrot.lane.b32.xlu1 %v3763_v23, %s20053_s24  ;;  %18173 = vmatmul.mubr.msk.f32.vlgmr.msra.gmra.mrb[130].mxu0 %vm4175_vm8, %v4148_v25  ;;  %v3780_v55 = vpop.permute.xlu0 %3779  ;;  %v18017_v34 = vpop.f32.mrb[81].mxu1 }
 0x214   : > { %v3998_v26 = vmul.f32 %v20843_v58, %v3968_v43  ;;  %v3849_v45 = vadd.f32 %v3780_v55, %v3705_v39  ;;  %19601 = vmatpush3.bf16.msra.mxu0 %v20971_v44  ;;  %18181 = vmatprep.mubr.msk.f32.mxu0 %vm20050_vm1, %v24842_v0  ;;  %v18012_v14 = vpop.f32.mrb[89].mxu0  ;;  %v3762_v39 = vrot.slane %v21176_v28, 4 }
 0x215   : > { %v3900_v38 = vpop.permute.xlu1 %3899  ;;  %3633 = vrot.lane.b32.xlu0 %v3596_v31, %s20054_s25  ;;  %18179 = vmatprep.subr.mxu0 %v24842_v0 }
 0x216   : > { %v4028_v56 = vadd.f32 %v20860_v60, %v3998_v26  ;;  %v3969_v15 = vadd.f32 %v3900_v38, %v3849_v45  ;;  %v21266_v23 = vpop.f32.mrb[82].mxu1  ;;  %v21268_v41 = vpop.f32.mrb[90].mxu0  ;;  %v24860_v45 = vmov 0.0|0.0  }
 0x217   : > { %3917 = vrot.lane.b32.xlu1 %v21188_v4, %s20054_s25  ;;  %v3185_v11 = vpop.permute.xlu0 %3184  ;;  %v18020_v43 = vpop.f32.mrb[83].mxu1 }
 0x218   : > { %vm4052_vm9 = vcmp.gt.f32.partialorder %v4028_v56, 0.0  ;;  %v4076_v25 = vmul.f32 0.2, %v4028_v56  ;;  %v3999_v31 = vmul.f32 %v20843_v58, %v3969_v15  ;;  %v3251_v55 = vadd.f32 %v3185_v11, %v21019_v3  ;;  %18180 = vmatpush3.msra.mxu0 %v20992_v51  ;;  %v18034_v34 = vpop.f32.mrb[91].mxu0 }
 0x219   : > { %v3305_v26 = vpop.permute.xlu1 %3304  ;;  %3797 = vrot.lane.b32.xlu0 %v3762_v39, %s20053_s24  ;;  %19608 = vmatprep.subr.bf16.mxu0 %v24860_v45  ;;  %v3396_v43 = vrot.slane %v21043_v19, 4 }
 0x21a   : > { %v4100_v4 = vsel %vm4052_vm9, %v4028_v56, %v4076_v25  ;;  %v4029_v14 = vadd.f32 %v20860_v60, %v3999_v31  ;;  %v3371_v38 = vadd.f32 %v3305_v26, %v3251_v55  ;;  %v21281_v0 = vpop.f32.mrb[84].mxu1  ;;  %v21283_v24 = vpop.f32.mrb[92].mxu0  ;;  %v3166_v31 = vrot.slane %v21204_v6, 4 }
 0x21b   : > { %4125 = vst.msk [vmem:[%s20200_s28 + $0x1b] sm:$0xf] %vm4123_vm6, %v4100_v4  ;;  %3204 = vrot.lane.b32.xlu1 %v3165_v30, %s20053_s24  ;;  %v3187_v3 = vpop.permute.xlu0 %3186  ;;  %v18023_v15 = vpop.f32.mrb[85].mxu1  ;;  %v3397_v30 = vrot.slane %v21065_v42, 4  ;;  %vm441_vm9 = vcmask 112640  }
 0x21c   : > { %vm4053_vm10 = vcmp.gt.f32.partialorder %v4029_v14, 0.0  ;;  %v4077_v39 = vmul.f32 0.2, %v4029_v14  ;;  %v3252_v56 = vadd.f32 %v3187_v3, %v21030_v10  ;;  %v3444_v11 = vadd.f32 %v3396_v43, %v3371_v38  ;;  %v18037_v25 = vpop.f32.mrb[93].mxu0 }
 0x21d   : > { %v3307_v19 = vpop.permute.xlu1 %3306  ;;  %3919 = vrot.lane.b32.xlu0 %v21196_v13, %s20054_s25  ;;  %v3597_v13 = vrot.slane %v21218_v48, 4 }
 0x21e   : > { %v4101_v55 = vsel %vm4053_vm10, %v4029_v14, %v4077_v39  ;;  %v3372_v34 = vadd.f32 %v3307_v19, %v3252_v56  ;;  %v21292_v26 = vpop.f32.mrb[94].mxu0  ;;  %v21295_v4 = vpop.f32.mrb[86].mxu1 }
 0x21f   : > { %4126 = vst.msk [vmem:[%s20200_s28 + $0x33] sm:$0xf] %vm4123_vm6, %v4101_v55  ;;  %3324 = vrot.lane.b32.xlu1 %v21206_v18, %s20054_s25  ;;  %v3496_v10 = vpop.permute.xlu0 %3495  ;;  %v18026_v38 = vpop.f32.mrb[87].mxu1  ;;  %v24861_v55 = vmov 0.0  }
 0x220   : > { %v21301_v43 = vadd.f32 %v3397_v30, %v3372_v34  ;;  %v18040_v3 = vpop.f32.mrb[95].mxu0  ;;  %v3764_v30 = vrot.slane %v21228_v7, 4  ;;  %v3563_v38 = vadd.f32 %v3496_v10, %v21224_v33  ;;  %442 = vst.msk [vmem:[#allocation3] sm:$0x7f] %vm441_vm9, %v24861_v55  ;;  %443 = vst.msk [vmem:[#allocation3 + $0x8] sm:$0x7f] %vm441_vm9, %v24861_v55 }
 0x221   : > { %v3618_v15 = vpop.permute.xlu1 %3617  ;;  %3206 = vrot.lane.b32.xlu0 %v3166_v31, %s20053_s24  ;;  %444 = vst.msk [vmem:[#allocation3 + $0x10] sm:$0x7f] %vm441_vm9, %v24861_v55  ;;  %445 = vst.msk [vmem:[#allocation3 + $0x18] sm:$0x7f] %vm441_vm9, %v24861_v55 }
 0x222   : > { %v4149_v14 = vld [vmem:[%s20200_s28 + $0x18] sm:$0x7f]  ;;  %v21306_v39 = vpop.f32.mrb[88].mxu1  ;;  %v21308_v42 = vpop.f32.mrb[96].mxu0  ;;  %446 = vst.msk [vmem:[#allocation3 + $0x20] sm:$0x7f] %vm441_vm9, %v24861_v55 }
 0x223   : > { %3326 = vrot.lane.b32.xlu1 %v21216_v36, %s20054_s25  ;;  %18182 = vmatmul.mubr.msk.f32.vlgmr.msra.gmra.mrb[130].mxu0 %vm4175_vm8, %v4149_v14  ;;  %v3498_v56 = vpop.permute.xlu0 %3497  ;;  %v18029_v25 = vpop.f32.mrb[89].mxu1  ;;  %447 = vst.msk [vmem:[#allocation3 + $0x28] sm:$0x7f] %vm441_vm9, %v24861_v55  ;;  %448 = vst.msk [vmem:[#allocation3 + $0x30] sm:$0x7f] %vm441_vm9, %v24861_v55 }
 0x224   : > { %v3564_v19 = vadd.f32 %v3498_v56, %v3444_v11  ;;  %19610 = vmatpush3.bf16.msra.mxu0 %v20971_v44  ;;  %18208 = vmatprep.mubr.msk.f32.mxu0 %vm20050_vm1, %v24861_v55  ;;  %v18043_v31 = vpop.f32.mrb[97].mxu0  ;;  %449 = vst.msk [vmem:[#allocation3 + $0x38] sm:$0x7f] %vm441_vm9, %v24861_v55  ;;  %450 = vst.msk [vmem:[#allocation3 + $0x40] sm:$0x7f] %vm441_vm9, %v24861_v55 }
 0x225   : > { %v3782_v34 = vpop.permute.xlu1 %3781  ;;  %3635 = vrot.lane.b32.xlu0 %v3597_v13, %s20054_s25  ;;  %18206 = vmatprep.subr.mxu0 %v24861_v55  ;;  %451 = vst.msk [vmem:[#allocation3 + $0x48] sm:$0x7f] %vm441_vm9, %v24861_v55  ;;  %452 = vst.msk [vmem:[#allocation3 + $0x50] sm:$0x7f] %vm441_vm9, %v24861_v55 }
 0x226   : > { %v3684_v3 = vadd.f32 %v3618_v15, %v3564_v19  ;;  %v4150_v14 = vld [vmem:[%s20200_s28 + $0x30] sm:$0x7f]  ;;  %v21321_v6 = vpop.f32.mrb[90].mxu1  ;;  %v21323_v11 = vpop.f32.mrb[98].mxu0  ;;  %v3850_v13 = vadd.f32 %v3782_v34, %v21248_v54  ;;  %v3765_v15 = vrot.slane %v21237_v27, 4 }
 0x227   : > { %3515 = vrot.lane.b32.xlu1 %v21218_v48, %s20053_s24  ;;  %18191 = vmatmul.mubr.msk.f32.vlgmr.msra.gmra.mrb[130].mxu1 %vm4175_vm8, %v4150_v14  ;;  %v3616_v56 = vpop.permute.xlu0 %3615  ;;  %v18046_v25 = vpop.f32.mrb[99].mxu0  ;;  %453 = vst.msk [vmem:[#allocation3 + $0x58] sm:$0x7f] %vm441_vm9, %v24861_v55  ;;  %454 = vst.msk [vmem:[#allocation3 + $0x60] sm:$0x7f] %vm441_vm9, %v24861_v55 }
 0x228   : > { %v3683_v31 = vadd.f32 %v3616_v56, %v3563_v38  ;;  %19607 = vmatpush3.bf16.msra.mxu1 %v20971_v44  ;;  %18199 = vmatprep.mubr.msk.f32.mxu1 %vm20050_vm1, %v24861_v55  ;;  %v21333_v33 = vadd.f32 %v3684_v3, %v21075_v57  ;;  %v18051_v10 = vpop.f32.mrb[91].mxu1  ;;  %455 = vst.msk [vmem:[#allocation3 + $0x68] sm:$0x7f] %vm441_vm9, %v24861_v55  ;;  %vm6033_vm9 = vcmask 56320  }
 0x229   : > { %v3902_v19 = vpop.permute.xlu1 %3901  ;;  %3801 = vrot.lane.b32.xlu0 %v3764_v30, %s20053_s24  ;;  %18197 = vmatprep.subr.mxu1 %v24861_v55 }
 0x22a   : > { %v3970_v48 = vadd.f32 %v3902_v19, %v3850_v13  ;;  %v3707_v54 = vadd.f32 %v3683_v31, %v21053_v29  ;;  %18207 = vmatpush3.msra.mxu0 %v20992_v51  ;;  %v21340_v34 = vpop.f32.mrb[92].mxu1  ;;  %v21342_v38 = vpop.f32.mrb[100].mxu0  ;;  %v3598_v29 = vrot.slane %v21226_v21, 4  ;;  %v3167_v19 = vrot.slane %v21252_v32, 4 }
 0x22b   : > { %3517 = vrot.lane.b32.xlu1 %v21226_v21, %s20053_s24  ;;  %v3784_v57 = vpop.permute.xlu0 %3783  ;;  %19611 = vmatprep.subr.bf16.mxu0 %v24860_v45  ;;  %v18054_v3 = vpop.f32.mrb[93].mxu1 }
 0x22c   : > { %v4000_v30 = vmul.f32 %v20843_v58, %v3970_v48  ;;  %18198 = vmatpush3.msra.mxu1 %v20992_v51  ;;  %v18068_v14 = vpop.f32.mrb[101].mxu0  ;;  %v3851_v13 = vadd.f32 %v3784_v57, %v3707_v54 }
 0x22d   : > { %v3189_v56 = vpop.permute.xlu1 %3188  ;;  %3803 = vrot.lane.b32.xlu0 %v3765_v15, %s20053_s24  ;;  %19614 = vmatprep.subr.bf16.mxu1 %v24860_v45 }
 0x22e   : > { %v4030_v25 = vadd.f32 %v20860_v60, %v4000_v30  ;;  %v21353_v31 = vpop.f32.mrb[94].mxu1  ;;  %v21355_v10 = vpop.f32.mrb[102].mxu0  ;;  %v3253_v15 = vadd.f32 %v3189_v56, %v21058_v35 }
 0x22f   : > { %3637 = vrot.lane.b32.xlu1 %v3598_v29, %s20054_s25  ;;  %v3904_v48 = vpop.permute.xlu0 %3903  ;;  %v18057_v3 = vpop.f32.mrb[95].mxu1  ;;  %v3398_v29 = vrot.slane %v21070_v49, 4 }
 0x230   : > { %vm4054_vm11 = vcmp.gt.f32.partialorder %v4030_v25, 0.0  ;;  %v4078_v21 = vmul.f32 0.2, %v4030_v25  ;;  %v3971_v14 = vadd.f32 %v3904_v48, %v3851_v13  ;;  %v18071_v27 = vpop.f32.mrb[103].mxu0 }
 0x231   : > { %v3309_v36 = vpop.permute.xlu1 %3308  ;;  %3921 = vrot.lane.b32.xlu0 %v21239_v50, %s20054_s25 }
 0x232   : > { %v4102_v54 = vsel %vm4054_vm11, %v4030_v25, %v4078_v21  ;;  %v4001_v57 = vmul.f32 %v20843_v58, %v3971_v14  ;;  %v3373_v30 = vadd.f32 %v3309_v36, %v3253_v15  ;;  %v21364_v32 = vpop.f32.mrb[96].mxu1  ;;  %v21366_v7 = vpop.f32.mrb[104].mxu0 }
 0x233   : > { %4127 = vst.msk [vmem:[%s20200_s28 + $0x4b] sm:$0xf] %vm4123_vm6, %v4102_v54  ;;  %3208 = vrot.lane.b32.xlu1 %v3167_v19, %s20053_s24  ;;  %v3191_v35 = vpop.permute.xlu0 %3190  ;;  %v18060_v27 = vpop.f32.mrb[97].mxu1  ;;  %v3399_v54 = vrot.slane %v21092_v22, 4 }
 0x234   : > { %v4031_v56 = vadd.f32 %v20860_v60, %v4001_v57  ;;  %v3446_v13 = vadd.f32 %v3398_v29, %v3373_v30  ;;  %v18074_v50 = vpop.f32.mrb[105].mxu0  ;;  %v3254_v36 = vadd.f32 %v3191_v35, %v21063_v16  ;;  %v3599_v27 = vrot.slane %v21281_v0, 4 }
 0x235   : > { %v3502_v25 = vpop.permute.xlu1 %3501  ;;  %3923 = vrot.lane.b32.xlu0 %v21254_v47, %s20054_s25 }
 0x236   : > { %vm4055_vm12 = vcmp.gt.f32.partialorder %v4031_v56, 0.0  ;;  %v4079_v49 = vmul.f32 0.2, %v4031_v56  ;;  %v21375_v48 = vpop.f32.mrb[106].mxu0  ;;  %v21377_v3 = vpop.f32.mrb[98].mxu1  ;;  %v3566_v50 = vadd.f32 %v3502_v25, %v3446_v13 }
 0x237   : > { %24862 = vst [vmem:[#allocation11_spill] sm:$0xff] %v21375_v48  ;;  %3328 = vrot.lane.b32.xlu1 %v21266_v23, %s20054_s25  ;;  %v3311_v19 = vpop.permute.xlu0 %3310  ;;  %v18077_v21 = vpop.f32.mrb[107].mxu0 }
 0x238   : > { %v4103_v15 = vsel %vm4055_vm12, %v4031_v56, %v4079_v49  ;;  %v3374_v14 = vadd.f32 %v3311_v19, %v3254_v36  ;;  %v18063_v57 = vpop.f32.mrb[99].mxu1  ;;  %v3766_v19 = vrot.slane %v21295_v4, 4 }
 0x239   : > { %4128 = vst.msk [vmem:[%s20200_s28 + $0x63] sm:$0xf] %vm4123_vm6, %v4103_v15  ;;  %v3620_v47 = vpop.permute.xlu1 %3619  ;;  %3519 = vrot.lane.b32.xlu0 %v21281_v0, %s20053_s24 }
 0x23a   : > { %v4151_v16 = vld [vmem:[%s20200_s28 + $0x48] sm:$0x7f]  ;;  %v21387_v30 = vadd.f32 %v3399_v54, %v3374_v14  ;;  %v21389_v29 = vpop.f32.mrb[100].mxu1  ;;  %v21391_v35 = vpop.f32.mrb[108].mxu0 }
 0x23b   : > { %24863 = vst [vmem:[#allocation12_spill] sm:$0xff] %v21389_v29  ;;  %3521 = vrot.lane.b32.xlu1 %v21292_v26, %s20053_s24  ;;  %18200 = vmatmul.mubr.msk.f32.vlgmr.msra.gmra.mrb[130].mxu1 %vm4175_vm8, %v4151_v16  ;;  %v3500_v22 = vpop.permute.xlu0 %3499  ;;  %v18085_v56 = vpop.f32.mrb[101].mxu1 }
 0x23c   : > { %v3565_v49 = vadd.f32 %v3500_v22, %v21301_v43  ;;  %19616 = vmatpush3.bf16.msra.mxu1 %v20971_v44  ;;  %18226 = vmatprep.mubr.msk.f32.mxu1 %vm20050_vm1, %v24861_v55  ;;  %v18080_v36 = vpop.f32.mrb[109].mxu0  ;;  %v3168_v22 = vrot.slane %v21268_v41, 4 }
 0x23d   : > { %v3622_v0 = vpop.permute.xlu1 %3621  ;;  %3639 = vrot.lane.b32.xlu0 %v3599_v27, %s20054_s25  ;;  %18224 = vmatprep.subr.mxu1 %v24861_v55 }
 0x23e   : > { %v3685_v21 = vadd.f32 %v3620_v47, %v3565_v49  ;;  %v3686_v15 = vadd.f32 %v3622_v0, %v3566_v50  ;;  %v21404_v14 = vpop.f32.mrb[102].mxu1  ;;  %v21406_v13 = vpop.f32.mrb[110].mxu0 }
 0x23f   : > { %3925 = vrot.lane.b32.xlu1 %v21306_v39, %s20054_s25  ;;  %v3786_v43 = vpop.permute.xlu0 %3785  ;;  %v18088_v25 = vpop.f32.mrb[103].mxu1  ;;  %v3767_v39 = vrot.slane %v21308_v42, 4 }
 0x240   : > { %v3852_v54 = vadd.f32 %v3786_v43, %v21333_v33  ;;  %v4152_v57 = vld [vmem:[%s20200_s28 + $0x60] sm:$0x7f]  ;;  %v3709_v16 = vadd.f32 %v3685_v21, %v21080_v2  ;;  %v21414_v27 = vadd.f32 %v3686_v15, %v21102_v37  ;;  %18225 = vmatpush3.msra.mxu1 %v20992_v51  ;;  %v18102_v47 = vpop.f32.mrb[111].mxu0  ;;  %v21437_v43 = vld [vmem:[%s24835_s7 + $0x10] sm:$0xff] }
 0x241   : > { %v3906_v56 = vpop.permute.xlu1 %3905  ;;  %3805 = vrot.lane.b32.xlu0 %v3766_v19, %s20053_s24  ;;  %18209 = vmatmul.mubr.msk.f32.vlgmr.msra.gmra.mrb[132].mxu0 %vm4175_vm8, %v4152_v57  ;;  %v3600_v57 = vrot.slane %v21292_v26, 4  ;;  %v3169_v47 = vrot.slane %v21321_v6, 4 }
 0x242   : > { %v3972_v50 = vadd.f32 %v3906_v56, %v3852_v54  ;;  %19613 = vmatpush3.bf16.msra.mxu0 %v20971_v44  ;;  %18217 = vmatprep.mubr.msk.f32.mxu0 %vm20050_vm1, %v24861_v55  ;;  %v21424_v2 = vpop.f32.mrb[104].mxu1  ;;  %v21426_v37 = vpop.f32.mrb[112].mxu0 }
 0x243   : > { %3210 = vrot.lane.b32.xlu1 %v3168_v22, %s20053_s24  ;;  %v3788_v51 = vpop.permute.xlu0 %3787  ;;  %18215 = vmatprep.subr.mxu0 %v24861_v55  ;;  %v18091_v33 = vpop.f32.mrb[105].mxu1 }
 0x244   : > { %v4002_v49 = vmul.f32 %v20843_v58, %v3972_v50  ;;  %v3853_v36 = vadd.f32 %v3788_v51, %v3709_v16  ;;  %19617 = vmatprep.subr.bf16.mxu1 %v24860_v45  ;;  %v18105_v19 = vpop.f32.mrb[113].mxu0 }
 0x245   : > { %v3908_v0 = vpop.permute.xlu1 %3907  ;;  %3807 = vrot.lane.b32.xlu0 %v3767_v39, %s20053_s24  ;;  %v3400_v19 = vrot.slane %v21097_v5, 4  ;;  %v3170_v5 = vrot.slane %v21342_v38, 4 }
 0x246   : > { %v4032_v21 = vadd.f32 %v20860_v60, %v4002_v49  ;;  %v3973_v15 = vadd.f32 %v3908_v0, %v3853_v36  ;;  %18216 = vmatpush3.msra.mxu0 %v21437_v43  ;;  %v21440_v25 = vpop.f32.mrb[106].mxu1  ;;  %v21442_v54 = vpop.f32.mrb[114].mxu0 }
 0x247   : > { %3330 = vrot.lane.b32.xlu1 %v21283_v24, %s20054_s25  ;;  %v3193_v16 = vpop.permute.xlu0 %3192  ;;  %v18094_v22 = vpop.f32.mrb[107].mxu1  ;;  %19620 = vmatprep.subr.bf16.mxu0 %v24860_v45 }
 0x248   : > { %vm4056_vm13 = vcmp.gt.f32.partialorder %v4032_v21, 0.0  ;;  %v4080_v56 = vmul.f32 0.2, %v4032_v21  ;;  %v4003_v39 = vmul.f32 %v20843_v58, %v3973_v15  ;;  %v3255_v50 = vadd.f32 %v3193_v16, %v21085_v12  ;;  %v18108_v51 = vpop.f32.mrb[115].mxu0 }
 0x249   : > { %v3313_v33 = vpop.permute.xlu1 %3312  ;;  %3641 = vrot.lane.b32.xlu0 %v3600_v57, %s20054_s25 }
 0x24a   : > { %v4104_v26 = vsel %vm4056_vm13, %v4032_v21, %v4080_v56  ;;  %v4033_v49 = vadd.f32 %v20860_v60, %v4003_v39  ;;  %v3375_v36 = vadd.f32 %v3313_v33, %v3255_v50  ;;  %v21454_v0 = vpop.f32.mrb[108].mxu1  ;;  %v21456_v22 = vpop.f32.mrb[116].mxu0 }
 0x24b   : > { %4129 = vst.msk [vmem:[%s20200_s28 + $0x7b] sm:$0xf] %vm4123_vm6, %v4104_v26  ;;  %3212 = vrot.lane.b32.xlu1 %v3169_v47, %s20053_s24  ;;  %v3195_v12 = vpop.permute.xlu0 %3194  ;;  %v18097_v15 = vpop.f32.mrb[109].mxu1  ;;  %v3401_v47 = vrot.slane %v21119_v63, 4 }
 0x24c   : > { %vm4057_vm14 = vcmp.gt.f32.partialorder %v4033_v49, 0.0  ;;  %v4081_v16 = vmul.f32 0.2, %v4033_v49  ;;  %v3256_v21 = vadd.f32 %v3195_v12, %v21090_v20  ;;  %v3448_v57 = vadd.f32 %v3400_v19, %v3375_v36  ;;  %v18111_v56 = vpop.f32.mrb[117].mxu0 }
 0x24d   : > { %v3315_v39 = vpop.permute.xlu1 %3314  ;;  %3927 = vrot.lane.b32.xlu0 %v21323_v11, %s20054_s25 }
 0x24e   : > { %v4105_v50 = vsel %vm4057_vm14, %v4033_v49, %v4081_v16  ;;  %v3376_v51 = vadd.f32 %v3315_v39, %v3256_v21  ;;  %v21466_v33 = vpop.f32.mrb[110].mxu1  ;;  %v21468_v26 = vpop.f32.mrb[118].mxu0  ;;  %v3601_v49 = vrot.slane %v21353_v31, 4 }
 0x24f   : > { %4130 = vst.msk [vmem:[%s20200_s28 + $0x93] sm:$0xf] %vm4123_vm6, %v4105_v50  ;;  %3332 = vrot.lane.b32.xlu1 %v21340_v34, %s20054_s25  ;;  %v3504_v20 = vpop.permute.xlu0 %3503  ;;  %v18119_v36 = vpop.f32.mrb[111].mxu1  ;;  %v3768_v50 = vrot.slane %v21364_v32, 4 }
 0x250   : > { %v21474_v19 = vadd.f32 %v3401_v47, %v3376_v51  ;;  %v18114_v11 = vpop.f32.mrb[119].mxu0  ;;  %v3567_v47 = vadd.f32 %v3504_v20, %v21387_v30 }
 0x251   : > { %v3626_v12 = vpop.permute.xlu1 %3625  ;;  %3214 = vrot.lane.b32.xlu0 %v3170_v5, %s20053_s24 }
 0x252   : > { %v4153_v63 = vld [vmem:[%s20200_s28 + $0x78] sm:$0x7f]  ;;  %v21479_v15 = vpop.f32.mrb[112].mxu1 }
 0x253   : > { %3334 = vrot.lane.b32.xlu1 %v21355_v10, %s20054_s25  ;;  %18218 = vmatmul.mubr.msk.f32.vlgmr.msra.gmra.mrb[132].mxu0 %vm4175_vm8, %v4153_v63  ;;  %v3506_v16 = vpop.permute.xlu0 %3505  ;;  %v18122_v21 = vpop.f32.mrb[113].mxu1 }
 0x254   : > { %v3568_v56 = vadd.f32 %v3506_v16, %v3448_v57  ;;  %19622 = vmatpush3.bf16.msra.mxu0 %v20971_v44  ;;  %18244 = vmatprep.mubr.msk.f32.mxu0 %vm20050_vm1, %v24861_v55  ;;  %v3013_v39 = vpop.f32.mrb[120].mxu0 }
 0x255   : > { %v3790_v5 = vpop.permute.xlu1 %3789  ;;  %3643 = vrot.lane.b32.xlu0 %v3601_v49, %s20054_s25  ;;  %18242 = vmatprep.subr.mxu0 %v24861_v55  ;;  %v18136_v51 = vpop.f32.mrb[121].mxu0 }
 0x256   : > { %v3688_v36 = vadd.f32 %v3626_v12, %v3568_v56  ;;  %v4154_v11 = vld [vmem:[%s20200_s28 + $0x90] sm:$0x7f]  ;;  %v21492_v63 = vpop.f32.mrb[114].mxu1  ;;  %v3854_v49 = vadd.f32 %v3790_v5, %v21414_v27 }
 0x257   : > { %3523 = vrot.lane.b32.xlu1 %v21353_v31, %s20053_s24  ;;  %18227 = vmatmul.mubr.msk.f32.vlgmr.msra.gmra.mrb[132].mxu1 %vm4175_vm8, %v4154_v11  ;;  %v3624_v57 = vpop.permute.xlu0 %3623  ;;  %v18125_v16 = vpop.f32.mrb[115].mxu1  ;;  %v3769_v31 = vrot.slane %v21375_v48, 4 }
 0x258   : > { %v3687_v21 = vadd.f32 %v3624_v57, %v3567_v47  ;;  %19619 = vmatpush3.bf16.msra.mxu1 %v20971_v44  ;;  %18235 = vmatprep.mubr.msk.f32.mxu1 %vm20050_vm1, %v24861_v55  ;;  %v21502_v30 = vadd.f32 %v3688_v36, %v21133_v1  ;;  %v21504_v20 = vpop.f32.mrb[122].mxu0 }
 0x259   : > { %24864 = vst [vmem:[#allocation13_spill] sm:$0xff] %v21504_v20  ;;  %v3910_v12 = vpop.permute.xlu1 %3909  ;;  %3809 = vrot.lane.b32.xlu0 %v3768_v50, %s20053_s24  ;;  %18233 = vmatprep.subr.mxu1 %v24861_v55  ;;  %v18139_v56 = vpop.f32.mrb[123].mxu0 }
 0x25a   : > { %v3974_v27 = vadd.f32 %v3910_v12, %v3854_v49  ;;  %v3711_v39 = vadd.f32 %v3687_v21, %v21107_v46  ;;  %18243 = vmatpush3.msra.mxu0 %v21437_v43  ;;  %v21511_v5 = vpop.f32.mrb[116].mxu1  ;;  %v3602_v46 = vrot.slane %v21366_v7, 4  ;;  %v3171_v21 = vrot.slane %v21389_v29, 4 }
 0x25b   : > { %3525 = vrot.lane.b32.xlu1 %v21366_v7, %s20053_s24  ;;  %v3792_v1 = vpop.permute.xlu0 %3791  ;;  %19623 = vmatprep.subr.bf16.mxu0 %v24860_v45  ;;  %v21516_v51 = vpop.f32.mrb[124].mxu0 }
 0x25c   : > { %v4004_v50 = vmul.f32 %v20843_v58, %v3974_v27  ;;  %18234 = vmatpush3.msra.mxu1 %v21437_v43  ;;  %v18128_v47 = vpop.f32.mrb[117].mxu1  ;;  %v18142_v36 = vpop.f32.mrb[125].mxu0  ;;  %v3855_v16 = vadd.f32 %v3792_v1, %v3711_v39 }
 0x25d   : > { %v3197_v11 = vpop.permute.xlu1 %3196  ;;  %3811 = vrot.lane.b32.xlu0 %v3769_v31, %s20053_s24  ;;  %19626 = vmatprep.subr.bf16.mxu1 %v24860_v45 }
 0x25e   : > { %v4034_v57 = vadd.f32 %v20860_v60, %v4004_v50  ;;  %v21524_v49 = vpop.f32.mrb[118].mxu1  ;;  %v3257_v27 = vadd.f32 %v3197_v11, %v21112_v53 }
 0x25f   : > { %3645 = vrot.lane.b32.xlu1 %v3602_v46, %s20054_s25  ;;  %v3912_v12 = vpop.permute.xlu0 %3911  ;;  %v21528_v56 = vpop.f32.mrb[126].mxu0  ;;  %v3402_v46 = vrot.slane %v21124_v9, 4 }
 0x260   : > { %vm4058_vm15 = vcmp.gt.f32.partialorder %v4034_v57, 0.0  ;;  %v4082_v7 = vmul.f32 0.2, %v4034_v57  ;;  %v3975_v31 = vadd.f32 %v3912_v12, %v3855_v16  ;;  %v18131_v47 = vpop.f32.mrb[119].mxu1  ;;  %v18145_v36 = vpop.f32.mrb[127].mxu0 }
 0x261   : > { %v3317_v20 = vpop.permute.xlu1 %3316  ;;  %3929 = vrot.lane.b32.xlu0 %v21377_v3, %s20054_s25  ;;  %v3403_v47 = vrot.slane %v21155_v17, 4 }
 0x262   : > { %v4106_v39 = vsel %vm4058_vm15, %v4034_v57, %v4082_v7  ;;  %v4005_v1 = vmul.f32 %v20843_v58, %v3975_v31  ;;  %v3377_v50 = vadd.f32 %v3317_v20, %v3257_v27  ;;  %v3105_v29 = vpop.f32.mrb[120].mxu1 }
 0x263   : > { %4131 = vst.msk [vmem:[%s20200_s28 + $0xab] sm:$0xf] %vm4123_vm6, %v4106_v39  ;;  %3216 = vrot.lane.b32.xlu1 %v3171_v21, %s20053_s24  ;;  %v3199_v48 = vpop.permute.xlu0 %3198  ;;  %v18153_v53 = vpop.f32.mrb[121].mxu1 }
 0x264   : > { %v4035_v11 = vadd.f32 %v20860_v60, %v4005_v1  ;;  %v3450_v16 = vadd.f32 %v3402_v46, %v3377_v50  ;;  %v21539_v12 = vpop.f32.mrb[128].mxu0  ;;  %v3258_v29 = vadd.f32 %v3199_v48, %v21117_v61 }
 0x265   : > { %v3510_v3 = vpop.permute.xlu1 %3509  ;;  %3931 = vrot.lane.b32.xlu0 %v21391_v35, %s20054_s25  ;;  %v18148_v20 = vpop.f32.mrb[129].mxu0  ;;  %v3770_v35 = vrot.slane %v21440_v25, 4 }
 0x266   : > { %vm4059_vm0 = vcmp.gt.f32.partialorder %v4035_v11, 0.0  ;;  %v4083_v9 = vmul.f32 0.2, %v4035_v11  ;;  %v3109_v57 = vpop.f32.mrb[122].mxu1  ;;  %v3570_v17 = vadd.f32 %v3510_v3, %v3450_v16  ;;  %v3172_v16 = vrot.slane %v21406_v13, 4 }
 0x267   : > { %3933 = vrot.lane.b32.xlu1 %v21454_v0, %s20054_s25  ;;  %v3319_v21 = vpop.permute.xlu0 %3318  ;;  %v18156_v7 = vpop.f32.mrb[123].mxu1 }
 0x268   : > { %v4107_v27 = vsel %vm4059_vm0, %v4035_v11, %v4083_v9  ;;  %v3378_v31 = vadd.f32 %v3319_v21, %v3258_v29  ;;  %v3603_v9 = vrot.slane %v21424_v2, 4 }
 0x269   : > { %4132 = vst.msk [vmem:[%s20200_s28 + $0xc3] sm:$0xf] %vm4123_vm6, %v4107_v27  ;;  %v3628_v36 = vpop.permute.xlu1 %3627  ;;  %3527 = vrot.lane.b32.xlu0 %v21424_v2, %s20053_s24  ;;  %v3771_v2 = vrot.slane %v21456_v22, 4 }
 0x26a   : > { %v4155_v39 = vld [vmem:[%s20200_s28 + $0xa8] sm:$0x7f]  ;;  %v21553_v61 = vadd.f32 %v3403_v47, %v3378_v31  ;;  %v3113_v48 = vpop.f32.mrb[124].mxu1 }
 0x26b   : > { %3336 = vrot.lane.b32.xlu1 %v21404_v14, %s20054_s25  ;;  %18236 = vmatmul.mubr.msk.f32.vlgmr.msra.gmra.mrb[132].mxu1 %vm4175_vm8, %v4155_v39  ;;  %v3508_v0 = vpop.permute.xlu0 %3507  ;;  %v18159_v1 = vpop.f32.mrb[125].mxu1 }
 0x26c   : > { %v3569_v50 = vadd.f32 %v3508_v0, %v21474_v19  ;;  %19628 = vmatpush3.bf16.msra.mxu1 %v20971_v44  ;;  %18262 = vmatprep.mubr.msk.f32.mxu1 %vm20050_vm1, %v24861_v55 }
 0x26d   : > { %v3630_v46 = vpop.permute.xlu1 %3629  ;;  %3813 = vrot.lane.b32.xlu0 %v3770_v35, %s20053_s24  ;;  %18260 = vmatprep.subr.mxu1 %v24861_v55 }
 0x26e   : > { %v3689_v53 = vadd.f32 %v3628_v36, %v3569_v50  ;;  %v3690_v11 = vadd.f32 %v3630_v46, %v3570_v17  ;;  %v21564_v20 = vpop.f32.mrb[126].mxu1  ;;  %v3604_v36 = vrot.slane %v21442_v54, 4  ;;  %v3173_v17 = vrot.slane %v21466_v33, 4 }
 0x26f   : > { %3529 = vrot.lane.b32.xlu1 %v21442_v54, %s20053_s24  ;;  %v3794_v19 = vpop.permute.xlu0 %3793  ;;  %v18162_v3 = vpop.f32.mrb[127].mxu1 }
 0x270   : > { %v3856_v29 = vadd.f32 %v3794_v19, %v21502_v30  ;;  %v4156_v57 = vld [vmem:[%s20200_s28 + $0xc0] sm:$0x7f]  ;;  %v3713_v21 = vadd.f32 %v3689_v53, %v21138_v40  ;;  %18261 = vmatpush3.msra.mxu1 %v21437_v43  ;;  %v21575_v7 = vadd.f32 %v3690_v11, %v21176_v28 }
 0x271   : > { %v3914_v27 = vpop.permute.xlu1 %3913  ;;  %3647 = vrot.lane.b32.xlu0 %v3603_v9, %s20054_s25  ;;  %18245 = vmatmul.mubr.msk.f32.vlgmr.msra.gmra.mrb[134].mxu0 %vm4175_vm8, %v4156_v57 }
 0x272   : > { %v3976_v31 = vadd.f32 %v3914_v27, %v3856_v29  ;;  %19625 = vmatpush3.bf16.msra.mxu0 %v20971_v44  ;;  %18253 = vmatprep.mubr.msk.f32.mxu0 %vm20050_vm1, %v24861_v55  ;;  %v21583_v30 = vpop.f32.mrb[128].mxu1  ;;  %v3605_v29 = vrot.slane %v21492_v63, 4  ;;  %v3404_v27 = vrot.slane %v21162_v62, 4  ;;  %v3405_v62 = vrot.slane %v21206_v18, 4 }
 0x273   : > { %3218 = vrot.lane.b32.xlu1 %v3172_v16, %s20053_s24  ;;  %v3796_v40 = vpop.permute.xlu0 %3795  ;;  %18251 = vmatprep.subr.mxu0 %v24861_v55  ;;  %v18165_v28 = vpop.f32.mrb[129].mxu1 }
 0x274   : > { %v4006_v47 = vmul.f32 %v20843_v58, %v3976_v31  ;;  %v3857_v35 = vadd.f32 %v3796_v40, %v3713_v21  ;;  %19629 = vmatprep.subr.bf16.mxu1 %v24860_v45 }
 0x275   : > { %v3916_v39 = vpop.permute.xlu1 %3915  ;;  %3815 = vrot.lane.b32.xlu0 %v3771_v2, %s20053_s24 }
 0x276   : > { %v4036_v48 = vadd.f32 %v20860_v60, %v4006_v47  ;;  %v3977_v0 = vadd.f32 %v3916_v39, %v3857_v35  ;;  %18252 = vmatpush3.msra.mxu0 %v21437_v43 }
 0x277   : > { %3338 = vrot.lane.b32.xlu1 %v21426_v37, %s20054_s25  ;;  %v3201_v1 = vpop.permute.xlu0 %3200  ;;  %19632 = vmatprep.subr.bf16.mxu0 %v24860_v45 }
 0x278   : > { %vm4060_vm3 = vcmp.gt.f32.partialorder %v4036_v48, 0.0  ;;  %v4084_v50 = vmul.f32 0.2, %v4036_v48  ;;  %v4007_v54 = vmul.f32 %v20843_v58, %v3977_v0  ;;  %v3259_v19 = vadd.f32 %v3201_v1, %v21147_v52 }
 0x279   : > { %v3203_v46 = vpop.permute.xlu1 %3202  ;;  %3649 = vrot.lane.b32.xlu0 %v3604_v36, %s20054_s25  ;;  %v3606_v0 = vrot.slane %v21516_v51, 4 }
 0x27a   : > { %v4108_v53 = vsel %vm4060_vm3, %v4036_v48, %v4084_v50  ;;  %v4037_v11 = vadd.f32 %v20860_v60, %v4007_v54  ;;  %v3260_v31 = vadd.f32 %v3203_v46, %v21153_v8  ;;  %v24865_v54 = vld [vmem:[#allocation8_spill] sm:$0xff] }
 0x27b   : > { %4133 = vst.msk [vmem:[%s20200_s28 + $0xdb] sm:$0xf] %vm4123_vm6, %v4108_v53  ;;  %3220 = vrot.lane.b32.xlu1 %v3173_v17, %s20053_s24  ;;  %v3512_v9 = vpop.permute.xlu0 %3511 }
 0x27c   : > { %vm4061_vm4 = vcmp.gt.f32.partialorder %v4037_v11, 0.0  ;;  %v4085_v16 = vmul.f32 0.2, %v4037_v11  ;;  %v3571_v28 = vadd.f32 %v3512_v9, %v21553_v61 }
 0x27d   : > { %v3321_v3 = vpop.permute.xlu1 %3320  ;;  %3935 = vrot.lane.b32.xlu0 %v21468_v26, %s20054_s25  ;;  %v3772_v26 = vrot.slane %v21511_v5, 4 }
 0x27e   : > { %v4109_v57 = vsel %vm4061_vm4, %v4037_v11, %v4085_v16  ;;  %v3379_v21 = vadd.f32 %v3321_v3, %v3259_v19  ;;  %v24866_v3 = vld [vmem:[#allocation5_spill] sm:$0xff] }
 0x27f   : > { %4134 = vst.msk [vmem:[%s20200_s28 + $0xf3] sm:$0xf] %vm4123_vm6, %v4109_v57  ;;  %3531 = vrot.lane.b32.xlu1 %v21492_v63, %s20053_s24  ;;  %v3514_v2 = vpop.permute.xlu0 %3513 }
 0x280   : > { %v3452_v52 = vadd.f32 %v3404_v27, %v3379_v21 }
 0x281   : > { %v3323_v40 = vpop.permute.xlu1 %3322  ;;  %3651 = vrot.lane.b32.xlu0 %v3605_v29, %s20054_s25 }
 0x282   : > { %v3380_v47 = vadd.f32 %v3323_v40, %v3260_v31  ;;  %v4157_v35 = vld [vmem:[%s20200_s28 + $0xd8] sm:$0x7f]  ;;  %v3572_v18 = vadd.f32 %v3514_v2, %v3452_v52  ;;  %v24867_v40 = vld [vmem:[#allocation7_spill] sm:$0xff] }
 0x283   : > { %3340 = vrot.lane.b32.xlu1 %v21479_v15, %s20054_s25  ;;  %18254 = vmatmul.mubr.msk.f32.vlgmr.msra.gmra.mrb[134].mxu0 %vm4175_vm8, %v4157_v35  ;;  %v3632_v63 = vpop.permute.xlu0 %3631 }
 0x284   : > { %v3691_v8 = vadd.f32 %v3632_v63, %v3571_v28  ;;  %v21621_v36 = vadd.f32 %v3405_v62, %v3380_v47  ;;  %19634 = vmatpush3.bf16.msra.mxu0 %v20971_v44  ;;  %18280 = vmatprep.mubr.msk.f32.mxu0 %vm20050_vm1, %v24861_v55  ;;  %v24868_v47 = vld [vmem:[#allocation6_spill] sm:$0xff]  ;;  %v3407_v63 = vrot.slane %v21266_v23, 4 }
 0x285   : > { %v3800_v61 = vpop.permute.xlu1 %3799  ;;  %3817 = vrot.lane.b32.xlu0 %v3772_v26, %s20053_s24  ;;  %18278 = vmatprep.subr.mxu0 %v24861_v55 }
 0x286   : > { %v3715_v39 = vadd.f32 %v3691_v8, %v21186_v59  ;;  %v4158_v48 = vld [vmem:[%s20200_s28 + $0xf0] sm:$0x7f]  ;;  %v3773_v59 = vrot.slane %v21528_v56, 4 }
 0x287   : > { %3533 = vrot.lane.b32.xlu1 %v21516_v51, %s20053_s24  ;;  %18263 = vmatmul.mubr.msk.f32.vlgmr.msra.gmra.mrb[134].mxu1 %vm4175_vm8, %v4158_v48  ;;  %v3634_v1 = vpop.permute.xlu0 %3633 }
 0x288   : > { %v3692_v17 = vadd.f32 %v3634_v1, %v3572_v18  ;;  %19631 = vmatpush3.bf16.msra.mxu1 %v20971_v44  ;;  %18271 = vmatprep.mubr.msk.f32.mxu1 %vm20050_vm1, %v24861_v55 }
 0x289   : > { %v3918_v50 = vpop.permute.xlu1 %3917  ;;  %3937 = vrot.lane.b32.xlu0 %v21524_v49, %s20054_s25  ;;  %18269 = vmatprep.subr.mxu1 %v24861_v55  ;;  %v3859_v49 = vadd.f32 %v3800_v61, %v3715_v39 }
 0x28a   : > { %v21642_v46 = vadd.f32 %v3692_v17, %v24865_v54  ;;  %18279 = vmatpush3.msra.mxu0 %v21437_v43 }
 0x28b   : > { %3653 = vrot.lane.b32.xlu1 %v3606_v0, %s20054_s25  ;;  %v3798_v51 = vpop.permute.xlu0 %3797  ;;  %19635 = vmatprep.subr.bf16.mxu0 %v24860_v45 }
 0x28c   : > { %v3858_v53 = vadd.f32 %v3798_v51, %v21575_v7  ;;  %18270 = vmatpush3.msra.mxu1 %v21437_v43  ;;  %v3774_v7 = vrot.slane %v21564_v20, 4  ;;  %v24869_v51 = vld [vmem:[#allocation9_spill] sm:$0xff] }
 0x28d   : > { %v3205_v11 = vpop.permute.xlu1 %3204  ;;  %3819 = vrot.lane.b32.xlu0 %v3773_v59, %s20053_s24  ;;  %19638 = vmatprep.subr.bf16.mxu1 %v24860_v45 }
 0x28e   : > { %v3978_v9 = vadd.f32 %v3918_v50, %v3858_v53  ;;  %v3261_v29 = vadd.f32 %v3205_v11, %v24866_v3 }
 0x28f   : > { %v3920_v16 = vpop.permute.xlu0 %3919  ;;  %3941 = vrot.lane.b32.xlu1 %v21583_v30, %s20054_s25  ;;  %v3406_v30 = vrot.slane %v24867_v40, 4 }
 0x290   : > { %v4008_v19 = vmul.f32 %v20843_v58, %v3978_v9  ;;  %v3979_v57 = vadd.f32 %v3920_v16, %v3859_v49 }
 0x291   : > { %v3325_v21 = vpop.permute.xlu1 %3324  ;;  %3939 = vrot.lane.b32.xlu0 %v21539_v12, %s20054_s25 }
 0x292   : > { %v4038_v27 = vadd.f32 %v20860_v60, %v4008_v19  ;;  %v4009_v2 = vmul.f32 %v20843_v58, %v3979_v57  ;;  %v3381_v31 = vadd.f32 %v3325_v21, %v3261_v29 }
 0x293   : > { %v3207_v52 = vpop.permute.xlu0 %3206 }
 0x294   : > { %vm4062_vm5 = vcmp.gt.f32.partialorder %v4038_v27, 0.0  ;;  %v4086_v26 = vmul.f32 0.2, %v4038_v27  ;;  %v4039_v28 = vadd.f32 %v20860_v60, %v4009_v2  ;;  %v3262_v35 = vadd.f32 %v3207_v52, %v24868_v47 }
 0x295   : > { %v3327_v62 = vpop.permute.xlu1 %3326  ;;  %3821 = vrot.lane.b32.xlu0 %v3774_v7, %s20053_s24  ;;  %v3454_v12 = vadd.f32 %v3406_v30, %v3381_v31  ;;  %v24870_v31 = vld [vmem:[#allocation10_spill] sm:$0xff]  ;;  %v3408_v30 = vrot.slane %v21283_v24, 4 }
 0x296   : > { %v4110_v8 = vsel %vm4062_vm5, %v4038_v27, %v4086_v26  ;;  %vm4063_vm7 = vcmp.gt.f32.partialorder %v4039_v28, 0.0  ;;  %v4087_v61 = vmul.f32 0.2, %v4039_v28  ;;  %v3382_v18 = vadd.f32 %v3327_v62, %v3262_v35 }
 0x297   : > { %4135 = vst.msk [vmem:[%s20200_s28 + $0x10b] sm:$0xf] %vm4123_vm6, %v4110_v8  ;;  %v3636_v39 = vpop.permute.xlu0 %3635 }
 0x298   : > { %v4111_v48 = vsel %vm4063_vm7, %v4039_v28, %v4087_v61  ;;  %v21667_v0 = vadd.f32 %v3407_v63, %v3382_v18  ;;  %vm6049_vm7 = vcmask 1046528  }
 0x299   : > { %4136 = vst.msk [vmem:[%s20200_s28 + $0x123] sm:$0xf] %vm4123_vm6, %v4111_v48  ;;  %v3516_v23 = vpop.permute.xlu1 %3515 }
 0x29a   : > { %v3573_v1 = vadd.f32 %v3516_v23, %v21621_v36 }
 0x29b   : > { %v3802_v17 = vpop.permute.xlu0 %3801 }
 0x29c   : > { %v3693_v50 = vadd.f32 %v3636_v39, %v3573_v1  ;;  %v3860_v36 = vadd.f32 %v3802_v17, %v21642_v46 }
 0x29d   : > { %v3518_v59 = vpop.permute.xlu1 %3517 }
 0x29e   : > { %v4159_v54 = vld [vmem:[%s20200_s28 + $0x108] sm:$0x7f]  ;;  %v3717_v53 = vadd.f32 %v3693_v50, %v24869_v51  ;;  %v3574_v49 = vadd.f32 %v3518_v59, %v3454_v12 }
 0x29f   : > { %18272 = vmatmul.mubr.msk.f32.vlgmr.msra.gmra.mrb[134].mxu1 %vm4175_vm8, %v4159_v54  ;;  %v3804_v11 = vpop.permute.xlu0 %3803 }
 0x2a0   : > { %v4160_v9 = vld [vmem:[%s20200_s28 + $0x120] sm:$0x7f]  ;;  %19640 = vmatpush3.bf16.msra.mxu1 %v20971_v44  ;;  %18298 = vmatprep.mubr.msk.f32.mxu1 %vm20050_vm1, %v24861_v55  ;;  %v3861_v7 = vadd.f32 %v3804_v11, %v3717_v53 }
 0x2a1   : > { %v3638_v16 = vpop.permute.xlu1 %3637  ;;  %18281 = vmatmul.mubr.msk.f32.vlgmr.msra.gmra.mrb[136].mxu0 %vm4175_vm8, %v4160_v9  ;;  %18296 = vmatprep.subr.mxu1 %v24861_v55 }
 0x2a2   : > { %v3694_v19 = vadd.f32 %v3638_v16, %v3574_v49  ;;  %19637 = vmatpush3.bf16.msra.mxu0 %v20971_v44  ;;  %18289 = vmatprep.mubr.msk.f32.mxu0 %vm20050_vm1, %v24861_v55 }
 0x2a3   : > { %v3922_v3 = vpop.permute.xlu0 %3921  ;;  %18287 = vmatprep.subr.mxu0 %v24861_v55 }
 0x2a4   : > { %v3980_v29 = vadd.f32 %v3922_v3, %v3860_v36  ;;  %v3718_v57 = vadd.f32 %v3694_v19, %v21295_v4  ;;  %18297 = vmatpush3.msra.mxu1 %v21437_v43  ;;  %v3409_v19 = vrot.slane %v21340_v34, 4 }
 0x2a5   : > { %v3209_v21 = vpop.permute.xlu1 %3208  ;;  %19641 = vmatprep.subr.bf16.mxu1 %v24860_v45 }
 0x2a6   : > { %v4010_v46 = vmul.f32 %v20843_v58, %v3980_v29  ;;  %18288 = vmatpush3.msra.mxu0 %v21437_v43  ;;  %v3263_v52 = vadd.f32 %v3209_v21, %v24870_v31 }
 0x2a7   : > { %v3924_v27 = vpop.permute.xlu0 %3923  ;;  %19644 = vmatprep.subr.bf16.mxu0 %v24860_v45 }
 0x2a8   : > { %v4040_v2 = vadd.f32 %v20860_v60, %v4010_v46  ;;  %v3981_v40 = vadd.f32 %v3924_v27, %v3861_v7 }
 0x2a9   : > { %v3329_v4 = vpop.permute.xlu1 %3328 }
 0x2aa   : > { %vm4064_vm10 = vcmp.gt.f32.partialorder %v4040_v2, 0.0  ;;  %v4088_v26 = vmul.f32 0.2, %v4040_v2  ;;  %v4011_v28 = vmul.f32 %v20843_v58, %v3981_v40  ;;  %v3383_v47 = vadd.f32 %v3329_v4, %v3263_v52 }
 0x2ab   : > { %v3520_v35 = vpop.permute.xlu0 %3519 }
 0x2ac   : > { %v4112_v62 = vsel %vm4064_vm10, %v4040_v2, %v4088_v26  ;;  %v4041_v12 = vadd.f32 %v20860_v60, %v4011_v28  ;;  %v3456_v63 = vadd.f32 %v3408_v30, %v3383_v47  ;;  %v3575_v18 = vadd.f32 %v3520_v35, %v21667_v0 }
 0x2ad   : > { %4137 = vst.msk [vmem:[%s20200_s28 + $0x13b] sm:$0xf] %vm4123_vm6, %v4112_v62  ;;  %v3522_v8 = vpop.permute.xlu1 %3521  ;;  %v3410_v30 = vrot.slane %v21355_v10, 4 }
 0x2ae   : > { %vm4065_vm11 = vcmp.gt.f32.partialorder %v4041_v12, 0.0  ;;  %v4089_v61 = vmul.f32 0.2, %v4041_v12  ;;  %v3576_v9 = vadd.f32 %v3522_v8, %v3456_v63 }
 0x2af   : > { %v3640_v24 = vpop.permute.xlu0 %3639 }
 0x2b0   : > { %v4113_v39 = vsel %vm4065_vm11, %v4041_v12, %v4089_v61  ;;  %v3695_v48 = vadd.f32 %v3640_v24, %v3575_v18  ;;  %vm6001_vm11 = vcmask 104456  }
 0x2b1   : > { %4138 = vst.msk [vmem:[%s20200_s28 + $0x153] sm:$0xf] %vm4123_vm6, %v4113_v39  ;;  %v3926_v23 = vpop.permute.xlu1 %3925 }
 0x2b2   : > { %v3719_v1 = vadd.f32 %v3695_v48, %v21308_v42  ;;  %v24871_v48 = vld [vmem:[#allocation11_spill] sm:$0xff] }
 0x2b3   : > { %v3806_v17 = vpop.permute.xlu0 %3805 }
 0x2b4   : > { %v3862_v50 = vadd.f32 %v3806_v17, %v3718_v57  ;;  %v4161_v59 = vld [vmem:[%s20200_s28 + $0x138] sm:$0x7f] }
 0x2b5   : > { %v3211_v54 = vpop.permute.xlu1 %3210  ;;  %18290 = vmatmul.mubr.msk.f32.vlgmr.msra.gmra.mrb[136].mxu0 %vm4175_vm8, %v4161_v59 }
 0x2b6   : > { %v3982_v51 = vadd.f32 %v3926_v23, %v3862_v50  ;;  %19646 = vmatpush3.bf16.msra.mxu0 %v20971_v44  ;;  %18316 = vmatprep.mubr.msk.f32.mxu0 %vm20050_vm1, %v24861_v55  ;;  %v3264_v11 = vadd.f32 %v3211_v54, %v21268_v41 }
 0x2b7   : > { %v3808_v0 = vpop.permute.xlu0 %3807  ;;  %18314 = vmatprep.subr.mxu0 %v24861_v55 }
 0x2b8   : > { %v4012_v53 = vmul.f32 %v20843_v58, %v3982_v51  ;;  %v4162_v42 = vld [vmem:[%s20200_s28 + $0x150] sm:$0x7f]  ;;  %v3863_v46 = vadd.f32 %v3808_v0, %v3719_v1 }
 0x2b9   : > { %v3331_v49 = vpop.permute.xlu1 %3330  ;;  %18299 = vmatmul.mubr.msk.f32.vlgmr.msra.gmra.mrb[136].mxu1 %vm4175_vm8, %v4162_v42 }
 0x2ba   : > { %v4042_v16 = vadd.f32 %v20860_v60, %v4012_v53  ;;  %v3384_v36 = vadd.f32 %v3331_v49, %v3264_v11  ;;  %19643 = vmatpush3.bf16.msra.mxu1 %v20971_v44  ;;  %18307 = vmatprep.mubr.msk.f32.mxu1 %vm20050_vm1, %v24861_v55 }
 0x2bb   : > { %v3642_v3 = vpop.permute.xlu0 %3641  ;;  %18305 = vmatprep.subr.mxu1 %v24861_v55  ;;  %18315 = vmatpush3.msra.mxu0 %v21437_v43 }
 0x2bc   : > { %vm4066_vm12 = vcmp.gt.f32.partialorder %v4042_v16, 0.0  ;;  %v4090_v41 = vmul.f32 0.2, %v4042_v16  ;;  %v3696_v29 = vadd.f32 %v3642_v3, %v3576_v9  ;;  %v3457_v57 = vadd.f32 %v3409_v19, %v3384_v36  ;;  %19647 = vmatprep.subr.bf16.mxu0 %v24860_v45 }
 0x2bd   : > { %v3213_v21 = vpop.permute.xlu1 %3212 }
 0x2be   : > { %v4114_v7 = vsel %vm4066_vm12, %v4042_v16, %v4090_v41  ;;  %18306 = vmatpush3.msra.mxu1 %v21437_v43  ;;  %v3720_v27 = vadd.f32 %v3696_v29, %v21364_v32  ;;  %v3265_v2 = vadd.f32 %v3213_v21, %v21321_v6  ;;  %v3411_v6 = vrot.slane %v21404_v14, 4  ;;  %v24872_v21 = vld [vmem:[#allocation12_spill] sm:$0xff] }
 0x2bf   : > { %4139 = vst.msk [vmem:[%s20200_s28 + $0x16b] sm:$0xf] %vm4123_vm6, %v4114_v7  ;;  %v3928_v34 = vpop.permute.xlu0 %3927  ;;  %19650 = vmatprep.subr.bf16.mxu1 %v24860_v45  ;;  %vm7856_vm12 = vcmask 1043456  }
 0x2c0   : > { %v3983_v31 = vadd.f32 %v3928_v34, %v3863_v46 }
 0x2c1   : > { %v3333_v52 = vpop.permute.xlu1 %3332 }
 0x2c2   : > { %v4013_v40 = vmul.f32 %v20843_v58, %v3983_v31  ;;  %v3385_v4 = vadd.f32 %v3333_v52, %v3265_v2  ;;  %v3412_v31 = vrot.slane %v21426_v37, 4 }
 0x2c3   : > { %v3215_v26 = vpop.permute.xlu0 %3214 }
 0x2c4   : > { %v4043_v28 = vadd.f32 %v20860_v60, %v4013_v40  ;;  %v3266_v32 = vadd.f32 %v3215_v26, %v21342_v38  ;;  %v3458_v47 = vadd.f32 %v3410_v30, %v3385_v4 }
 0x2c5   : > { %v3335_v35 = vpop.permute.xlu1 %3334 }
 0x2c6   : > { %vm4067_vm13 = vcmp.gt.f32.partialorder %v4043_v28, 0.0  ;;  %v4091_v62 = vmul.f32 0.2, %v4043_v28  ;;  %v3386_v12 = vadd.f32 %v3335_v35, %v3266_v32  ;;  %v4163_v63 = vld [vmem:[%s20200_s28 + $0x168] sm:$0x7f] }
 0x2c7   : > { %18308 = vmatmul.mubr.msk.f32.vlgmr.msra.gmra.mrb[136].mxu1 %vm4175_vm8, %v4163_v63  ;;  %v3644_v8 = vpop.permute.xlu0 %3643 }
 0x2c8   : > { %v4115_v61 = vsel %vm4067_vm13, %v4043_v28, %v4091_v62  ;;  %v3459_v10 = vadd.f32 %v3411_v6, %v3386_v12  ;;  %19652 = vmatpush3.bf16.msra.mxu1 %v20971_v44  ;;  %18334 = vmatprep.mubr.msk.f32.mxu1 %vm20050_vm1, %v24861_v55  ;;  %vm20056_vm13 = vmmov 1  }
 0x2c9   : > { %4140 = vst.msk [vmem:[%s20200_s28 + $0x183] sm:$0xf] %vm4123_vm6, %v4115_v61  ;;  %v3524_v38 = vpop.permute.xlu1 %3523  ;;  %18332 = vmatprep.subr.mxu1 %v24861_v55 }
 0x2ca   : > { %v3577_v18 = vadd.f32 %v3524_v38, %v3457_v57 }
 0x2cb   : > { %v3810_v24 = vpop.permute.xlu0 %3809 }
 0x2cc   : > { %v3697_v39 = vadd.f32 %v3644_v8, %v3577_v18  ;;  %18333 = vmatpush3.msra.mxu1 %v21437_v43  ;;  %v3864_v54 = vadd.f32 %v3810_v24, %v3720_v27 }
 0x2cd   : > { %v3526_v14 = vpop.permute.xlu1 %3525  ;;  %19653 = vmatprep.subr.bf16.mxu1 %v24860_v45 }
 0x2ce   : > { %v3721_v23 = vadd.f32 %v3697_v39, %v24871_v48  ;;  %v3578_v17 = vadd.f32 %v3526_v14, %v3458_v47  ;;  %v3413_v14 = vrot.slane %v21479_v15, 4 }
 0x2cf   : > { %v3812_v1 = vpop.permute.xlu0 %3811 }
 0x2d0   : > { %v4164_v50 = vld [vmem:[%s20200_s28 + $0x180] sm:$0x7f]  ;;  %v3865_v49 = vadd.f32 %v3812_v1, %v3721_v23 }
 0x2d1   : > { %v3646_v59 = vpop.permute.xlu1 %3645  ;;  %18317 = vmatmul.mubr.msk.f32.vlgmr.msra.gmra.mrb[138].mxu0 %vm4175_vm8, %v4164_v50 }
 0x2d2   : > { %v3698_v51 = vadd.f32 %v3646_v59, %v3578_v17  ;;  %19649 = vmatpush3.bf16.msra.mxu0 %v20971_v44  ;;  %18325 = vmatprep.mubr.msk.f32.mxu0 %vm20050_vm1, %v24861_v55 }
 0x2d3   : > { %v3930_v0 = vpop.permute.xlu0 %3929  ;;  %18323 = vmatprep.subr.mxu0 %v24861_v55 }
 0x2d4   : > { %v3984_v53 = vadd.f32 %v3930_v0, %v3864_v54  ;;  %v3722_v11 = vadd.f32 %v3698_v51, %v21440_v25 }
 0x2d5   : > { %v3217_v42 = vpop.permute.xlu1 %3216 }
 0x2d6   : > { %v4014_v9 = vmul.f32 %v20843_v58, %v3984_v53  ;;  %18324 = vmatpush3.msra.mxu0 %v21437_v43  ;;  %v3267_v7 = vadd.f32 %v3217_v42, %v24872_v21 }
 0x2d7   : > { %v3932_v16 = vpop.permute.xlu0 %3931  ;;  %19656 = vmatprep.subr.bf16.mxu0 %v24860_v45 }
 0x2d8   : > { %v4044_v36 = vadd.f32 %v20860_v60, %v4014_v9  ;;  %v3985_v19 = vadd.f32 %v3932_v16, %v3865_v49 }
 0x2d9   : > { %v3934_v3 = vpop.permute.xlu1 %3933 }
 0x2da   : > { %vm4068_vm14 = vcmp.gt.f32.partialorder %v4044_v36, 0.0  ;;  %v4092_v41 = vmul.f32 0.2, %v4044_v36  ;;  %v4015_v29 = vmul.f32 %v20843_v58, %v3985_v19 }
 0x2db   : > { %v3528_v25 = vpop.permute.xlu0 %3527 }
 0x2dc   : > { %v4116_v57 = vsel %vm4068_vm14, %v4044_v36, %v4092_v41  ;;  %v4045_v46 = vadd.f32 %v20860_v60, %v4015_v29  ;;  %v3579_v28 = vadd.f32 %v3528_v25, %v3459_v10  ;;  %vm22237_vm14 = vmpackc.low %vm7856_vm12, %vm20056_vm13 }
 0x2dd   : > { %4141 = vst.msk [vmem:[%s20200_s28 + $0x19b] sm:$0xf] %vm4123_vm6, %v4116_v57  ;;  %v3337_v27 = vpop.permute.xlu1 %3336 }
 0x2de   : > { %vm4069_vm15 = vcmp.gt.f32.partialorder %v4045_v46, 0.0  ;;  %v4093_v34 = vmul.f32 0.2, %v4045_v46  ;;  %v3387_v2 = vadd.f32 %v3337_v27, %v3267_v7  ;;  %v21828_v7 = vld [vmem:[%s24835_s7 + $0x10] sm:$0xff] }
 0x2df   : > { %v3814_v52 = vpop.permute.xlu0 %3813 }
 0x2e0   : > { %v4117_v40 = vsel %vm4069_vm15, %v4045_v46, %v4093_v34  ;;  %v3866_v4 = vadd.f32 %v3814_v52, %v3722_v11  ;;  %v3460_v30 = vadd.f32 %v3412_v31, %v3387_v2 }
 0x2e1   : > { %4142 = vst.msk [vmem:[%s20200_s28 + $0x1b3] sm:$0xf] %vm4123_vm6, %v4117_v40  ;;  %v3530_v26 = vpop.permute.xlu1 %3529 }
 0x2e2   : > { %v3986_v32 = vadd.f32 %v3934_v3, %v3866_v4  ;;  %v3580_v39 = vadd.f32 %v3530_v26, %v3460_v30 }
 0x2e3   : > { %v3648_v47 = vpop.permute.xlu0 %3647 }
 0x2e4   : > { %v4016_v35 = vmul.f32 %v20843_v58, %v3986_v32  ;;  %v3699_v62 = vadd.f32 %v3648_v47, %v3579_v28  ;;  %v4165_v12 = vld [vmem:[%s20200_s28 + $0x198] sm:$0x7f] }
 0x2e5   : > { %v3219_v63 = vpop.permute.xlu1 %3218  ;;  %18326 = vmatmul.mubr.msk.f32.vlgmr.msra.gmra.mrb[138].mxu0 %vm4175_vm8, %v4165_v12 }
 0x2e6   : > { %v4046_v37 = vadd.f32 %v20860_v60, %v4016_v35  ;;  %v3723_v6 = vadd.f32 %v3699_v62, %v21456_v22  ;;  %19658 = vmatpush3.bf16.msra.mxu0 %v20971_v44  ;;  %18352 = vmatprep.mubr.msk.f32.mxu0 %vm20050_vm1, %v24861_v55  ;;  %v3268_v10 = vadd.f32 %v3219_v63, %v21406_v13 }
 0x2e7   : > { %v3816_v8 = vpop.permute.xlu0 %3815  ;;  %18350 = vmatprep.subr.mxu0 %v24861_v55 }
 0x2e8   : > { %vm4070_vm0 = vcmp.gt.f32.partialorder %v4046_v37, 0.0  ;;  %v4094_v61 = vmul.f32 0.2, %v4046_v37  ;;  %v4166_v38 = vld [vmem:[%s20200_s28 + $0x1b0] sm:$0x7f]  ;;  %v3867_v17 = vadd.f32 %v3816_v8, %v3723_v6 }
 0x2e9   : > { %v3339_v18 = vpop.permute.xlu1 %3338  ;;  %18335 = vmatmul.mubr.msk.f32.vlgmr.msra.gmra.mrb[138].mxu1 %vm4175_vm8, %v4166_v38  ;;  %v6014_v38 = vld [vmem:[#allocation3] sm:$0x7f] }
 0x2ea   : > { %v4118_v24 = vsel %vm4070_vm0, %v4046_v37, %v4094_v61  ;;  %v3388_v22 = vadd.f32 %v3339_v18, %v3268_v10  ;;  %19655 = vmatpush3.bf16.msra.mxu1 %v20971_v44  ;;  %18343 = vmatprep.mubr.msk.f32.mxu1 %vm20050_vm1, %v24861_v55  ;;  %vm7852_vm0 = vcmask 97280  }
 0x2eb   : > { %4143 = vst.msk [vmem:[%s20200_s28 + $0x1cb] sm:$0xf] %vm4123_vm6, %v4118_v24  ;;  %v3650_v48 = vpop.permute.xlu0 %3649  ;;  %18341 = vmatprep.subr.mxu1 %v24861_v55  ;;  %18351 = vmatpush3.msra.mxu0 %v21437_v43 }
 0x2ec   : > { %v3700_v13 = vadd.f32 %v3650_v48, %v3580_v39  ;;  %v3461_v23 = vadd.f32 %v3413_v14, %v3388_v22  ;;  %19659 = vmatprep.subr.bf16.mxu0 %v24860_v45  ;;  %v21862_v48 = vld [vmem:[%s24830_s2] sm:$0xff] }
 0x2ed   : > { %v3221_v1 = vpop.permute.xlu1 %3220 }
 0x2ee   : > { %18342 = vmatpush3.msra.mxu1 %v21437_v43  ;;  %v3724_v15 = vadd.f32 %v3700_v13, %v21511_v5  ;;  %v3269_v42 = vadd.f32 %v3221_v1, %v21466_v33  ;;  %v24873_v43 = vld [vmem:[#allocation13_spill] sm:$0xff]  ;;  %v21873_v1 = vld [vmem:[%s24830_s2 + $0x8] sm:$0xff] }
 0x2ef   : > { %v3936_v50 = vpop.permute.xlu0 %3935  ;;  %19662 = vmatprep.subr.bf16.mxu1 %v24860_v45  ;;  %v3414_v5 = vrot.slane %v24873_v43, 4 }
 0x2f0   : > { %v3987_v59 = vadd.f32 %v3936_v50, %v3867_v17 }
 0x2f1   : > { %v3532_v54 = vpop.permute.xlu1 %3531 }
 0x2f2   : > { %v4017_v51 = vmul.f32 %v20843_v58, %v3987_v59  ;;  %v3581_v0 = vadd.f32 %v3532_v54, %v3461_v23  ;;  %v4167_v53 = vld [vmem:[%s20200_s28 + $0x1c8] sm:$0x7f]  ;;  %v21914_v59 = vld [vmem:[%s24830_s2 + $0x20] sm:$0xf] }
 0x2f3   : > { %18344 = vmatmul.mubr.msk.f32.vlgmr.msra.gmra.mrb[138].mxu1 %vm4175_vm8, %v4167_v53  ;;  %v3652_v11 = vpop.permute.xlu0 %3651 }
 0x2f4   : > { %v4047_v49 = vadd.f32 %v20860_v60, %v4017_v51  ;;  %v3701_v9 = vadd.f32 %v3652_v11, %v3581_v0  ;;  %19664 = vmatpush3.bf16.msra.mxu1 %v20971_v44  ;;  %18370 = vmatprep.mubr.msk.f32.mxu1 %vm20050_vm1, %v24861_v55 }
 0x2f5   : > { %v3341_v16 = vpop.permute.xlu1 %3340  ;;  %18368 = vmatprep.subr.mxu1 %v24861_v55 }
 0x2f6   : > { %vm4071_vm3 = vcmp.gt.f32.partialorder %v4047_v49, 0.0  ;;  %v4095_v36 = vmul.f32 0.2, %v4047_v49  ;;  %v3389_v19 = vadd.f32 %v3341_v16, %v3269_v42  ;;  %v4318_v3 = vpop.f32.mrb[130].mxu0  ;;  %v3725_v33 = vadd.f32 %v3701_v9, %v21528_v56 }
 0x2f7   : > { %v5940_v41 = vmul.f32 0.5, %v4318_v3  ;;  %v18183_v29 = vpop.f32.mrb[131].mxu0  ;;  %v3818_v25 = vpop.permute.xlu0 %3817 }
 0x2f8   : > { %v4119_v57 = vsel %vm4071_vm3, %v4047_v49, %v4095_v36  ;;  %v3462_v21 = vadd.f32 %v3414_v5, %v3389_v19  ;;  %18369 = vmatpush3.msra.mxu1 %v21828_v7  ;;  %v3868_v56 = vadd.f32 %v3818_v25, %v3724_v15  ;;  %v21890_v15 = vld [vmem:[%s24830_s2 + $0x10] sm:$0xff] }
 0x2f9   : > { %4144 = vst.msk [vmem:[%s20200_s28 + $0x1e3] sm:$0xf] %vm4123_vm6, %v4119_v57  ;;  %v3534_v46 = vpop.permute.xlu1 %3533  ;;  %5964 = vrot.lane.b32.xlu0 %v5940_v41, %s20051_s14  ;;  %19665 = vmatprep.subr.bf16.mxu1 %v24860_v45 }
 0x2fa   : > { %v3582_v34 = vadd.f32 %v3534_v46, %v3462_v21 }
 0x2fb   : > { %v3938_v27 = vpop.permute.xlu0 %3937 }
 0x2fc   : > { %v3988_v2 = vadd.f32 %v3938_v27, %v3868_v56 }
 0x2fd   : > { %v3654_v31 = vpop.permute.xlu1 %3653 }
 0x2fe   : > { %v4018_v52 = vmul.f32 %v20843_v58, %v3988_v2  ;;  %v3702_v40 = vadd.f32 %v3654_v31, %v3582_v34 }
 0x2ff   : > { %v3820_v4 = vpop.permute.xlu0 %3819 }
 0x300   : > { %v4048_v30 = vadd.f32 %v20860_v60, %v4018_v52  ;;  %v4168_v26 = vld [vmem:[%s20200_s28 + $0x1e0] sm:$0x7f]  ;;  %v3726_v28 = vadd.f32 %v3702_v40, %v21564_v20  ;;  %v3869_v47 = vadd.f32 %v3820_v4, %v3725_v33 }
 0x301   : > { %18353 = vmatmul.mubr.msk.f32.vlgmr.msra.gmra.mrb[140].mxu0 %vm4175_vm8, %v4168_v26  ;;  %v3942_v37 = vpop.permute.xlu1 %3941 }
 0x302   : > { %vm4072_vm4 = vcmp.gt.f32.partialorder %v4048_v30, 0.0  ;;  %v4096_v32 = vmul.f32 0.2, %v4048_v30  ;;  %19661 = vmatpush3.bf16.msra.mxu0 %v20971_v44  ;;  %18361 = vmatprep.mubr.msk.f32.mxu0 %vm20050_vm1, %v24861_v55 }
 0x303   : > { %v3940_v35 = vpop.permute.xlu0 %3939  ;;  %18359 = vmatprep.subr.mxu0 %v24861_v55 }
 0x304   : > { %v4120_v62 = vsel %vm4072_vm4, %v4048_v30, %v4096_v32  ;;  %v3989_v12 = vadd.f32 %v3940_v35, %v3869_v47 }
 0x305   : > { %4145 = vst.msk [vmem:[%s20200_s28 + $0x1fb] sm:$0xf] %vm4123_vm6, %v4120_v62 }
 0x306   : > { %v4019_v20 = vmul.f32 %v20843_v58, %v3989_v12  ;;  %18360 = vmatpush3.msra.mxu0 %v21828_v7 }
 0x307   : > { %v3822_v63 = vpop.permute.xlu0 %3821  ;;  %18382 = vmatprep.subr.mxu0 %v24861_v55 }
 0x308   : > { %v4049_v6 = vadd.f32 %v20860_v60, %v4019_v20  ;;  %v3870_v8 = vadd.f32 %v3822_v63, %v3726_v28 }
 0x30a   : > { %vm4073_vm5 = vcmp.gt.f32.partialorder %v4049_v6, 0.0  ;;  %v4097_v61 = vmul.f32 0.2, %v4049_v6  ;;  %v3990_v10 = vadd.f32 %v3942_v37, %v3870_v8  ;;  %v16641_v8 = vld [vmem:[%s24834_s6 + $0x4] sm:$0xf] }
 0x30c   : > { %v4121_v18 = vsel %vm4073_vm5, %v4049_v6, %v4097_v61  ;;  %v4020_v24 = vmul.f32 %v20843_v58, %v3990_v10  ;;  %v4169_v39 = vld [vmem:[%s20200_s28 + $0x1f8] sm:$0x7f] }
 0x30d   : > { %4146 = vst.msk [vmem:[%s20200_s28 + $0x213] sm:$0xf] %vm4123_vm6, %v4121_v18  ;;  %18362 = vmatmul.mubr.msk.f32.vlgmr.msra.gmra.mrb[140].mxu0 %vm4175_vm8, %v4169_v39 }
 0x30e   : > { %v4050_v22 = vadd.f32 %v20860_v60, %v4020_v24  ;;  %v4464_v14 = vpop.f32.mrb[130].mxu1  ;;  %18383 = vmatpush3.msk.msra.mxu0 %vm6049_vm7, %v6014_v38  ;;  %18384 = vmatprep.mubr.msk.f32.mxu0 %vm20050_vm1, %v24861_v55 }
 0x30f   : > { %v5941_v58 = vmul.f32 0.5, %v4464_v14  ;;  %v18201_v13 = vpop.f32.mrb[131].mxu1  ;;  %18416 = vmatprep.subr.mxu0 %v24861_v55 }
 0x310   : > { %vm4074_vm10 = vcmp.gt.f32.partialorder %v4050_v22, 0.0  ;;  %v4098_v60 = vmul.f32 0.2, %v4050_v22 }
 0x311   : > { %5966 = vrot.lane.b32.xlu1 %v5941_v58, %s20051_s14  ;;  %18385 = vmatmul.mubr.msk.f32.vlgmr.msra.gmra.mrb[142].mxu0 %vm6033_vm9, %v21862_v48 }
 0x312   : > { %v4122_v23 = vsel %vm4074_vm10, %v4050_v22, %v4098_v60  ;;  %18387 = vmatprep.mubr.msk.f32.mxu0 %vm20050_vm1, %v24861_v55 }
 0x313   : > { %4147 = vst.msk [vmem:[%s20200_s28 + $0x22b] sm:$0xf] %vm4123_vm6, %v4122_v23  ;;  %v16640_v23 = vld [vmem:[%s24833_s5 + $0x4] sm:$0xf] }
 0x314   : > { %v4170_v17 = vld [vmem:[%s20200_s28 + $0x210] sm:$0x7f] }
 0x315   : > { %18371 = vmatmul.mubr.msk.f32.vlgmr.msra.gmra.mrb[140].mxu1 %vm4175_vm8, %v4170_v17  ;;  %18388 = vmatmul.mubr.msk.f32.gmra.mrb[144].mxu0 %vm6033_vm9, %v21873_v1 }
 0x316   : > { %19667 = vmatpush3.bf16.msra.mxu1 %v20971_v44  ;;  %18379 = vmatprep.mubr.msk.f32.mxu1 %vm20050_vm1, %v24861_v55  ;;  %v21900_v44 = vld [vmem:[%s24830_s2 + $0x18] sm:$0xff] }
 0x317   : > { %18377 = vmatprep.subr.mxu1 %v24861_v55  ;;  %18390 = vmatprep.mubr.msk.f32.mxu0 %vm20050_vm1, %v24861_v55 }
 0x319   : > { %18391 = vmatmul.mubr.msk.f32.gmra.mrb[146].mxu0 %vm6033_vm9, %v21890_v15 }
 0x31a   : > { %18378 = vmatpush3.msra.mxu1 %v21828_v7  ;;  %18393 = vmatprep.mubr.msk.f32.mxu0 %vm20050_vm1, %v24861_v55  ;;  %v4171_v50 = vld [vmem:[%s20200_s28 + $0x228] sm:$0x7f] }
 0x31b   : > { %18399 = vmatprep.subr.mxu1 %v24861_v55 }
 0x31d   : > { %18380 = vmatmul.mubr.msk.f32.vlgmr.msra.gmra.mrb[140].mxu1 %vm4175_vm8, %v4171_v50  ;;  %18394 = vmatmul.mubr.msk.f32.gmra.mrb[148].mxu0 %vm6033_vm9, %v21900_v44 }
 0x31e   : > { %18401 = vmatprep.mubr.msk.f32.mxu1 %vm20050_vm1, %v24861_v55  ;;  %18396 = vmatprep.mubr.msk.f32.mxu0 %vm20050_vm1, %v24861_v55 }
 0x321   : > { %18397 = vmatmul.mubr.msk.f32.gmra.mrb[150].mxu0 %vm6033_vm9, %v21914_v59 }
 0x322   : > { %18418 = vmatprep.mubr.msk.f32.mxu0 %vm20050_vm1, %v24861_v55 }
 0x326   : > { %v4610_v54 = vpop.f32.mrb[132].mxu0 }
 0x327   : > { %v5942_v51 = vmul.f32 0.5, %v4610_v54  ;;  %v18219_v0 = vpop.f32.mrb[133].mxu0 }
 0x329   : > { %5968 = vrot.lane.b32.xlu0 %v5942_v51, %s20051_s14 }
 0x33e   : > { %v4756_v53 = vpop.f32.mrb[132].mxu1 }
 0x33f   : > { %v5943_v11 = vmul.f32 0.5, %v4756_v53  ;;  %v18237_v42 = vpop.f32.mrb[133].mxu1 }
 0x341   : > { %5970 = vrot.lane.b32.xlu1 %v5943_v11, %s20051_s14 }
 0x356   : > { %v4902_v49 = vpop.f32.mrb[134].mxu0 }
 0x357   : > { %v5944_v9 = vmul.f32 0.5, %v4902_v49  ;;  %v18255_v43 = vpop.f32.mrb[135].mxu0 }
 0x359   : > { %5972 = vrot.lane.b32.xlu0 %v5944_v9, %s20051_s14 }
 0x36b   : > { %v5965_v5 = vpop.permute.xlu0 %5964 }
 0x36c   : > { %6002 = vst.msk [vmem:[#allocation3 + $0x8] sm:$0x7f] %vm6001_vm11, %v5965_v5 }
 0x372   : > { %v5048_v16 = vpop.f32.mrb[134].mxu1 }
 0x373   : > { %v5945_v36 = vmul.f32 0.5, %v5048_v16  ;;  %v18273_v19 = vpop.f32.mrb[135].mxu1  ;;  %v6015_v3 = vld [vmem:[#allocation3 + $0x8] sm:$0x7f] }
 0x374   : > { %18400 = vmatpush3.msk.msra.mxu1 %vm6049_vm7, %v6015_v3 }
 0x375   : > { %5974 = vrot.lane.b32.xlu1 %v5945_v36, %s20051_s14  ;;  %18402 = vmatmul.mubr.msk.f32.vlgmr.msra.gmra.mrb[142].mxu1 %vm6033_vm9, %v21862_v48 }
 0x376   : > { %18404 = vmatprep.mubr.msk.f32.mxu1 %vm20050_vm1, %v24861_v55  ;;  %18433 = vmatprep.subr.mxu1 %v24861_v55 }
 0x379   : > { %18405 = vmatmul.mubr.msk.f32.gmra.mrb[144].mxu1 %vm6033_vm9, %v21873_v1 }
 0x37a   : > { %18407 = vmatprep.mubr.msk.f32.mxu1 %vm20050_vm1, %v24861_v55 }
 0x37d   : > { %18408 = vmatmul.mubr.msk.f32.gmra.mrb[146].mxu1 %vm6033_vm9, %v21890_v15 }
 0x37e   : > { %18410 = vmatprep.mubr.msk.f32.mxu1 %vm20050_vm1, %v24861_v55 }
 0x381   : > { %18411 = vmatmul.mubr.msk.f32.gmra.mrb[148].mxu1 %vm6033_vm9, %v21900_v44 }
 0x382   : > { %18413 = vmatprep.mubr.msk.f32.mxu1 %vm20050_vm1, %v24861_v55 }
 0x383   : > { %v5967_v33 = vpop.permute.xlu1 %5966 }
 0x384   : > { %6003 = vst.msk [vmem:[#allocation3 + $0x10] sm:$0x7f] %vm6001_vm11, %v5967_v33 }
 0x385   : > { %18414 = vmatmul.mubr.msk.f32.gmra.mrb[150].mxu1 %vm6033_vm9, %v21914_v59 }
 0x386   : > { %18435 = vmatprep.mubr.msk.f32.mxu1 %vm20050_vm1, %v24861_v55 }
 0x388   : > { %v5194_v41 = vpop.f32.mrb[136].mxu0 }
 0x389   : > { %v5946_v29 = vmul.f32 0.5, %v5194_v41  ;;  %v18291_v25 = vpop.f32.mrb[137].mxu0 }
 0x38b   : > { %5976 = vrot.lane.b32.xlu0 %v5946_v29, %s20051_s14  ;;  %v6016_v57 = vld [vmem:[#allocation3 + $0x10] sm:$0x7f] }
 0x38c   : > { %18417 = vmatpush3.msk.msra.mxu0 %vm6049_vm7, %v6016_v57 }
 0x38d   : > { %18419 = vmatmul.mubr.msk.f32.vlgmr.msra.gmra.mrb[152].mxu0 %vm6033_vm9, %v21862_v48  ;;  %18450 = vmatprep.subr.mxu0 %v24861_v55 }
 0x38e   : > { %18421 = vmatprep.mubr.msk.f32.mxu0 %vm20050_vm1, %v24861_v55 }
 0x391   : > { %18422 = vmatmul.mubr.msk.f32.gmra.mrb[154].mxu0 %vm6033_vm9, %v21873_v1 }
 0x392   : > { %18424 = vmatprep.mubr.msk.f32.mxu0 %vm20050_vm1, %v24861_v55 }
 0x395   : > { %18425 = vmatmul.mubr.msk.f32.gmra.mrb[156].mxu0 %vm6033_vm9, %v21890_v15 }
 0x396   : > { %18427 = vmatprep.mubr.msk.f32.mxu0 %vm20050_vm1, %v24861_v55 }
 0x399   : > { %18428 = vmatmul.mubr.msk.f32.gmra.mrb[158].mxu0 %vm6033_vm9, %v21900_v44 }
 0x39a   : > { %v5340_v21 = vpop.f32.mrb[136].mxu1  ;;  %18430 = vmatprep.mubr.msk.f32.mxu0 %vm20050_vm1, %v24861_v55 }
 0x39b   : > { %v5947_v7 = vmul.f32 0.5, %v5340_v21  ;;  %v18309_v46 = vpop.f32.mrb[137].mxu1  ;;  %v5969_v56 = vpop.permute.xlu0 %5968 }
 0x39c   : > { %6004 = vst.msk [vmem:[#allocation3 + $0x18] sm:$0x7f] %vm6001_vm11, %v5969_v56 }
 0x39d   : > { %5978 = vrot.lane.b32.xlu1 %v5947_v7, %s20051_s14  ;;  %18431 = vmatmul.mubr.msk.f32.gmra.mrb[160].mxu0 %vm6033_vm9, %v21914_v59  ;;  %v6027_v7 = vld [vmem:[#allocation3 + $0x68] sm:$0x7f] }
 0x39e   : > { %18452 = vmatprep.mubr.msk.f32.mxu0 %vm20050_vm1, %v24861_v55 }
 0x3a3   : > { %v6017_v27 = vld [vmem:[#allocation3 + $0x18] sm:$0x7f] }
 0x3a4   : > { %18434 = vmatpush3.msk.msra.mxu1 %vm6049_vm7, %v6017_v27 }
 0x3a5   : > { %18436 = vmatmul.mubr.msk.f32.vlgmr.msra.gmra.mrb[152].mxu1 %vm6033_vm9, %v21862_v48  ;;  %18467 = vmatprep.subr.mxu1 %v24861_v55 }
 0x3a6   : > { %18438 = vmatprep.mubr.msk.f32.mxu1 %vm20050_vm1, %v24861_v55 }
 0x3a9   : > { %18439 = vmatmul.mubr.msk.f32.gmra.mrb[154].mxu1 %vm6033_vm9, %v21873_v1 }
 0x3aa   : > { %18441 = vmatprep.mubr.msk.f32.mxu1 %vm20050_vm1, %v24861_v55 }
 0x3ad   : > { %18442 = vmatmul.mubr.msk.f32.gmra.mrb[156].mxu1 %vm6033_vm9, %v21890_v15 }
 0x3ae   : > { %18444 = vmatprep.mubr.msk.f32.mxu1 %vm20050_vm1, %v24861_v55 }
 0x3b1   : > { %18445 = vmatmul.mubr.msk.f32.gmra.mrb[158].mxu1 %vm6033_vm9, %v21900_v44 }
 0x3b2   : > { %18447 = vmatprep.mubr.msk.f32.mxu1 %vm20050_vm1, %v24861_v55 }
 0x3b3   : > { %v5971_v34 = vpop.permute.xlu1 %5970 }
 0x3b4   : > { %6005 = vst.msk [vmem:[#allocation3 + $0x20] sm:$0x7f] %vm6001_vm11, %v5971_v34 }
 0x3b5   : > { %18448 = vmatmul.mubr.msk.f32.gmra.mrb[160].mxu1 %vm6033_vm9, %v21914_v59 }
 0x3b6   : > { %18469 = vmatprep.mubr.msk.f32.mxu1 %vm20050_vm1, %v24861_v55 }
 0x3b8   : > { %v5486_v2 = vpop.f32.mrb[138].mxu0 }
 0x3b9   : > { %v5948_v31 = vmul.f32 0.5, %v5486_v2  ;;  %v18327_v52 = vpop.f32.mrb[139].mxu0 }
 0x3bb   : > { %5980 = vrot.lane.b32.xlu0 %v5948_v31, %s20051_s14  ;;  %v6018_v40 = vld [vmem:[#allocation3 + $0x20] sm:$0x7f] }
 0x3bc   : > { %18451 = vmatpush3.msk.msra.mxu0 %vm6049_vm7, %v6018_v40 }
 0x3bd   : > { %18453 = vmatmul.mubr.msk.f32.vlgmr.msra.gmra.mrb[162].mxu0 %vm6033_vm9, %v21862_v48  ;;  %18484 = vmatprep.subr.mxu0 %v24861_v55 }
 0x3be   : > { %18455 = vmatprep.mubr.msk.f32.mxu0 %vm20050_vm1, %v24861_v55 }
 0x3c1   : > { %18456 = vmatmul.mubr.msk.f32.gmra.mrb[164].mxu0 %vm6033_vm9, %v21873_v1 }
 0x3c2   : > { %18458 = vmatprep.mubr.msk.f32.mxu0 %vm20050_vm1, %v24861_v55 }
 0x3c5   : > { %18459 = vmatmul.mubr.msk.f32.gmra.mrb[166].mxu0 %vm6033_vm9, %v21890_v15 }
 0x3c6   : > { %v5632_v4 = vpop.f32.mrb[138].mxu1  ;;  %18461 = vmatprep.mubr.msk.f32.mxu0 %vm20050_vm1, %v24861_v55 }
 0x3c7   : > { %v5949_v30 = vmul.f32 0.5, %v5632_v4  ;;  %v18345_v26 = vpop.f32.mrb[139].mxu1 }
 0x3c9   : > { %5982 = vrot.lane.b32.xlu1 %v5949_v30, %s20051_s14  ;;  %18462 = vmatmul.mubr.msk.f32.gmra.mrb[168].mxu0 %vm6033_vm9, %v21900_v44 }
 0x3ca   : > { %18464 = vmatprep.mubr.msk.f32.mxu0 %vm20050_vm1, %v24861_v55 }
 0x3cb   : > { %v5973_v28 = vpop.permute.xlu0 %5972 }
 0x3cc   : > { %6006 = vst.msk [vmem:[#allocation3 + $0x28] sm:$0x7f] %vm6001_vm11, %v5973_v28 }
 0x3cd   : > { %18465 = vmatmul.mubr.msk.f32.gmra.mrb[170].mxu0 %vm6033_vm9, %v21914_v59 }
 0x3ce   : > { %18486 = vmatprep.mubr.msk.f32.mxu0 %vm20050_vm1, %v24861_v55 }
 0x3d3   : > { %v6019_v32 = vld [vmem:[#allocation3 + $0x28] sm:$0x7f] }
 0x3d4   : > { %18468 = vmatpush3.msk.msra.mxu1 %vm6049_vm7, %v6019_v32 }
 0x3d5   : > { %18470 = vmatmul.mubr.msk.f32.vlgmr.msra.gmra.mrb[162].mxu1 %vm6033_vm9, %v21862_v48  ;;  %18501 = vmatprep.subr.mxu1 %v24861_v55 }
 0x3d6   : > { %18472 = vmatprep.mubr.msk.f32.mxu1 %vm20050_vm1, %v24861_v55 }
 0x3d9   : > { %18473 = vmatmul.mubr.msk.f32.gmra.mrb[164].mxu1 %vm6033_vm9, %v21873_v1 }
 0x3da   : > { %18475 = vmatprep.mubr.msk.f32.mxu1 %vm20050_vm1, %v24861_v55 }
 0x3dd   : > { %18476 = vmatmul.mubr.msk.f32.gmra.mrb[166].mxu1 %vm6033_vm9, %v21890_v15 }
 0x3de   : > { %18478 = vmatprep.mubr.msk.f32.mxu1 %vm20050_vm1, %v24861_v55 }
 0x3e0   : > { %v5778_v47 = vpop.f32.mrb[140].mxu0 }
 0x3e1   : > { %v5950_v35 = vmul.f32 0.5, %v5778_v47  ;;  %v18363_v62 = vpop.f32.mrb[141].mxu0  ;;  %18479 = vmatmul.mubr.msk.f32.gmra.mrb[168].mxu1 %vm6033_vm9, %v21900_v44 }
 0x3e2   : > { %18481 = vmatprep.mubr.msk.f32.mxu1 %vm20050_vm1, %v24861_v55 }
 0x3e3   : > { %5984 = vrot.lane.b32.xlu0 %v5950_v35, %s20051_s14 }
 0x3e4   : > { %v22040_v12 = vpop.f32.mrb[142].mxu0 }
 0x3e5   : > { %18482 = vmatmul.mubr.msk.f32.gmra.mrb[170].mxu1 %vm6033_vm9, %v21914_v59  ;;  %v7355_v20 = vrot.slane %v22040_v12, 4  ;;  %v18386_v63 = vpop.f32.mrb[143].mxu0 }
 0x3e6   : > { %18503 = vmatprep.mubr.msk.f32.mxu1 %vm20050_vm1, %v24861_v55 }
 0x3e7   : > { %v5975_v37 = vpop.permute.xlu1 %5974  ;;  %7367 = vrot.lane.b32.xlu0 %v7355_v20, %s20053_s24 }
 0x3e8   : > { %6007 = vst.msk [vmem:[#allocation3 + $0x30] sm:$0x7f] %vm6001_vm11, %v5975_v37  ;;  %v6124_v6 = vpop.f32.mrb[144].mxu0  ;;  %v7850_v37 = vld [vmem:[%s24836_s8] sm:$0xff] }
 0x3e9   : > { %v18389_v61 = vpop.f32.mrb[145].mxu0 }
 0x3eb   : > { %7799 = vperm.xlu0 %20027, %v16641_v8  }
 0x3ec   : > { %v6129_v10 = vpop.f32.mrb[146].mxu0 }
 0x3ed   : > { %v18392_v38 = vpop.f32.mrb[147].mxu0 }
 0x3ef   : > { %v6020_v18 = vld [vmem:[#allocation3 + $0x30] sm:$0x7f] }
 0x3f0   : > { %v5924_v24 = vpop.f32.mrb[140].mxu1  ;;  %18485 = vmatpush3.msk.msra.mxu0 %vm6049_vm7, %v6020_v18  ;;  %v6133_v39 = vpop.f32.mrb[148].mxu0 }
 0x3f1   : > { %v5951_v22 = vmul.f32 0.5, %v5924_v24  ;;  %v18381_v14 = vpop.f32.mrb[141].mxu1  ;;  %18487 = vmatmul.mubr.msk.f32.vlgmr.msra.gmra.mrb[172].mxu0 %vm6033_vm9, %v21862_v48  ;;  %18518 = vmatprep.subr.mxu0 %v24861_v55  ;;  %v18395_v58 = vpop.f32.mrb[149].mxu0 }
 0x3f2   : > { %18489 = vmatprep.mubr.msk.f32.mxu0 %vm20050_vm1, %v24861_v55 }
 0x3f3   : > { %5986 = vrot.lane.b32.xlu1 %v5951_v22, %s20051_s14 }
 0x3f4   : > { %v6137_v13 = vpop.f32.mrb[150].mxu0 }
 0x3f5   : > { %18490 = vmatmul.mubr.msk.f32.gmra.mrb[174].mxu0 %vm6033_vm9, %v21873_v1  ;;  %v18398_v60 = vpop.f32.mrb[151].mxu0 }
 0x3f6   : > { %18492 = vmatprep.mubr.msk.f32.mxu0 %vm20050_vm1, %v24861_v55 }
 0x3f7   : > { %7427 = vrot.lane.b32.xlu1 %v6124_v6, %s20054_s25  ;;  %v7851_v6 = vld [vmem:[%s24836_s8 + $0x8] sm:$0xf] }
 0x3f8   : > { %v22233_v10 = vpack.c.bf16 %v7851_v6, %v7850_v37 }
 0x3f9   : > { %18493 = vmatmul.mubr.msk.f32.gmra.mrb[176].mxu0 %vm6033_vm9, %v21890_v15 }
 0x3fa   : > { %18495 = vmatprep.mubr.msk.f32.mxu0 %vm20050_vm1, %v24861_v55 }
 0x3fb   : > { %7780 = vperm.xlu1 %20026, %v16640_v23  }
 0x3fd   : > { %18496 = vmatmul.mubr.msk.f32.gmra.mrb[178].mxu0 %vm6033_vm9, %v21900_v44  ;;  %v5977_v17 = vpop.permute.xlu0 %5976 }
 0x3fe   : > { %6008 = vst.msk [vmem:[#allocation3 + $0x38] sm:$0x7f] %vm6001_vm11, %v5977_v17  ;;  %18498 = vmatprep.mubr.msk.f32.mxu0 %vm20050_vm1, %v24861_v55 }
 0x401   : > { %18499 = vmatmul.mubr.msk.f32.gmra.mrb[180].mxu0 %vm6033_vm9, %v21914_v59 }
 0x402   : > { %18520 = vmatprep.mubr.msk.f32.mxu0 %vm20050_vm1, %v24861_v55 }
 0x405   : > { %v6021_v50 = vld [vmem:[#allocation3 + $0x38] sm:$0x7f] }
 0x406   : > { %18502 = vmatpush3.msk.msra.mxu1 %vm6049_vm7, %v6021_v50 }
 0x407   : > { %18504 = vmatmul.mubr.msk.f32.vlgmr.msra.gmra.mrb[172].mxu1 %vm6033_vm9, %v21862_v48  ;;  %18535 = vmatprep.subr.mxu1 %v24861_v55 }
 0x408   : > { %18506 = vmatprep.mubr.msk.f32.mxu1 %vm20050_vm1, %v24861_v55 }
 0x40b   : > { %18507 = vmatmul.mubr.msk.f32.gmra.mrb[174].mxu1 %vm6033_vm9, %v21873_v1 }
 0x40c   : > { %18509 = vmatprep.mubr.msk.f32.mxu1 %vm20050_vm1, %v24861_v55 }
 0x40f   : > { %v5979_v54 = vpop.permute.xlu1 %5978  ;;  %18510 = vmatmul.mubr.msk.f32.gmra.mrb[176].mxu1 %vm6033_vm9, %v21890_v15 }
 0x410   : > { %6009 = vst.msk [vmem:[#allocation3 + $0x40] sm:$0x7f] %vm6001_vm11, %v5979_v54  ;;  %18512 = vmatprep.mubr.msk.f32.mxu1 %vm20050_vm1, %v24861_v55 }
 0x413   : > { %18513 = vmatmul.mubr.msk.f32.gmra.mrb[178].mxu1 %vm6033_vm9, %v21900_v44 }
 0x414   : > { %18515 = vmatprep.mubr.msk.f32.mxu1 %vm20050_vm1, %v24861_v55 }
 0x417   : > { %18516 = vmatmul.mubr.msk.f32.gmra.mrb[180].mxu1 %vm6033_vm9, %v21914_v59  ;;  %v6022_v51 = vld [vmem:[#allocation3 + $0x40] sm:$0x7f] }
 0x418   : > { %18519 = vmatpush3.msk.msra.mxu0 %vm6049_vm7, %v6022_v51  ;;  %18537 = vmatprep.mubr.msk.f32.mxu1 %vm20050_vm1, %v24861_v55 }
 0x419   : > { %18521 = vmatmul.mubr.msk.f32.vlgmr.msra.gmra.mrb[182].mxu0 %vm6033_vm9, %v21862_v48  ;;  %18552 = vmatprep.subr.mxu0 %v24861_v55 }
 0x41a   : > { %18523 = vmatprep.mubr.msk.f32.mxu0 %vm20050_vm1, %v24861_v55 }
 0x41d   : > { %18524 = vmatmul.mubr.msk.f32.gmra.mrb[184].mxu0 %vm6033_vm9, %v21873_v1 }
 0x41e   : > { %18526 = vmatprep.mubr.msk.f32.mxu0 %vm20050_vm1, %v24861_v55 }
 0x421   : > { %18527 = vmatmul.mubr.msk.f32.gmra.mrb[186].mxu0 %vm6033_vm9, %v21890_v15 }
 0x422   : > { %18529 = vmatprep.mubr.msk.f32.mxu0 %vm20050_vm1, %v24861_v55 }
 0x425   : > { %18530 = vmatmul.mubr.msk.f32.gmra.mrb[188].mxu0 %vm6033_vm9, %v21900_v44 }
 0x426   : > { %18532 = vmatprep.mubr.msk.f32.mxu0 %vm20050_vm1, %v24861_v55 }
 0x429   : > { %18533 = vmatmul.mubr.msk.f32.gmra.mrb[190].mxu0 %vm6033_vm9, %v21914_v59 }
 0x42a   : > { %18554 = vmatprep.mubr.msk.f32.mxu0 %vm20050_vm1, %v24861_v55 }
 0x42d   : > { %v5981_v0 = vpop.permute.xlu0 %5980 }
 0x42e   : > { %6010 = vst.msk [vmem:[#allocation3 + $0x48] sm:$0x7f] %vm6001_vm11, %v5981_v0 }
 0x435   : > { %v6023_v53 = vld [vmem:[#allocation3 + $0x48] sm:$0x7f] }
 0x436   : > { %18536 = vmatpush3.msk.msra.mxu1 %vm6049_vm7, %v6023_v53 }
 0x437   : > { %18538 = vmatmul.mubr.msk.f32.vlgmr.msra.gmra.mrb[182].mxu1 %vm6033_vm9, %v21862_v48  ;;  %18569 = vmatprep.subr.mxu1 %v24861_v55 }
 0x438   : > { %18540 = vmatprep.mubr.msk.f32.mxu1 %vm20050_vm1, %v24861_v55 }
 0x43b   : > { %v5983_v11 = vpop.permute.xlu1 %5982  ;;  %18541 = vmatmul.mubr.msk.f32.gmra.mrb[184].mxu1 %vm6033_vm9, %v21873_v1 }
 0x43c   : > { %6011 = vst.msk [vmem:[#allocation3 + $0x50] sm:$0x7f] %vm6001_vm11, %v5983_v11  ;;  %18543 = vmatprep.mubr.msk.f32.mxu1 %vm20050_vm1, %v24861_v55 }
 0x43f   : > { %18544 = vmatmul.mubr.msk.f32.gmra.mrb[186].mxu1 %vm6033_vm9, %v21890_v15 }
 0x440   : > { %18546 = vmatprep.mubr.msk.f32.mxu1 %vm20050_vm1, %v24861_v55 }
 0x443   : > { %18547 = vmatmul.mubr.msk.f32.gmra.mrb[188].mxu1 %vm6033_vm9, %v21900_v44  ;;  %v6024_v42 = vld [vmem:[#allocation3 + $0x50] sm:$0x7f] }
 0x444   : > { %18553 = vmatpush3.msk.msra.mxu0 %vm6049_vm7, %v6024_v42  ;;  %18549 = vmatprep.mubr.msk.f32.mxu1 %vm20050_vm1, %v24861_v55 }
 0x445   : > { %18555 = vmatmul.mubr.msk.f32.vlgmr.msra.gmra.mrb[192].mxu0 %vm6033_vm9, %v21862_v48  ;;  %18586 = vmatprep.subr.mxu0 %v24861_v55 }
 0x446   : > { %18557 = vmatprep.mubr.msk.f32.mxu0 %vm20050_vm1, %v24861_v55 }
 0x447   : > { %18550 = vmatmul.mubr.msk.f32.gmra.mrb[190].mxu1 %vm6033_vm9, %v21914_v59 }
 0x448   : > { %v22153_v49 = vpop.f32.mrb[142].mxu1  ;;  %18571 = vmatprep.mubr.msk.f32.mxu1 %vm20050_vm1, %v24861_v55 }
 0x449   : > { %v7356_v9 = vrot.slane %v22153_v49, 4  ;;  %18558 = vmatmul.mubr.msk.f32.gmra.mrb[194].mxu0 %vm6033_vm9, %v21873_v1  ;;  %v18403_v43 = vpop.f32.mrb[143].mxu1 }
 0x44a   : > { %18560 = vmatprep.mubr.msk.f32.mxu0 %vm20050_vm1, %v24861_v55 }
 0x44b   : > { %7369 = vrot.lane.b32.xlu0 %v7356_v9, %s20053_s24 }
 0x44c   : > { %v6214_v5 = vpop.f32.mrb[144].mxu1 }
 0x44d   : > { %18561 = vmatmul.mubr.msk.f32.gmra.mrb[196].mxu0 %vm6033_vm9, %v21890_v15  ;;  %7429 = vrot.lane.b32.xlu1 %v6214_v5, %s20054_s25  ;;  %v18406_v16 = vpop.f32.mrb[145].mxu1  ;;  %v7476_v30 = vrot.slane %v6214_v5, 4 }
 0x44e   : > { %18563 = vmatprep.mubr.msk.f32.mxu0 %vm20050_vm1, %v24861_v55 }
 0x450   : > { %v6219_v36 = vpop.f32.mrb[146].mxu1 }
 0x451   : > { %v7572_v19 = vrot.slane %v6219_v36, 4  ;;  %18564 = vmatmul.mubr.msk.f32.gmra.mrb[198].mxu0 %vm6033_vm9, %v21900_v44  ;;  %7524 = vrot.lane.b32.xlu0 %v6219_v36, %s20053_s24  ;;  %v18409_v3 = vpop.f32.mrb[147].mxu1 }
 0x452   : > { %18566 = vmatprep.mubr.msk.f32.mxu0 %vm20050_vm1, %v24861_v55 }
 0x453   : > { %7584 = vrot.lane.b32.xlu1 %v7572_v19, %s20054_s25 }
 0x454   : > { %v6224_v33 = vpop.f32.mrb[148].mxu1 }
 0x455   : > { %18567 = vmatmul.mubr.msk.f32.gmra.mrb[200].mxu0 %vm6033_vm9, %v21914_v59  ;;  %v5985_v41 = vpop.permute.xlu0 %5984  ;;  %v18412_v29 = vpop.f32.mrb[149].mxu1 }
 0x456   : > { %6012 = vst.msk [vmem:[#allocation3 + $0x58] sm:$0x7f] %vm6001_vm11, %v5985_v41  ;;  %18588 = vmatprep.mubr.msk.f32.mxu0 %vm20050_vm1, %v24861_v55 }
 0x458   : > { %v6228_v25 = vpop.f32.mrb[150].mxu1 }
 0x459   : > { %v18415_v57 = vpop.f32.mrb[151].mxu1  ;;  %v7368_v34 = vpop.permute.xlu0 %7367 }
 0x45a   : > { %v7403_v40 = vadd.f32 %v7368_v34, %v22040_v12 }
 0x45d   : > { %v6025_v21 = vld [vmem:[#allocation3 + $0x58] sm:$0x7f] }
 0x45e   : > { %18570 = vmatpush3.msk.msra.mxu1 %vm6049_vm7, %v6025_v21 }
 0x45f   : > { %18572 = vmatmul.mubr.msk.f32.vlgmr.msra.gmra.mrb[192].mxu1 %vm6033_vm9, %v21862_v48  ;;  %18603 = vmatprep.subr.mxu1 %v24861_v55 }
 0x460   : > { %v22183_v46 = vpop.f32.mrb[152].mxu0  ;;  %18574 = vmatprep.mubr.msk.f32.mxu1 %vm20050_vm1, %v24861_v55  ;;  %18604 = vmatpush3.msk.msra.mxu1 %vm6049_vm7, %v6027_v7 }
 0x461   : > { %v7357_v56 = vrot.slane %v22183_v46, 4  ;;  %v18420_v27 = vpop.f32.mrb[153].mxu0  ;;  %19672 = vmatprep.subr.bf16.mxu1 %v24860_v45 }
 0x463   : > { %7371 = vrot.lane.b32.xlu0 %v7357_v56, %s20053_s24  ;;  %18575 = vmatmul.mubr.msk.f32.gmra.mrb[194].mxu1 %vm6033_vm9, %v21873_v1 }
 0x464   : > { %v22193_v2 = vpop.f32.mrb[154].mxu0  ;;  %18577 = vmatprep.mubr.msk.f32.mxu1 %vm20050_vm1, %v24861_v55 }
 0x465   : > { %v5987_v31 = vpop.permute.xlu1 %5986  ;;  %7431 = vrot.lane.b32.xlu1 %v22193_v2, %s20054_s25  ;;  %v18423_v52 = vpop.f32.mrb[155].mxu0 }
 0x466   : > { %6013 = vst.msk [vmem:[#allocation3 + $0x60] sm:$0x7f] %vm6001_vm11, %v5987_v31 }
 0x467   : > { %18578 = vmatmul.mubr.msk.f32.gmra.mrb[196].mxu1 %vm6033_vm9, %v21890_v15 }
 0x468   : > { %v6310_v4 = vpop.f32.mrb[156].mxu0  ;;  %18580 = vmatprep.mubr.msk.f32.mxu1 %vm20050_vm1, %v24861_v55 }
 0x469   : > { %v7573_v26 = vrot.slane %v6310_v4, 4  ;;  %7526 = vrot.lane.b32.xlu0 %v6310_v4, %s20053_s24  ;;  %v18426_v28 = vpop.f32.mrb[157].mxu0  ;;  %v7428_v32 = vpop.permute.xlu1 %7427 }
 0x46a   : > { %v7463_v47 = vadd.f32 %v7428_v32, %v7403_v40  ;;  %v22329_v27 = vpop.permute.xlu0 %7799 }
 0x46b   : > { %7586 = vrot.lane.b32.xlu1 %v7573_v26, %s20054_s25  ;;  %18581 = vmatmul.mubr.msk.f32.gmra.mrb[198].mxu1 %vm6033_vm9, %v21900_v44  ;;  %v7477_v26 = vrot.slane %v22193_v2, 4 }
 0x46c   : > { %v22209_v35 = vpop.f32.mrb[158].mxu0  ;;  %18583 = vmatprep.mubr.msk.f32.mxu1 %vm20050_vm1, %v24861_v55  ;;  %v22213_v62 = vadd.f32 %v7476_v30, %v7463_v47 }
 0x46d   : > { %v7656_v12 = vrot.slane %v22209_v35, 4  ;;  %v6026_v20 = vld [vmem:[#allocation3 + $0x60] sm:$0x7f]  ;;  %v18429_v63 = vpop.f32.mrb[159].mxu0 }
 0x46e   : > { %18587 = vmatpush3.msk.msra.mxu0 %vm6049_vm7, %v6026_v20 }
 0x46f   : > { %18589 = vmatmul.mubr.msk.f32.vlgmr.msra.gmra.mrb[202].mxu0 %vm6033_vm9, %v21862_v48  ;;  %7668 = vrot.lane.b32.xlu1 %v7656_v12, %s20053_s24 }
 0x470   : > { %18584 = vmatmul.mubr.msk.f32.gmra.mrb[200].mxu1 %vm6033_vm9, %v21914_v59  ;;  %v6320_v8 = vpop.f32.mrb[160].mxu0  ;;  %18591 = vmatprep.mubr.msk.f32.mxu0 %vm20050_vm1, %v24861_v55 }
 0x471   : > { %7728 = vrot.lane.b32.xlu0 %v6320_v8, %s20054_s25  ;;  %18605 = vmatprep.mubr.msk.f32.mxu1 %vm20050_vm1, %v24861_v55  ;;  %v18432_v61 = vpop.f32.mrb[161].mxu0 }
 0x472   : > { %19668 = vmatprep.subr.bf16.mxu0 %v24860_v45 }
 0x473   : > { %18592 = vmatmul.mubr.msk.f32.gmra.mrb[204].mxu0 %vm6033_vm9, %v21873_v1 }
 0x474   : > { %18594 = vmatprep.mubr.msk.f32.mxu0 %vm20050_vm1, %v24861_v55  ;;  %18606 = vmatmul.mubr.msk.f32.vlgmr.msra.gmra.mrb[202].mxu1 %vm6033_vm9, %v21862_v48 }
 0x475   : > { %18608 = vmatprep.mubr.msk.f32.mxu1 %vm20050_vm1, %v24861_v55  ;;  %19671 = vmatpush3.bf16.msk.msra.mxu0 %vm22237_vm14, %v22233_v10 }
 0x476   : > { %19675 = vmatpush3.bf16.msk.msra.mxu1 %vm22237_vm14, %v22233_v10  ;;  %19676 = vmatprep.subr.bf16.mxu0 %v24860_v45 }
 0x477   : > { %18595 = vmatmul.mubr.msk.f32.gmra.mrb[206].mxu0 %vm6033_vm9, %v21890_v15  ;;  %19680 = vmatprep.subr.bf16.mxu1 %v24860_v45 }
 0x478   : > { %v22259_v18 = vpop.f32.mrb[152].mxu1  ;;  %18597 = vmatprep.mubr.msk.f32.mxu0 %vm20050_vm1, %v24861_v55  ;;  %18609 = vmatmul.mubr.msk.f32.gmra.mrb[204].mxu1 %vm6033_vm9, %v21873_v1 }
 0x479   : > { %v7358_v48 = vrot.slane %v22259_v18, 4  ;;  %v18437_v24 = vpop.f32.mrb[153].mxu1  ;;  %18611 = vmatprep.mubr.msk.f32.mxu1 %vm20050_vm1, %v24861_v55 }
 0x47a   : > { %v22331_v52 = vpop.permute.xlu1 %7780 }
 0x47b   : > { %18598 = vmatmul.mubr.msk.f32.gmra.mrb[208].mxu0 %vm6033_vm9, %v21900_v44  ;;  %7373 = vrot.lane.b32.xlu1 %v7358_v48, %s20053_s24 }
 0x47c   : > { %v22271_v39 = vpop.f32.mrb[154].mxu1  ;;  %18600 = vmatprep.mubr.msk.f32.mxu0 %vm20050_vm1, %v24861_v55  ;;  %18612 = vmatmul.mubr.msk.f32.gmra.mrb[206].mxu1 %vm6033_vm9, %v21890_v15 }
 0x47d   : > { %7433 = vrot.lane.b32.xlu0 %v22271_v39, %s20054_s25  ;;  %v18440_v1 = vpop.f32.mrb[155].mxu1  ;;  %18614 = vmatprep.mubr.msk.f32.mxu1 %vm20050_vm1, %v24861_v55 }
 0x47f   : > { %18601 = vmatmul.mubr.msk.f32.gmra.mrb[210].mxu0 %vm6033_vm9, %v21914_v59 }
 0x480   : > { %v6403_v22 = vpop.f32.mrb[156].mxu1  ;;  %18615 = vmatmul.mubr.msk.f32.gmra.mrb[208].mxu1 %vm6033_vm9, %v21900_v44  ;;  %18624 = vmatprep.mubr.msk.f32.mxu0 %vm20050_vm1, %v24861_v55 }
 0x481   : > { %v7574_v14 = vrot.slane %v6403_v22, 4  ;;  %7528 = vrot.lane.b32.xlu1 %v6403_v22, %s20053_s24  ;;  %v18443_v15 = vpop.f32.mrb[157].mxu1  ;;  %18617 = vmatprep.mubr.msk.f32.mxu1 %vm20050_vm1, %v24861_v55 }
 0x483   : > { %7588 = vrot.lane.b32.xlu0 %v7574_v14, %s20054_s25 }
 0x484   : > { %v22291_v58 = vpop.f32.mrb[158].mxu1  ;;  %18618 = vmatmul.mubr.msk.f32.gmra.mrb[210].mxu1 %vm6033_vm9, %v21914_v59 }
 0x485   : > { %v7657_v13 = vrot.slane %v22291_v58, 4  ;;  %v18446_v44 = vpop.f32.mrb[159].mxu1  ;;  %18631 = vmatprep.mubr.msk.f32.mxu1 %vm20050_vm1, %v24861_v55 }
 0x487   : > { %7670 = vrot.lane.b32.xlu0 %v7657_v13, %s20053_s24 }
 0x488   : > { %v6413_v60 = vpop.f32.mrb[160].mxu1 }
 0x489   : > { %7730 = vrot.lane.b32.xlu1 %v6413_v60, %s20054_s25  ;;  %v18449_v23 = vpop.f32.mrb[161].mxu1  ;;  %v7478_v60 = vrot.slane %v22271_v39, 4 }
 0x490   : > { %v22300_v17 = vpop.f32.mrb[162].mxu0 }
 0x491   : > { %v7359_v50 = vrot.slane %v22300_v17, 4  ;;  %v18454_v54 = vpop.f32.mrb[163].mxu0 }
 0x493   : > { %7375 = vrot.lane.b32.xlu0 %v7359_v50, %s20053_s24 }
 0x494   : > { %v22304_v59 = vpop.f32.mrb[164].mxu0 }
 0x495   : > { %v18457_v51 = vpop.f32.mrb[165].mxu0 }
 0x497   : > { %7435 = vrot.lane.b32.xlu0 %v22304_v59, %s20054_s25 }
 0x498   : > { %v6496_v0 = vpop.f32.mrb[166].mxu0 }
 0x499   : > { %v7575_v53 = vrot.slane %v6496_v0, 4  ;;  %v18460_v11 = vpop.f32.mrb[167].mxu0 }
 0x49b   : > { %7530 = vrot.lane.b32.xlu0 %v6496_v0, %s20053_s24  ;;  %7590 = vrot.lane.b32.xlu1 %v7575_v53, %s20054_s25 }
 0x49c   : > { %v22310_v42 = vpop.f32.mrb[168].mxu0 }
 0x49d   : > { %v7658_v9 = vrot.slane %v22310_v42, 4  ;;  %v18463_v43 = vpop.f32.mrb[169].mxu0 }
 0x49f   : > { %7672 = vrot.lane.b32.xlu1 %v7658_v9, %s20053_s24 }
 0x4a0   : > { %v6506_v5 = vpop.f32.mrb[170].mxu0 }
 0x4a1   : > { %v18466_v16 = vpop.f32.mrb[171].mxu0 }
 0x4a3   : > { %7732 = vrot.lane.b32.xlu1 %v6506_v5, %s20054_s25 }
 0x4a8   : > { %v22315_v36 = vpop.f32.mrb[162].mxu1 }
 0x4a9   : > { %v7360_v19 = vrot.slane %v22315_v36, 4  ;;  %v18471_v3 = vpop.f32.mrb[163].mxu1 }
 0x4ab   : > { %7377 = vrot.lane.b32.xlu0 %v7360_v19, %s20053_s24 }
 0x4ac   : > { %v22319_v33 = vpop.f32.mrb[164].mxu1 }
 0x4ad   : > { %v18474_v41 = vpop.f32.mrb[165].mxu1 }
 0x4b0   : > { %v6589_v29 = vpop.f32.mrb[166].mxu1 }
 0x4b1   : > { %v7576_v25 = vrot.slane %v6589_v29, 4  ;;  %7532 = vrot.lane.b32.xlu0 %v6589_v29, %s20053_s24  ;;  %v18477_v57 = vpop.f32.mrb[167].mxu1 }
 0x4b3   : > { %7592 = vrot.lane.b32.xlu1 %v7576_v25, %s20054_s25 }
 0x4b4   : > { %v22323_v21 = vpop.f32.mrb[168].mxu1 }
 0x4b5   : > { %v7659_v7 = vrot.slane %v22323_v21, 4  ;;  %7437 = vrot.lane.b32.xlu0 %v22319_v33, %s20054_s25  ;;  %v18480_v56 = vpop.f32.mrb[169].mxu1 }
 0x4b7   : > { %7674 = vrot.lane.b32.xlu1 %v7659_v7, %s20053_s24 }
 0x4b8   : > { %v6599_v34 = vpop.f32.mrb[170].mxu1 }
 0x4b9   : > { %v18483_v31 = vpop.f32.mrb[171].mxu1 }
 0x4bb   : > { %7734 = vrot.lane.b32.xlu1 %v6599_v34, %s20054_s25 }
 0x4bd   : > { %v7370_v40 = vpop.permute.xlu0 %7369 }
 0x4be   : > { %v7404_v4 = vadd.f32 %v7370_v40, %v22153_v49 }
 0x4bf   : > { %v7430_v30 = vpop.permute.xlu1 %7429 }
 0x4c0   : > { %v7464_v28 = vadd.f32 %v7430_v30, %v7404_v4 }
 0x4c2   : > { %v7501_v32 = vadd.f32 %v7477_v26, %v7464_v28 }
 0x4c3   : > { %v7525_v47 = vpop.permute.xlu0 %7524 }
 0x4c4   : > { %v7560_v12 = vadd.f32 %v7525_v47, %v22213_v62  ;;  %v22337_v20 = vpop.f32.mrb[172].mxu0 }
 0x4c5   : > { %v7585_v63 = vpop.permute.xlu1 %7584  ;;  %v18488_v37 = vpop.f32.mrb[173].mxu0  ;;  %v7361_v40 = vrot.slane %v22337_v20, 4 }
 0x4c6   : > { %v7620_v6 = vadd.f32 %v7585_v63, %v7560_v12  ;;  %v7479_v63 = vrot.slane %v22304_v59, 4 }
 0x4c8   : > { %v22339_v8 = vpop.f32.mrb[174].mxu0  ;;  %v7632_v61 = vadd.f32 %v7620_v6, %v22209_v35 }
 0x4c9   : > { %v18491_v48 = vpop.f32.mrb[175].mxu0 }
 0x4cc   : > { %v6682_v24 = vpop.f32.mrb[176].mxu0 }
 0x4cd   : > { %v7577_v49 = vrot.slane %v6682_v24, 4  ;;  %7534 = vrot.lane.b32.xlu0 %v6682_v24, %s20053_s24  ;;  %v18494_v2 = vpop.f32.mrb[177].mxu0 }
 0x4d0   : > { %v22343_v1 = vpop.f32.mrb[178].mxu0 }
 0x4d1   : > { %v7660_v22 = vrot.slane %v22343_v1, 4  ;;  %7594 = vrot.lane.b32.xlu0 %v7577_v49, %s20054_s25  ;;  %v18497_v62 = vpop.f32.mrb[179].mxu0 }
 0x4d3   : > { %7676 = vrot.lane.b32.xlu1 %v7660_v22, %s20053_s24 }
 0x4d4   : > { %v6692_v14 = vpop.f32.mrb[180].mxu0 }
 0x4d5   : > { %v7372_v15 = vpop.permute.xlu0 %7371  ;;  %v18500_v13 = vpop.f32.mrb[181].mxu0 }
 0x4d6   : > { %v7405_v35 = vadd.f32 %v7372_v15, %v22183_v46 }
 0x4d7   : > { %v7432_v44 = vpop.permute.xlu1 %7431  ;;  %7736 = vrot.lane.b32.xlu1 %v6692_v14, %s20054_s25 }
 0x4d8   : > { %v7465_v23 = vadd.f32 %v7432_v44, %v7405_v35 }
 0x4da   : > { %v22351_v50 = vpop.f32.mrb[172].mxu1  ;;  %v7502_v54 = vadd.f32 %v7478_v60, %v7465_v23 }
 0x4db   : > { %v7527_v51 = vpop.permute.xlu0 %7526  ;;  %v18505_v0 = vpop.f32.mrb[173].mxu1 }
 0x4dc   : > { %v7561_v53 = vadd.f32 %v7527_v51, %v7501_v32 }
 0x4dd   : > { %v7587_v11 = vpop.permute.xlu1 %7586 }
 0x4de   : > { %v7621_v9 = vadd.f32 %v7587_v11, %v7561_v53  ;;  %v22353_v43 = vpop.f32.mrb[174].mxu1 }
 0x4df   : > { %v18508_v5 = vpop.f32.mrb[175].mxu1 }
 0x4e0   : > { %v7633_v16 = vadd.f32 %v7621_v9, %v22291_v58 }
 0x4e1   : > { %v7669_v46 = vpop.permute.xlu1 %7668 }
 0x4e2   : > { %v7704_v19 = vadd.f32 %v7669_v46, %v7632_v61  ;;  %v6775_v3 = vpop.f32.mrb[176].mxu1 }
 0x4e3   : > { %v7729_v41 = vpop.permute.xlu0 %7728  ;;  %v18511_v29 = vpop.f32.mrb[177].mxu1  ;;  %v7578_v61 = vrot.slane %v6775_v3, 4 }
 0x4e4   : > { %v7764_v39 = vadd.f32 %v7729_v41, %v7704_v19  ;;  %v7480_v41 = vrot.slane %v22319_v33, 4 }
 0x4e6   : > { %v7783_v25 = vmul.f32 %v22331_v52, %v7764_v39  ;;  %v22357_v57 = vpop.f32.mrb[178].mxu1 }
 0x4e7   : > { %v7661_v7 = vrot.slane %v22357_v57, 4  ;;  %v18514_v56 = vpop.f32.mrb[179].mxu1 }
 0x4e8   : > { %v7802_v34 = vadd.f32 %v22329_v27, %v7783_v25 }
 0x4e9   : > { %7678 = vrot.lane.b32.xlu1 %v7661_v7, %s20053_s24 }
 0x4ea   : > { %vm7814_vm15 = vcmp.gt.f32.partialorder %v7802_v34, 0.0  ;;  %v7826_v31 = vmul.f32 0.2, %v7802_v34  ;;  %v6785_v58 = vpop.f32.mrb[180].mxu1 }
 0x4eb   : > { %7738 = vrot.lane.b32.xlu0 %v6785_v58, %s20054_s25  ;;  %v18517_v4 = vpop.f32.mrb[181].mxu1 }
 0x4ec   : > { %v22364_v30 = vpop.f32.mrb[182].mxu0  ;;  %v7838_v26 = vsel %vm7814_vm15, %v7802_v34, %v7826_v31 }
 0x4ed   : > { %v7374_v28 = vpop.permute.xlu1 %7373  ;;  %7379 = vrot.lane.b32.xlu1 %v7361_v40, %s20053_s24  ;;  %18625 = vmatmul.mubr.msk.f32.vlgmr.msra.gmra.mrb[212].mxu0 %vm7852_vm0, %v7838_v26  ;;  %v18522_v32 = vpop.f32.mrb[183].mxu0 }
 0x4ee   : > { %v7406_v47 = vadd.f32 %v7374_v28, %v22259_v18  ;;  %19679 = vmatpush3.bf16.msk.msra.mxu0 %vm22237_vm14, %v22233_v10  ;;  %18638 = vmatprep.mubr.msk.f32.mxu0 %vm20050_vm1, %v24861_v55 }
 0x4ef   : > { %7439 = vrot.lane.b32.xlu0 %v22339_v8, %s20054_s25  ;;  %v7434_v12 = vpop.permute.xlu0 %7433  ;;  %19684 = vmatprep.subr.bf16.mxu0 %v24860_v45 }
 0x4f0   : > { %v7466_v37 = vadd.f32 %v7434_v12, %v7406_v47  ;;  %v22378_v6 = vpop.f32.mrb[184].mxu0 }
 0x4f1   : > { %7536 = vrot.lane.b32.xlu1 %v6775_v3, %s20053_s24  ;;  %v18525_v18 = vpop.f32.mrb[185].mxu0 }
 0x4f2   : > { %v7503_v48 = vadd.f32 %v7479_v63, %v7466_v37 }
 0x4f3   : > { %v7529_v24 = vpop.permute.xlu1 %7528  ;;  %7596 = vrot.lane.b32.xlu0 %v7578_v61, %s20054_s25 }
 0x4f4   : > { %v7562_v49 = vadd.f32 %v7529_v24, %v7502_v54  ;;  %v6868_v2 = vpop.f32.mrb[186].mxu0  ;;  %v7362_v54 = vrot.slane %v22351_v50, 4 }
 0x4f5   : > { %v7589_v22 = vpop.permute.xlu0 %7588  ;;  %v18528_v62 = vpop.f32.mrb[187].mxu0  ;;  %v7579_v5 = vrot.slane %v6868_v2, 4 }
 0x4f6   : > { %v7622_v14 = vadd.f32 %v7589_v22, %v7562_v49 }
 0x4f8   : > { %v22382_v15 = vpop.f32.mrb[188].mxu0  ;;  %v7634_v59 = vadd.f32 %v7622_v14, %v22310_v42 }
 0x4f9   : > { %v7662_v13 = vrot.slane %v22382_v15, 4  ;;  %v7671_v35 = vpop.permute.xlu0 %7670  ;;  %v18531_v44 = vpop.f32.mrb[189].mxu0 }
 0x4fa   : > { %v7705_v60 = vadd.f32 %v7671_v35, %v7633_v16 }
 0x4fb   : > { %v7731_v23 = vpop.permute.xlu1 %7730  ;;  %7680 = vrot.lane.b32.xlu1 %v7662_v13, %s20053_s24 }
 0x4fc   : > { %v7765_v51 = vadd.f32 %v7731_v23, %v7705_v60  ;;  %v6878_v0 = vpop.f32.mrb[190].mxu0 }
 0x4fd   : > { %7740 = vrot.lane.b32.xlu0 %v6878_v0, %s20054_s25  ;;  %v18534_v53 = vpop.f32.mrb[191].mxu0 }
 0x4fe   : > { %v7784_v11 = vmul.f32 %v22331_v52, %v7765_v51 }
 0x4ff   : > { %7381 = vrot.lane.b32.xlu1 %v7362_v54, %s20053_s24 }
 0x500   : > { %v7803_v42 = vadd.f32 %v22329_v27, %v7784_v11 }
 0x501   : > { %7441 = vrot.lane.b32.xlu0 %v22353_v43, %s20054_s25 }
 0x502   : > { %vm7815_vm3 = vcmp.gt.f32.partialorder %v7803_v42, 0.0  ;;  %v7827_v9 = vmul.f32 0.2, %v7803_v42 }
 0x503   : > { %7538 = vrot.lane.b32.xlu1 %v6868_v2, %s20053_s24 }
 0x504   : > { %v7839_v16 = vsel %vm7815_vm3, %v7803_v42, %v7827_v9 }
 0x505   : > { %7598 = vrot.lane.b32.xlu0 %v7579_v5, %s20054_s25  ;;  %18632 = vmatmul.mubr.msk.f32.vlgmr.msra.gmra.mrb[212].mxu1 %vm7852_vm0, %v7839_v16  ;;  %v7376_v46 = vpop.permute.xlu0 %7375 }
 0x506   : > { %19683 = vmatpush3.bf16.msk.msra.mxu1 %vm22237_vm14, %v22233_v10  ;;  %18645 = vmatprep.mubr.msk.f32.mxu1 %vm20050_vm1, %v24861_v55  ;;  %v7407_v19 = vadd.f32 %v7376_v46, %v22300_v17  ;;  %v7481_v46 = vrot.slane %v22339_v8, 4 }
 0x507   : > { %19688 = vmatprep.subr.bf16.mxu1 %v24860_v45 }
 0x509   : > { %v7436_v3 = vpop.permute.xlu0 %7435 }
 0x50a   : > { %v7467_v29 = vadd.f32 %v7436_v3, %v7407_v19  ;;  %v22405_v39 = vpop.f32.mrb[182].mxu1 }
 0x50b   : > { %v18539_v25 = vpop.f32.mrb[183].mxu1 }
 0x50c   : > { %v7504_v7 = vadd.f32 %v7480_v41, %v7467_v29  ;;  %v7364_v29 = vrot.slane %v22405_v39, 4 }
 0x50d   : > { %v7591_v56 = vpop.permute.xlu1 %7590  ;;  %v7531_v34 = vpop.permute.xlu0 %7530 }
 0x50e   : > { %v7563_v31 = vadd.f32 %v7531_v34, %v7503_v48  ;;  %v22407_v58 = vpop.f32.mrb[184].mxu1 }
 0x50f   : > { %v18542_v40 = vpop.f32.mrb[185].mxu1 }
 0x510   : > { %v7623_v4 = vadd.f32 %v7591_v56, %v7563_v31 }
 0x511   : > { %v7673_v26 = vpop.permute.xlu1 %7672 }
 0x512   : > { %v6961_v28 = vpop.f32.mrb[186].mxu1  ;;  %v7635_v32 = vadd.f32 %v7623_v4, %v22323_v21  ;;  %v7706_v47 = vadd.f32 %v7673_v26, %v7634_v59  ;;  %v7363_v21 = vrot.slane %v22364_v30, 4 }
 0x513   : > { %v18545_v17 = vpop.f32.mrb[187].mxu1  ;;  %v7580_v60 = vrot.slane %v6961_v28, 4 }
 0x515   : > { %v7733_v12 = vpop.permute.xlu1 %7732 }
 0x516   : > { %v7766_v33 = vadd.f32 %v7733_v12, %v7706_v47  ;;  %v22410_v63 = vpop.f32.mrb[188].mxu1 }
 0x517   : > { %v7663_v37 = vrot.slane %v22410_v63, 4  ;;  %v18548_v61 = vpop.f32.mrb[189].mxu1 }
 0x518   : > { %v7785_v18 = vmul.f32 %v22331_v52, %v7766_v33  ;;  %v22414_v48 = vpop.f32.mrb[192].mxu0 }
 0x519   : > { %7682 = vrot.lane.b32.xlu1 %v7663_v37, %s20053_s24  ;;  %v18556_v24 = vpop.f32.mrb[193].mxu0 }
 0x51a   : > { %v7804_v49 = vadd.f32 %v22329_v27, %v7785_v18  ;;  %v6971_v2 = vpop.f32.mrb[190].mxu1 }
 0x51b   : > { %7742 = vrot.lane.b32.xlu0 %v6971_v2, %s20054_s25  ;;  %v18551_v22 = vpop.f32.mrb[191].mxu1 }
 0x51c   : > { %vm7816_vm4 = vcmp.gt.f32.partialorder %v7804_v49, 0.0  ;;  %v7828_v62 = vmul.f32 0.2, %v7804_v49  ;;  %v22420_v14 = vpop.f32.mrb[194].mxu0 }
 0x51d   : > { %7383 = vrot.lane.b32.xlu1 %v7363_v21, %s20053_s24  ;;  %v18559_v59 = vpop.f32.mrb[195].mxu0  ;;  %v7378_v35 = vpop.permute.xlu0 %7377  ;;  %v7365_v21 = vrot.slane %v22414_v48, 4 }
 0x51e   : > { %v7840_v13 = vsel %vm7816_vm4, %v7804_v49, %v7828_v62  ;;  %v7408_v9 = vadd.f32 %v7378_v35, %v22315_v36 }
 0x51f   : > { %7443 = vrot.lane.b32.xlu0 %v22378_v6, %s20054_s25  ;;  %18639 = vmatmul.mubr.msk.f32.vlgmr.msra.gmra.mrb[214].mxu0 %vm7852_vm0, %v7840_v13 }
 0x520   : > { %v7054_v44 = vpop.f32.mrb[196].mxu0  ;;  %19687 = vmatpush3.bf16.msk.msra.mxu0 %vm22237_vm14, %v22233_v10  ;;  %18652 = vmatprep.mubr.msk.f32.mxu0 %vm20050_vm1, %v24861_v55 }
 0x521   : > { %7540 = vrot.lane.b32.xlu1 %v6961_v28, %s20053_s24  ;;  %v18562_v23 = vpop.f32.mrb[197].mxu0  ;;  %19692 = vmatprep.subr.bf16.mxu0 %v24860_v45  ;;  %v7581_v8 = vrot.slane %v7054_v44, 4 }
 0x523   : > { %7600 = vrot.lane.b32.xlu0 %v7580_v60, %s20054_s25  ;;  %v7533_v51 = vpop.permute.xlu0 %7532 }
 0x524   : > { %v7564_v0 = vadd.f32 %v7533_v51, %v7504_v7  ;;  %v22434_v54 = vpop.f32.mrb[198].mxu0 }
 0x525   : > { %v7664_v53 = vrot.slane %v22434_v54, 4  ;;  %v7593_v11 = vpop.permute.xlu1 %7592  ;;  %v18565_v42 = vpop.f32.mrb[199].mxu0 }
 0x526   : > { %v7624_v5 = vadd.f32 %v7593_v11, %v7564_v0 }
 0x527   : > { %7684 = vrot.lane.b32.xlu1 %v7664_v53, %s20053_s24  ;;  %v7438_v16 = vpop.permute.xlu0 %7437 }
 0x528   : > { %v7468_v19 = vadd.f32 %v7438_v16, %v7408_v9  ;;  %v7064_v3 = vpop.f32.mrb[200].mxu0  ;;  %v7636_v41 = vadd.f32 %v7624_v5, %v22343_v1 }
 0x529   : > { %v7675_v25 = vpop.permute.xlu1 %7674  ;;  %7744 = vrot.lane.b32.xlu0 %v7064_v3, %s20054_s25  ;;  %v18568_v7 = vpop.f32.mrb[201].mxu0 }
 0x52a   : > { %v7505_v56 = vadd.f32 %v7481_v46, %v7468_v19  ;;  %v7707_v36 = vadd.f32 %v7675_v25, %v7635_v32 }
 0x52b   : > { %7385 = vrot.lane.b32.xlu1 %v7364_v29, %s20053_s24 }
 0x52d   : > { %v7735_v34 = vpop.permute.xlu1 %7734  ;;  %7445 = vrot.lane.b32.xlu0 %v22407_v58, %s20054_s25 }
 0x52e   : > { %v7767_v31 = vadd.f32 %v7735_v34, %v7707_v36 }
 0x52f   : > { %7542 = vrot.lane.b32.xlu1 %v7054_v44, %s20053_s24 }
 0x530   : > { %v7786_v1 = vmul.f32 %v22331_v52, %v7767_v31 }
 0x531   : > { %7602 = vrot.lane.b32.xlu0 %v7581_v8, %s20054_s25 }
 0x532   : > { %v7805_v40 = vadd.f32 %v22329_v27, %v7786_v1  ;;  %v22450_v4 = vpop.f32.mrb[192].mxu1 }
 0x533   : > { %v18573_v26 = vpop.f32.mrb[193].mxu1  ;;  %v7366_v1 = vrot.slane %v22450_v4, 4 }
 0x534   : > { %vm7817_vm5 = vcmp.gt.f32.partialorder %v7805_v40, 0.0  ;;  %v7829_v28 = vmul.f32 0.2, %v7805_v40 }
 0x536   : > { %v7841_v32 = vsel %vm7817_vm5, %v7805_v40, %v7829_v28  ;;  %v22452_v17 = vpop.f32.mrb[194].mxu1  ;;  %vm458_vm5 = vcmask 59392  }
 0x537   : > { %18646 = vmatmul.mubr.msk.f32.vlgmr.msra.gmra.mrb[214].mxu1 %vm7852_vm0, %v7841_v32  ;;  %v18576_v47 = vpop.f32.mrb[195].mxu1  ;;  %459 = vst.msk [vmem:[#allocation4 + $0x8] sm:$0x7] %vm458_vm5, %v24861_v55  ;;  %461 = vst.msk [vmem:[#allocation4 + $0x18] sm:$0x7] %vm458_vm5, %v24861_v55 }
 0x538   : > { %19691 = vmatpush3.bf16.msk.msra.mxu1 %vm22237_vm14, %v22233_v10  ;;  %18659 = vmatprep.mubr.msk.f32.mxu1 %vm20050_vm1, %v24861_v55  ;;  %463 = vst.msk [vmem:[#allocation4 + $0x28] sm:$0x7] %vm458_vm5, %v24861_v55  ;;  %465 = vst.msk [vmem:[#allocation4 + $0x38] sm:$0x7] %vm458_vm5, %v24861_v55 }
 0x539   : > { %19696 = vmatprep.subr.bf16.mxu1 %v24860_v45  ;;  %467 = vst.msk [vmem:[#allocation4 + $0x48] sm:$0x7] %vm458_vm5, %v24861_v55  ;;  %469 = vst.msk [vmem:[#allocation4 + $0x58] sm:$0x7] %vm458_vm5, %v24861_v55 }
 0x53a   : > { %v7147_v12 = vpop.f32.mrb[196].mxu1  ;;  %471 = vst.msk [vmem:[#allocation4 + $0x68] sm:$0x7] %vm458_vm5, %v24861_v55  ;;  %473 = vst.msk [vmem:[#allocation4 + $0x78] sm:$0x7] %vm458_vm5, %v24861_v55 }
 0x53b   : > { %v18579_v33 = vpop.f32.mrb[197].mxu1  ;;  %v7582_v53 = vrot.slane %v7147_v12, 4 }
 0x53e   : > { %v22461_v37 = vpop.f32.mrb[198].mxu1 }
 0x53f   : > { %v7665_v61 = vrot.slane %v22461_v37, 4  ;;  %v7535_v18 = vpop.permute.xlu0 %7534  ;;  %v18582_v24 = vpop.f32.mrb[199].mxu1 }
 0x540   : > { %v7565_v49 = vadd.f32 %v7535_v18, %v7505_v56 }
 0x541   : > { %7686 = vrot.lane.b32.xlu1 %v7665_v61, %s20053_s24 }
 0x542   : > { %v7230_v2 = vpop.f32.mrb[202].mxu0 }
 0x543   : > { %v7157_v22 = vpop.f32.mrb[200].mxu1  ;;  %v7595_v62 = vpop.permute.xlu0 %7594 }
 0x544   : > { %7746 = vrot.lane.b32.xlu0 %v7157_v22, %s20054_s25  ;;  %v7625_v59 = vadd.f32 %v7595_v62, %v7565_v49  ;;  %v18590_v13 = vpop.f32.mrb[203].mxu0  ;;  %v18585_v35 = vpop.f32.mrb[201].mxu1 }
 0x545   : > { %v7677_v44 = vpop.permute.xlu1 %7676  ;;  %7387 = vrot.lane.b32.xlu1 %v7365_v21, %s20053_s24 }
 0x546   : > { %v22468_v60 = vpop.f32.mrb[204].mxu0  ;;  %v7637_v23 = vadd.f32 %v7625_v59, %v22357_v57  ;;  %v7708_v11 = vadd.f32 %v7677_v44, %v7636_v41  ;;  %v7482_v59 = vrot.slane %v22353_v43, 4 }
 0x547   : > { %v18593_v51 = vpop.f32.mrb[205].mxu0  ;;  %v7322_v0 = vpop.f32.mrb[202].mxu1 }
 0x548   : > { %7447 = vrot.lane.b32.xlu0 %v22420_v14, %s20054_s25  ;;  %v18607_v42 = vpop.f32.mrb[203].mxu1 }
 0x549   : > { %v7737_v9 = vpop.permute.xlu1 %7736  ;;  %7544 = vrot.lane.b32.xlu1 %v7147_v12, %s20053_s24 }
 0x54a   : > { %v7768_v5 = vadd.f32 %v7737_v9, %v7708_v11  ;;  %v7239_v16 = vpop.f32.mrb[206].mxu0 }
 0x54b   : > { %v18596_v46 = vpop.f32.mrb[207].mxu0  ;;  %v7326_v19 = vpop.f32.mrb[204].mxu1  ;;  %v7583_v32 = vrot.slane %v7239_v16, 4 }
 0x54c   : > { %v7787_v3 = vmul.f32 %v22331_v52, %v7768_v5  ;;  %7604 = vrot.lane.b32.xlu0 %v7582_v53, %s20054_s25  ;;  %v18610_v57 = vpop.f32.mrb[205].mxu1 }
 0x54e   : > { %v7806_v29 = vadd.f32 %v22329_v27, %v7787_v3  ;;  %v22477_v25 = vpop.f32.mrb[208].mxu0 }
 0x54f   : > { %v7666_v41 = vrot.slane %v22477_v25, 4  ;;  %v18599_v7 = vpop.f32.mrb[209].mxu0  ;;  %v7330_v56 = vpop.f32.mrb[206].mxu1 }
 0x550   : > { %vm7818_vm9 = vcmp.gt.f32.partialorder %v7806_v29, 0.0  ;;  %v7830_v36 = vmul.f32 0.2, %v7806_v29  ;;  %v18613_v34 = vpop.f32.mrb[207].mxu1 }
 0x551   : > { %7688 = vrot.lane.b32.xlu1 %v7666_v41, %s20053_s24 }
 0x552   : > { %v7249_v31 = vpop.f32.mrb[210].mxu0  ;;  %v7842_v8 = vsel %vm7818_vm9, %v7806_v29, %v7830_v36  ;;  %v7483_v29 = vrot.slane %v22378_v6, 4  ;;  %vm22817_vm9 = vmpackc.low %vm716_vm2, %vm20056_vm13  ;;  %vm10973_vm2 = vcmask 89088  }
 0x553   : > { %7748 = vrot.lane.b32.xlu0 %v7249_v31, %s20054_s25  ;;  %18653 = vmatmul.mubr.msk.f32.vlgmr.msra.gmra.mrb[216].mxu0 %vm7852_vm0, %v7842_v8  ;;  %v22484_v40 = vpop.f32.mrb[208].mxu1  ;;  %v18602_v26 = vpop.f32.mrb[211].mxu0 }
 0x554   : > { %v18616_v28 = vpop.f32.mrb[209].mxu1  ;;  %19695 = vmatpush3.bf16.msk.msra.mxu0 %vm22237_vm14, %v22233_v10  ;;  %18666 = vmatprep.mubr.msk.f32.mxu0 %vm20050_vm1, %v24861_v55  ;;  %v7667_v33 = vrot.slane %v22484_v40, 4 }
 0x555   : > { %7389 = vrot.lane.b32.xlu1 %v7366_v1, %s20053_s24  ;;  %19700 = vmatprep.subr.bf16.mxu0 %v24860_v45 }
 0x557   : > { %7449 = vrot.lane.b32.xlu0 %v22452_v17, %s20054_s25  ;;  %v7339_v47 = vpop.f32.mrb[210].mxu1 }
 0x558   : > { %v18619_v12 = vpop.f32.mrb[211].mxu1 }
 0x559   : > { %7546 = vrot.lane.b32.xlu1 %v7239_v16, %s20053_s24 }
 0x55b   : > { %v7679_v61 = vpop.permute.xlu1 %7678  ;;  %7606 = vrot.lane.b32.xlu0 %v7583_v32, %s20054_s25 }
 0x55c   : > { %v7709_v18 = vadd.f32 %v7679_v61, %v7637_v23 }
 0x55d   : > { %v7739_v24 = vpop.permute.xlu0 %7738  ;;  %7690 = vrot.lane.b32.xlu1 %v7667_v33, %s20053_s24 }
 0x55e   : > { %v7769_v49 = vadd.f32 %v7739_v24, %v7709_v18  ;;  %v7484_v18 = vrot.slane %v22407_v58, 4 }
 0x55f   : > { %v7380_v2 = vpop.permute.xlu1 %7379  ;;  %7750 = vrot.lane.b32.xlu0 %v7339_v47, %s20054_s25 }
 0x560   : > { %v7788_v21 = vmul.f32 %v22331_v52, %v7769_v49  ;;  %v7409_v22 = vadd.f32 %v7380_v2, %v22337_v20 }
 0x561   : > { %v7440_v62 = vpop.permute.xlu0 %7439 }
 0x562   : > { %v7807_v13 = vadd.f32 %v22329_v27, %v7788_v21  ;;  %v7469_v35 = vadd.f32 %v7440_v62, %v7409_v22 }
 0x563   : > { %v7537_v51 = vpop.permute.xlu1 %7536 }
 0x564   : > { %v7506_v44 = vadd.f32 %v7482_v59, %v7469_v35  ;;  %vm7819_vm10 = vcmp.gt.f32.partialorder %v7807_v13, 0.0  ;;  %v7831_v23 = vmul.f32 0.2, %v7807_v13 }
 0x565   : > { %v7597_v11 = vpop.permute.xlu0 %7596 }
 0x566   : > { %v7566_v0 = vadd.f32 %v7537_v51, %v7506_v44  ;;  %v7843_v53 = vsel %vm7819_vm10, %v7807_v13, %v7831_v23  ;;  %vm10938_vm10 = vcmask 56328  }
 0x567   : > { %18660 = vmatmul.mubr.msk.f32.vlgmr.msra.gmra.mrb[216].mxu1 %vm7852_vm0, %v7843_v53 }
 0x568   : > { %v7626_v42 = vadd.f32 %v7597_v11, %v7566_v0  ;;  %19699 = vmatpush3.bf16.msk.msra.mxu1 %vm22237_vm14, %v22233_v10  ;;  %18673 = vmatprep.mubr.msk.f32.mxu1 %vm20050_vm1, %v24861_v55  ;;  %v7485_v11 = vrot.slane %v22420_v14, 4 }
 0x569   : > { %19704 = vmatprep.subr.bf16.mxu1 %v24860_v45 }
 0x56a   : > { %v7638_v20 = vadd.f32 %v7626_v42, %v22382_v15 }
 0x56d   : > { %v7681_v43 = vpop.permute.xlu1 %7680 }
 0x56e   : > { %v7710_v9 = vadd.f32 %v7681_v43, %v7638_v20 }
 0x56f   : > { %v7741_v5 = vpop.permute.xlu0 %7740 }
 0x570   : > { %v7770_v16 = vadd.f32 %v7741_v5, %v7710_v9  ;;  %v8894_v5 = vld [vmem:[%s24837_s9] sm:$0xff] }
 0x571   : > { %v7382_v46 = vpop.permute.xlu1 %7381 }
 0x572   : > { %v7789_v19 = vmul.f32 %v22331_v52, %v7770_v16  ;;  %v7410_v3 = vadd.f32 %v7382_v46, %v22351_v50 }
 0x573   : > { %v7442_v57 = vpop.permute.xlu0 %7441 }
 0x574   : > { %v7808_v41 = vadd.f32 %v22329_v27, %v7789_v19  ;;  %v7470_v7 = vadd.f32 %v7442_v57, %v7410_v3 }
 0x575   : > { %v7539_v34 = vpop.permute.xlu1 %7538 }
 0x576   : > { %v7507_v56 = vadd.f32 %v7483_v29, %v7470_v7  ;;  %vm7820_vm11 = vcmp.gt.f32.partialorder %v7808_v41, 0.0  ;;  %v7832_v36 = vmul.f32 0.2, %v7808_v41 }
 0x577   : > { %v7599_v8 = vpop.permute.xlu0 %7598 }
 0x578   : > { %v7567_v15 = vadd.f32 %v7539_v34, %v7507_v56  ;;  %v7844_v31 = vsel %vm7820_vm11, %v7808_v41, %v7832_v36  ;;  %vm11990_vm11 = vcmask 1045504  }
 0x579   : > { %18667 = vmatmul.mubr.msk.f32.vlgmr.msra.gmra.mrb[218].mxu0 %vm7852_vm0, %v7844_v31 }
 0x57a   : > { %v7627_v1 = vadd.f32 %v7599_v8, %v7567_v15  ;;  %19703 = vmatpush3.bf16.msk.msra.mxu0 %vm22237_vm14, %v22233_v10  ;;  %18680 = vmatprep.mubr.msk.f32.mxu0 %vm20050_vm1, %v24861_v55  ;;  %v7486_v8 = vrot.slane %v22452_v17, 4 }
 0x57b   : > { %19708 = vmatprep.subr.bf16.mxu0 %v24860_v45 }
 0x57c   : > { %v7639_v50 = vadd.f32 %v7627_v1, %v22410_v63 }
 0x58b   : > { %v7683_v6 = vpop.permute.xlu1 %7682 }
 0x58c   : > { %v7711_v26 = vadd.f32 %v7683_v6, %v7639_v50 }
 0x58d   : > { %v7743_v28 = vpop.permute.xlu0 %7742 }
 0x58e   : > { %v7771_v32 = vadd.f32 %v7743_v28, %v7711_v26 }
 0x58f   : > { %v7384_v47 = vpop.permute.xlu1 %7383 }
 0x590   : > { %v7790_v12 = vmul.f32 %v22331_v52, %v7771_v32  ;;  %v7411_v33 = vadd.f32 %v7384_v47, %v22364_v30 }
 0x591   : > { %v7444_v61 = vpop.permute.xlu0 %7443 }
 0x592   : > { %v7809_v24 = vadd.f32 %v22329_v27, %v7790_v12  ;;  %v7471_v49 = vadd.f32 %v7444_v61, %v7411_v33 }
 0x593   : > { %v7541_v22 = vpop.permute.xlu1 %7540 }
 0x594   : > { %v7508_v2 = vadd.f32 %v7484_v18, %v7471_v49  ;;  %vm7821_vm12 = vcmp.gt.f32.partialorder %v7809_v24, 0.0  ;;  %v7833_v21 = vmul.f32 0.2, %v7809_v24 }
 0x595   : > { %v7601_v59 = vpop.permute.xlu0 %7600 }
 0x596   : > { %v7568_v63 = vadd.f32 %v7541_v22, %v7508_v2  ;;  %v7845_v62 = vsel %vm7821_vm12, %v7809_v24, %v7833_v21  ;;  %vm11986_vm12 = vcmask 48128  }
 0x597   : > { %18674 = vmatmul.mubr.msk.f32.vlgmr.msra.gmra.mrb[218].mxu1 %vm7852_vm0, %v7845_v62 }
 0x598   : > { %v7628_v13 = vadd.f32 %v7601_v59, %v7568_v63  ;;  %19707 = vmatpush3.bf16.msk.msra.mxu1 %vm22237_vm14, %v22233_v10  ;;  %18687 = vmatprep.mubr.msk.f32.mxu1 %vm20050_vm1, %v24861_v55 }
 0x599   : > { %v7685_v30 = vpop.permute.xlu1 %7684  ;;  %19712 = vmatprep.subr.bf16.mxu1 %v24860_v45 }
 0x59a   : > { %v7640_v58 = vadd.f32 %v7628_v13, %v22434_v54  ;;  %v8895_v54 = vld [vmem:[%s24837_s9 + $0x8] sm:$0xff] }
 0x59b   : > { %v7745_v35 = vpop.permute.xlu0 %7744  ;;  %v22546_v14 = vpack.c.bf16 %v8895_v54, %v8894_v5 }
 0x59c   : > { %v7712_v44 = vadd.f32 %v7685_v30, %v7640_v58 }
 0x59d   : > { %v7386_v23 = vpop.permute.xlu1 %7385 }
 0x59e   : > { %v7772_v51 = vadd.f32 %v7745_v35, %v7712_v44  ;;  %v7412_v0 = vadd.f32 %v7386_v23, %v22405_v39 }
 0x59f   : > { %v7446_v53 = vpop.permute.xlu0 %7445 }
 0x5a0   : > { %v7791_v42 = vmul.f32 %v22331_v52, %v7772_v51  ;;  %v7472_v20 = vadd.f32 %v7446_v53, %v7412_v0 }
 0x5a1   : > { %v7543_v16 = vpop.permute.xlu1 %7542 }
 0x5a2   : > { %v7810_v43 = vadd.f32 %v22329_v27, %v7791_v42  ;;  %v7509_v9 = vadd.f32 %v7485_v11, %v7472_v20 }
 0x5a3   : > { %v7603_v19 = vpop.permute.xlu0 %7602 }
 0x5a4   : > { %v7569_v46 = vadd.f32 %v7543_v16, %v7509_v9  ;;  %vm7822_vm15 = vcmp.gt.f32.partialorder %v7810_v43, 0.0  ;;  %v7834_v39 = vmul.f32 0.2, %v7810_v43 }
 0x5a6   : > { %v7629_v3 = vadd.f32 %v7603_v19, %v7569_v46  ;;  %v7846_v57 = vsel %vm7822_vm15, %v7810_v43, %v7834_v39 }
 0x5a7   : > { %18681 = vmatmul.mubr.msk.f32.vlgmr.msra.gmra.mrb[220].mxu0 %vm7852_vm0, %v7846_v57 }
 0x5a8   : > { %v7641_v29 = vadd.f32 %v7629_v3, %v22461_v37  ;;  %19711 = vmatpush3.bf16.msk.msra.mxu0 %vm22237_vm14, %v22233_v10  ;;  %18694 = vmatprep.mubr.msk.f32.mxu0 %vm20050_vm1, %v24861_v55 }
 0x5a9   : > { %19717 = vmatprep.subr.bf16.mxu0 %v22546_v14 }
 0x5b3   : > { %v7687_v41 = vpop.permute.xlu1 %7686 }
 0x5b4   : > { %v7713_v7 = vadd.f32 %v7687_v41, %v7641_v29 }
 0x5b6   : > { %v7747_v56 = vpop.permute.xlu0 %7746 }
 0x5b7   : > { %v7773_v36 = vadd.f32 %v7747_v56, %v7713_v7  ;;  %v7388_v34 = vpop.permute.xlu1 %7387 }
 0x5b8   : > { %v7413_v15 = vadd.f32 %v7388_v34, %v22414_v48 }
 0x5b9   : > { %v7792_v31 = vmul.f32 %v22331_v52, %v7773_v36 }
 0x5ba   : > { %v7448_v37 = vpop.permute.xlu0 %7447 }
 0x5bb   : > { %v7811_v1 = vadd.f32 %v22329_v27, %v7792_v31  ;;  %v7473_v50 = vadd.f32 %v7448_v37, %v7413_v15  ;;  %v7545_v28 = vpop.permute.xlu1 %7544 }
 0x5bd   : > { %v7510_v6 = vadd.f32 %v7486_v8, %v7473_v50  ;;  %vm7823_vm3 = vcmp.gt.f32.partialorder %v7811_v1, 0.0  ;;  %v7835_v26 = vmul.f32 0.2, %v7811_v1 }
 0x5be   : > { %v7605_v12 = vpop.permute.xlu0 %7604 }
 0x5bf   : > { %v7570_v32 = vadd.f32 %v7545_v28, %v7510_v6  ;;  %v7847_v47 = vsel %vm7823_vm3, %v7811_v1, %v7835_v26  ;;  %vm389_vm3 = vcmask 210944  }
 0x5c0   : > { %18688 = vmatmul.mubr.msk.f32.vlgmr.msra.gmra.mrb[220].mxu1 %vm7852_vm0, %v7847_v47  ;;  %v7926_v33 = vpop.f32.mrb[212].mxu0  ;;  %390 = vst.msk [vmem:[#allocation2 + $0x8] sm:$0x7f] %vm389_vm3, %v24861_v55  ;;  %392 = vst.msk [vmem:[#allocation2 + $0x18] sm:$0x7f] %vm389_vm3, %v24861_v55 }
 0x5c1   : > { %v7630_v48 = vadd.f32 %v7605_v12, %v7570_v32  ;;  %8733 = vst.msk [vmem:[%s20200_s28 + $0x7] sm:$0xf] %vm4123_vm6, %v7926_v33  ;;  %v18626_v61 = vpop.f32.mrb[213].mxu0  ;;  %19715 = vmatpush3.bf16.msk.msra.mxu1 %vm22237_vm14, %v22233_v10  ;;  %18701 = vmatprep.mubr.msk.f32.mxu1 %vm20050_vm1, %v24861_v55  ;;  %v7487_v10 = vrot.slane %v22468_v60, 4  ;;  %v8734_v43 = vmul.f32 0.5217391, %v7926_v33 }
 0x5c2   : > { %19733 = vmatprep.subr.bf16.mxu1 %v22546_v14  ;;  %394 = vst.msk [vmem:[#allocation2 + $0x28] sm:$0x7f] %vm389_vm3, %v24861_v55  ;;  %396 = vst.msk [vmem:[#allocation2 + $0x38] sm:$0x7f] %vm389_vm3, %v24861_v55 }
 0x5c3   : > { %v7689_v17 = vpop.permute.xlu1 %7688  ;;  %v7642_v18 = vadd.f32 %v7630_v48, %v22477_v25  ;;  %398 = vst.msk [vmem:[#allocation2 + $0x48] sm:$0x7f] %vm389_vm3, %v24861_v55  ;;  %400 = vst.msk [vmem:[#allocation2 + $0x58] sm:$0x7f] %vm389_vm3, %v24861_v55 }
 0x5c4   : > { %402 = vst.msk [vmem:[#allocation2 + $0x68] sm:$0x7f] %vm389_vm3, %v24861_v55  ;;  %404 = vst.msk [vmem:[#allocation2 + $0x78] sm:$0x7f] %vm389_vm3, %v24861_v55 }
 0x5c5   : > { %v7714_v24 = vadd.f32 %v7689_v17, %v7642_v18  ;;  %v7749_v49 = vpop.permute.xlu0 %7748  ;;  %406 = vst.msk [vmem:[#allocation2 + $0x88] sm:$0x7f] %vm389_vm3, %v24861_v55  ;;  %408 = vst.msk [vmem:[#allocation2 + $0x98] sm:$0x7f] %vm389_vm3, %v24861_v55 }
 0x5c6   : > { %410 = vst.msk [vmem:[#allocation2 + $0xa8] sm:$0x7f] %vm389_vm3, %v24861_v55  ;;  %412 = vst.msk [vmem:[#allocation2 + $0xb8] sm:$0x7f] %vm389_vm3, %v24861_v55 }
 0x5c7   : > { %v7774_v2 = vadd.f32 %v7749_v49, %v7714_v24  ;;  %v7390_v21 = vpop.permute.xlu1 %7389  ;;  %414 = vst.msk [vmem:[#allocation2 + $0xc8] sm:$0x7f] %vm389_vm3, %v24861_v55  ;;  %416 = vst.msk [vmem:[#allocation2 + $0xd8] sm:$0x7f] %vm389_vm3, %v24861_v55 }
 0x5c8   : > { %v7414_v22 = vadd.f32 %v7390_v21, %v22450_v4  ;;  %v22577_v4 = vld [vmem:[%s24837_s9 + $0x10] sm:$0xff]  ;;  %v8846_v60 = vld [vmem:[%s20200_s28] sm:$0xff]  ;;  %v8847_v42 = vld [vmem:[%s20200_s28 + $0x8] sm:$0x7]  ;;  %418 = vst.msk [vmem:[#allocation2 + $0xe8] sm:$0x7f] %vm389_vm3, %v24861_v55 }
 0x5c9   : > { %v7793_v63 = vmul.f32 %v22331_v52, %v7774_v2  ;;  %v7450_v62 = vpop.permute.xlu0 %7449  ;;  %420 = vst.msk [vmem:[#allocation2 + $0xf8] sm:$0x7f] %vm389_vm3, %v24861_v55  ;;  %422 = vst.msk [vmem:[#allocation2 + $0x108] sm:$0x7f] %vm389_vm3, %v24861_v55 }
 0x5ca   : > { %v7474_v38 = vadd.f32 %v7450_v62, %v7414_v22  ;;  %424 = vst.msk [vmem:[#allocation2 + $0x118] sm:$0x7f] %vm389_vm3, %v24861_v55  ;;  %426 = vst.msk [vmem:[#allocation2 + $0x128] sm:$0x7f] %vm389_vm3, %v24861_v55 }
 0x5cb   : > { %v7812_v59 = vadd.f32 %v22329_v27, %v7793_v63  ;;  %v7547_v30 = vpop.permute.xlu1 %7546  ;;  %428 = vst.msk [vmem:[#allocation2 + $0x138] sm:$0x7f] %vm389_vm3, %v24861_v55  ;;  %430 = vst.msk [vmem:[#allocation2 + $0x148] sm:$0x7f] %vm389_vm3, %v24861_v55 }
 0x5cc   : > { %v7511_v13 = vadd.f32 %v7487_v10, %v7474_v38  ;;  %432 = vst.msk [vmem:[#allocation2 + $0x158] sm:$0x7f] %vm389_vm3, %v24861_v55  ;;  %434 = vst.msk [vmem:[#allocation2 + $0x168] sm:$0x7f] %vm389_vm3, %v24861_v55 }
 0x5cd   : > { %vm7824_vm14 = vcmp.gt.f32.partialorder %v7812_v59, 0.0  ;;  %v7836_v58 = vmul.f32 0.2, %v7812_v59  ;;  %v7607_v44 = vpop.permute.xlu0 %7606  ;;  %436 = vst.msk [vmem:[#allocation2 + $0x178] sm:$0x7f] %vm389_vm3, %v24861_v55 }
 0x5ce   : > { %v7571_v25 = vadd.f32 %v7547_v30, %v7511_v13  ;;  %438 = vst.msk [vmem:[#allocation2 + $0x188] sm:$0x7f] %vm389_vm3, %v24861_v55  ;;  %440 = vst.msk [vmem:[#allocation2 + $0x198] sm:$0x7f] %vm389_vm3, %v24861_v55 }
 0x5cf   : > { %v7848_v35 = vsel %vm7824_vm14, %v7812_v59, %v7836_v58  ;;  %v7691_v51 = vpop.permute.xlu1 %7690 }
 0x5d0   : > { %18695 = vmatmul.mubr.msk.f32.vlgmr.msra.gmra.mrb[222].mxu0 %vm7852_vm0, %v7848_v35  ;;  %v7631_v23 = vadd.f32 %v7607_v44, %v7571_v25 }
 0x5d1   : > { %19719 = vmatpush3.bf16.msra.mxu0 %v22546_v14  ;;  %18710 = vmatprep.mubr.msk.f32.mxu0 %vm4175_vm8, %v8846_v60  ;;  %v7751_v53 = vpop.permute.xlu0 %7750 }
 0x5d2   : > { %18708 = vmatprep.subr.mxu0 %v22577_v4  ;;  %v7643_v0 = vadd.f32 %v7631_v23, %v22484_v40  ;;  %v8739_v40 = vmul.f32 0.04347826, %v7926_v33 }
 0x5d4   : > { %v7715_v11 = vadd.f32 %v7691_v51, %v7643_v0 }
 0x5d5   : > { %18709 = vmatpush3.msra.mxu0 %v22577_v4 }
 0x5d6   : > { %18711 = vmatmul.mubr.msk.f32.vlgmr.msra.gmra.mrb[224].mxu0 %vm4175_vm8, %v8847_v42  ;;  %v7775_v20 = vadd.f32 %v7751_v53, %v7715_v11  ;;  %19721 = vmatprep.subr.bf16.mxu0 %v22546_v14 }
 0x5d7   : > { %19723 = vmatpush3.bf16.msra.mxu0 %v22546_v14 }
 0x5d8   : > { %v7794_v9 = vmul.f32 %v22331_v52, %v7775_v20  ;;  %v7999_v5 = vpop.f32.mrb[212].mxu1  ;;  %18717 = vmatprep.subr.mxu0 %v22577_v4 }
 0x5d9   : > { %v8735_v54 = vmul.f32 0.47826087, %v7999_v5  ;;  %v8740_v16 = vmul.f32 0.95652175, %v7999_v5  ;;  %v18633_v39 = vpop.f32.mrb[213].mxu1 }
 0x5da   : > { %v7813_v46 = vadd.f32 %v22329_v27, %v7794_v9  ;;  %v8744_v56 = vmul.f32 0.5652174, %v7999_v5  ;;  %v8749_v34 = vmul.f32 0.08695652, %v7999_v5 }
 0x5db   : > { %v8736_v19 = vadd.f32 %v8735_v54, %v8734_v43  ;;  %v8741_v3 = vadd.f32 %v8740_v16, %v8739_v40  ;;  %18718 = vmatpush3.msra.mxu0 %v22577_v4 }
 0x5dc   : > { %vm7825_vm4 = vcmp.gt.f32.partialorder %v7813_v46, 0.0  ;;  %v7837_v57 = vmul.f32 0.2, %v7813_v46  ;;  %19725 = vmatprep.subr.bf16.mxu0 %v22546_v14 }
 0x5dd   : > { %16666 = vst.msk [vmem:[%s20200_s28 + $0x1f] sm:$0xf] %vm4123_vm6, %v8736_v19  ;;  %16667 = vst.msk [vmem:[%s20200_s28 + $0x37] sm:$0xf] %vm4123_vm6, %v8741_v3 }
 0x5de   : > { %v7849_v52 = vsel %vm7825_vm4, %v7813_v46, %v7837_v57 }
 0x5df   : > { %18702 = vmatmul.mubr.msk.f32.vlgmr.msra.gmra.mrb[222].mxu1 %vm7852_vm0, %v7849_v52  ;;  %vm456_vm0 = vcmask 64512  }
 0x5e0   : > { %19735 = vmatpush3.bf16.msra.mxu1 %v22546_v14  ;;  %457 = vst.msk [vmem:[#allocation4] sm:$0xff] %vm456_vm0, %v24861_v55  ;;  %460 = vst.msk [vmem:[#allocation4 + $0x10] sm:$0xff] %vm456_vm0, %v24861_v55 }
 0x5e1   : > { %18744 = vmatprep.subr.mxu1 %v22577_v4  ;;  %462 = vst.msk [vmem:[#allocation4 + $0x20] sm:$0xff] %vm456_vm0, %v24861_v55  ;;  %464 = vst.msk [vmem:[#allocation4 + $0x30] sm:$0xff] %vm456_vm0, %v24861_v55 }
 0x5e2   : > { %466 = vst.msk [vmem:[#allocation4 + $0x40] sm:$0xff] %vm456_vm0, %v24861_v55  ;;  %468 = vst.msk [vmem:[#allocation4 + $0x50] sm:$0xff] %vm456_vm0, %v24861_v55 }
 0x5e3   : > { %470 = vst.msk [vmem:[#allocation4 + $0x60] sm:$0xff] %vm456_vm0, %v24861_v55  ;;  %472 = vst.msk [vmem:[#allocation4 + $0x70] sm:$0xff] %vm456_vm0, %v24861_v55 }
 0x5e4   : > { %v8848_v27 = vld [vmem:[%s20200_s28 + $0x18] sm:$0xff]  ;;  %v8849_v29 = vld [vmem:[%s20200_s28 + $0x20] sm:$0x7]  ;;  %18745 = vmatpush3.msra.mxu1 %v22577_v4  ;;  %v8850_v41 = vld [vmem:[%s20200_s28 + $0x30] sm:$0xff] }
 0x5e5   : > { %18719 = vmatprep.mubr.msk.f32.mxu0 %vm4175_vm8, %v8848_v27  ;;  %19737 = vmatprep.subr.bf16.mxu1 %v22546_v14  ;;  %v8851_v7 = vld [vmem:[%s20200_s28 + $0x38] sm:$0x7] }
 0x5e6   : > { %18720 = vmatmul.mubr.msk.f32.vlgmr.msra.gmra.mrb[224].mxu0 %vm4175_vm8, %v8849_v29 }
 0x5e7   : > { %18728 = vmatprep.mubr.msk.f32.mxu0 %vm4175_vm8, %v8850_v41  ;;  %19727 = vmatpush3.bf16.msra.mxu0 %v22546_v14 }
 0x5e8   : > { %18726 = vmatprep.subr.mxu0 %v22577_v4 }
 0x5eb   : > { %18727 = vmatpush3.msra.mxu0 %v22577_v4 }
 0x5ec   : > { %19729 = vmatprep.subr.bf16.mxu0 %v22546_v14 }
 0x5ee   : > { %18729 = vmatmul.mubr.msk.f32.vlgmr.msra.gmra.mrb[224].mxu0 %vm4175_vm8, %v8851_v7 }
 0x5ef   : > { %19731 = vmatpush3.bf16.msra.mxu0 %v22546_v14 }
 0x5f0   : > { %18735 = vmatprep.subr.mxu0 %v22577_v4 }
 0x5f2   : > { %v8072_v36 = vpop.f32.mrb[214].mxu0 }
 0x5f3   : > { %v8745_v15 = vmul.f32 0.4347826, %v8072_v36  ;;  %v8750_v31 = vmul.f32 0.9130435, %v8072_v36  ;;  %18736 = vmatpush3.msra.mxu0 %v22577_v4  ;;  %v18640_v37 = vpop.f32.mrb[215].mxu0 }
 0x5f4   : > { %19749 = vmatprep.subr.bf16.mxu0 %v22546_v14  ;;  %v8754_v32 = vmul.f32 0.6086956, %v8072_v36  ;;  %v8759_v12 = vmul.f32 0.13043478, %v8072_v36 }
 0x5f5   : > { %v8746_v8 = vadd.f32 %v8745_v15, %v8744_v56  ;;  %v8751_v1 = vadd.f32 %v8750_v31, %v8749_v34 }
 0x5f7   : > { %16668 = vst.msk [vmem:[%s20200_s28 + $0x4f] sm:$0xf] %vm4123_vm6, %v8746_v8  ;;  %16669 = vst.msk [vmem:[%s20200_s28 + $0x67] sm:$0xf] %vm4123_vm6, %v8751_v1 }
 0x5fe   : > { %v8852_v50 = vld [vmem:[%s20200_s28 + $0x48] sm:$0xff]  ;;  %v8854_v6 = vld [vmem:[%s20200_s28 + $0x60] sm:$0xff]  ;;  %v8853_v26 = vld [vmem:[%s20200_s28 + $0x50] sm:$0x7] }
 0x5ff   : > { %18737 = vmatprep.mubr.msk.f32.mxu0 %vm4175_vm8, %v8852_v50  ;;  %18746 = vmatprep.mubr.msk.f32.mxu1 %vm4175_vm8, %v8854_v6  ;;  %v8855_v28 = vld [vmem:[%s20200_s28 + $0x68] sm:$0x7] }
 0x600   : > { %18738 = vmatmul.mubr.msk.f32.vlgmr.msra.gmra.mrb[224].mxu0 %vm4175_vm8, %v8853_v26  ;;  %18747 = vmatmul.mubr.msk.f32.vlgmr.msra.gmra.mrb[224].mxu1 %vm4175_vm8, %v8855_v28 }
 0x601   : > { %19739 = vmatpush3.bf16.msra.mxu1 %v22546_v14  ;;  %19751 = vmatpush3.bf16.msra.mxu0 %v22546_v14 }
 0x602   : > { %18753 = vmatprep.subr.mxu1 %v22577_v4  ;;  %18780 = vmatprep.subr.mxu0 %v22577_v4 }
 0x605   : > { %18754 = vmatpush3.msra.mxu1 %v22577_v4  ;;  %18781 = vmatpush3.msra.mxu0 %v22577_v4 }
 0x606   : > { %19741 = vmatprep.subr.bf16.mxu1 %v22546_v14  ;;  %19753 = vmatprep.subr.bf16.mxu0 %v22546_v14 }
 0x60a   : > { %v8145_v47 = vpop.f32.mrb[214].mxu1 }
 0x60b   : > { %v8755_v33 = vmul.f32 0.39130434, %v8145_v47  ;;  %v8760_v48 = vmul.f32 0.8695652, %v8145_v47  ;;  %v18647_v61 = vpop.f32.mrb[215].mxu1 }
 0x60c   : > { %v8764_v22 = vmul.f32 0.65217394, %v8145_v47  ;;  %v8769_v62 = vmul.f32 0.17391305, %v8145_v47 }
 0x60d   : > { %v8756_v17 = vadd.f32 %v8755_v33, %v8754_v32  ;;  %v8761_v18 = vadd.f32 %v8760_v48, %v8759_v12 }
 0x60f   : > { %16670 = vst.msk [vmem:[%s20200_s28 + $0x7f] sm:$0xf] %vm4123_vm6, %v8756_v17  ;;  %16671 = vst.msk [vmem:[%s20200_s28 + $0x97] sm:$0xf] %vm4123_vm6, %v8761_v18 }
 0x616   : > { %v8856_v24 = vld [vmem:[%s20200_s28 + $0x78] sm:$0xff]  ;;  %v8857_v49 = vld [vmem:[%s20200_s28 + $0x80] sm:$0x7]  ;;  %v8858_v2 = vld [vmem:[%s20200_s28 + $0x90] sm:$0xff] }
 0x617   : > { %18755 = vmatprep.mubr.msk.f32.mxu1 %vm4175_vm8, %v8856_v24  ;;  %v8859_v21 = vld [vmem:[%s20200_s28 + $0x98] sm:$0x7] }
 0x618   : > { %18756 = vmatmul.mubr.msk.f32.vlgmr.msra.gmra.mrb[224].mxu1 %vm4175_vm8, %v8857_v49 }
 0x619   : > { %18764 = vmatprep.mubr.msk.f32.mxu1 %vm4175_vm8, %v8858_v2  ;;  %19743 = vmatpush3.bf16.msra.mxu1 %v22546_v14 }
 0x61a   : > { %18762 = vmatprep.subr.mxu1 %v22577_v4 }
 0x61d   : > { %18763 = vmatpush3.msra.mxu1 %v22577_v4 }
 0x61e   : > { %19745 = vmatprep.subr.bf16.mxu1 %v22546_v14 }
 0x620   : > { %18765 = vmatmul.mubr.msk.f32.vlgmr.msra.gmra.mrb[224].mxu1 %vm4175_vm8, %v8859_v21 }
 0x621   : > { %19747 = vmatpush3.bf16.msra.mxu1 %v22546_v14 }
 0x622   : > { %18771 = vmatprep.subr.mxu1 %v22577_v4 }
 0x625   : > { %18772 = vmatpush3.msra.mxu1 %v22577_v4 }
 0x626   : > { %v8218_v63 = vpop.f32.mrb[216].mxu0  ;;  %19765 = vmatprep.subr.bf16.mxu1 %v22546_v14 }
 0x627   : > { %v8765_v10 = vmul.f32 0.3478261, %v8218_v63  ;;  %v8770_v38 = vmul.f32 0.82608694, %v8218_v63  ;;  %v18654_v59 = vpop.f32.mrb[217].mxu0 }
 0x628   : > { %v8774_v23 = vmul.f32 0.6956522, %v8218_v63  ;;  %v8779_v51 = vmul.f32 0.2173913, %v8218_v63 }
 0x629   : > { %v8766_v13 = vadd.f32 %v8765_v10, %v8764_v22  ;;  %v8771_v30 = vadd.f32 %v8770_v38, %v8769_v62 }
 0x62b   : > { %16672 = vst.msk [vmem:[%s20200_s28 + $0xaf] sm:$0xf] %vm4123_vm6, %v8766_v13  ;;  %16673 = vst.msk [vmem:[%s20200_s28 + $0xc7] sm:$0xf] %vm4123_vm6, %v8771_v30 }
 0x632   : > { %v8860_v58 = vld [vmem:[%s20200_s28 + $0xa8] sm:$0xff]  ;;  %v8862_v25 = vld [vmem:[%s20200_s28 + $0xc0] sm:$0xff]  ;;  %v8861_v35 = vld [vmem:[%s20200_s28 + $0xb0] sm:$0x7] }
 0x633   : > { %18773 = vmatprep.mubr.msk.f32.mxu1 %vm4175_vm8, %v8860_v58  ;;  %18782 = vmatprep.mubr.msk.f32.mxu0 %vm4175_vm8, %v8862_v25  ;;  %v8863_v44 = vld [vmem:[%s20200_s28 + $0xc8] sm:$0x7] }
 0x634   : > { %18774 = vmatmul.mubr.msk.f32.vlgmr.msra.gmra.mrb[224].mxu1 %vm4175_vm8, %v8861_v35  ;;  %18783 = vmatmul.mubr.msk.f32.vlgmr.msra.gmra.mrb[226].mxu0 %vm4175_vm8, %v8863_v44 }
 0x635   : > { %19755 = vmatpush3.bf16.msra.mxu0 %v22546_v14  ;;  %19767 = vmatpush3.bf16.msra.mxu1 %v22546_v14 }
 0x636   : > { %18789 = vmatprep.subr.mxu0 %v22577_v4  ;;  %18816 = vmatprep.subr.mxu1 %v22577_v4 }
 0x639   : > { %18790 = vmatpush3.msra.mxu0 %v22577_v4  ;;  %18817 = vmatpush3.msra.mxu1 %v22577_v4 }
 0x63a   : > { %v8291_v60 = vpop.f32.mrb[216].mxu1  ;;  %19757 = vmatprep.subr.bf16.mxu0 %v22546_v14  ;;  %19769 = vmatprep.subr.bf16.mxu1 %v22546_v14 }
 0x63b   : > { %v8775_v0 = vmul.f32 0.3043478, %v8291_v60  ;;  %v8780_v53 = vmul.f32 0.7826087, %v8291_v60  ;;  %v18661_v11 = vpop.f32.mrb[217].mxu1 }
 0x63c   : > { %v8784_v40 = vmul.f32 0.73913044, %v8291_v60  ;;  %v8789_v16 = vmul.f32 0.26086956, %v8291_v60 }
 0x63d   : > { %v8776_v42 = vadd.f32 %v8775_v0, %v8774_v23  ;;  %v8781_v20 = vadd.f32 %v8780_v53, %v8779_v51 }
 0x63f   : > { %16674 = vst.msk [vmem:[%s20200_s28 + $0xdf] sm:$0xf] %vm4123_vm6, %v8776_v42  ;;  %16675 = vst.msk [vmem:[%s20200_s28 + $0xf7] sm:$0xf] %vm4123_vm6, %v8781_v20 }
 0x646   : > { %v8864_v43 = vld [vmem:[%s20200_s28 + $0xd8] sm:$0xff]  ;;  %v8865_v9 = vld [vmem:[%s20200_s28 + $0xe0] sm:$0x7]  ;;  %v8866_v5 = vld [vmem:[%s20200_s28 + $0xf0] sm:$0xff] }
 0x647   : > { %18791 = vmatprep.mubr.msk.f32.mxu0 %vm4175_vm8, %v8864_v43  ;;  %v8867_v52 = vld [vmem:[%s20200_s28 + $0xf8] sm:$0x7]  ;;  %v10952_v43 = vld [vmem:[#allocation4] sm:$0xff] }
 0x648   : > { %18792 = vmatmul.mubr.msk.f32.vlgmr.msra.gmra.mrb[226].mxu0 %vm4175_vm8, %v8865_v9  ;;  %v10953_v9 = vld [vmem:[#allocation4 + $0x8] sm:$0x7] }
 0x649   : > { %18800 = vmatprep.mubr.msk.f32.mxu0 %vm4175_vm8, %v8866_v5  ;;  %19759 = vmatpush3.bf16.msra.mxu0 %v22546_v14  ;;  %v19813_v5 = vpack.c.bf16 %v10953_v9, %v10952_v43 }
 0x64a   : > { %18798 = vmatprep.subr.mxu0 %v22577_v4 }
 0x64c   : > { %v8364_v54 = vpop.f32.mrb[218].mxu0 }
 0x64d   : > { %v8785_v46 = vmul.f32 0.26086956, %v8364_v54  ;;  %v8790_v39 = vmul.f32 0.73913044, %v8364_v54  ;;  %18799 = vmatpush3.msra.mxu0 %v22577_v4  ;;  %v18668_v19 = vpop.f32.mrb[219].mxu0 }
 0x64e   : > { %19761 = vmatprep.subr.bf16.mxu0 %v22546_v14  ;;  %v8794_v56 = vmul.f32 0.7826087, %v8364_v54  ;;  %v8799_v34 = vmul.f32 0.3043478, %v8364_v54  ;;  %v22833_v19 = vld [vmem:[%s24831_s3] sm:$0xff] }
 0x64f   : > { %v8786_v3 = vadd.f32 %v8785_v46, %v8784_v40  ;;  %v8791_v57 = vadd.f32 %v8790_v39, %v8789_v16 }
 0x650   : > { %18801 = vmatmul.mubr.msk.f32.vlgmr.msra.gmra.mrb[226].mxu0 %vm4175_vm8, %v8867_v52 }
 0x651   : > { %16676 = vst.msk [vmem:[%s20200_s28 + $0x10f] sm:$0xf] %vm4123_vm6, %v8786_v3  ;;  %16677 = vst.msk [vmem:[%s20200_s28 + $0x127] sm:$0xf] %vm4123_vm6, %v8791_v57  ;;  %19763 = vmatpush3.bf16.msra.mxu0 %v22546_v14 }
 0x652   : > { %18807 = vmatprep.subr.mxu0 %v22577_v4 }
 0x655   : > { %18808 = vmatpush3.msra.mxu0 %v22577_v4 }
 0x656   : > { %19781 = vmatprep.subr.bf16.mxu0 %v22546_v14 }
 0x658   : > { %v8868_v27 = vld [vmem:[%s20200_s28 + $0x108] sm:$0xff]  ;;  %v8870_v29 = vld [vmem:[%s20200_s28 + $0x120] sm:$0xff]  ;;  %v8869_v41 = vld [vmem:[%s20200_s28 + $0x110] sm:$0x7] }
 0x659   : > { %18809 = vmatprep.mubr.msk.f32.mxu0 %vm4175_vm8, %v8868_v27  ;;  %18818 = vmatprep.mubr.msk.f32.mxu1 %vm4175_vm8, %v8870_v29  ;;  %v8871_v7 = vld [vmem:[%s20200_s28 + $0x128] sm:$0x7] }
 0x65a   : > { %18810 = vmatmul.mubr.msk.f32.vlgmr.msra.gmra.mrb[226].mxu0 %vm4175_vm8, %v8869_v41  ;;  %18819 = vmatmul.mubr.msk.f32.vlgmr.msra.gmra.mrb[226].mxu1 %vm4175_vm8, %v8871_v7 }
 0x65b   : > { %19771 = vmatpush3.bf16.msra.mxu1 %v22546_v14  ;;  %19783 = vmatpush3.bf16.msra.mxu0 %v22546_v14 }
 0x65c   : > { %18825 = vmatprep.subr.mxu1 %v22577_v4  ;;  %18852 = vmatprep.subr.mxu0 %v22577_v4 }
 0x65f   : > { %18826 = vmatpush3.msra.mxu1 %v22577_v4  ;;  %18853 = vmatpush3.msra.mxu0 %v22577_v4 }
 0x660   : > { %19773 = vmatprep.subr.bf16.mxu1 %v22546_v14  ;;  %19785 = vmatprep.subr.bf16.mxu0 %v22546_v14 }
 0x66a   : > { %v8437_v36 = vpop.f32.mrb[218].mxu1 }
 0x66b   : > { %v8795_v15 = vmul.f32 0.2173913, %v8437_v36  ;;  %v8800_v31 = vmul.f32 0.6956522, %v8437_v36  ;;  %v18675_v37 = vpop.f32.mrb[219].mxu1 }
 0x66c   : > { %v8804_v28 = vmul.f32 0.82608694, %v8437_v36  ;;  %v8809_v47 = vmul.f32 0.3478261, %v8437_v36  ;;  %v22852_v36 = vld [vmem:[%s24831_s3 + $0x8] sm:$0xff] }
 0x66d   : > { %v8796_v8 = vadd.f32 %v8795_v15, %v8794_v56  ;;  %v8801_v1 = vadd.f32 %v8800_v31, %v8799_v34 }
 0x66f   : > { %16678 = vst.msk [vmem:[%s20200_s28 + $0x13f] sm:$0xf] %vm4123_vm6, %v8796_v8  ;;  %16679 = vst.msk [vmem:[%s20200_s28 + $0x157] sm:$0xf] %vm4123_vm6, %v8801_v1 }
 0x676   : > { %v8872_v50 = vld [vmem:[%s20200_s28 + $0x138] sm:$0xff]  ;;  %v8873_v6 = vld [vmem:[%s20200_s28 + $0x140] sm:$0x7]  ;;  %v8874_v26 = vld [vmem:[%s20200_s28 + $0x150] sm:$0xff] }
 0x677   : > { %18827 = vmatprep.mubr.msk.f32.mxu1 %vm4175_vm8, %v8872_v50  ;;  %v8875_v18 = vld [vmem:[%s20200_s28 + $0x158] sm:$0x7] }
 0x678   : > { %18828 = vmatmul.mubr.msk.f32.vlgmr.msra.gmra.mrb[226].mxu1 %vm4175_vm8, %v8873_v6 }
 0x679   : > { %18836 = vmatprep.mubr.msk.f32.mxu1 %vm4175_vm8, %v8874_v26  ;;  %19775 = vmatpush3.bf16.msra.mxu1 %v22546_v14 }
 0x67a   : > { %v8510_v32 = vpop.f32.mrb[220].mxu0  ;;  %18834 = vmatprep.subr.mxu1 %v22577_v4 }
 0x67b   : > { %v8805_v12 = vmul.f32 0.17391305, %v8510_v32  ;;  %v8810_v33 = vmul.f32 0.65217394, %v8510_v32  ;;  %v18682_v48 = vpop.f32.mrb[221].mxu0 }
 0x67c   : > { %v8814_v22 = vmul.f32 0.8695652, %v8510_v32  ;;  %v8819_v62 = vmul.f32 0.39130434, %v8510_v32 }
 0x67d   : > { %v8806_v61 = vadd.f32 %v8805_v12, %v8804_v28  ;;  %v8811_v17 = vadd.f32 %v8810_v33, %v8809_v47  ;;  %18835 = vmatpush3.msra.mxu1 %v22577_v4  ;;  %v22908_v47 = vld [vmem:[%s24831_s3 + $0x20] sm:$0xf] }
 0x67e   : > { %19777 = vmatprep.subr.bf16.mxu1 %v22546_v14 }
 0x67f   : > { %16680 = vst.msk [vmem:[%s20200_s28 + $0x16f] sm:$0xf] %vm4123_vm6, %v8806_v61  ;;  %16681 = vst.msk [vmem:[%s20200_s28 + $0x187] sm:$0xf] %vm4123_vm6, %v8811_v17 }
 0x680   : > { %18837 = vmatmul.mubr.msk.f32.vlgmr.msra.gmra.mrb[226].mxu1 %vm4175_vm8, %v8875_v18 }
 0x681   : > { %19779 = vmatpush3.bf16.msra.mxu1 %v22546_v14 }
 0x682   : > { %18843 = vmatprep.subr.mxu1 %v22577_v4 }
 0x685   : > { %18844 = vmatpush3.msra.mxu1 %v22577_v4 }
 0x686   : > { %v8876_v24 = vld [vmem:[%s20200_s28 + $0x168] sm:$0xff]  ;;  %v8878_v49 = vld [vmem:[%s20200_s28 + $0x180] sm:$0xff]  ;;  %v8877_v2 = vld [vmem:[%s20200_s28 + $0x170] sm:$0x7]  ;;  %19797 = vmatprep.subr.bf16.mxu1 %v22546_v14 }
 0x687   : > { %18845 = vmatprep.mubr.msk.f32.mxu1 %vm4175_vm8, %v8876_v24  ;;  %18854 = vmatprep.mubr.msk.f32.mxu0 %vm4175_vm8, %v8878_v49  ;;  %v8879_v21 = vld [vmem:[%s20200_s28 + $0x188] sm:$0x7] }
 0x688   : > { %18846 = vmatmul.mubr.msk.f32.vlgmr.msra.gmra.mrb[226].mxu1 %vm4175_vm8, %v8877_v2  ;;  %18855 = vmatmul.mubr.msk.f32.vlgmr.msra.gmra.mrb[228].mxu0 %vm4175_vm8, %v8879_v21 }
 0x689   : > { %19787 = vmatpush3.bf16.msra.mxu0 %v22546_v14  ;;  %19799 = vmatpush3.bf16.msra.mxu1 %v22546_v14 }
 0x68a   : > { %18861 = vmatprep.subr.mxu0 %v22577_v4  ;;  %18888 = vmatprep.subr.mxu1 %v22577_v4 }
 0x68d   : > { %18862 = vmatpush3.msra.mxu0 %v22577_v4  ;;  %18889 = vmatpush3.msra.mxu1 %v22577_v4 }
 0x68e   : > { %19789 = vmatprep.subr.bf16.mxu0 %v22546_v14  ;;  %19801 = vmatprep.subr.bf16.mxu1 %v22546_v14 }
 0x693   : > { %v8583_v63 = vpop.f32.mrb[220].mxu1 }
 0x694   : > { %v8815_v10 = vmul.f32 0.13043478, %v8583_v63  ;;  %v8820_v38 = vmul.f32 0.6086956, %v8583_v63  ;;  %v18689_v59 = vpop.f32.mrb[221].mxu1 }
 0x695   : > { %v8824_v44 = vmul.f32 0.9130435, %v8583_v63  ;;  %v8829_v60 = vmul.f32 0.4347826, %v8583_v63 }
 0x696   : > { %v8816_v13 = vadd.f32 %v8815_v10, %v8814_v22  ;;  %v8821_v30 = vadd.f32 %v8820_v38, %v8819_v62 }
 0x698   : > { %16682 = vst.msk [vmem:[%s20200_s28 + $0x19f] sm:$0xf] %vm4123_vm6, %v8816_v13  ;;  %16683 = vst.msk [vmem:[%s20200_s28 + $0x1b7] sm:$0xf] %vm4123_vm6, %v8821_v30 }
 0x69f   : > { %v8880_v58 = vld [vmem:[%s20200_s28 + $0x198] sm:$0xff]  ;;  %v8881_v25 = vld [vmem:[%s20200_s28 + $0x1a0] sm:$0x7]  ;;  %v8882_v35 = vld [vmem:[%s20200_s28 + $0x1b0] sm:$0xff] }
 0x6a0   : > { %18863 = vmatprep.mubr.msk.f32.mxu0 %vm4175_vm8, %v8880_v58  ;;  %v8883_v20 = vld [vmem:[%s20200_s28 + $0x1b8] sm:$0x7] }
 0x6a1   : > { %18864 = vmatmul.mubr.msk.f32.vlgmr.msra.gmra.mrb[228].mxu0 %vm4175_vm8, %v8881_v25 }
 0x6a2   : > { %18872 = vmatprep.mubr.msk.f32.mxu0 %vm4175_vm8, %v8882_v35  ;;  %19791 = vmatpush3.bf16.msra.mxu0 %v22546_v14 }
 0x6a3   : > { %v8656_v23 = vpop.f32.mrb[222].mxu0  ;;  %18870 = vmatprep.subr.mxu0 %v22577_v4 }
 0x6a4   : > { %v8825_v51 = vmul.f32 0.08695652, %v8656_v23  ;;  %v8830_v0 = vmul.f32 0.5652174, %v8656_v23  ;;  %v18696_v53 = vpop.f32.mrb[223].mxu0 }
 0x6a5   : > { %v8834_v3 = vmul.f32 0.95652175, %v8656_v23  ;;  %v8839_v57 = vmul.f32 0.47826087, %v8656_v23 }
 0x6a6   : > { %v8826_v11 = vadd.f32 %v8825_v51, %v8824_v44  ;;  %v8831_v42 = vadd.f32 %v8830_v0, %v8829_v60  ;;  %18871 = vmatpush3.msra.mxu0 %v22577_v4 }
 0x6a7   : > { %19793 = vmatprep.subr.bf16.mxu0 %v22546_v14 }
 0x6a8   : > { %16684 = vst.msk [vmem:[%s20200_s28 + $0x1cf] sm:$0xf] %vm4123_vm6, %v8826_v11  ;;  %16685 = vst.msk [vmem:[%s20200_s28 + $0x1e7] sm:$0xf] %vm4123_vm6, %v8831_v42 }
 0x6a9   : > { %18873 = vmatmul.mubr.msk.f32.vlgmr.msra.gmra.mrb[228].mxu0 %vm4175_vm8, %v8883_v20 }
 0x6aa   : > { %19795 = vmatpush3.bf16.msra.mxu0 %v22546_v14 }
 0x6ab   : > { %18879 = vmatprep.subr.mxu0 %v22577_v4 }
 0x6ae   : > { %18880 = vmatpush3.msra.mxu0 %v22577_v4 }
 0x6af   : > { %v8884_v54 = vld [vmem:[%s20200_s28 + $0x1c8] sm:$0xff]  ;;  %v8886_v16 = vld [vmem:[%s20200_s28 + $0x1e0] sm:$0xff]  ;;  %v8885_v46 = vld [vmem:[%s20200_s28 + $0x1d0] sm:$0x7]  ;;  %19812 = vmatprep.subr.bf16.mxu0 %v24860_v45 }
 0x6b0   : > { %18881 = vmatprep.mubr.msk.f32.mxu0 %vm4175_vm8, %v8884_v54  ;;  %18890 = vmatprep.mubr.msk.f32.mxu1 %vm4175_vm8, %v8886_v16  ;;  %v8887_v39 = vld [vmem:[%s20200_s28 + $0x1e8] sm:$0x7] }
 0x6b1   : > { %18882 = vmatmul.mubr.msk.f32.vlgmr.msra.gmra.mrb[228].mxu0 %vm4175_vm8, %v8885_v46  ;;  %18891 = vmatmul.mubr.msk.f32.vlgmr.msra.gmra.mrb[228].mxu1 %vm4175_vm8, %v8887_v39 }
 0x6b2   : > { %v8729_v52 = vpop.f32.mrb[222].mxu1  ;;  %19803 = vmatpush3.bf16.msra.mxu1 %v22546_v14  ;;  %19815 = vmatpush3.bf16.msk.msra.mxu0 %vm22817_vm9, %v19813_v5 }
 0x6b3   : > { %v8835_v27 = vmul.f32 0.04347826, %v8729_v52  ;;  %v8840_v29 = vmul.f32 0.5217391, %v8729_v52  ;;  %16688 = vst.msk [vmem:[%s20200_s28 + $0x22f] sm:$0xf] %vm4123_vm6, %v8729_v52  ;;  %18897 = vmatprep.subr.mxu1 %v22577_v4  ;;  %18924 = vmatprep.mubr.msk.f32.mxu0 %vm20050_vm1, %v24861_v55 }
 0x6b4   : > { %v18703_v41 = vpop.f32.mrb[223].mxu1  ;;  %19820 = vmatprep.subr.bf16.mxu0 %v24860_v45 }
 0x6b5   : > { %v8836_v7 = vadd.f32 %v8835_v27, %v8834_v3  ;;  %v8841_v56 = vadd.f32 %v8840_v29, %v8839_v57  ;;  %18925 = vmatmul.mubr.msk.f32.vlgmr.msra.gmra.mrb[230].mxu0 %vm10973_vm2, %v22833_v19 }
 0x6b6   : > { %18898 = vmatpush3.msra.mxu1 %v22577_v4  ;;  %18927 = vmatprep.mubr.msk.f32.mxu0 %vm20050_vm1, %v24861_v55 }
 0x6b7   : > { %16686 = vst.msk [vmem:[%s20200_s28 + $0x1ff] sm:$0xf] %vm4123_vm6, %v8836_v7  ;;  %16687 = vst.msk [vmem:[%s20200_s28 + $0x217] sm:$0xf] %vm4123_vm6, %v8841_v56  ;;  %19805 = vmatprep.subr.bf16.mxu1 %v22546_v14 }
 0x6b9   : > { %18928 = vmatmul.mubr.msk.f32.gmra.mrb[232].mxu0 %vm10973_vm2, %v22852_v36 }
 0x6ba   : > { %18930 = vmatprep.mubr.msk.f32.mxu0 %vm20050_vm1, %v24861_v55  ;;  %v8892_v8 = vld [vmem:[%s20200_s28 + $0x228] sm:$0xff]  ;;  %v8893_v1 = vld [vmem:[%s20200_s28 + $0x230] sm:$0x7] }
 0x6be   : > { %v8888_v34 = vld [vmem:[%s20200_s28 + $0x1f8] sm:$0xff]  ;;  %v8889_v15 = vld [vmem:[%s20200_s28 + $0x200] sm:$0x7]  ;;  %v8890_v31 = vld [vmem:[%s20200_s28 + $0x210] sm:$0xff] }
 0x6bf   : > { %18899 = vmatprep.mubr.msk.f32.mxu1 %vm4175_vm8, %v8888_v34  ;;  %v8891_v37 = vld [vmem:[%s20200_s28 + $0x218] sm:$0x7] }
 0x6c0   : > { %18900 = vmatmul.mubr.msk.f32.vlgmr.msra.gmra.mrb[228].mxu1 %vm4175_vm8, %v8889_v15 }
 0x6c1   : > { %18908 = vmatprep.mubr.msk.f32.mxu1 %vm4175_vm8, %v8890_v31  ;;  %19807 = vmatpush3.bf16.msra.mxu1 %v22546_v14 }
 0x6c2   : > { %18906 = vmatprep.subr.mxu1 %v22577_v4 }
 0x6c5   : > { %18907 = vmatpush3.msra.mxu1 %v22577_v4 }
 0x6c6   : > { %19809 = vmatprep.subr.bf16.mxu1 %v22546_v14 }
 0x6c8   : > { %18909 = vmatmul.mubr.msk.f32.vlgmr.msra.gmra.mrb[228].mxu1 %vm4175_vm8, %v8891_v37 }
 0x6c9   : > { %18917 = vmatprep.mubr.msk.f32.mxu1 %vm4175_vm8, %v8892_v8  ;;  %19811 = vmatpush3.bf16.msra.mxu1 %v22546_v14  ;;  %v22890_v14 = vld [vmem:[%s24831_s3 + $0x10] sm:$0xff] }
 0x6ca   : > { %18915 = vmatprep.subr.mxu1 %v22577_v4  ;;  %18931 = vmatmul.mubr.msk.f32.gmra.mrb[234].mxu0 %vm10973_vm2, %v22890_v14 }
 0x6cb   : > { %18933 = vmatprep.mubr.msk.f32.mxu0 %vm20050_vm1, %v24861_v55 }
 0x6cd   : > { %18916 = vmatpush3.msra.mxu1 %v22577_v4  ;;  %v22899_v4 = vld [vmem:[%s24831_s3 + $0x18] sm:$0xff] }
 0x6ce   : > { %19816 = vmatprep.subr.bf16.mxu1 %v24860_v45  ;;  %18934 = vmatmul.mubr.msk.f32.gmra.mrb[236].mxu0 %vm10973_vm2, %v22899_v4 }
 0x6cf   : > { %18936 = vmatprep.mubr.msk.f32.mxu0 %vm20050_vm1, %v24861_v55 }
 0x6d0   : > { %18918 = vmatmul.mubr.msk.f32.vlgmr.msra.gmra.mrb[228].mxu1 %vm4175_vm8, %v8893_v1  ;;  %vm10940_vm8 = vcmask 51208  }
 0x6d1   : > { %18943 = vmatprep.mubr.msk.f32.mxu1 %vm20050_vm1, %v24861_v55 }
 0x6d2   : > { %18937 = vmatmul.mubr.msk.f32.gmra.mrb[238].mxu0 %vm10973_vm2, %v22908_v47 }
 0x6d3   : > { %v18739_v50 = vpop.f32.mrb[224].mxu0  ;;  %18962 = vmatprep.mubr.msk.f32.mxu0 %vm20050_vm1, %v24861_v55 }
 0x6d4   : > { %v10878_v6 = vmul.f32 0.25, %v18739_v50  ;;  %v9212_v26 = vpop.f32.mrb[225].mxu0 }
 0x6d5   : > { %v10877_v28 = vmul.f32 0.25, %v9212_v26 }
 0x6d6   : > { %10903 = vrot.lane.b32.xlu0 %v10878_v6, %s20051_s14 }
 0x6d7   : > { %10901 = vrot.lane.b32.xlu1 %v10877_v28, %s20051_s14  ;;  %v10966_v28 = vld [vmem:[#allocation4 + $0x70] sm:$0xff] }
 0x707   : > { %v18775_v32 = vpop.f32.mrb[224].mxu1 }
 0x708   : > { %v10880_v12 = vmul.f32 0.25, %v18775_v32  ;;  %v9536_v33 = vpop.f32.mrb[225].mxu1  ;;  %v10967_v32 = vld [vmem:[#allocation4 + $0x78] sm:$0x7] }
 0x709   : > { %v10879_v48 = vmul.f32 0.25, %v9536_v33  ;;  %v19841_v33 = vpack.c.bf16 %v10967_v32, %v10966_v28 }
 0x70a   : > { %10907 = vrot.lane.b32.xlu0 %v10880_v12, %s20051_s14 }
 0x70b   : > { %10905 = vrot.lane.b32.xlu1 %v10879_v48, %s20051_s14 }
 0x72d   : > { %v18811_v61 = vpop.f32.mrb[226].mxu0 }
 0x72e   : > { %v10882_v17 = vmul.f32 0.25, %v18811_v61  ;;  %v9860_v18 = vpop.f32.mrb[227].mxu0 }
 0x72f   : > { %v10881_v24 = vmul.f32 0.25, %v9860_v18 }
 0x730   : > { %10911 = vrot.lane.b32.xlu0 %v10882_v17, %s20051_s14 }
 0x731   : > { %10909 = vrot.lane.b32.xlu1 %v10881_v24, %s20051_s14 }
 0x748   : > { %v10904_v49 = vpop.permute.xlu0 %10903 }
 0x749   : > { %10941 = vst.msk [vmem:[#allocation4 + $0x18] sm:$0x7] %vm10940_vm8, %v10904_v49  ;;  %v10902_v2 = vpop.permute.xlu1 %10901 }
 0x74a   : > { %10939 = vst.msk [vmem:[#allocation4 + $0x10] sm:$0xff] %vm10938_vm10, %v10902_v2 }
 0x750   : > { %v10955_v21 = vld [vmem:[#allocation4 + $0x18] sm:$0x7] }
 0x751   : > { %v10954_v22 = vld [vmem:[#allocation4 + $0x10] sm:$0xff] }
 0x752   : > { %v19817_v63 = vpack.c.bf16 %v10955_v21, %v10954_v22 }
 0x754   : > { %19819 = vmatpush3.bf16.msk.msra.mxu1 %vm22817_vm9, %v19817_v63 }
 0x755   : > { %19824 = vmatprep.subr.bf16.mxu1 %v24860_v45 }
 0x757   : > { %18944 = vmatmul.mubr.msk.f32.vlgmr.msra.gmra.mrb[230].mxu1 %vm10973_vm2, %v22833_v19 }
 0x758   : > { %18946 = vmatprep.mubr.msk.f32.mxu1 %vm20050_vm1, %v24861_v55 }
 0x75b   : > { %v18847_v62 = vpop.f32.mrb[226].mxu1  ;;  %18947 = vmatmul.mubr.msk.f32.gmra.mrb[232].mxu1 %vm10973_vm2, %v22852_v36 }
 0x75c   : > { %v10884_v10 = vmul.f32 0.25, %v18847_v62  ;;  %v10184_v38 = vpop.f32.mrb[227].mxu1  ;;  %18949 = vmatprep.mubr.msk.f32.mxu1 %vm20050_vm1, %v24861_v55 }
 0x75d   : > { %v10883_v59 = vmul.f32 0.25, %v10184_v38 }
 0x75e   : > { %10915 = vrot.lane.b32.xlu0 %v10884_v10, %s20051_s14 }
 0x75f   : > { %10913 = vrot.lane.b32.xlu1 %v10883_v59, %s20051_s14  ;;  %18950 = vmatmul.mubr.msk.f32.gmra.mrb[234].mxu1 %vm10973_vm2, %v22890_v14 }
 0x760   : > { %18952 = vmatprep.mubr.msk.f32.mxu1 %vm20050_vm1, %v24861_v55 }
 0x763   : > { %18953 = vmatmul.mubr.msk.f32.gmra.mrb[236].mxu1 %vm10973_vm2, %v22899_v4 }
 0x764   : > { %18955 = vmatprep.mubr.msk.f32.mxu1 %vm20050_vm1, %v24861_v55 }
 0x767   : > { %18956 = vmatmul.mubr.msk.f32.gmra.mrb[238].mxu1 %vm10973_vm2, %v22908_v47 }
 0x768   : > { %18981 = vmatprep.mubr.msk.f32.mxu1 %vm20050_vm1, %v24861_v55 }
 0x77c   : > { %v10908_v13 = vpop.permute.xlu0 %10907 }
 0x77d   : > { %10943 = vst.msk [vmem:[#allocation4 + $0x28] sm:$0x7] %vm10940_vm8, %v10908_v13  ;;  %v10906_v30 = vpop.permute.xlu1 %10905 }
 0x77e   : > { %10942 = vst.msk [vmem:[#allocation4 + $0x20] sm:$0xff] %vm10938_vm10, %v10906_v30  ;;  %v16786_v30 = vld [vmem:[%s24834_s6 + $0x8] sm:$0xf] }
 0x784   : > { %v18883_v58 = vpop.f32.mrb[228].mxu0  ;;  %v10957_v25 = vld [vmem:[#allocation4 + $0x28] sm:$0x7] }
 0x785   : > { %v10886_v35 = vmul.f32 0.25, %v18883_v58  ;;  %v10508_v44 = vpop.f32.mrb[229].mxu0  ;;  %v10956_v23 = vld [vmem:[#allocation4 + $0x20] sm:$0xff] }
 0x786   : > { %v10885_v60 = vmul.f32 0.25, %v10508_v44  ;;  %v19821_v51 = vpack.c.bf16 %v10957_v25, %v10956_v23 }
 0x787   : > { %10919 = vrot.lane.b32.xlu0 %v10886_v35, %s20051_s14 }
 0x788   : > { %10917 = vrot.lane.b32.xlu1 %v10885_v60, %s20051_s14  ;;  %19823 = vmatpush3.bf16.msk.msra.mxu0 %vm22817_vm9, %v19821_v51  ;;  %v22951_v0 = vpop.f32.mrb[230].mxu0 }
 0x789   : > { %19828 = vmatprep.subr.bf16.mxu0 %v24860_v45  ;;  %v18926_v53 = vpop.f32.mrb[231].mxu0  ;;  %v11730_v46 = vrot.slane %v22951_v0, 4 }
 0x78b   : > { %18963 = vmatmul.mubr.msk.f32.vlgmr.msra.gmra.mrb[240].mxu0 %vm10973_vm2, %v22833_v19 }
 0x78c   : > { %18965 = vmatprep.mubr.msk.f32.mxu0 %vm20050_vm1, %v24861_v55  ;;  %v11063_v11 = vpop.f32.mrb[232].mxu0 }
 0x78d   : > { %v18929_v42 = vpop.f32.mrb[233].mxu0 }
 0x78f   : > { %18966 = vmatmul.mubr.msk.f32.gmra.mrb[242].mxu0 %vm10973_vm2, %v22852_v36 }
 0x790   : > { %18968 = vmatprep.mubr.msk.f32.mxu0 %vm20050_vm1, %v24861_v55 }
 0x793   : > { %18969 = vmatmul.mubr.msk.f32.gmra.mrb[244].mxu0 %vm10973_vm2, %v22890_v14 }
 0x794   : > { %18971 = vmatprep.mubr.msk.f32.mxu0 %vm20050_vm1, %v24861_v55 }
 0x797   : > { %18972 = vmatmul.mubr.msk.f32.gmra.mrb[246].mxu0 %vm10973_vm2, %v22899_v4 }
 0x798   : > { %18974 = vmatprep.mubr.msk.f32.mxu0 %vm20050_vm1, %v24861_v55 }
 0x79b   : > { %18975 = vmatmul.mubr.msk.f32.gmra.mrb[248].mxu0 %vm10973_vm2, %v22908_v47 }
 0x79c   : > { %19000 = vmatprep.mubr.msk.f32.mxu0 %vm20050_vm1, %v24861_v55 }
 0x79d   : > { %v11068_v52 = vpop.f32.mrb[234].mxu0 }
 0x79e   : > { %v18932_v27 = vpop.f32.mrb[235].mxu0 }
 0x7a1   : > { %v11072_v56 = vpop.f32.mrb[236].mxu0 }
 0x7a2   : > { %v10912_v20 = vpop.permute.xlu0 %10911  ;;  %v18935_v15 = vpop.f32.mrb[237].mxu0 }
 0x7a3   : > { %10945 = vst.msk [vmem:[#allocation4 + $0x38] sm:$0x7] %vm10940_vm8, %v10912_v20  ;;  %v10910_v43 = vpop.permute.xlu1 %10909  ;;  %v18919_v9 = vpop.f32.mrb[228].mxu1 }
 0x7a4   : > { %10944 = vst.msk [vmem:[#allocation4 + $0x30] sm:$0xff] %vm10938_vm10, %v10910_v43  ;;  %v10888_v5 = vmul.f32 0.25, %v18919_v9  ;;  %v10832_v54 = vpop.f32.mrb[229].mxu1 }
 0x7a5   : > { %v10887_v16 = vmul.f32 0.25, %v10832_v54  ;;  %v11076_v37 = vpop.f32.mrb[238].mxu0 }
 0x7a6   : > { %10923 = vrot.lane.b32.xlu0 %v10888_v5, %s20051_s14  ;;  %v18938_v8 = vpop.f32.mrb[239].mxu0 }
 0x7a7   : > { %10921 = vrot.lane.b32.xlu1 %v10887_v16, %s20051_s14 }
 0x7aa   : > { %v10959_v39 = vld [vmem:[#allocation4 + $0x38] sm:$0x7]  ;;  %11766 = vrot.lane.b32.xlu0 %v11063_v11, %s20054_s25 }
 0x7ab   : > { %v10958_v3 = vld [vmem:[#allocation4 + $0x30] sm:$0xff]  ;;  %11736 = vrot.lane.b32.xlu1 %v11730_v46, %s20053_s24 }
 0x7ac   : > { %v19825_v57 = vpack.c.bf16 %v10959_v39, %v10958_v3 }
 0x7ae   : > { %19827 = vmatpush3.bf16.msk.msra.mxu1 %vm22817_vm9, %v19825_v57 }
 0x7af   : > { %19832 = vmatprep.subr.bf16.mxu1 %v24860_v45 }
 0x7b1   : > { %18982 = vmatmul.mubr.msk.f32.vlgmr.msra.gmra.mrb[240].mxu1 %vm10973_vm2, %v22833_v19 }
 0x7b2   : > { %18984 = vmatprep.mubr.msk.f32.mxu1 %vm20050_vm1, %v24861_v55 }
 0x7b5   : > { %18985 = vmatmul.mubr.msk.f32.gmra.mrb[242].mxu1 %vm10973_vm2, %v22852_v36 }
 0x7b6   : > { %18987 = vmatprep.mubr.msk.f32.mxu1 %vm20050_vm1, %v24861_v55 }
 0x7b9   : > { %18988 = vmatmul.mubr.msk.f32.gmra.mrb[244].mxu1 %vm10973_vm2, %v22890_v14 }
 0x7ba   : > { %18990 = vmatprep.mubr.msk.f32.mxu1 %vm20050_vm1, %v24861_v55 }
 0x7bd   : > { %18991 = vmatmul.mubr.msk.f32.gmra.mrb[246].mxu1 %vm10973_vm2, %v22899_v4 }
 0x7be   : > { %18993 = vmatprep.mubr.msk.f32.mxu1 %vm20050_vm1, %v24861_v55 }
 0x7c1   : > { %18994 = vmatmul.mubr.msk.f32.gmra.mrb[248].mxu1 %vm10973_vm2, %v22908_v47 }
 0x7c2   : > { %19019 = vmatprep.mubr.msk.f32.mxu1 %vm20050_vm1, %v24861_v55 }
 0x7d0   : > { %v10916_v29 = vpop.permute.xlu0 %10915 }
 0x7d1   : > { %10947 = vst.msk [vmem:[#allocation4 + $0x48] sm:$0x7] %vm10940_vm8, %v10916_v29  ;;  %v10914_v41 = vpop.permute.xlu1 %10913 }
 0x7d2   : > { %10946 = vst.msk [vmem:[#allocation4 + $0x40] sm:$0xff] %vm10938_vm10, %v10914_v41 }
 0x7d8   : > { %v10961_v7 = vld [vmem:[#allocation4 + $0x48] sm:$0x7] }
 0x7d9   : > { %v10960_v34 = vld [vmem:[#allocation4 + $0x40] sm:$0xff] }
 0x7da   : > { %v19829_v31 = vpack.c.bf16 %v10961_v7, %v10960_v34 }
 0x7dc   : > { %19831 = vmatpush3.bf16.msk.msra.mxu0 %vm22817_vm9, %v19829_v31 }
 0x7dd   : > { %19836 = vmatprep.subr.bf16.mxu0 %v24860_v45 }
 0x7df   : > { %19001 = vmatmul.mubr.msk.f32.vlgmr.msra.gmra.mrb[250].mxu0 %vm10973_vm2, %v22833_v19 }
 0x7e0   : > { %19003 = vmatprep.mubr.msk.f32.mxu0 %vm20050_vm1, %v24861_v55 }
 0x7e3   : > { %19004 = vmatmul.mubr.msk.f32.gmra.mrb[252].mxu0 %vm10973_vm2, %v22852_v36 }
 0x7e4   : > { %19006 = vmatprep.mubr.msk.f32.mxu0 %vm20050_vm1, %v24861_v55 }
 0x7e7   : > { %19007 = vmatmul.mubr.msk.f32.gmra.mrb[254].mxu0 %vm10973_vm2, %v22890_v14 }
 0x7e8   : > { %19009 = vmatprep.mubr.msk.f32.mxu0 %vm20050_vm1, %v24861_v55 }
 0x7eb   : > { %19010 = vmatmul.mubr.msk.f32.gmra.mrb[0].mxu0 %vm10973_vm2, %v22899_v4 }
 0x7ec   : > { %19012 = vmatprep.mubr.msk.f32.mxu0 %vm20050_vm1, %v24861_v55 }
 0x7ef   : > { %19013 = vmatmul.mubr.msk.f32.gmra.mrb[2].mxu0 %vm10973_vm2, %v22908_v47 }
 0x7f0   : > { %19038 = vmatprep.mubr.msk.f32.mxu0 %vm20050_vm1, %v24861_v55 }
 0x7f9   : > { %v10920_v1 = vpop.permute.xlu0 %10919 }
 0x7fa   : > { %10949 = vst.msk [vmem:[#allocation4 + $0x58] sm:$0x7] %vm10940_vm8, %v10920_v1  ;;  %v10918_v50 = vpop.permute.xlu1 %10917 }
 0x7fb   : > { %10948 = vst.msk [vmem:[#allocation4 + $0x50] sm:$0xff] %vm10938_vm10, %v10918_v50 }
 0x801   : > { %v10963_v6 = vld [vmem:[#allocation4 + $0x58] sm:$0x7] }
 0x802   : > { %v10962_v26 = vld [vmem:[#allocation4 + $0x50] sm:$0xff] }
 0x803   : > { %v19833_v12 = vpack.c.bf16 %v10963_v6, %v10962_v26 }
 0x805   : > { %19835 = vmatpush3.bf16.msk.msra.mxu1 %vm22817_vm9, %v19833_v12 }
 0x806   : > { %19840 = vmatprep.subr.bf16.mxu1 %v24860_v45 }
 0x808   : > { %19020 = vmatmul.mubr.msk.f32.vlgmr.msra.gmra.mrb[250].mxu1 %vm10973_vm2, %v22833_v19 }
 0x809   : > { %19022 = vmatprep.mubr.msk.f32.mxu1 %vm20050_vm1, %v24861_v55  ;;  %19843 = vmatpush3.bf16.msk.msra.mxu1 %vm22817_vm9, %v19841_v33 }
 0x80a   : > { %19077 = vmatprep.subr.mxu1 %v24861_v55 }
 0x80c   : > { %19023 = vmatmul.mubr.msk.f32.gmra.mrb[252].mxu1 %vm10973_vm2, %v22852_v36 }
 0x80d   : > { %19025 = vmatprep.mubr.msk.f32.mxu1 %vm20050_vm1, %v24861_v55 }
 0x810   : > { %19026 = vmatmul.mubr.msk.f32.gmra.mrb[254].mxu1 %vm10973_vm2, %v22890_v14 }
 0x811   : > { %19028 = vmatprep.mubr.msk.f32.mxu1 %vm20050_vm1, %v24861_v55 }
 0x814   : > { %19029 = vmatmul.mubr.msk.f32.gmra.mrb[0].mxu1 %vm10973_vm2, %v22899_v4 }
 0x815   : > { %19031 = vmatprep.mubr.msk.f32.mxu1 %vm20050_vm1, %v24861_v55 }
 0x818   : > { %19032 = vmatmul.mubr.msk.f32.gmra.mrb[2].mxu1 %vm10973_vm2, %v22908_v47  ;;  %v10924_v48 = vpop.permute.xlu0 %10923 }
 0x819   : > { %10951 = vst.msk [vmem:[#allocation4 + $0x68] sm:$0x7] %vm10940_vm8, %v10924_v48  ;;  %v10922_v61 = vpop.permute.xlu1 %10921  ;;  %19057 = vmatprep.mubr.msk.f32.mxu1 %vm20050_vm1, %v24861_v55  ;;  %vm12761_vm8 = vcmask 202760  }
 0x81a   : > { %10950 = vst.msk [vmem:[#allocation4 + $0x60] sm:$0xff] %vm10938_vm10, %v10922_v61 }
 0x81c   : > { %19058 = vmatmul.mubr.msk.f32.vlgmr.msra.gmra.mrb[4].mxu1 %vm10973_vm2, %v22833_v19  ;;  %v11767_v21 = vpop.permute.xlu0 %11766 }
 0x81d   : > { %19060 = vmatprep.mubr.msk.f32.mxu1 %vm20050_vm1, %v24861_v55  ;;  %v11737_v49 = vpop.permute.xlu1 %11736 }
 0x81e   : > { %v11754_v40 = vadd.f32 %v11737_v49, %v22951_v0 }
 0x820   : > { %v10965_v17 = vld [vmem:[#allocation4 + $0x68] sm:$0x7]  ;;  %19061 = vmatmul.mubr.msk.f32.gmra.mrb[6].mxu1 %vm10973_vm2, %v22852_v36 }
 0x821   : > { %v10964_v18 = vld [vmem:[#allocation4 + $0x60] sm:$0xff]  ;;  %19063 = vmatprep.mubr.msk.f32.mxu1 %vm20050_vm1, %v24861_v55 }
 0x822   : > { %v19837_v24 = vpack.c.bf16 %v10965_v17, %v10964_v18 }
 0x824   : > { %19839 = vmatpush3.bf16.msk.msra.mxu0 %vm22817_vm9, %v19837_v24  ;;  %19064 = vmatmul.mubr.msk.f32.gmra.mrb[8].mxu1 %vm10973_vm2, %v22890_v14  ;;  %vm23358_vm9 = vmpackc.low %vm6049_vm7, %vm20056_vm13  ;;  %vm12866_vm7 = vcmask 121856   ;;  %vm12759_vm13 = vcmask 203784  }
 0x825   : > { %19066 = vmatprep.mubr.msk.f32.mxu1 %vm20050_vm1, %v24861_v55  ;;  %19072 = vmatprep.subr.mxu0 %v24861_v55 }
 0x827   : > { %19039 = vmatmul.mubr.msk.f32.vlgmr.msra.gmra.mrb[4].mxu0 %vm10973_vm2, %v22833_v19  ;;  %v11784_v19 = vadd.f32 %v11767_v21, %v11754_v40 }
 0x828   : > { %19041 = vmatprep.mubr.msk.f32.mxu0 %vm20050_vm1, %v24861_v55  ;;  %19067 = vmatmul.mubr.msk.f32.gmra.mrb[10].mxu1 %vm10973_vm2, %v22899_v4 }
 0x829   : > { %19069 = vmatprep.mubr.msk.f32.mxu1 %vm20050_vm1, %v24861_v55 }
 0x82a   : > { %v23083_v2 = vpop.f32.mrb[230].mxu1 }
 0x82b   : > { %19042 = vmatmul.mubr.msk.f32.gmra.mrb[6].mxu0 %vm10973_vm2, %v22852_v36  ;;  %v18945_v22 = vpop.f32.mrb[231].mxu1  ;;  %v11731_v9 = vrot.slane %v23083_v2, 4 }
 0x82c   : > { %19044 = vmatprep.mubr.msk.f32.mxu0 %vm20050_vm1, %v24861_v55  ;;  %19070 = vmatmul.mubr.msk.f32.gmra.mrb[12].mxu1 %vm10973_vm2, %v22908_v47 }
 0x82d   : > { %19079 = vmatprep.mubr.msk.f32.mxu1 %vm20050_vm1, %v24861_v55 }
 0x82e   : > { %v11153_v63 = vpop.f32.mrb[232].mxu1 }
 0x82f   : > { %19045 = vmatmul.mubr.msk.f32.gmra.mrb[8].mxu0 %vm10973_vm2, %v22890_v14  ;;  %v11791_v62 = vrot.slane %v11153_v63, 4  ;;  %v18948_v10 = vpop.f32.mrb[233].mxu1  ;;  %v16785_v14 = vld [vmem:[%s24833_s5 + $0x8] sm:$0xf] }
 0x830   : > { %19047 = vmatprep.mubr.msk.f32.mxu0 %vm20050_vm1, %v24861_v55 }
 0x831   : > { %v23097_v36 = vadd.f32 %v11791_v62, %v11784_v19 }
 0x832   : > { %v11158_v38 = vpop.f32.mrb[234].mxu1 }
 0x833   : > { %v11839_v59 = vrot.slane %v11158_v38, 4  ;;  %11815 = vrot.lane.b32.xlu1 %v11158_v38, %s20053_s24  ;;  %19048 = vmatmul.mubr.msk.f32.gmra.mrb[10].mxu0 %vm10973_vm2, %v22899_v4  ;;  %v18951_v13 = vpop.f32.mrb[235].mxu1 }
 0x834   : > { %19050 = vmatprep.mubr.msk.f32.mxu0 %vm20050_vm1, %v24861_v55 }
 0x835   : > { %11845 = vrot.lane.b32.xlu0 %v11839_v59, %s20054_s25 }
 0x836   : > { %v11163_v58 = vpop.f32.mrb[236].mxu1 }
 0x837   : > { %11945 = vperm.xlu1 %20026, %v16785_v14   ;;  %19051 = vmatmul.mubr.msk.f32.gmra.mrb[12].mxu0 %vm10973_vm2, %v22908_v47  ;;  %v18954_v4 = vpop.f32.mrb[237].mxu1  ;;  %v23122_v47 = vld [vmem:[%s24838_s10] sm:$0x3f] }
 0x838   : > { %19074 = vmatprep.mubr.msk.f32.mxu0 %vm20050_vm1, %v24861_v55  ;;  %19073 = vmatpush3.msk.msra.mxu0 %vm11990_vm11, %v23122_v47 }
 0x839   : > { %11958 = vperm.xlu0 %20027, %v16786_v30   ;;  %19078 = vmatpush3.msk.msra.mxu1 %vm11990_vm11, %v23122_v47 }
 0x83a   : > { %v11167_v25 = vpop.f32.mrb[238].mxu1  ;;  %19082 = vmatprep.subr.mxu0 %v24861_v55  ;;  %19087 = vmatprep.subr.mxu1 %v24861_v55 }
 0x83b   : > { %v18957_v35 = vpop.f32.mrb[239].mxu1 }
 0x85e   : > { %v23115_v44 = vpop.f32.mrb[240].mxu0 }
 0x85f   : > { %v18964_v23 = vpop.f32.mrb[241].mxu0  ;;  %v11732_v56 = vrot.slane %v23115_v44, 4 }
 0x862   : > { %v23117_v60 = vpop.f32.mrb[242].mxu0 }
 0x863   : > { %v18967_v51 = vpop.f32.mrb[243].mxu0  ;;  %v11792_v23 = vrot.slane %v23117_v60, 4 }
 0x866   : > { %v11249_v0 = vpop.f32.mrb[244].mxu0 }
 0x867   : > { %v18970_v53 = vpop.f32.mrb[245].mxu0  ;;  %v11840_v54 = vrot.slane %v11249_v0, 4 }
 0x86a   : > { %v11254_v11 = vpop.f32.mrb[246].mxu0 }
 0x86b   : > { %v11881_v42 = vrot.slane %v11254_v11, 4  ;;  %v18973_v20 = vpop.f32.mrb[247].mxu0 }
 0x86d   : > { %11887 = vrot.lane.b32.xlu1 %v11881_v42, %s20053_s24 }
 0x86e   : > { %v11259_v43 = vpop.f32.mrb[248].mxu0 }
 0x86f   : > { %11917 = vrot.lane.b32.xlu0 %v11259_v43, %s20054_s25  ;;  %v18976_v5 = vpop.f32.mrb[249].mxu0 }
 0x871   : > { %11738 = vrot.lane.b32.xlu1 %v11731_v9, %s20053_s24 }
 0x873   : > { %11768 = vrot.lane.b32.xlu0 %v11153_v63, %s20054_s25 }
 0x875   : > { %11817 = vrot.lane.b32.xlu1 %v11249_v0, %s20053_s24 }
 0x877   : > { %11847 = vrot.lane.b32.xlu0 %v11840_v54, %s20054_s25 }
 0x884   : > { %v23137_v16 = vpop.f32.mrb[240].mxu1 }
 0x885   : > { %v18983_v46 = vpop.f32.mrb[241].mxu1  ;;  %v11733_v24 = vrot.slane %v23137_v16, 4 }
 0x888   : > { %v23139_v39 = vpop.f32.mrb[242].mxu1 }
 0x889   : > { %v18986_v3 = vpop.f32.mrb[243].mxu1 }
 0x88c   : > { %v11342_v57 = vpop.f32.mrb[244].mxu1 }
 0x88d   : > { %v18989_v52 = vpop.f32.mrb[245].mxu1  ;;  %v11841_v15 = vrot.slane %v11342_v57, 4 }
 0x890   : > { %v23141_v27 = vpop.f32.mrb[246].mxu1 }
 0x891   : > { %v11882_v29 = vrot.slane %v23141_v27, 4  ;;  %v18992_v41 = vpop.f32.mrb[247].mxu1 }
 0x893   : > { %11889 = vrot.lane.b32.xlu1 %v11882_v29, %s20053_s24 }
 0x894   : > { %v11352_v7 = vpop.f32.mrb[248].mxu1 }
 0x895   : > { %11919 = vrot.lane.b32.xlu0 %v11352_v7, %s20054_s25  ;;  %v18995_v34 = vpop.f32.mrb[249].mxu1 }
 0x897   : > { %11740 = vrot.lane.b32.xlu1 %v11732_v56, %s20053_s24 }
 0x899   : > { %11770 = vrot.lane.b32.xlu0 %v23117_v60, %s20054_s25 }
 0x89b   : > { %11819 = vrot.lane.b32.xlu1 %v11342_v57, %s20053_s24 }
 0x89d   : > { %11849 = vrot.lane.b32.xlu0 %v11841_v15, %s20054_s25 }
 0x8a5   : > { %v11816_v31 = vpop.permute.xlu1 %11815 }
 0x8a6   : > { %v11833_v37 = vadd.f32 %v11816_v31, %v23097_v36 }
 0x8a7   : > { %v11846_v8 = vpop.permute.xlu0 %11845 }
 0x8a8   : > { %v11863_v1 = vadd.f32 %v11846_v8, %v11833_v37 }
 0x8aa   : > { %v11869_v50 = vadd.f32 %v11863_v1, %v11254_v11 }
 0x8b2   : > { %v23153_v6 = vpop.f32.mrb[250].mxu0 }
 0x8b3   : > { %v19002_v26 = vpop.f32.mrb[251].mxu0  ;;  %v11734_v60 = vrot.slane %v23153_v6, 4 }
 0x8b6   : > { %v23155_v28 = vpop.f32.mrb[252].mxu0  ;;  %v23168_v21 = vpop.permute.xlu1 %11945 }
 0x8b7   : > { %v19005_v32 = vpop.f32.mrb[253].mxu0 }
 0x8b8   : > { %v23172_v63 = vpop.permute.xlu0 %11958 }
 0x8ba   : > { %v11435_v12 = vpop.f32.mrb[254].mxu0 }
 0x8bb   : > { %v19008_v33 = vpop.f32.mrb[255].mxu0  ;;  %v11842_v40 = vrot.slane %v11435_v12, 4 }
 0x8be   : > { %v23157_v48 = vpop.f32.mrb[0].mxu0 }
 0x8bf   : > { %v11883_v61 = vrot.slane %v23157_v48, 4  ;;  %v19011_v17 = vpop.f32.mrb[1].mxu0 }
 0x8c1   : > { %11891 = vrot.lane.b32.xlu1 %v11883_v61, %s20053_s24 }
 0x8c2   : > { %v11445_v18 = vpop.f32.mrb[2].mxu0 }
 0x8c3   : > { %11921 = vrot.lane.b32.xlu0 %v11445_v18, %s20054_s25  ;;  %v19014_v49 = vpop.f32.mrb[3].mxu0 }
 0x8c5   : > { %11742 = vrot.lane.b32.xlu1 %v11733_v24, %s20053_s24 }
 0x8c7   : > { %11772 = vrot.lane.b32.xlu0 %v23139_v39, %s20054_s25 }
 0x8c9   : > { %11821 = vrot.lane.b32.xlu1 %v11435_v12, %s20053_s24 }
 0x8cb   : > { %11851 = vrot.lane.b32.xlu0 %v11842_v40, %s20054_s25 }
 0x8db   : > { %v23170_v22 = vpop.f32.mrb[250].mxu1 }
 0x8dc   : > { %v19021_v19 = vpop.f32.mrb[251].mxu1 }
 0x8df   : > { %v11888_v62 = vpop.permute.xlu1 %11887  ;;  %v23174_v10 = vpop.f32.mrb[252].mxu1 }
 0x8e0   : > { %v11905_v36 = vadd.f32 %v11888_v62, %v11869_v50  ;;  %v19024_v38 = vpop.f32.mrb[253].mxu1 }
 0x8e1   : > { %v11918_v59 = vpop.permute.xlu0 %11917 }
 0x8e2   : > { %v11935_v13 = vadd.f32 %v11918_v59, %v11905_v36 }
 0x8e3   : > { %v11739_v14 = vpop.permute.xlu1 %11738  ;;  %v11528_v30 = vpop.f32.mrb[254].mxu1 }
 0x8e4   : > { %v11948_v58 = vmul.f32 %v23168_v21, %v11935_v13  ;;  %v11755_v4 = vadd.f32 %v11739_v14, %v23083_v2  ;;  %v19027_v25 = vpop.f32.mrb[255].mxu1  ;;  %v11843_v41 = vrot.slane %v11528_v30, 4  ;;  %v11735_v14 = vrot.slane %v23170_v22, 4 }
 0x8e5   : > { %v11769_v35 = vpop.permute.xlu0 %11768 }
 0x8e6   : > { %v11961_v51 = vadd.f32 %v23172_v63, %v11948_v58  ;;  %v11785_v0 = vadd.f32 %v11769_v35, %v11755_v4  ;;  %v11793_v4 = vrot.slane %v23139_v39, 4 }
 0x8e7   : > { %v23180_v53 = vpop.f32.mrb[0].mxu1  ;;  %v11818_v11 = vpop.permute.xlu1 %11817 }
 0x8e8   : > { %vm11967_vm15 = vcmp.gt.f32.partialorder %v11961_v51, 0.0  ;;  %v11973_v42 = vmul.f32 0.2, %v11961_v51  ;;  %v11884_v20 = vrot.slane %v23180_v53, 4  ;;  %v11804_v43 = vadd.f32 %v11792_v23, %v11785_v0  ;;  %v19030_v9 = vpop.f32.mrb[1].mxu1 }
 0x8e9   : > { %v11848_v5 = vpop.permute.xlu0 %11847 }
 0x8ea   : > { %v11979_v54 = vsel %vm11967_vm15, %v11961_v51, %v11973_v42  ;;  %v11834_v2 = vadd.f32 %v11818_v11, %v11804_v43  ;;  %11893 = vrot.lane.b32.xlu1 %v11884_v20, %s20053_s24 }
 0x8eb   : > { %v11538_v46 = vpop.f32.mrb[2].mxu1  ;;  %19075 = vmatmul.mubr.msk.f32.vlgmr.msra.gmra.mrb[14].mxu0 %vm11986_vm12, %v11979_v54  ;;  %v12521_v54 = vld [vmem:[%s20200_s28 + $0x18] sm:$0xff] }
 0x8ec   : > { %11923 = vrot.lane.b32.xlu0 %v11538_v46, %s20054_s25  ;;  %v11864_v3 = vadd.f32 %v11848_v5, %v11834_v2  ;;  %v19033_v57 = vpop.f32.mrb[3].mxu1  ;;  %19083 = vmatpush3.msk.msra.mxu0 %vm11990_vm11, %v23122_v47  ;;  %v12519_v5 = vld [vmem:[%s20200_s28] sm:$0xff]  ;;  %v12523_v2 = vld [vmem:[%s20200_s28 + $0x30] sm:$0xff]  ;;  %v12525_v46 = vld [vmem:[%s20200_s28 + $0x48] sm:$0xff] }
 0x8ed   : > { %19084 = vmatprep.mubr.msk.f32.mxu0 %vm20050_vm1, %v24861_v55  ;;  %19092 = vmatprep.subr.mxu0 %v24861_v55 }
 0x8ee   : > { %11744 = vrot.lane.b32.xlu1 %v11734_v60, %s20053_s24  ;;  %v11870_v52 = vadd.f32 %v11864_v3, %v23141_v27  ;;  %v12529_v60 = vld [vmem:[%s20200_s28 + $0x78] sm:$0xff]  ;;  %v12531_v3 = vld [vmem:[%s20200_s28 + $0x90] sm:$0xff] }
 0x8ef   : > { %v11703_v29 = vpop.f32.mrb[4].mxu1 }
 0x8f0   : > { %11774 = vrot.lane.b32.xlu0 %v23155_v28, %s20054_s25  ;;  %v19059_v7 = vpop.f32.mrb[5].mxu1  ;;  %v12533_v29 = vld [vmem:[%s20200_s28 + $0xa8] sm:$0xff] }
 0x8f2   : > { %11823 = vrot.lane.b32.xlu1 %v11528_v30, %s20053_s24 }
 0x8f3   : > { %v11707_v56 = vpop.f32.mrb[6].mxu1 }
 0x8f4   : > { %11853 = vrot.lane.b32.xlu0 %v11843_v41, %s20054_s25  ;;  %v19062_v34 = vpop.f32.mrb[7].mxu1 }
 0x8f7   : > { %v11711_v15 = vpop.f32.mrb[8].mxu1 }
 0x8f8   : > { %v19065_v31 = vpop.f32.mrb[9].mxu1 }
 0x8f9   : > { %v12535_v31 = vld [vmem:[%s20200_s28 + $0xc0] sm:$0xff] }
 0x8fa   : > { %v11611_v37 = vpop.f32.mrb[4].mxu0 }
 0x8fb   : > { %v19040_v8 = vpop.f32.mrb[5].mxu0  ;;  %v23198_v1 = vpop.f32.mrb[10].mxu1 }
 0x8fc   : > { %v19068_v50 = vpop.f32.mrb[11].mxu1  ;;  %v11886_v39 = vrot.slane %v23198_v1, 4  ;;  %v11794_v8 = vrot.slane %v23155_v28, 4 }
 0x8fe   : > { %v23200_v27 = vpop.f32.mrb[6].mxu0 }
 0x8ff   : > { %v19043_v26 = vpop.f32.mrb[7].mxu0  ;;  %v23202_v32 = vpop.f32.mrb[12].mxu1 }
 0x900   : > { %v19071_v12 = vpop.f32.mrb[13].mxu1 }
 0x902   : > { %v11620_v33 = vpop.f32.mrb[8].mxu0 }
 0x903   : > { %v19046_v61 = vpop.f32.mrb[9].mxu0  ;;  %v11844_v0 = vrot.slane %v11620_v33, 4 }
 0x905   : > { %v11890_v17 = vpop.permute.xlu1 %11889 }
 0x906   : > { %v11906_v18 = vadd.f32 %v11890_v17, %v11870_v52  ;;  %v23256_v24 = vpop.f32.mrb[10].mxu0 }
 0x907   : > { %v11885_v49 = vrot.slane %v23256_v24, 4  ;;  %v11920_v40 = vpop.permute.xlu0 %11919  ;;  %v19049_v19 = vpop.f32.mrb[11].mxu0 }
 0x908   : > { %v11936_v62 = vadd.f32 %v11920_v40, %v11906_v18  ;;  %v12541_v19 = vld [vmem:[%s20200_s28 + $0x108] sm:$0xff] }
 0x909   : > { %v11741_v36 = vpop.permute.xlu1 %11740  ;;  %11895 = vrot.lane.b32.xlu1 %v11885_v49, %s20053_s24  ;;  %v12539_v49 = vld [vmem:[%s20200_s28 + $0xf0] sm:$0xff] }
 0x90a   : > { %v11949_v38 = vmul.f32 %v23168_v21, %v11936_v62  ;;  %v11756_v59 = vadd.f32 %v11741_v36, %v23115_v44  ;;  %v11630_v13 = vpop.f32.mrb[12].mxu0  ;;  %v12543_v62 = vld [vmem:[%s20200_s28 + $0x120] sm:$0xff]  ;;  %v12545_v36 = vld [vmem:[%s20200_s28 + $0x138] sm:$0xff] }
 0x90b   : > { %11925 = vrot.lane.b32.xlu0 %v11630_v13, %s20054_s25  ;;  %v11771_v30 = vpop.permute.xlu0 %11770  ;;  %v19052_v58 = vpop.f32.mrb[13].mxu0  ;;  %v12551_v13 = vld [vmem:[%s20200_s28 + $0x180] sm:$0xff] }
 0x90c   : > { %v11962_v25 = vadd.f32 %v23172_v63, %v11949_v38  ;;  %v11786_v35 = vadd.f32 %v11771_v30, %v11756_v59  ;;  %v12547_v38 = vld [vmem:[%s20200_s28 + $0x150] sm:$0xff]  ;;  %v12549_v59 = vld [vmem:[%s20200_s28 + $0x168] sm:$0xff] }
 0x90d   : > { %11746 = vrot.lane.b32.xlu1 %v11735_v14, %s20053_s24  ;;  %v11820_v11 = vpop.permute.xlu1 %11819  ;;  %v12553_v14 = vld [vmem:[%s20200_s28 + $0x198] sm:$0xff] }
 0x90e   : > { %vm11968_vm14 = vcmp.gt.f32.partialorder %v11962_v25, 0.0  ;;  %v11974_v23 = vmul.f32 0.2, %v11962_v25  ;;  %v11805_v51 = vadd.f32 %v11793_v4, %v11786_v35  ;;  %v12555_v35 = vld [vmem:[%s20200_s28 + $0x1b0] sm:$0xff] }
 0x90f   : > { %11776 = vrot.lane.b32.xlu0 %v23174_v10, %s20054_s25  ;;  %v11850_v20 = vpop.permute.xlu0 %11849 }
 0x910   : > { %v11980_v44 = vsel %vm11968_vm14, %v11962_v25, %v11974_v23  ;;  %v11835_v42 = vadd.f32 %v11820_v11, %v11805_v51  ;;  %v11795_v11 = vrot.slane %v23174_v10, 4 }
 0x911   : > { %11825 = vrot.lane.b32.xlu1 %v11620_v33, %s20053_s24  ;;  %19080 = vmatmul.mubr.msk.f32.vlgmr.msra.gmra.mrb[14].mxu1 %vm11986_vm12, %v11980_v44  ;;  %v12537_v33 = vld [vmem:[%s20200_s28 + $0xd8] sm:$0xff] }
 0x912   : > { %v11865_v43 = vadd.f32 %v11850_v20, %v11835_v42  ;;  %19088 = vmatpush3.msk.msra.mxu1 %vm11990_vm11, %v23122_v47  ;;  %19089 = vmatprep.mubr.msk.f32.mxu1 %vm20050_vm1, %v24861_v55  ;;  %v12557_v20 = vld [vmem:[%s20200_s28 + $0x1c8] sm:$0xff] }
 0x913   : > { %11855 = vrot.lane.b32.xlu0 %v11844_v0, %s20054_s25  ;;  %19097 = vmatprep.subr.mxu1 %v24861_v55 }
 0x914   : > { %v11871_v9 = vadd.f32 %v11865_v43, %v23157_v48  ;;  %v12527_v48 = vld [vmem:[%s20200_s28 + $0x60] sm:$0xff] }
 0x915   : > { %11897 = vrot.lane.b32.xlu1 %v11886_v39, %s20053_s24 }
 0x917   : > { %11927 = vrot.lane.b32.xlu0 %v23202_v32, %s20054_s25 }
 0x919   : > { %12615 = vrot.lane.b32.xlu1 %v12519_v5, %s20051_s14 }
 0x91d   : > { %12619 = vrot.lane.b32.xlu1 %v12521_v54, %s20051_s14 }
 0x921   : > { %12623 = vrot.lane.b32.xlu1 %v12523_v2, %s20051_s14  ;;  %v12559_v2 = vld [vmem:[%s20200_s28 + $0x1e0] sm:$0xff] }
 0x925   : > { %12627 = vrot.lane.b32.xlu1 %v12525_v46, %s20051_s14 }
 0x929   : > { %12631 = vrot.lane.b32.xlu1 %v12527_v48, %s20051_s14  ;;  %v12561_v48 = vld [vmem:[%s20200_s28 + $0x1f8] sm:$0xff] }
 0x92d   : > { %12635 = vrot.lane.b32.xlu1 %v12529_v60, %s20051_s14  ;;  %v12563_v60 = vld [vmem:[%s20200_s28 + $0x210] sm:$0xff] }
 0x931   : > { %12639 = vrot.lane.b32.xlu1 %v12531_v3, %s20051_s14  ;;  %v20035_v3 = vld [vmem:[%s20200_s28 + $0x228] sm:$0xff] }
 0x933   : > { %v11892_v57 = vpop.permute.xlu1 %11891 }
 0x934   : > { %v11907_v52 = vadd.f32 %v11892_v57, %v11871_v9 }
 0x935   : > { %12643 = vrot.lane.b32.xlu1 %v12533_v29, %s20051_s14  ;;  %v11922_v41 = vpop.permute.xlu0 %11921 }
 0x936   : > { %v11937_v7 = vadd.f32 %v11922_v41, %v11907_v52 }
 0x937   : > { %v11743_v56 = vpop.permute.xlu1 %11742 }
 0x938   : > { %v11950_v34 = vmul.f32 %v23168_v21, %v11937_v7  ;;  %v11757_v15 = vadd.f32 %v11743_v56, %v23137_v16 }
 0x939   : > { %12647 = vrot.lane.b32.xlu1 %v12535_v31, %s20051_s14  ;;  %v11773_v37 = vpop.permute.xlu0 %11772  ;;  %v11796_v31 = vrot.slane %v23200_v27, 4 }
 0x93a   : > { %v11963_v50 = vadd.f32 %v23172_v63, %v11950_v34  ;;  %v11787_v26 = vadd.f32 %v11773_v37, %v11757_v15  ;;  %v12810_v15 = vld [vmem:[#allocation2 + $0x8] sm:$0x7f] }
 0x93b   : > { %v11822_v61 = vpop.permute.xlu1 %11821 }
 0x93c   : > { %vm11969_vm4 = vcmp.gt.f32.partialorder %v11963_v50, 0.0  ;;  %v11975_v32 = vmul.f32 0.2, %v11963_v50  ;;  %v11806_v12 = vadd.f32 %v11794_v8, %v11787_v26 }
 0x93d   : > { %12651 = vrot.lane.b32.xlu1 %v12537_v33, %s20051_s14  ;;  %v11852_v18 = vpop.permute.xlu0 %11851 }
 0x93e   : > { %v11981_v16 = vsel %vm11969_vm4, %v11963_v50, %v11975_v32  ;;  %v11836_v17 = vadd.f32 %v11822_v61, %v11806_v12 }
 0x93f   : > { %19085 = vmatmul.mubr.msk.f32.vlgmr.msra.gmra.mrb[16].mxu0 %vm11986_vm12, %v11981_v16 }
 0x940   : > { %v11866_v28 = vadd.f32 %v11852_v18, %v11836_v17  ;;  %19093 = vmatpush3.msk.msra.mxu0 %vm11990_vm11, %v23122_v47  ;;  %19094 = vmatprep.mubr.msk.f32.mxu0 %vm20050_vm1, %v24861_v55  ;;  %v23370_v18 = vld [vmem:[%s24832_s4] sm:$0xff] }
 0x941   : > { %12655 = vrot.lane.b32.xlu1 %v12539_v49, %s20051_s14  ;;  %19844 = vmatprep.subr.bf16.mxu0 %v24860_v45 }
 0x942   : > { %v11872_v40 = vadd.f32 %v11866_v28, %v23180_v53 }
 0x945   : > { %12659 = vrot.lane.b32.xlu1 %v12541_v19, %s20051_s14 }
 0x949   : > { %12663 = vrot.lane.b32.xlu1 %v12543_v62, %s20051_s14  ;;  %v23382_v62 = vld [vmem:[%s24832_s4 + $0x8] sm:$0xff] }
 0x94d   : > { %12667 = vrot.lane.b32.xlu1 %v12545_v36, %s20051_s14 }
 0x951   : > { %12671 = vrot.lane.b32.xlu1 %v12547_v38, %s20051_s14 }
 0x955   : > { %12675 = vrot.lane.b32.xlu1 %v12549_v59, %s20051_s14 }
 0x959   : > { %12679 = vrot.lane.b32.xlu1 %v12551_v13, %s20051_s14 }
 0x95c   : > { %v11894_v53 = vpop.permute.xlu1 %11893 }
 0x95d   : > { %v11908_v30 = vadd.f32 %v11894_v53, %v11872_v40  ;;  %12683 = vrot.lane.b32.xlu1 %v12553_v14, %s20051_s14 }
 0x95e   : > { %v11924_v58 = vpop.permute.xlu0 %11923 }
 0x95f   : > { %v11938_v4 = vadd.f32 %v11924_v58, %v11908_v30 }
 0x960   : > { %v11745_v25 = vpop.permute.xlu1 %11744 }
 0x961   : > { %v11951_v23 = vmul.f32 %v23168_v21, %v11938_v4  ;;  %v11758_v51 = vadd.f32 %v11745_v25, %v23153_v6  ;;  %12687 = vrot.lane.b32.xlu1 %v12555_v35, %s20051_s14 }
 0x962   : > { %v11775_v0 = vpop.permute.xlu0 %11774 }
 0x963   : > { %v11964_v44 = vadd.f32 %v23172_v63, %v11951_v23  ;;  %v11788_v42 = vadd.f32 %v11775_v0, %v11758_v51 }
 0x964   : > { %v11824_v9 = vpop.permute.xlu1 %11823 }
 0x965   : > { %vm11970_vm0 = vcmp.gt.f32.partialorder %v11964_v44, 0.0  ;;  %v11976_v39 = vmul.f32 0.2, %v11964_v44  ;;  %v11807_v43 = vadd.f32 %v11795_v11, %v11788_v42  ;;  %12691 = vrot.lane.b32.xlu1 %v12557_v20, %s20051_s14 }
 0x966   : > { %v11854_v54 = vpop.permute.xlu0 %11853 }
 0x967   : > { %v11982_v6 = vsel %vm11970_vm0, %v11964_v44, %v11976_v39  ;;  %v11837_v5 = vadd.f32 %v11824_v9, %v11807_v43 }
 0x968   : > { %19090 = vmatmul.mubr.msk.f32.vlgmr.msra.gmra.mrb[16].mxu1 %vm11986_vm12, %v11982_v6 }
 0x969   : > { %v11867_v10 = vadd.f32 %v11854_v54, %v11837_v5  ;;  %12695 = vrot.lane.b32.xlu1 %v12559_v2, %s20051_s14  ;;  %19098 = vmatpush3.msk.msra.mxu1 %vm11990_vm11, %v23122_v47  ;;  %v23417_v5 = vld [vmem:[%s24832_s4 + $0x10] sm:$0xff] }
 0x96a   : > { %19099 = vmatprep.mubr.msk.f32.mxu1 %vm20050_vm1, %v24861_v55  ;;  %19848 = vmatprep.subr.bf16.mxu1 %v24860_v45 }
 0x96b   : > { %v11873_v46 = vadd.f32 %v11867_v10, %v23256_v24  ;;  %v12809_v24 = vld [vmem:[#allocation2] sm:$0xff] }
 0x96c   : > { %v19845_v12 = vpack.c.bf16 %v12810_v15, %v12809_v24 }
 0x96d   : > { %12699 = vrot.lane.b32.xlu1 %v12561_v48, %s20051_s14 }
 0x971   : > { %12703 = vrot.lane.b32.xlu1 %v12563_v60, %s20051_s14 }
 0x975   : > { %12707 = vrot.lane.b32.xlu1 %v20035_v3, %s20051_s14 }
 0x97b   : > { %v11896_v57 = vpop.permute.xlu1 %11895 }
 0x97c   : > { %v11909_v52 = vadd.f32 %v11896_v57, %v11873_v46 }
 0x97d   : > { %v11926_v29 = vpop.permute.xlu0 %11925 }
 0x97e   : > { %v11939_v47 = vadd.f32 %v11926_v29, %v11909_v52 }
 0x97f   : > { %v11747_v41 = vpop.permute.xlu1 %11746 }
 0x980   : > { %v11952_v7 = vmul.f32 %v23168_v21, %v11939_v47  ;;  %v11759_v56 = vadd.f32 %v11747_v41, %v23170_v22 }
 0x981   : > { %v11777_v34 = vpop.permute.xlu0 %11776 }
 0x982   : > { %v11965_v37 = vadd.f32 %v23172_v63, %v11952_v7  ;;  %v11789_v8 = vadd.f32 %v11777_v34, %v11759_v56 }
 0x983   : > { %v11826_v50 = vpop.permute.xlu1 %11825 }
 0x984   : > { %vm11971_vm5 = vcmp.gt.f32.partialorder %v11965_v37, 0.0  ;;  %v11977_v26 = vmul.f32 0.2, %v11965_v37  ;;  %v11808_v32 = vadd.f32 %v11796_v31, %v11789_v8 }
 0x985   : > { %v11856_v22 = vpop.permute.xlu0 %11855 }
 0x986   : > { %v11983_v61 = vsel %vm11971_vm5, %v11965_v37, %v11977_v26  ;;  %v11838_v16 = vadd.f32 %v11826_v50, %v11808_v32  ;;  %v23432_v50 = vld [vmem:[%s24832_s4 + $0x18] sm:$0xff]  ;;  %v23451_v32 = vld [vmem:[%s24832_s4 + $0x20] sm:$0xf] }
 0x987   : > { %v11898_v17 = vpop.permute.xlu1 %11897  ;;  %19095 = vmatmul.mubr.msk.f32.vlgmr.msra.gmra.mrb[18].mxu0 %vm11986_vm12, %v11983_v61 }
 0x988   : > { %v11868_v27 = vadd.f32 %v11856_v22, %v11838_v16  ;;  %19847 = vmatpush3.bf16.msk.msra.mxu0 %vm23358_vm9, %v19845_v12  ;;  %19106 = vmatprep.mubr.msk.f32.mxu0 %vm20050_vm1, %v24861_v55 }
 0x989   : > { %19852 = vmatprep.subr.bf16.mxu0 %v24860_v45  ;;  %v11928_v40 = vpop.permute.xlu0 %11927 }
 0x98a   : > { %v11874_v28 = vadd.f32 %v11868_v27, %v23198_v1 }
 0x98b   : > { %v12616_v49 = vpop.permute.xlu1 %12615  ;;  %19107 = vmatmul.mubr.msk.f32.vlgmr.msra.gmra.mrb[20].mxu0 %vm12866_vm7, %v23370_v18 }
 0x98c   : > { %12760 = vst.msk [vmem:[#allocation2 + $0x10] sm:$0xff] %vm12759_vm13, %v12616_v49  ;;  %v11910_v19 = vadd.f32 %v11898_v17, %v11874_v28  ;;  %19109 = vmatprep.mubr.msk.f32.mxu0 %vm20050_vm1, %v24861_v55 }
 0x98e   : > { %v11940_v36 = vadd.f32 %v11928_v40, %v11910_v19 }
 0x98f   : > { %v12620_v38 = vpop.permute.xlu1 %12619  ;;  %19110 = vmatmul.mubr.msk.f32.gmra.mrb[22].mxu0 %vm12866_vm7, %v23382_v62 }
 0x990   : > { %v11953_v1 = vmul.f32 %v23168_v21, %v11940_v36  ;;  %12763 = vst.msk [vmem:[#allocation2 + $0x20] sm:$0xff] %vm12759_vm13, %v12620_v38  ;;  %19112 = vmatprep.mubr.msk.f32.mxu0 %vm20050_vm1, %v24861_v55 }
 0x992   : > { %v11966_v59 = vadd.f32 %v23172_v63, %v11953_v1 }
 0x993   : > { %v12624_v13 = vpop.permute.xlu1 %12623  ;;  %19113 = vmatmul.mubr.msk.f32.gmra.mrb[24].mxu0 %vm12866_vm7, %v23417_v5 }
 0x994   : > { %vm11972_vm2 = vcmp.gt.f32.partialorder %v11966_v59, 0.0  ;;  %v11978_v53 = vmul.f32 0.2, %v11966_v59  ;;  %12765 = vst.msk [vmem:[#allocation2 + $0x30] sm:$0xff] %vm12759_vm13, %v12624_v13  ;;  %19115 = vmatprep.mubr.msk.f32.mxu0 %vm20050_vm1, %v24861_v55 }
 0x996   : > { %v11984_v14 = vsel %vm11972_vm2, %v11966_v59, %v11978_v53 }
 0x997   : > { %v12628_v30 = vpop.permute.xlu1 %12627  ;;  %19100 = vmatmul.mubr.msk.f32.vlgmr.msra.gmra.mrb[18].mxu1 %vm11986_vm12, %v11984_v14  ;;  %19116 = vmatmul.mubr.msk.f32.gmra.mrb[26].mxu0 %vm12866_vm7, %v23432_v50 }
 0x998   : > { %12767 = vst.msk [vmem:[#allocation2 + $0x40] sm:$0xff] %vm12759_vm13, %v12628_v30  ;;  %19125 = vmatprep.mubr.msk.f32.mxu1 %vm20050_vm1, %v24861_v55  ;;  %19118 = vmatprep.mubr.msk.f32.mxu0 %vm20050_vm1, %v24861_v55 }
 0x99b   : > { %v12632_v21 = vpop.permute.xlu1 %12631  ;;  %19119 = vmatmul.mubr.msk.f32.gmra.mrb[28].mxu0 %vm12866_vm7, %v23451_v32 }
 0x99c   : > { %12769 = vst.msk [vmem:[#allocation2 + $0x50] sm:$0xff] %vm12759_vm13, %v12632_v21  ;;  %19144 = vmatprep.mubr.msk.f32.mxu0 %vm20050_vm1, %v24861_v55 }
 0x99f   : > { %v12636_v58 = vpop.permute.xlu1 %12635 }
 0x9a0   : > { %12771 = vst.msk [vmem:[#allocation2 + $0x60] sm:$0xff] %vm12759_vm13, %v12636_v58 }
 0x9a3   : > { %v12640_v63 = vpop.permute.xlu1 %12639 }
 0x9a4   : > { %12773 = vst.msk [vmem:[#allocation2 + $0x70] sm:$0xff] %vm12759_vm13, %v12640_v63 }
 0x9a7   : > { %v12644_v4 = vpop.permute.xlu1 %12643 }
 0x9a8   : > { %12775 = vst.msk [vmem:[#allocation2 + $0x80] sm:$0xff] %vm12759_vm13, %v12644_v4 }
 0x9ab   : > { %v12648_v25 = vpop.permute.xlu1 %12647 }
 0x9ac   : > { %12777 = vst.msk [vmem:[#allocation2 + $0x90] sm:$0xff] %vm12759_vm13, %v12648_v25 }
 0x9af   : > { %v12652_v35 = vpop.permute.xlu1 %12651 }
 0x9b0   : > { %12779 = vst.msk [vmem:[#allocation2 + $0xa0] sm:$0xff] %vm12759_vm13, %v12652_v35 }
 0x9b3   : > { %v12656_v23 = vpop.permute.xlu1 %12655 }
 0x9b4   : > { %12781 = vst.msk [vmem:[#allocation2 + $0xb0] sm:$0xff] %vm12759_vm13, %v12656_v23 }
 0x9b7   : > { %v12660_v51 = vpop.permute.xlu1 %12659 }
 0x9b8   : > { %12783 = vst.msk [vmem:[#allocation2 + $0xc0] sm:$0xff] %vm12759_vm13, %v12660_v51 }
 0x9bb   : > { %v12664_v0 = vpop.permute.xlu1 %12663 }
 0x9bc   : > { %12785 = vst.msk [vmem:[#allocation2 + $0xd0] sm:$0xff] %vm12759_vm13, %v12664_v0 }
 0x9be   : > { %v12060_v11 = vpop.f32.mrb[14].mxu0 }
 0x9bf   : > { %12429 = vst.msk [vmem:[%s20200_s28 + $0xb] sm:$0xf] %vm4123_vm6, %v12060_v11  ;;  %v12668_v44 = vpop.permute.xlu1 %12667  ;;  %v19076_v42 = vpop.f32.mrb[15].mxu0  ;;  %v12430_v48 = vmul.f32 0.7826087, %v12060_v11 }
 0x9c0   : > { %12787 = vst.msk [vmem:[#allocation2 + $0xe0] sm:$0xff] %vm12759_vm13, %v12668_v44  ;;  %v12434_v3 = vmul.f32 0.5652174, %v12060_v11  ;;  %v12438_v57 = vmul.f32 0.3478261, %v12060_v11 }
 0x9c1   : > { %v12442_v7 = vmul.f32 0.13043478, %v12060_v11 }
 0x9c3   : > { %v12672_v20 = vpop.permute.xlu1 %12671 }
 0x9c4   : > { %12789 = vst.msk [vmem:[#allocation2 + $0xf0] sm:$0xff] %vm12759_vm13, %v12672_v20 }
 0x9c6   : > { %v12520_v39 = vld [vmem:[%s20200_s28 + $0x8] sm:$0x7f] }
 0x9c7   : > { %v12676_v43 = vpop.permute.xlu1 %12675  ;;  %12617 = vrot.lane.b32.xlu0 %v12520_v39, %s20051_s14 }
 0x9c8   : > { %12791 = vst.msk [vmem:[#allocation2 + $0x100] sm:$0xff] %vm12759_vm13, %v12676_v43 }
 0x9cb   : > { %v12680_v9 = vpop.permute.xlu1 %12679 }
 0x9cc   : > { %12793 = vst.msk [vmem:[#allocation2 + $0x110] sm:$0xff] %vm12759_vm13, %v12680_v9 }
 0x9cf   : > { %v12684_v6 = vpop.permute.xlu1 %12683 }
 0x9d0   : > { %12795 = vst.msk [vmem:[#allocation2 + $0x120] sm:$0xff] %vm12759_vm13, %v12684_v6 }
 0x9d3   : > { %v12688_v54 = vpop.permute.xlu1 %12687 }
 0x9d4   : > { %12797 = vst.msk [vmem:[#allocation2 + $0x130] sm:$0xff] %vm12759_vm13, %v12688_v54 }
 0x9d7   : > { %v12692_v2 = vpop.permute.xlu1 %12691 }
 0x9d8   : > { %12799 = vst.msk [vmem:[#allocation2 + $0x140] sm:$0xff] %vm12759_vm13, %v12692_v2 }
 0x9db   : > { %v12696_v10 = vpop.permute.xlu1 %12695 }
 0x9dc   : > { %12801 = vst.msk [vmem:[#allocation2 + $0x150] sm:$0xff] %vm12759_vm13, %v12696_v10 }
 0x9df   : > { %v12700_v46 = vpop.permute.xlu1 %12699 }
 0x9e0   : > { %12803 = vst.msk [vmem:[#allocation2 + $0x160] sm:$0xff] %vm12759_vm13, %v12700_v46 }
 0x9e3   : > { %v12704_v60 = vpop.permute.xlu1 %12703 }
 0x9e4   : > { %12805 = vst.msk [vmem:[#allocation2 + $0x170] sm:$0xff] %vm12759_vm13, %v12704_v60  ;;  %v12133_v52 = vpop.f32.mrb[14].mxu1  ;;  %v12811_v60 = vld [vmem:[#allocation2 + $0x10] sm:$0xff] }
 0x9e5   : > { %v12431_v29 = vmul.f32 0.2173913, %v12133_v52  ;;  %v12435_v47 = vmul.f32 0.4347826, %v12133_v52  ;;  %v12439_v41 = vmul.f32 0.65217394, %v12133_v52 }
 0x9e6   : > { %v12443_v56 = vmul.f32 0.8695652, %v12133_v52  ;;  %v19081_v31 = vpop.f32.mrb[15].mxu1  ;;  %v12446_v16 = vmul.f32 0.9130435, %v12133_v52 }
 0x9e7   : > { %v12432_v34 = vadd.f32 %v12431_v29, %v12430_v48  ;;  %v12436_v24 = vadd.f32 %v12435_v47, %v12434_v3  ;;  %v12440_v15 = vadd.f32 %v12439_v41, %v12438_v57  ;;  %v12708_v37 = vpop.permute.xlu1 %12707  ;;  %v12450_v17 = vmul.f32 0.6956522, %v12133_v52 }
 0x9e8   : > { %v12444_v8 = vadd.f32 %v12443_v56, %v12442_v7  ;;  %12807 = vst.msk [vmem:[#allocation2 + $0x180] sm:$0xff] %vm12759_vm13, %v12708_v37  ;;  %v12454_v27 = vmul.f32 0.47826087, %v12133_v52  ;;  %v12458_v28 = vmul.f32 0.26086956, %v12133_v52 }
 0x9e9   : > { %16799 = vst.msk [vmem:[%s20200_s28 + $0x23] sm:$0xf] %vm4123_vm6, %v12432_v34  ;;  %16800 = vst.msk [vmem:[%s20200_s28 + $0x3b] sm:$0xf] %vm4123_vm6, %v12436_v24  ;;  %v12462_v38 = vmul.f32 0.04347826, %v12133_v52 }
 0x9ea   : > { %16801 = vst.msk [vmem:[%s20200_s28 + $0x53] sm:$0xf] %vm4123_vm6, %v12440_v15  ;;  %16802 = vst.msk [vmem:[%s20200_s28 + $0x6b] sm:$0xf] %vm4123_vm6, %v12444_v8 }
 0x9f0   : > { %v12522_v26 = vld [vmem:[%s20200_s28 + $0x20] sm:$0x7f]  ;;  %v12524_v12 = vld [vmem:[%s20200_s28 + $0x38] sm:$0x7f] }
 0x9f1   : > { %12621 = vrot.lane.b32.xlu0 %v12522_v26, %s20051_s14  ;;  %v12526_v22 = vld [vmem:[%s20200_s28 + $0x50] sm:$0x7f]  ;;  %v12528_v61 = vld [vmem:[%s20200_s28 + $0x68] sm:$0x7f] }
 0x9f5   : > { %12625 = vrot.lane.b32.xlu0 %v12524_v12, %s20051_s14 }
 0x9f9   : > { %12629 = vrot.lane.b32.xlu0 %v12526_v22, %s20051_s14 }
 0x9fd   : > { %12633 = vrot.lane.b32.xlu0 %v12528_v61, %s20051_s14 }
 0xa12   : > { %v12206_v49 = vpop.f32.mrb[16].mxu0 }
 0xa13   : > { %v12447_v40 = vmul.f32 0.08695652, %v12206_v49  ;;  %v12451_v19 = vmul.f32 0.3043478, %v12206_v49  ;;  %v12455_v36 = vmul.f32 0.5217391, %v12206_v49 }
 0xa14   : > { %v12459_v1 = vmul.f32 0.73913044, %v12206_v49  ;;  %v12463_v59 = vmul.f32 0.95652175, %v12206_v49  ;;  %v19086_v30 = vpop.f32.mrb[17].mxu0 }
 0xa15   : > { %v12448_v13 = vadd.f32 %v12447_v40, %v12446_v16  ;;  %v12452_v53 = vadd.f32 %v12451_v19, %v12450_v17  ;;  %v12456_v14 = vadd.f32 %v12455_v36, %v12454_v27  ;;  %v12466_v0 = vmul.f32 0.82608694, %v12206_v49 }
 0xa16   : > { %v12460_v21 = vadd.f32 %v12459_v1, %v12458_v28  ;;  %v12464_v58 = vadd.f32 %v12463_v59, %v12462_v38  ;;  %v12470_v11 = vmul.f32 0.6086956, %v12206_v49  ;;  %v12474_v44 = vmul.f32 0.39130434, %v12206_v49 }
 0xa17   : > { %16803 = vst.msk [vmem:[%s20200_s28 + $0x83] sm:$0xf] %vm4123_vm6, %v12448_v13  ;;  %16804 = vst.msk [vmem:[%s20200_s28 + $0x9b] sm:$0xf] %vm4123_vm6, %v12452_v53  ;;  %v12478_v9 = vmul.f32 0.17391305, %v12206_v49 }
 0xa18   : > { %16805 = vst.msk [vmem:[%s20200_s28 + $0xb3] sm:$0xf] %vm4123_vm6, %v12456_v14  ;;  %16806 = vst.msk [vmem:[%s20200_s28 + $0xcb] sm:$0xf] %vm4123_vm6, %v12460_v21  ;;  %v16978_v53 = vld [vmem:[%s24833_s5 + $0xc] sm:$0xf] }
 0xa19   : > { %16807 = vst.msk [vmem:[%s20200_s28 + $0xe3] sm:$0xf] %vm4123_vm6, %v12464_v58 }
 0xa1e   : > { %v12530_v63 = vld [vmem:[%s20200_s28 + $0x80] sm:$0x7f]  ;;  %v12532_v4 = vld [vmem:[%s20200_s28 + $0x98] sm:$0x7f] }
 0xa1f   : > { %12637 = vrot.lane.b32.xlu0 %v12530_v63, %s20051_s14  ;;  %v12534_v25 = vld [vmem:[%s20200_s28 + $0xb0] sm:$0x7f]  ;;  %v12536_v35 = vld [vmem:[%s20200_s28 + $0xc8] sm:$0x7f] }
 0xa20   : > { %v12538_v23 = vld [vmem:[%s20200_s28 + $0xe0] sm:$0x7f] }
 0xa23   : > { %12641 = vrot.lane.b32.xlu0 %v12532_v4, %s20051_s14 }
 0xa27   : > { %12645 = vrot.lane.b32.xlu0 %v12534_v25, %s20051_s14 }
 0xa2b   : > { %12649 = vrot.lane.b32.xlu0 %v12536_v35, %s20051_s14 }
 0xa2f   : > { %12653 = vrot.lane.b32.xlu0 %v12538_v23, %s20051_s14 }
 0xa39   : > { %v12618_v51 = vpop.permute.xlu0 %12617 }
 0xa3a   : > { %12762 = vst.msk [vmem:[#allocation2 + $0x18] sm:$0x7f] %vm12761_vm8, %v12618_v51 }
 0xa3b   : > { %v12279_v42 = vpop.f32.mrb[16].mxu1 }
 0xa3c   : > { %v12467_v20 = vmul.f32 0.17391305, %v12279_v42  ;;  %v12471_v39 = vmul.f32 0.39130434, %v12279_v42  ;;  %v12475_v43 = vmul.f32 0.6086956, %v12279_v42 }
 0xa3d   : > { %v12479_v6 = vmul.f32 0.82608694, %v12279_v42  ;;  %v19091_v46 = vpop.f32.mrb[17].mxu1  ;;  %v12482_v7 = vmul.f32 0.95652175, %v12279_v42 }
 0xa3e   : > { %v12468_v54 = vadd.f32 %v12467_v20, %v12466_v0  ;;  %v12472_v2 = vadd.f32 %v12471_v39, %v12470_v11  ;;  %v12476_v10 = vadd.f32 %v12475_v43, %v12474_v44  ;;  %v12486_v56 = vmul.f32 0.73913044, %v12279_v42  ;;  %v12815_v46 = vld [vmem:[#allocation2 + $0x30] sm:$0xff] }
 0xa3f   : > { %v12480_v48 = vadd.f32 %v12479_v6, %v12478_v9  ;;  %v12490_v34 = vmul.f32 0.5217391, %v12279_v42  ;;  %v12494_v24 = vmul.f32 0.3043478, %v12279_v42  ;;  %v12498_v15 = vmul.f32 0.08695652, %v12279_v42 }
 0xa40   : > { %16808 = vst.msk [vmem:[%s20200_s28 + $0xfb] sm:$0xf] %vm4123_vm6, %v12468_v54  ;;  %16809 = vst.msk [vmem:[%s20200_s28 + $0x113] sm:$0xf] %vm4123_vm6, %v12472_v2  ;;  %v12813_v42 = vld [vmem:[#allocation2 + $0x20] sm:$0xff] }
 0xa41   : > { %16810 = vst.msk [vmem:[%s20200_s28 + $0x12b] sm:$0xf] %vm4123_vm6, %v12476_v10  ;;  %16811 = vst.msk [vmem:[%s20200_s28 + $0x143] sm:$0xf] %vm4123_vm6, %v12480_v48  ;;  %v12812_v3 = vld [vmem:[#allocation2 + $0x18] sm:$0x7f] }
 0xa42   : > { %v19849_v57 = vpack.c.bf16 %v12812_v3, %v12811_v60 }
 0xa44   : > { %19851 = vmatpush3.bf16.msk.msra.mxu1 %vm23358_vm9, %v19849_v57  ;;  %v12817_v57 = vld [vmem:[#allocation2 + $0x40] sm:$0xff] }
 0xa45   : > { %19856 = vmatprep.subr.bf16.mxu1 %v24860_v45 }
 0xa47   : > { %v12540_v52 = vld [vmem:[%s20200_s28 + $0xf8] sm:$0x7f]  ;;  %19126 = vmatmul.mubr.msk.f32.vlgmr.msra.gmra.mrb[20].mxu1 %vm12866_vm7, %v23370_v18  ;;  %v12542_v29 = vld [vmem:[%s20200_s28 + $0x110] sm:$0x7f] }
 0xa48   : > { %12657 = vrot.lane.b32.xlu0 %v12540_v52, %s20051_s14  ;;  %19128 = vmatprep.mubr.msk.f32.mxu1 %vm20050_vm1, %v24861_v55  ;;  %v12544_v47 = vld [vmem:[%s20200_s28 + $0x128] sm:$0x7f]  ;;  %v12546_v41 = vld [vmem:[%s20200_s28 + $0x140] sm:$0x7f] }
 0xa4b   : > { %19129 = vmatmul.mubr.msk.f32.gmra.mrb[22].mxu1 %vm12866_vm7, %v23382_v62 }
 0xa4c   : > { %12661 = vrot.lane.b32.xlu0 %v12542_v29, %s20051_s14  ;;  %19131 = vmatprep.mubr.msk.f32.mxu1 %vm20050_vm1, %v24861_v55 }
 0xa4f   : > { %19132 = vmatmul.mubr.msk.f32.gmra.mrb[24].mxu1 %vm12866_vm7, %v23417_v5 }
 0xa50   : > { %12665 = vrot.lane.b32.xlu0 %v12544_v47, %s20051_s14  ;;  %19134 = vmatprep.mubr.msk.f32.mxu1 %vm20050_vm1, %v24861_v55 }
 0xa53   : > { %19135 = vmatmul.mubr.msk.f32.gmra.mrb[26].mxu1 %vm12866_vm7, %v23432_v50 }
 0xa54   : > { %12669 = vrot.lane.b32.xlu0 %v12546_v41, %s20051_s14  ;;  %19137 = vmatprep.mubr.msk.f32.mxu1 %vm20050_vm1, %v24861_v55  ;;  %v12819_v41 = vld [vmem:[#allocation2 + $0x50] sm:$0xff] }
 0xa57   : > { %19138 = vmatmul.mubr.msk.f32.gmra.mrb[28].mxu1 %vm12866_vm7, %v23451_v32 }
 0xa58   : > { %19163 = vmatprep.mubr.msk.f32.mxu1 %vm20050_vm1, %v24861_v55 }
 0xa5a   : > { %v12352_v31 = vpop.f32.mrb[18].mxu0 }
 0xa5b   : > { %v12483_v37 = vmul.f32 0.04347826, %v12352_v31  ;;  %v12487_v8 = vmul.f32 0.26086956, %v12352_v31  ;;  %v12491_v26 = vmul.f32 0.47826087, %v12352_v31 }
 0xa5c   : > { %v12495_v12 = vmul.f32 0.6956522, %v12352_v31  ;;  %v12499_v22 = vmul.f32 0.9130435, %v12352_v31  ;;  %v19096_v61 = vpop.f32.mrb[19].mxu0 }
 0xa5d   : > { %v12484_v16 = vadd.f32 %v12483_v37, %v12482_v7  ;;  %v12488_v17 = vadd.f32 %v12487_v8, %v12486_v56  ;;  %v12492_v27 = vadd.f32 %v12491_v26, %v12490_v34  ;;  %v12502_v30 = vmul.f32 0.8695652, %v12352_v31  ;;  %v16979_v8 = vld [vmem:[%s24834_s6 + $0xc] sm:$0xf]  ;;  %v12821_v61 = vld [vmem:[#allocation2 + $0x60] sm:$0xff] }
 0xa5e   : > { %v12496_v28 = vadd.f32 %v12495_v12, %v12494_v24  ;;  %v12500_v49 = vadd.f32 %v12499_v22, %v12498_v15  ;;  %v23523_v40 = vpop.f32.mrb[20].mxu0  ;;  %v12506_v21 = vmul.f32 0.65217394, %v12352_v31  ;;  %v12510_v58 = vmul.f32 0.4347826, %v12352_v31 }
 0xa5f   : > { %16812 = vst.msk [vmem:[%s20200_s28 + $0x15b] sm:$0xf] %vm4123_vm6, %v12484_v16  ;;  %16813 = vst.msk [vmem:[%s20200_s28 + $0x173] sm:$0xf] %vm4123_vm6, %v12488_v17  ;;  %v15315_v19 = vrot.slane %v23523_v40, 4  ;;  %v19108_v36 = vpop.f32.mrb[21].mxu0 }
 0xa60   : > { %16814 = vst.msk [vmem:[%s20200_s28 + $0x18b] sm:$0xf] %vm4123_vm6, %v12492_v27  ;;  %16815 = vst.msk [vmem:[%s20200_s28 + $0x1a3] sm:$0xf] %vm4123_vm6, %v12496_v28  ;;  %v12514_v4 = vmul.f32 0.2173913, %v12352_v31 }
 0xa61   : > { %16816 = vst.msk [vmem:[%s20200_s28 + $0x1bb] sm:$0xf] %vm4123_vm6, %v12500_v49  ;;  %15339 = vrot.lane.b32.xlu1 %v15315_v19, %s20053_s24  ;;  %v12823_v28 = vld [vmem:[#allocation2 + $0x70] sm:$0xff] }
 0xa62   : > { %v12956_v38 = vpop.f32.mrb[22].mxu0 }
 0xa63   : > { %v12622_v1 = vpop.permute.xlu0 %12621  ;;  %v19111_v59 = vpop.f32.mrb[23].mxu0 }
 0xa64   : > { %12764 = vst.msk [vmem:[#allocation2 + $0x28] sm:$0x7f] %vm12761_vm8, %v12622_v1 }
 0xa65   : > { %15459 = vrot.lane.b32.xlu1 %v12956_v38, %s20054_s25  ;;  %v12825_v38 = vld [vmem:[#allocation2 + $0x80] sm:$0xff] }
 0xa66   : > { %v12548_v13 = vld [vmem:[%s20200_s28 + $0x158] sm:$0x7f]  ;;  %v12550_v25 = vld [vmem:[%s20200_s28 + $0x170] sm:$0x7f] }
 0xa67   : > { %12673 = vrot.lane.b32.xlu0 %v12548_v13, %s20051_s14  ;;  %v12626_v14 = vpop.permute.xlu0 %12625  ;;  %v12552_v2 = vld [vmem:[%s20200_s28 + $0x188] sm:$0x7f]  ;;  %v12554_v3 = vld [vmem:[%s20200_s28 + $0x1a0] sm:$0x7f]  ;;  %v12961_v13 = vpop.f32.mrb[24].mxu0 }
 0xa68   : > { %12766 = vst.msk [vmem:[#allocation2 + $0x38] sm:$0x7f] %vm12761_vm8, %v12626_v14  ;;  %v12556_v47 = vld [vmem:[%s20200_s28 + $0x1b8] sm:$0x7f] }
 0xa69   : > { %16160 = vperm.xlu1 %20026, %v16978_v53   ;;  %v12827_v53 = vld [vmem:[#allocation2 + $0x90] sm:$0xff] }
 0xa6a   : > { %v12425_v63 = vpop.f32.mrb[18].mxu1 }
 0xa6b   : > { %v12503_v35 = vmul.f32 0.13043478, %v12425_v63  ;;  %v12507_v23 = vmul.f32 0.3478261, %v12425_v63  ;;  %v12511_v51 = vmul.f32 0.5652174, %v12425_v63  ;;  %12677 = vrot.lane.b32.xlu0 %v12550_v25, %s20051_s14  ;;  %v12630_v0 = vpop.permute.xlu0 %12629 }
 0xa6c   : > { %16821 = vst.msk [vmem:[%s20200_s28 + $0x233] sm:$0xf] %vm4123_vm6, %v12425_v63  ;;  %v12515_v11 = vmul.f32 0.7826087, %v12425_v63  ;;  %v19101_v44 = vpop.f32.mrb[19].mxu1  ;;  %v12829_v63 = vld [vmem:[#allocation2 + $0xa0] sm:$0xff] }
 0xa6d   : > { %12768 = vst.msk [vmem:[#allocation2 + $0x48] sm:$0x7f] %vm12761_vm8, %v12630_v0  ;;  %v12814_v20 = vld [vmem:[#allocation2 + $0x28] sm:$0x7f]  ;;  %v12504_v39 = vadd.f32 %v12503_v35, %v12502_v30  ;;  %v12508_v43 = vadd.f32 %v12507_v23, %v12506_v21  ;;  %v12512_v9 = vadd.f32 %v12511_v51, %v12510_v58  ;;  %v19114_v30 = vpop.f32.mrb[25].mxu0 }
 0xa6e   : > { %v19853_v6 = vpack.c.bf16 %v12814_v20, %v12813_v42  ;;  %v12516_v54 = vadd.f32 %v12515_v11, %v12514_v4  ;;  %v12965_v35 = vpop.f32.mrb[26].mxu0  ;;  %v12831_v11 = vld [vmem:[#allocation2 + $0xb0] sm:$0xff] }
 0xa6f   : > { %16817 = vst.msk [vmem:[%s20200_s28 + $0x1d3] sm:$0xf] %vm4123_vm6, %v12504_v39  ;;  %16818 = vst.msk [vmem:[%s20200_s28 + $0x1eb] sm:$0xf] %vm4123_vm6, %v12508_v43  ;;  %12681 = vrot.lane.b32.xlu0 %v12552_v2, %s20051_s14  ;;  %v12634_v10 = vpop.permute.xlu0 %12633  ;;  %v12816_v48 = vld [vmem:[#allocation2 + $0x38] sm:$0x7f] }
 0xa70   : > { %16819 = vst.msk [vmem:[%s20200_s28 + $0x203] sm:$0xf] %vm4123_vm6, %v12512_v9  ;;  %19855 = vmatpush3.bf16.msk.msra.mxu0 %vm23358_vm9, %v19853_v6  ;;  %16820 = vst.msk [vmem:[%s20200_s28 + $0x21b] sm:$0xf] %vm4123_vm6, %v12516_v54  ;;  %v19857_v60 = vpack.c.bf16 %v12816_v48, %v12815_v46  ;;  %v19117_v23 = vpop.f32.mrb[27].mxu0  ;;  %v12833_v43 = vld [vmem:[#allocation2 + $0xc0] sm:$0xff] }
 0xa71   : > { %12770 = vst.msk [vmem:[#allocation2 + $0x58] sm:$0x7f] %vm12761_vm8, %v12634_v10  ;;  %19860 = vmatprep.subr.bf16.mxu0 %v24860_v45  ;;  %v12969_v20 = vpop.f32.mrb[28].mxu0  ;;  %v12835_v2 = vld [vmem:[#allocation2 + $0xd0] sm:$0xff] }
 0xa72   : > { %19859 = vmatpush3.bf16.msk.msra.mxu1 %vm23358_vm9, %v19857_v60  ;;  %v19120_v6 = vpop.f32.mrb[29].mxu0  ;;  %v12851_v30 = vld [vmem:[#allocation2 + $0x150] sm:$0xff] }
 0xa73   : > { %19145 = vmatmul.mubr.msk.f32.vlgmr.msra.gmra.mrb[30].mxu0 %vm12866_vm7, %v23370_v18  ;;  %12685 = vrot.lane.b32.xlu0 %v12554_v3, %s20051_s14  ;;  %v12566_v37 = vld [vmem:[%s20200_s28 + $0x230] sm:$0x7f]  ;;  %v12837_v3 = vld [vmem:[#allocation2 + $0xe0] sm:$0xff] }
 0xa74   : > { %19147 = vmatprep.mubr.msk.f32.mxu0 %vm20050_vm1, %v24861_v55  ;;  %v12818_v52 = vld [vmem:[#allocation2 + $0x48] sm:$0x7f]  ;;  %19864 = vmatprep.subr.bf16.mxu1 %v24860_v45  ;;  %v24007_v23 = vld [vmem:[%s24832_s4 + $0x10] sm:$0xff]  ;;  %v12853_v6 = vld [vmem:[#allocation2 + $0x160] sm:$0xff] }
 0xa75   : > { %v19861_v29 = vpack.c.bf16 %v12818_v52, %v12817_v57  ;;  %19164 = vmatmul.mubr.msk.f32.vlgmr.msra.gmra.mrb[30].mxu1 %vm12866_vm7, %v23370_v18 }
 0xa76   : > { %19166 = vmatprep.mubr.msk.f32.mxu1 %vm20050_vm1, %v24861_v55  ;;  %v12558_v34 = vld [vmem:[%s20200_s28 + $0x1d0] sm:$0x7f]  ;;  %v12560_v24 = vld [vmem:[%s20200_s28 + $0x1e8] sm:$0x7f] }
 0xa77   : > { %19863 = vmatpush3.bf16.msk.msra.mxu0 %vm23358_vm9, %v19861_v29  ;;  %12689 = vrot.lane.b32.xlu0 %v12556_v47, %s20051_s14  ;;  %v12562_v15 = vld [vmem:[%s20200_s28 + $0x200] sm:$0x7f]  ;;  %v12564_v31 = vld [vmem:[%s20200_s28 + $0x218] sm:$0x7f]  ;;  %v12839_v47 = vld [vmem:[#allocation2 + $0xf0] sm:$0xff] }
 0xa78   : > { %19148 = vmatmul.mubr.msk.f32.gmra.mrb[32].mxu0 %vm12866_vm7, %v23382_v62  ;;  %v12820_v7 = vld [vmem:[#allocation2 + $0x58] sm:$0x7f]  ;;  %19868 = vmatprep.subr.bf16.mxu0 %v24860_v45 }
 0xa79   : > { %v19865_v56 = vpack.c.bf16 %v12820_v7, %v12819_v41  ;;  %19150 = vmatprep.mubr.msk.f32.mxu0 %vm20050_vm1, %v24861_v55  ;;  %19167 = vmatmul.mubr.msk.f32.gmra.mrb[32].mxu1 %vm12866_vm7, %v23382_v62 }
 0xa7a   : > { %19169 = vmatprep.mubr.msk.f32.mxu1 %vm20050_vm1, %v24861_v55 }
 0xa7b   : > { %19867 = vmatpush3.bf16.msk.msra.mxu1 %vm23358_vm9, %v19865_v56  ;;  %12693 = vrot.lane.b32.xlu0 %v12558_v34, %s20051_s14 }
 0xa7c   : > { %19151 = vmatmul.mubr.msk.f32.gmra.mrb[34].mxu0 %vm12866_vm7, %v23417_v5  ;;  %19872 = vmatprep.subr.bf16.mxu1 %v24860_v45 }
 0xa7d   : > { %19153 = vmatprep.mubr.msk.f32.mxu0 %vm20050_vm1, %v24861_v55  ;;  %19170 = vmatmul.mubr.msk.f32.gmra.mrb[34].mxu1 %vm12866_vm7, %v23417_v5 }
 0xa7e   : > { %19172 = vmatprep.mubr.msk.f32.mxu1 %vm20050_vm1, %v24861_v55 }
 0xa7f   : > { %12697 = vrot.lane.b32.xlu0 %v12560_v24, %s20051_s14 }
 0xa80   : > { %19154 = vmatmul.mubr.msk.f32.gmra.mrb[36].mxu0 %vm12866_vm7, %v23432_v50 }
 0xa81   : > { %19156 = vmatprep.mubr.msk.f32.mxu0 %vm20050_vm1, %v24861_v55  ;;  %19173 = vmatmul.mubr.msk.f32.gmra.mrb[36].mxu1 %vm12866_vm7, %v23432_v50 }
 0xa82   : > { %19175 = vmatprep.mubr.msk.f32.mxu1 %vm20050_vm1, %v24861_v55 }
 0xa83   : > { %12701 = vrot.lane.b32.xlu0 %v12562_v15, %s20051_s14 }
 0xa84   : > { %19157 = vmatmul.mubr.msk.f32.gmra.mrb[38].mxu0 %vm12866_vm7, %v23451_v32 }
 0xa85   : > { %19182 = vmatprep.mubr.msk.f32.mxu0 %vm20050_vm1, %v24861_v55  ;;  %19176 = vmatmul.mubr.msk.f32.gmra.mrb[38].mxu1 %vm12866_vm7, %v23451_v32 }
 0xa86   : > { %19201 = vmatprep.mubr.msk.f32.mxu1 %vm20050_vm1, %v24861_v55 }
 0xa87   : > { %12705 = vrot.lane.b32.xlu0 %v12564_v31, %s20051_s14  ;;  %v12841_v31 = vld [vmem:[#allocation2 + $0x100] sm:$0xff] }
 0xa88   : > { %19183 = vmatmul.mubr.msk.f32.vlgmr.msra.gmra.mrb[40].mxu0 %vm12866_vm7, %v23370_v18 }
 0xa89   : > { %19185 = vmatprep.mubr.msk.f32.mxu0 %vm20050_vm1, %v24861_v55  ;;  %19202 = vmatmul.mubr.msk.f32.vlgmr.msra.gmra.mrb[40].mxu1 %vm12866_vm7, %v23370_v18 }
 0xa8a   : > { %19204 = vmatprep.mubr.msk.f32.mxu1 %vm20050_vm1, %v24861_v55 }
 0xa8b   : > { %12709 = vrot.lane.b32.xlu0 %v12566_v37, %s20051_s14 }
 0xa8c   : > { %19186 = vmatmul.mubr.msk.f32.gmra.mrb[42].mxu0 %vm12866_vm7, %v23382_v62 }
 0xa8d   : > { %19188 = vmatprep.mubr.msk.f32.mxu0 %vm20050_vm1, %v24861_v55  ;;  %19205 = vmatmul.mubr.msk.f32.gmra.mrb[42].mxu1 %vm12866_vm7, %v23382_v62 }
 0xa8e   : > { %19207 = vmatprep.mubr.msk.f32.mxu1 %vm20050_vm1, %v24861_v55 }
 0xa8f   : > { %16191 = vperm.xlu0 %20027, %v16979_v8  }
 0xa90   : > { %19189 = vmatmul.mubr.msk.f32.gmra.mrb[44].mxu0 %vm12866_vm7, %v23417_v5 }
 0xa91   : > { %19191 = vmatprep.mubr.msk.f32.mxu0 %vm20050_vm1, %v24861_v55  ;;  %v12638_v26 = vpop.permute.xlu0 %12637  ;;  %19208 = vmatmul.mubr.msk.f32.gmra.mrb[44].mxu1 %vm12866_vm7, %v23417_v5 }
 0xa92   : > { %12772 = vst.msk [vmem:[#allocation2 + $0x68] sm:$0x7f] %vm12761_vm8, %v12638_v26  ;;  %19210 = vmatprep.mubr.msk.f32.mxu1 %vm20050_vm1, %v24861_v55 }
 0xa94   : > { %19192 = vmatmul.mubr.msk.f32.gmra.mrb[46].mxu0 %vm12866_vm7, %v23432_v50 }
 0xa95   : > { %19194 = vmatprep.mubr.msk.f32.mxu0 %vm20050_vm1, %v24861_v55  ;;  %v12642_v12 = vpop.permute.xlu0 %12641  ;;  %19211 = vmatmul.mubr.msk.f32.gmra.mrb[46].mxu1 %vm12866_vm7, %v23432_v50 }
 0xa96   : > { %12774 = vst.msk [vmem:[#allocation2 + $0x78] sm:$0x7f] %vm12761_vm8, %v12642_v12  ;;  %19213 = vmatprep.mubr.msk.f32.mxu1 %vm20050_vm1, %v24861_v55  ;;  %v12843_v12 = vld [vmem:[#allocation2 + $0x110] sm:$0xff] }
 0xa98   : > { %19195 = vmatmul.mubr.msk.f32.gmra.mrb[48].mxu0 %vm12866_vm7, %v23451_v32 }
 0xa99   : > { %19220 = vmatprep.mubr.msk.f32.mxu0 %vm20050_vm1, %v24861_v55  ;;  %v12646_v22 = vpop.permute.xlu0 %12645  ;;  %v12822_v16 = vld [vmem:[#allocation2 + $0x68] sm:$0x7f]  ;;  %19214 = vmatmul.mubr.msk.f32.gmra.mrb[48].mxu1 %vm12866_vm7, %v23451_v32 }
 0xa9a   : > { %12776 = vst.msk [vmem:[#allocation2 + $0x88] sm:$0x7f] %vm12761_vm8, %v12646_v22  ;;  %v19869_v17 = vpack.c.bf16 %v12822_v16, %v12821_v61  ;;  %19239 = vmatprep.mubr.msk.f32.mxu1 %vm20050_vm1, %v24861_v55 }
 0xa9c   : > { %19871 = vmatpush3.bf16.msk.msra.mxu0 %vm23358_vm9, %v19869_v17  ;;  %v12845_v17 = vld [vmem:[#allocation2 + $0x120] sm:$0xff] }
 0xa9d   : > { %v12650_v27 = vpop.permute.xlu0 %12649  ;;  %v12824_v49 = vld [vmem:[#allocation2 + $0x78] sm:$0x7f]  ;;  %19876 = vmatprep.subr.bf16.mxu0 %v24860_v45 }
 0xa9e   : > { %12778 = vst.msk [vmem:[#allocation2 + $0x98] sm:$0x7f] %vm12761_vm8, %v12650_v27  ;;  %v19873_v19 = vpack.c.bf16 %v12824_v49, %v12823_v28  ;;  %v23926_v28 = vld [vmem:[%s24832_s4] sm:$0xff] }
 0xa9f   : > { %19221 = vmatmul.mubr.msk.f32.vlgmr.msra.gmra.mrb[50].mxu0 %vm12866_vm7, %v23370_v18 }
 0xaa0   : > { %19875 = vmatpush3.bf16.msk.msra.mxu1 %vm23358_vm9, %v19873_v19  ;;  %19223 = vmatprep.mubr.msk.f32.mxu0 %vm20050_vm1, %v24861_v55  ;;  %v12847_v19 = vld [vmem:[#allocation2 + $0x130] sm:$0xff] }
 0xaa1   : > { %v12654_v36 = vpop.permute.xlu0 %12653  ;;  %v12826_v1 = vld [vmem:[#allocation2 + $0x88] sm:$0x7f]  ;;  %19880 = vmatprep.subr.bf16.mxu1 %v24860_v45 }
 0xaa2   : > { %12780 = vst.msk [vmem:[#allocation2 + $0xa8] sm:$0x7f] %vm12761_vm8, %v12654_v36  ;;  %v19877_v59 = vpack.c.bf16 %v12826_v1, %v12825_v38  ;;  %v23940_v38 = vld [vmem:[%s24832_s4 + $0x8] sm:$0xff] }
 0xaa3   : > { %19224 = vmatmul.mubr.msk.f32.gmra.mrb[52].mxu0 %vm12866_vm7, %v23382_v62  ;;  %19240 = vmatmul.mubr.msk.f32.vlgmr.msra.gmra.mrb[50].mxu1 %vm12866_vm7, %v23370_v18 }
 0xaa4   : > { %19879 = vmatpush3.bf16.msk.msra.mxu0 %vm23358_vm9, %v19877_v59  ;;  %19226 = vmatprep.mubr.msk.f32.mxu0 %vm20050_vm1, %v24861_v55 }
 0xaa5   : > { %19242 = vmatprep.mubr.msk.f32.mxu1 %vm20050_vm1, %v24861_v55  ;;  %v12828_v14 = vld [vmem:[#allocation2 + $0x98] sm:$0x7f]  ;;  %19884 = vmatprep.subr.bf16.mxu0 %v24860_v45 }
 0xaa6   : > { %v19881_v21 = vpack.c.bf16 %v12828_v14, %v12827_v53 }
 0xaa7   : > { %19227 = vmatmul.mubr.msk.f32.gmra.mrb[54].mxu0 %vm12866_vm7, %v23417_v5  ;;  %19243 = vmatmul.mubr.msk.f32.gmra.mrb[52].mxu1 %vm12866_vm7, %v23382_v62 }
 0xaa8   : > { %19883 = vmatpush3.bf16.msk.msra.mxu1 %vm23358_vm9, %v19881_v21  ;;  %19229 = vmatprep.mubr.msk.f32.mxu0 %vm20050_vm1, %v24861_v55 }
 0xaa9   : > { %19245 = vmatprep.mubr.msk.f32.mxu1 %vm20050_vm1, %v24861_v55  ;;  %19888 = vmatprep.subr.bf16.mxu1 %v24860_v45  ;;  %v12830_v58 = vld [vmem:[#allocation2 + $0xa8] sm:$0x7f] }
 0xaaa   : > { %v19885_v4 = vpack.c.bf16 %v12830_v58, %v12829_v63 }
 0xaab   : > { %19230 = vmatmul.mubr.msk.f32.gmra.mrb[56].mxu0 %vm12866_vm7, %v23432_v50  ;;  %19246 = vmatmul.mubr.msk.f32.gmra.mrb[54].mxu1 %vm12866_vm7, %v23417_v5 }
 0xaac   : > { %19232 = vmatprep.mubr.msk.f32.mxu0 %vm20050_vm1, %v24861_v55  ;;  %19248 = vmatprep.mubr.msk.f32.mxu1 %vm20050_vm1, %v24861_v55 }
 0xaaf   : > { %19233 = vmatmul.mubr.msk.f32.gmra.mrb[58].mxu0 %vm12866_vm7, %v23451_v32  ;;  %19249 = vmatmul.mubr.msk.f32.gmra.mrb[56].mxu1 %vm12866_vm7, %v23432_v50 }
 0xab0   : > { %19251 = vmatprep.mubr.msk.f32.mxu1 %vm20050_vm1, %v24861_v55  ;;  %19258 = vmatprep.mubr.msk.f32.mxu0 %vm20050_vm1, %v24861_v55 }
 0xab3   : > { %19252 = vmatmul.mubr.msk.f32.gmra.mrb[58].mxu1 %vm12866_vm7, %v23451_v32  ;;  %19259 = vmatmul.mubr.msk.f32.vlgmr.msra.gmra.mrb[60].mxu0 %vm12866_vm7, %v23370_v18 }
 0xab4   : > { %19887 = vmatpush3.bf16.msk.msra.mxu0 %vm23358_vm9, %v19885_v4  ;;  %19261 = vmatprep.mubr.msk.f32.mxu0 %vm20050_vm1, %v24861_v55 }
 0xab5   : > { %19277 = vmatprep.mubr.msk.f32.mxu1 %vm20050_vm1, %v24861_v55  ;;  %19892 = vmatprep.subr.bf16.mxu0 %v24860_v45 }
 0xab7   : > { %19262 = vmatmul.mubr.msk.f32.gmra.mrb[62].mxu0 %vm12866_vm7, %v23382_v62  ;;  %19278 = vmatmul.mubr.msk.f32.vlgmr.msra.gmra.mrb[60].mxu1 %vm12866_vm7, %v23370_v18 }
 0xab8   : > { %19264 = vmatprep.mubr.msk.f32.mxu0 %vm20050_vm1, %v24861_v55  ;;  %19280 = vmatprep.mubr.msk.f32.mxu1 %vm20050_vm1, %v24861_v55 }
 0xaba   : > { %v12658_v25 = vpop.permute.xlu0 %12657 }
 0xabb   : > { %12782 = vst.msk [vmem:[#allocation2 + $0xb8] sm:$0x7f] %vm12761_vm8, %v12658_v25  ;;  %19265 = vmatmul.mubr.msk.f32.gmra.mrb[64].mxu0 %vm12866_vm7, %v23417_v5  ;;  %19281 = vmatmul.mubr.msk.f32.gmra.mrb[62].mxu1 %vm12866_vm7, %v23382_v62 }
 0xabc   : > { %19267 = vmatprep.mubr.msk.f32.mxu0 %vm20050_vm1, %v24861_v55  ;;  %19283 = vmatprep.mubr.msk.f32.mxu1 %vm20050_vm1, %v24861_v55 }
 0xabe   : > { %v12662_v51 = vpop.permute.xlu0 %12661 }
 0xabf   : > { %12784 = vst.msk [vmem:[#allocation2 + $0xc8] sm:$0x7f] %vm12761_vm8, %v12662_v51  ;;  %19268 = vmatmul.mubr.msk.f32.gmra.mrb[66].mxu0 %vm12866_vm7, %v23432_v50  ;;  %19284 = vmatmul.mubr.msk.f32.gmra.mrb[64].mxu1 %vm12866_vm7, %v23417_v5 }
 0xac0   : > { %19270 = vmatprep.mubr.msk.f32.mxu0 %vm20050_vm1, %v24861_v55  ;;  %19286 = vmatprep.mubr.msk.f32.mxu1 %vm20050_vm1, %v24861_v55 }
 0xac2   : > { %v12666_v0 = vpop.permute.xlu0 %12665  ;;  %v12832_v44 = vld [vmem:[#allocation2 + $0xb8] sm:$0x7f] }
 0xac3   : > { %12786 = vst.msk [vmem:[#allocation2 + $0xd8] sm:$0x7f] %vm12761_vm8, %v12666_v0  ;;  %19271 = vmatmul.mubr.msk.f32.gmra.mrb[68].mxu0 %vm12866_vm7, %v23451_v32  ;;  %19287 = vmatmul.mubr.msk.f32.gmra.mrb[66].mxu1 %vm12866_vm7, %v23432_v50  ;;  %v19889_v42 = vpack.c.bf16 %v12832_v44, %v12831_v11 }
 0xac4   : > { %19289 = vmatprep.mubr.msk.f32.mxu1 %vm20050_vm1, %v24861_v55  ;;  %19296 = vmatprep.mubr.msk.f32.mxu0 %vm20050_vm1, %v24861_v55 }
 0xac5   : > { %19891 = vmatpush3.bf16.msk.msra.mxu1 %vm23358_vm9, %v19889_v42 }
 0xac6   : > { %v12670_v39 = vpop.permute.xlu0 %12669  ;;  %v12834_v9 = vld [vmem:[#allocation2 + $0xc8] sm:$0x7f]  ;;  %19896 = vmatprep.subr.bf16.mxu1 %v24860_v45 }
 0xac7   : > { %12788 = vst.msk [vmem:[#allocation2 + $0xe8] sm:$0x7f] %vm12761_vm8, %v12670_v39  ;;  %19290 = vmatmul.mubr.msk.f32.gmra.mrb[68].mxu1 %vm12866_vm7, %v23451_v32  ;;  %19297 = vmatmul.mubr.msk.f32.vlgmr.msra.gmra.mrb[70].mxu0 %vm12866_vm7, %v23370_v18  ;;  %v19893_v54 = vpack.c.bf16 %v12834_v9, %v12833_v43 }
 0xac8   : > { %19299 = vmatprep.mubr.msk.f32.mxu0 %vm20050_vm1, %v24861_v55  ;;  %19315 = vmatprep.mubr.msk.f32.mxu1 %vm20050_vm1, %v24861_v55 }
 0xac9   : > { %19895 = vmatpush3.bf16.msk.msra.mxu0 %vm23358_vm9, %v19893_v54 }
 0xaca   : > { %v12836_v10 = vld [vmem:[#allocation2 + $0xd8] sm:$0x7f]  ;;  %19900 = vmatprep.subr.bf16.mxu0 %v24860_v45 }
 0xacb   : > { %19300 = vmatmul.mubr.msk.f32.gmra.mrb[72].mxu0 %vm12866_vm7, %v23382_v62  ;;  %19316 = vmatmul.mubr.msk.f32.vlgmr.msra.gmra.mrb[70].mxu1 %vm12866_vm7, %v23370_v18  ;;  %v19897_v46 = vpack.c.bf16 %v12836_v10, %v12835_v2  ;;  %v24048_v10 = vld [vmem:[%s24832_s4 + $0x20] sm:$0xf] }
 0xacc   : > { %19302 = vmatprep.mubr.msk.f32.mxu0 %vm20050_vm1, %v24861_v55  ;;  %19318 = vmatprep.mubr.msk.f32.mxu1 %vm20050_vm1, %v24861_v55 }
 0xacd   : > { %19899 = vmatpush3.bf16.msk.msra.mxu1 %vm23358_vm9, %v19897_v46 }
 0xace   : > { %19904 = vmatprep.subr.bf16.mxu1 %v24860_v45  ;;  %v12838_v48 = vld [vmem:[#allocation2 + $0xe8] sm:$0x7f] }
 0xacf   : > { %19303 = vmatmul.mubr.msk.f32.gmra.mrb[74].mxu0 %vm12866_vm7, %v23417_v5  ;;  %19319 = vmatmul.mubr.msk.f32.gmra.mrb[72].mxu1 %vm12866_vm7, %v23382_v62  ;;  %v19901_v57 = vpack.c.bf16 %v12838_v48, %v12837_v3  ;;  %v12855_v48 = vld [vmem:[#allocation2 + $0x170] sm:$0xff]  ;;  %v12857_v3 = vld [vmem:[#allocation2 + $0x180] sm:$0xff] }
 0xad0   : > { %19305 = vmatprep.mubr.msk.f32.mxu0 %vm20050_vm1, %v24861_v55  ;;  %19321 = vmatprep.mubr.msk.f32.mxu1 %vm20050_vm1, %v24861_v55 }
 0xad3   : > { %19306 = vmatmul.mubr.msk.f32.gmra.mrb[76].mxu0 %vm12866_vm7, %v23432_v50  ;;  %19322 = vmatmul.mubr.msk.f32.gmra.mrb[74].mxu1 %vm12866_vm7, %v23417_v5  ;;  %v15340_v59 = vpop.permute.xlu1 %15339 }
 0xad4   : > { %19308 = vmatprep.mubr.msk.f32.mxu0 %vm20050_vm1, %v24861_v55  ;;  %19324 = vmatprep.mubr.msk.f32.mxu1 %vm20050_vm1, %v24861_v55  ;;  %v15411_v14 = vadd.f32 %v15340_v59, %v23523_v40 }
 0xad7   : > { %19309 = vmatmul.mubr.msk.f32.gmra.mrb[78].mxu0 %vm12866_vm7, %v23451_v32  ;;  %19325 = vmatmul.mubr.msk.f32.gmra.mrb[76].mxu1 %vm12866_vm7, %v23432_v50  ;;  %v15460_v25 = vpop.permute.xlu1 %15459 }
 0xad8   : > { %19327 = vmatprep.mubr.msk.f32.mxu1 %vm20050_vm1, %v24861_v55  ;;  %19334 = vmatprep.mubr.msk.f32.mxu0 %vm20050_vm1, %v24861_v55  ;;  %v15531_v40 = vadd.f32 %v15460_v25, %v15411_v14 }
 0xad9   : > { %v12674_v60 = vpop.permute.xlu0 %12673 }
 0xada   : > { %12790 = vst.msk [vmem:[#allocation2 + $0xf8] sm:$0x7f] %vm12761_vm8, %v12674_v60 }
 0xadb   : > { %19328 = vmatmul.mubr.msk.f32.gmra.mrb[78].mxu1 %vm12866_vm7, %v23451_v32  ;;  %19335 = vmatmul.mubr.msk.f32.vlgmr.msra.gmra.mrb[80].mxu0 %vm12866_vm7, %v23370_v18 }
 0xadc   : > { %19903 = vmatpush3.bf16.msk.msra.mxu0 %vm23358_vm9, %v19901_v57  ;;  %19337 = vmatprep.mubr.msk.f32.mxu0 %vm20050_vm1, %v24861_v55 }
 0xadd   : > { %v12678_v52 = vpop.permute.xlu0 %12677  ;;  %19353 = vmatprep.mubr.msk.f32.mxu1 %vm20050_vm1, %v24861_v55  ;;  %19908 = vmatprep.subr.bf16.mxu0 %v24860_v45 }
 0xade   : > { %12792 = vst.msk [vmem:[#allocation2 + $0x108] sm:$0x7f] %vm12761_vm8, %v12678_v52  ;;  %v12859_v52 = vld [vmem:[#allocation2 + $0x190] sm:$0xff] }
 0xadf   : > { %19338 = vmatmul.mubr.msk.f32.gmra.mrb[82].mxu0 %vm12866_vm7, %v23382_v62  ;;  %19354 = vmatmul.mubr.msk.f32.vlgmr.msra.gmra.mrb[80].mxu1 %vm12866_vm7, %v23370_v18 }
 0xae0   : > { %19340 = vmatprep.mubr.msk.f32.mxu0 %vm20050_vm1, %v24861_v55  ;;  %19356 = vmatprep.mubr.msk.f32.mxu1 %vm20050_vm1, %v24861_v55 }
 0xae1   : > { %v12682_v29 = vpop.permute.xlu0 %12681  ;;  %v12840_v41 = vld [vmem:[#allocation2 + $0xf8] sm:$0x7f] }
 0xae2   : > { %12794 = vst.msk [vmem:[#allocation2 + $0x118] sm:$0x7f] %vm12761_vm8, %v12682_v29  ;;  %v19905_v7 = vpack.c.bf16 %v12840_v41, %v12839_v47  ;;  %v12860_v29 = vld [vmem:[#allocation2 + $0x198] sm:$0x7f] }
 0xae3   : > { %19341 = vmatmul.mubr.msk.f32.gmra.mrb[84].mxu0 %vm12866_vm7, %v23417_v5  ;;  %19357 = vmatmul.mubr.msk.f32.gmra.mrb[82].mxu1 %vm12866_vm7, %v23382_v62  ;;  %v19945_v47 = vpack.c.bf16 %v12860_v29, %v12859_v52 }
 0xae4   : > { %19907 = vmatpush3.bf16.msk.msra.mxu1 %vm23358_vm9, %v19905_v7  ;;  %19343 = vmatprep.mubr.msk.f32.mxu0 %vm20050_vm1, %v24861_v55 }
 0xae5   : > { %v12686_v56 = vpop.permute.xlu0 %12685  ;;  %19359 = vmatprep.mubr.msk.f32.mxu1 %vm20050_vm1, %v24861_v55  ;;  %19912 = vmatprep.subr.bf16.mxu1 %v24860_v45  ;;  %v12842_v24 = vld [vmem:[#allocation2 + $0x108] sm:$0x7f] }
 0xae6   : > { %12796 = vst.msk [vmem:[#allocation2 + $0x128] sm:$0x7f] %vm12761_vm8, %v12686_v56  ;;  %v19909_v37 = vpack.c.bf16 %v12842_v24, %v12841_v31 }
 0xae7   : > { %19344 = vmatmul.mubr.msk.f32.gmra.mrb[86].mxu0 %vm12866_vm7, %v23432_v50  ;;  %19360 = vmatmul.mubr.msk.f32.gmra.mrb[84].mxu1 %vm12866_vm7, %v23417_v5 }
 0xae8   : > { %19346 = vmatprep.mubr.msk.f32.mxu0 %vm20050_vm1, %v24861_v55  ;;  %19362 = vmatprep.mubr.msk.f32.mxu1 %vm20050_vm1, %v24861_v55 }
 0xae9   : > { %v12690_v34 = vpop.permute.xlu0 %12689  ;;  %v12844_v8 = vld [vmem:[#allocation2 + $0x118] sm:$0x7f] }
 0xaea   : > { %12798 = vst.msk [vmem:[#allocation2 + $0x138] sm:$0x7f] %vm12761_vm8, %v12690_v34  ;;  %v19913_v22 = vpack.c.bf16 %v12844_v8, %v12843_v12 }
 0xaeb   : > { %19347 = vmatmul.mubr.msk.f32.gmra.mrb[88].mxu0 %vm12866_vm7, %v23451_v32  ;;  %19363 = vmatmul.mubr.msk.f32.gmra.mrb[86].mxu1 %vm12866_vm7, %v23432_v50 }
 0xaec   : > { %19365 = vmatprep.mubr.msk.f32.mxu1 %vm20050_vm1, %v24861_v55  ;;  %19372 = vmatprep.mubr.msk.f32.mxu0 %vm20050_vm1, %v24861_v55 }
 0xaed   : > { %v12694_v15 = vpop.permute.xlu0 %12693  ;;  %v12846_v16 = vld [vmem:[#allocation2 + $0x128] sm:$0x7f] }
 0xaee   : > { %12800 = vst.msk [vmem:[#allocation2 + $0x148] sm:$0x7f] %vm12761_vm8, %v12694_v15  ;;  %v19917_v27 = vpack.c.bf16 %v12846_v16, %v12845_v17 }
 0xaef   : > { %19366 = vmatmul.mubr.msk.f32.gmra.mrb[88].mxu1 %vm12866_vm7, %v23451_v32  ;;  %19373 = vmatmul.mubr.msk.f32.vlgmr.msra.gmra.mrb[90].mxu0 %vm12866_vm7, %v23370_v18 }
 0xaf0   : > { %19911 = vmatpush3.bf16.msk.msra.mxu0 %vm23358_vm9, %v19909_v37  ;;  %19375 = vmatprep.mubr.msk.f32.mxu0 %vm20050_vm1, %v24861_v55 }
 0xaf1   : > { %v12698_v26 = vpop.permute.xlu0 %12697  ;;  %19391 = vmatprep.mubr.msk.f32.mxu1 %vm20050_vm1, %v24861_v55  ;;  %19916 = vmatprep.subr.bf16.mxu0 %v24860_v45  ;;  %v12848_v49 = vld [vmem:[#allocation2 + $0x138] sm:$0x7f] }
 0xaf2   : > { %12802 = vst.msk [vmem:[#allocation2 + $0x158] sm:$0x7f] %vm12761_vm8, %v12698_v26  ;;  %v19921_v36 = vpack.c.bf16 %v12848_v49, %v12847_v19 }
 0xaf3   : > { %19376 = vmatmul.mubr.msk.f32.gmra.mrb[92].mxu0 %vm12866_vm7, %v23382_v62  ;;  %19392 = vmatmul.mubr.msk.f32.vlgmr.msra.gmra.mrb[90].mxu1 %vm12866_vm7, %v23370_v18 }
 0xaf4   : > { %19915 = vmatpush3.bf16.msk.msra.mxu1 %vm23358_vm9, %v19913_v22  ;;  %19378 = vmatprep.mubr.msk.f32.mxu0 %vm20050_vm1, %v24861_v55 }
 0xaf5   : > { %v12702_v61 = vpop.permute.xlu0 %12701  ;;  %19394 = vmatprep.mubr.msk.f32.mxu1 %vm20050_vm1, %v24861_v55  ;;  %19920 = vmatprep.subr.bf16.mxu1 %v24860_v45  ;;  %v12850_v1 = vld [vmem:[#allocation2 + $0x148] sm:$0x7f] }
 0xaf6   : > { %12804 = vst.msk [vmem:[#allocation2 + $0x168] sm:$0x7f] %vm12761_vm8, %v12702_v61 }
 0xaf7   : > { %19379 = vmatmul.mubr.msk.f32.gmra.mrb[94].mxu0 %vm12866_vm7, %v23417_v5  ;;  %19395 = vmatmul.mubr.msk.f32.gmra.mrb[92].mxu1 %vm12866_vm7, %v23382_v62 }
 0xaf8   : > { %19381 = vmatprep.mubr.msk.f32.mxu0 %vm20050_vm1, %v24861_v55  ;;  %19397 = vmatprep.mubr.msk.f32.mxu1 %vm20050_vm1, %v24861_v55 }
 0xaf9   : > { %v12706_v18 = vpop.permute.xlu0 %12705  ;;  %v12852_v53 = vld [vmem:[#allocation2 + $0x158] sm:$0x7f] }
 0xafa   : > { %12806 = vst.msk [vmem:[#allocation2 + $0x178] sm:$0x7f] %vm12761_vm8, %v12706_v18  ;;  %v19929_v58 = vpack.c.bf16 %v12852_v53, %v12851_v30 }
 0xafb   : > { %19382 = vmatmul.mubr.msk.f32.gmra.mrb[96].mxu0 %vm12866_vm7, %v23432_v50  ;;  %19398 = vmatmul.mubr.msk.f32.gmra.mrb[94].mxu1 %vm12866_vm7, %v23417_v5 }
 0xafc   : > { %19384 = vmatprep.mubr.msk.f32.mxu0 %vm20050_vm1, %v24861_v55  ;;  %19400 = vmatprep.mubr.msk.f32.mxu1 %vm20050_vm1, %v24861_v55 }
 0xafd   : > { %v12710_v62 = vpop.permute.xlu0 %12709  ;;  %v12854_v43 = vld [vmem:[#allocation2 + $0x168] sm:$0x7f] }
 0xafe   : > { %12808 = vst.msk [vmem:[#allocation2 + $0x188] sm:$0x7f] %vm12761_vm8, %v12710_v62  ;;  %v19933_v54 = vpack.c.bf16 %v12854_v43, %v12853_v6 }
 0xaff   : > { %19385 = vmatmul.mubr.msk.f32.gmra.mrb[98].mxu0 %vm12866_vm7, %v23451_v32  ;;  %19401 = vmatmul.mubr.msk.f32.gmra.mrb[96].mxu1 %vm12866_vm7, %v23432_v50 }
 0xb00   : > { %19403 = vmatprep.mubr.msk.f32.mxu1 %vm20050_vm1, %v24861_v55  ;;  %19410 = vmatprep.mubr.msk.f32.mxu0 %vm20050_vm1, %v24861_v55 }
 0xb01   : > { %v12856_v46 = vld [vmem:[#allocation2 + $0x178] sm:$0x7f] }
 0xb02   : > { %v19937_v60 = vpack.c.bf16 %v12856_v46, %v12855_v48 }
 0xb03   : > { %19404 = vmatmul.mubr.msk.f32.gmra.mrb[98].mxu1 %vm12866_vm7, %v23451_v32  ;;  %19411 = vmatmul.mubr.msk.f32.vlgmr.msra.gmra.mrb[100].mxu0 %vm12866_vm7, %v23926_v28 }
 0xb04   : > { %19919 = vmatpush3.bf16.msk.msra.mxu0 %vm23358_vm9, %v19917_v27  ;;  %19413 = vmatprep.mubr.msk.f32.mxu0 %vm20050_vm1, %v24861_v55 }
 0xb05   : > { %19429 = vmatprep.mubr.msk.f32.mxu1 %vm20050_vm1, %v24861_v55  ;;  %19924 = vmatprep.subr.bf16.mxu0 %v24860_v45 }
 0xb07   : > { %19414 = vmatmul.mubr.msk.f32.gmra.mrb[102].mxu0 %vm12866_vm7, %v23940_v38  ;;  %19430 = vmatmul.mubr.msk.f32.vlgmr.msra.gmra.mrb[100].mxu1 %vm12866_vm7, %v23926_v28 }
 0xb08   : > { %19923 = vmatpush3.bf16.msk.msra.mxu1 %vm23358_vm9, %v19921_v36  ;;  %19416 = vmatprep.mubr.msk.f32.mxu0 %vm20050_vm1, %v24861_v55 }
 0xb09   : > { %19432 = vmatprep.mubr.msk.f32.mxu1 %vm20050_vm1, %v24861_v55  ;;  %19928 = vmatprep.subr.bf16.mxu1 %v24860_v45 }
 0xb0b   : > { %19417 = vmatmul.mubr.msk.f32.gmra.mrb[104].mxu0 %vm12866_vm7, %v23417_v5  ;;  %19433 = vmatmul.mubr.msk.f32.gmra.mrb[102].mxu1 %vm12866_vm7, %v23940_v38 }
 0xb0c   : > { %19419 = vmatprep.mubr.msk.f32.mxu0 %vm20050_vm1, %v24861_v55  ;;  %19435 = vmatprep.mubr.msk.f32.mxu1 %vm20050_vm1, %v24861_v55 }
 0xb0f   : > { %19420 = vmatmul.mubr.msk.f32.gmra.mrb[106].mxu0 %vm12866_vm7, %v23432_v50  ;;  %19436 = vmatmul.mubr.msk.f32.gmra.mrb[104].mxu1 %vm12866_vm7, %v23417_v5  ;;  %v12849_v5 = vld [vmem:[#allocation2 + $0x140] sm:$0xff] }
 0xb10   : > { %19422 = vmatprep.mubr.msk.f32.mxu0 %vm20050_vm1, %v24861_v55  ;;  %19438 = vmatprep.mubr.msk.f32.mxu1 %vm20050_vm1, %v24861_v55  ;;  %v19925_v13 = vpack.c.bf16 %v12850_v1, %v12849_v5 }
 0xb13   : > { %19423 = vmatmul.mubr.msk.f32.gmra.mrb[108].mxu0 %vm12866_vm7, %v23451_v32  ;;  %19439 = vmatmul.mubr.msk.f32.gmra.mrb[106].mxu1 %vm12866_vm7, %v23432_v50 }
 0xb14   : > { %19441 = vmatprep.mubr.msk.f32.mxu1 %vm20050_vm1, %v24861_v55  ;;  %19448 = vmatprep.mubr.msk.f32.mxu0 %vm20050_vm1, %v24861_v55 }
 0xb17   : > { %19442 = vmatmul.mubr.msk.f32.gmra.mrb[108].mxu1 %vm12866_vm7, %v23451_v32  ;;  %19449 = vmatmul.mubr.msk.f32.vlgmr.msra.gmra.mrb[110].mxu0 %vm12866_vm7, %v23926_v28 }
 0xb18   : > { %19927 = vmatpush3.bf16.msk.msra.mxu0 %vm23358_vm9, %v19925_v13  ;;  %19451 = vmatprep.mubr.msk.f32.mxu0 %vm20050_vm1, %v24861_v55 }
 0xb19   : > { %19467 = vmatprep.mubr.msk.f32.mxu1 %vm20050_vm1, %v24861_v55  ;;  %19932 = vmatprep.subr.bf16.mxu0 %v24860_v45 }
 0xb1a   : > { %v23989_v21 = vpop.f32.mrb[20].mxu1 }
 0xb1b   : > { %v15316_v63 = vrot.slane %v23989_v21, 4  ;;  %19452 = vmatmul.mubr.msk.f32.gmra.mrb[112].mxu0 %vm12866_vm7, %v23940_v38  ;;  %19468 = vmatmul.mubr.msk.f32.vlgmr.msra.gmra.mrb[110].mxu1 %vm12866_vm7, %v23926_v28  ;;  %v19127_v4 = vpop.f32.mrb[21].mxu1 }
 0xb1c   : > { %19931 = vmatpush3.bf16.msk.msra.mxu1 %vm23358_vm9, %v19929_v58  ;;  %19454 = vmatprep.mubr.msk.f32.mxu0 %vm20050_vm1, %v24861_v55 }
 0xb1d   : > { %15341 = vrot.lane.b32.xlu0 %v15316_v63, %s20053_s24  ;;  %19470 = vmatprep.mubr.msk.f32.mxu1 %vm20050_vm1, %v24861_v55 }
 0xb1e   : > { %v13046_v35 = vpop.f32.mrb[22].mxu1  ;;  %19936 = vmatprep.subr.bf16.mxu1 %v24860_v45 }
 0xb1f   : > { %19455 = vmatmul.mubr.msk.f32.gmra.mrb[114].mxu0 %vm12866_vm7, %v24007_v23  ;;  %19471 = vmatmul.mubr.msk.f32.gmra.mrb[112].mxu1 %vm12866_vm7, %v23940_v38  ;;  %v15556_v51 = vrot.slane %v13046_v35, 4  ;;  %v19130_v0 = vpop.f32.mrb[23].mxu1 }
 0xb20   : > { %19457 = vmatprep.mubr.msk.f32.mxu0 %vm20050_vm1, %v24861_v55  ;;  %19473 = vmatprep.mubr.msk.f32.mxu1 %vm20050_vm1, %v24861_v55 }
 0xb21   : > { %15461 = vrot.lane.b32.xlu0 %v13046_v35, %s20054_s25  ;;  %v24018_v11 = vadd.f32 %v15556_v51, %v15531_v40 }
 0xb22   : > { %v13051_v44 = vpop.f32.mrb[24].mxu1 }
 0xb23   : > { %v15748_v42 = vrot.slane %v13051_v44, 4  ;;  %15652 = vrot.lane.b32.xlu1 %v13051_v44, %s20053_s24  ;;  %19458 = vmatmul.mubr.msk.f32.gmra.mrb[116].mxu0 %vm12866_vm7, %v23432_v50  ;;  %v19133_v20 = vpop.f32.mrb[25].mxu1  ;;  %v24035_v50 = vld [vmem:[%s24832_s4 + $0x18] sm:$0xff] }
 0xb24   : > { %19474 = vmatmul.mubr.msk.f32.gmra.mrb[114].mxu1 %vm12866_vm7, %v24007_v23  ;;  %19460 = vmatprep.mubr.msk.f32.mxu0 %vm20050_vm1, %v24861_v55 }
 0xb25   : > { %19476 = vmatprep.mubr.msk.f32.mxu1 %vm20050_vm1, %v24861_v55 }
 0xb26   : > { %v13056_v39 = vpop.f32.mrb[26].mxu1 }
 0xb27   : > { %15772 = vrot.lane.b32.xlu1 %v15748_v42, %s20054_s25  ;;  %19461 = vmatmul.mubr.msk.f32.gmra.mrb[118].mxu0 %vm12866_vm7, %v23451_v32  ;;  %v19136_v9 = vpop.f32.mrb[27].mxu1 }
 0xb28   : > { %19477 = vmatmul.mubr.msk.f32.gmra.mrb[116].mxu1 %vm12866_vm7, %v24035_v50  ;;  %19486 = vmatprep.mubr.msk.f32.mxu0 %vm20050_vm1, %v24861_v55 }
 0xb29   : > { %19479 = vmatprep.mubr.msk.f32.mxu1 %vm20050_vm1, %v24861_v55 }
 0xb2a   : > { %v13060_v2 = vpop.f32.mrb[28].mxu1 }
 0xb2b   : > { %19487 = vmatmul.mubr.msk.f32.vlgmr.msra.gmra.mrb[120].mxu0 %vm12866_vm7, %v23926_v28  ;;  %v19139_v32 = vpop.f32.mrb[29].mxu1 }
 0xb2c   : > { %19480 = vmatmul.mubr.msk.f32.gmra.mrb[118].mxu1 %vm12866_vm7, %v24048_v10  ;;  %19935 = vmatpush3.bf16.msk.msra.mxu0 %vm23358_vm9, %v19933_v54 }
 0xb2d   : > { %19489 = vmatprep.mubr.msk.f32.mxu0 %vm20050_vm1, %v24861_v55  ;;  %19505 = vmatprep.mubr.msk.f32.mxu1 %vm20050_vm1, %v24861_v55 }
 0xb2e   : > { %19940 = vmatprep.subr.bf16.mxu0 %v24860_v45 }
 0xb2f   : > { %19490 = vmatmul.mubr.msk.f32.gmra.mrb[122].mxu0 %vm12866_vm7, %v23940_v38 }
 0xb30   : > { %19506 = vmatmul.mubr.msk.f32.vlgmr.msra.gmra.mrb[120].mxu1 %vm12866_vm7, %v23926_v28  ;;  %19492 = vmatprep.mubr.msk.f32.mxu0 %vm20050_vm1, %v24861_v55 }
 0xb31   : > { %19939 = vmatpush3.bf16.msk.msra.mxu1 %vm23358_vm9, %v19937_v60  ;;  %19508 = vmatprep.mubr.msk.f32.mxu1 %vm20050_vm1, %v24861_v55 }
 0xb32   : > { %19944 = vmatprep.subr.bf16.mxu1 %v24860_v45  ;;  %v12858_v45 = vld [vmem:[#allocation2 + $0x188] sm:$0x7f] }
 0xb33   : > { %19493 = vmatmul.mubr.msk.f32.gmra.mrb[124].mxu0 %vm12866_vm7, %v24007_v23  ;;  %v19941_v57 = vpack.c.bf16 %v12858_v45, %v12857_v3 }
 0xb34   : > { %19495 = vmatprep.mubr.msk.f32.mxu0 %vm20050_vm1, %v24861_v55  ;;  %19509 = vmatmul.mubr.msk.f32.gmra.mrb[122].mxu1 %vm12866_vm7, %v23940_v38 }
 0xb35   : > { %19511 = vmatprep.mubr.msk.f32.mxu1 %vm20050_vm1, %v24861_v55 }
 0xb37   : > { %19496 = vmatmul.mubr.msk.f32.gmra.mrb[126].mxu0 %vm12866_vm7, %v24035_v50 }
 0xb38   : > { %19498 = vmatprep.mubr.msk.f32.mxu0 %vm20050_vm1, %v24861_v55  ;;  %19512 = vmatmul.mubr.msk.f32.gmra.mrb[124].mxu1 %vm12866_vm7, %v24007_v23 }
 0xb39   : > { %19514 = vmatprep.mubr.msk.f32.mxu1 %vm20050_vm1, %v24861_v55 }
 0xb3b   : > { %19499 = vmatmul.mubr.msk.f32.gmra.mrb[128].mxu0 %vm12866_vm7, %v24048_v10 }
 0xb3c   : > { %19524 = vmatprep.mubr.msk.f32.mxu0 %vm20050_vm1, %v24861_v55  ;;  %19515 = vmatmul.mubr.msk.f32.gmra.mrb[126].mxu1 %vm12866_vm7, %v24035_v50 }
 0xb3d   : > { %19517 = vmatprep.mubr.msk.f32.mxu1 %vm20050_vm1, %v24861_v55 }
 0xb3f   : > { %19525 = vmatmul.mubr.msk.f32.vlgmr.msra.gmra.mrb[130].mxu0 %vm12866_vm7, %v23926_v28 }
 0xb40   : > { %19943 = vmatpush3.bf16.msk.msra.mxu0 %vm23358_vm9, %v19941_v57  ;;  %19527 = vmatprep.mubr.msk.f32.mxu0 %vm20050_vm1, %v24861_v55 }
 0xb41   : > { %19518 = vmatmul.mubr.msk.f32.gmra.mrb[128].mxu1 %vm12866_vm7, %v24048_v10 }
 0xb42   : > { %19543 = vmatprep.mubr.msk.f32.mxu1 %vm20050_vm1, %v24861_v55 }
 0xb43   : > { %19528 = vmatmul.mubr.msk.f32.gmra.mrb[132].mxu0 %vm12866_vm7, %v23940_v38 }
 0xb44   : > { %19530 = vmatprep.mubr.msk.f32.mxu0 %vm20050_vm1, %v24861_v55 }
 0xb45   : > { %19544 = vmatmul.mubr.msk.f32.vlgmr.msra.gmra.mrb[130].mxu1 %vm12866_vm7, %v23926_v28 }
 0xb46   : > { %v24108_v41 = vpop.f32.mrb[30].mxu0  ;;  %19546 = vmatprep.mubr.msk.f32.mxu1 %vm20050_vm1, %v24861_v55  ;;  %19947 = vmatpush3.bf16.msk.msra.mxu1 %vm23358_vm9, %v19945_v47 }
 0xb47   : > { %v15317_v7 = vrot.slane %v24108_v41, 4  ;;  %v19146_v56 = vpop.f32.mrb[31].mxu0  ;;  %19531 = vmatmul.mubr.msk.f32.gmra.mrb[134].mxu0 %vm12866_vm7, %v24007_v23 }
 0xb48   : > { %v24120_v34 = vpop.f32.mrb[30].mxu1  ;;  %19533 = vmatprep.mubr.msk.f32.mxu0 %vm20050_vm1, %v24861_v55 }
 0xb49   : > { %15343 = vrot.lane.b32.xlu1 %v15317_v7, %s20053_s24  ;;  %v15318_v24 = vrot.slane %v24120_v34, 4  ;;  %v19165_v15 = vpop.f32.mrb[31].mxu1  ;;  %19547 = vmatmul.mubr.msk.f32.gmra.mrb[132].mxu1 %vm12866_vm7, %v23940_v38 }
 0xb4a   : > { %19549 = vmatprep.mubr.msk.f32.mxu1 %vm20050_vm1, %v24861_v55 }
 0xb4b   : > { %v24127_v31 = vpop.f32.mrb[32].mxu0  ;;  %15345 = vrot.lane.b32.xlu0 %v15318_v24, %s20053_s24  ;;  %19534 = vmatmul.mubr.msk.f32.gmra.mrb[136].mxu0 %vm12866_vm7, %v24035_v50 }
 0xb4c   : > { %v19149_v33 = vpop.f32.mrb[33].mxu0  ;;  %v24136_v37 = vpop.f32.mrb[32].mxu1  ;;  %19536 = vmatprep.mubr.msk.f32.mxu0 %vm20050_vm1, %v24861_v55 }
 0xb4d   : > { %15463 = vrot.lane.b32.xlu1 %v24127_v31, %s20054_s25  ;;  %v19168_v8 = vpop.f32.mrb[33].mxu1  ;;  %19550 = vmatmul.mubr.msk.f32.gmra.mrb[134].mxu1 %vm12866_vm7, %v24007_v23 }
 0xb4e   : > { %19552 = vmatprep.mubr.msk.f32.mxu1 %vm20050_vm1, %v24861_v55 }
 0xb4f   : > { %v13142_v26 = vpop.f32.mrb[34].mxu0  ;;  %15465 = vrot.lane.b32.xlu0 %v24136_v37, %s20054_s25  ;;  %19537 = vmatmul.mubr.msk.f32.gmra.mrb[138].mxu0 %vm12866_vm7, %v24048_v10 }
 0xb50   : > { %v19152_v12 = vpop.f32.mrb[35].mxu0  ;;  %v13235_v22 = vpop.f32.mrb[34].mxu1  ;;  %19562 = vmatprep.mubr.msk.f32.mxu0 %vm20050_vm1, %v24861_v55  ;;  %v15749_v27 = vrot.slane %v13142_v26, 4 }
 0xb51   : > { %v15750_v61 = vrot.slane %v13235_v22, 4  ;;  %15656 = vrot.lane.b32.xlu1 %v13235_v22, %s20053_s24  ;;  %v19171_v18 = vpop.f32.mrb[35].mxu1  ;;  %19553 = vmatmul.mubr.msk.f32.gmra.mrb[136].mxu1 %vm12866_vm7, %v24035_v50 }
 0xb52   : > { %19555 = vmatprep.mubr.msk.f32.mxu1 %vm20050_vm1, %v24861_v55 }
 0xb53   : > { %v24153_v62 = vpop.f32.mrb[36].mxu0  ;;  %15654 = vrot.lane.b32.xlu0 %v13142_v26, %s20053_s24  ;;  %19563 = vmatmul.mubr.msk.f32.vlgmr.msra.gmra.mrb[140].mxu0 %vm12866_vm7, %v23926_v28 }
 0xb54   : > { %v19155_v16 = vpop.f32.mrb[37].mxu0  ;;  %v24160_v17 = vpop.f32.mrb[36].mxu1  ;;  %19565 = vmatprep.mubr.msk.f32.mxu0 %vm20050_vm1, %v24861_v55  ;;  %v15916_v49 = vrot.slane %v24153_v62, 4 }
 0xb55   : > { %15776 = vrot.lane.b32.xlu1 %v15750_v61, %s20054_s25  ;;  %v19174_v19 = vpop.f32.mrb[37].mxu1  ;;  %19556 = vmatmul.mubr.msk.f32.gmra.mrb[138].mxu1 %vm12866_vm7, %v24048_v10  ;;  %v15917_v1 = vrot.slane %v24160_v17, 4 }
 0xb56   : > { %19581 = vmatprep.mubr.msk.f32.mxu1 %vm20050_vm1, %v24861_v55 }
 0xb57   : > { %v13152_v36 = vpop.f32.mrb[38].mxu0  ;;  %15774 = vrot.lane.b32.xlu0 %v15749_v27, %s20054_s25  ;;  %19566 = vmatmul.mubr.msk.f32.gmra.mrb[142].mxu0 %vm12866_vm7, %v23940_v38 }
 0xb58   : > { %v19158_v5 = vpop.f32.mrb[39].mxu0  ;;  %v13245_v59 = vpop.f32.mrb[38].mxu1  ;;  %19568 = vmatprep.mubr.msk.f32.mxu0 %vm20050_vm1, %v24861_v55 }
 0xb59   : > { %15940 = vrot.lane.b32.xlu1 %v15916_v49, %s20053_s24  ;;  %v19177_v13 = vpop.f32.mrb[39].mxu1  ;;  %19582 = vmatmul.mubr.msk.f32.vlgmr.msra.gmra.mrb[140].mxu1 %vm12866_vm7, %v23926_v28 }
 0xb5a   : > { %19584 = vmatprep.mubr.msk.f32.mxu1 %vm20050_vm1, %v24861_v55 }
 0xb5b   : > { %v24179_v53 = vpop.f32.mrb[40].mxu0  ;;  %15942 = vrot.lane.b32.xlu0 %v15917_v1, %s20053_s24  ;;  %19569 = vmatmul.mubr.msk.f32.gmra.mrb[144].mxu0 %vm12866_vm7, %v24007_v23 }
 0xb5c   : > { %v19184_v14 = vpop.f32.mrb[41].mxu0  ;;  %v24186_v30 = vpop.f32.mrb[40].mxu1  ;;  %19571 = vmatprep.mubr.msk.f32.mxu0 %vm20050_vm1, %v24861_v55  ;;  %v15319_v28 = vrot.slane %v24179_v53, 4 }
 0xb5d   : > { %16060 = vrot.lane.b32.xlu1 %v13152_v36, %s20054_s25  ;;  %v19203_v58 = vpop.f32.mrb[41].mxu1  ;;  %19585 = vmatmul.mubr.msk.f32.gmra.mrb[142].mxu1 %vm12866_vm7, %v23940_v38  ;;  %v15320_v4 = vrot.slane %v24186_v30, 4 }
 0xb5e   : > { %19587 = vmatprep.mubr.msk.f32.mxu1 %vm20050_vm1, %v24861_v55 }
 0xb5f   : > { %v24194_v63 = vpop.f32.mrb[42].mxu0  ;;  %16062 = vrot.lane.b32.xlu0 %v13245_v59, %s20054_s25  ;;  %19572 = vmatmul.mubr.msk.f32.gmra.mrb[146].mxu0 %vm12866_vm7, %v24035_v50  ;;  %v24266_v59 = vpop.permute.xlu0 %16191 }
 0xb60   : > { %v19187_v25 = vpop.f32.mrb[43].mxu0  ;;  %v24202_v40 = vpop.f32.mrb[42].mxu1  ;;  %19574 = vmatprep.mubr.msk.f32.mxu0 %vm20050_vm1, %v24861_v55 }
 0xb61   : > { %15347 = vrot.lane.b32.xlu1 %v15319_v28, %s20053_s24  ;;  %v19206_v38 = vpop.f32.mrb[43].mxu1  ;;  %19588 = vmatmul.mubr.msk.f32.gmra.mrb[144].mxu1 %vm12866_vm7, %v24007_v23 }
 0xb62   : > { %19590 = vmatprep.mubr.msk.f32.mxu1 %vm20050_vm1, %v24861_v55 }
 0xb63   : > { %v13328_v35 = vpop.f32.mrb[44].mxu0  ;;  %15349 = vrot.lane.b32.xlu0 %v15320_v4, %s20053_s24  ;;  %19575 = vmatmul.mubr.msk.f32.gmra.mrb[148].mxu0 %vm12866_vm7, %v24048_v10 }
 0xb64   : > { %v19190_v51 = vpop.f32.mrb[45].mxu0  ;;  %v13421_v0 = vpop.f32.mrb[44].mxu1  ;;  %v15751_v54 = vrot.slane %v13328_v35, 4 }
 0xb65   : > { %15467 = vrot.lane.b32.xlu1 %v24194_v63, %s20054_s25  ;;  %v19209_v44 = vpop.f32.mrb[45].mxu1  ;;  %19591 = vmatmul.mubr.msk.f32.gmra.mrb[146].mxu1 %vm12866_vm7, %v24035_v50  ;;  %v15752_v39 = vrot.slane %v13421_v0, 4 }
 0xb66   : > { %19593 = vmatprep.mubr.msk.f32.mxu1 %vm20050_vm1, %v24861_v55 }
 0xb67   : > { %v24218_v42 = vpop.f32.mrb[46].mxu0  ;;  %15469 = vrot.lane.b32.xlu0 %v24202_v40, %s20054_s25 }
 0xb68   : > { %v19193_v23 = vpop.f32.mrb[47].mxu0  ;;  %v24224_v20 = vpop.f32.mrb[46].mxu1  ;;  %v15918_v55 = vrot.slane %v24218_v42, 4 }
 0xb69   : > { %15660 = vrot.lane.b32.xlu1 %v13421_v0, %s20053_s24  ;;  %v19212_v43 = vpop.f32.mrb[47].mxu1  ;;  %19594 = vmatmul.mubr.msk.f32.gmra.mrb[148].mxu1 %vm12866_vm7, %v24048_v10  ;;  %v15919_v32 = vrot.slane %v24224_v20, 4  ;;  %v24280_v23 = vpop.permute.xlu1 %16160 }
 0xb6b   : > { %v13338_v9 = vpop.f32.mrb[48].mxu0  ;;  %15658 = vrot.lane.b32.xlu0 %v13328_v35, %s20053_s24 }
 0xb6c   : > { %v19196_v50 = vpop.f32.mrb[49].mxu0  ;;  %v13431_v6 = vpop.f32.mrb[48].mxu1 }
 0xb6d   : > { %15780 = vrot.lane.b32.xlu1 %v15752_v39, %s20054_s25  ;;  %v19215_v2 = vpop.f32.mrb[49].mxu1 }
 0xb6f   : > { %15778 = vrot.lane.b32.xlu0 %v15751_v54, %s20054_s25  ;;  %v15557_v54 = vrot.slane %v24127_v31, 4 }
 0xb71   : > { %15944 = vrot.lane.b32.xlu1 %v15918_v55, %s20053_s24 }
 0xb72   : > { %v24235_v46 = vpop.f32.mrb[50].mxu0 }
 0xb73   : > { %15946 = vrot.lane.b32.xlu0 %v15919_v32, %s20053_s24  ;;  %v19222_v10 = vpop.f32.mrb[51].mxu0  ;;  %v15321_v48 = vrot.slane %v24235_v46, 4 }
 0xb75   : > { %16064 = vrot.lane.b32.xlu1 %v13338_v9, %s20054_s25 }
 0xb76   : > { %v24240_v60 = vpop.f32.mrb[50].mxu1  ;;  %v24242_v45 = vpop.f32.mrb[52].mxu0 }
 0xb77   : > { %16066 = vrot.lane.b32.xlu0 %v13431_v6, %s20054_s25  ;;  %v15322_v3 = vrot.slane %v24240_v60, 4  ;;  %v19241_v57 = vpop.f32.mrb[51].mxu1  ;;  %v19225_v52 = vpop.f32.mrb[53].mxu0 }
 0xb79   : > { %15351 = vrot.lane.b32.xlu1 %v15321_v48, %s20053_s24 }
 0xb7a   : > { %v24247_v29 = vpop.f32.mrb[52].mxu1  ;;  %v13514_v47 = vpop.f32.mrb[54].mxu0 }
 0xb7b   : > { %15353 = vrot.lane.b32.xlu0 %v15322_v3, %s20053_s24  ;;  %v19244_v7 = vpop.f32.mrb[53].mxu1  ;;  %v19228_v56 = vpop.f32.mrb[55].mxu0  ;;  %v15753_v16 = vrot.slane %v13514_v47, 4 }
 0xb7d   : > { %15471 = vrot.lane.b32.xlu1 %v24242_v45, %s20054_s25 }
 0xb7e   : > { %v13607_v24 = vpop.f32.mrb[54].mxu1  ;;  %v24252_v15 = vpop.f32.mrb[56].mxu0 }
 0xb7f   : > { %15473 = vrot.lane.b32.xlu0 %v24247_v29, %s20054_s25  ;;  %v19247_v33 = vpop.f32.mrb[55].mxu1  ;;  %v19231_v8 = vpop.f32.mrb[57].mxu0  ;;  %v15754_v26 = vrot.slane %v13607_v24, 4  ;;  %v15920_v27 = vrot.slane %v24252_v15, 4 }
 0xb81   : > { %15664 = vrot.lane.b32.xlu1 %v13607_v24, %s20053_s24 }
 0xb82   : > { %v24257_v12 = vpop.f32.mrb[56].mxu1  ;;  %v13524_v22 = vpop.f32.mrb[58].mxu0 }
 0xb83   : > { %15662 = vrot.lane.b32.xlu0 %v13514_v47, %s20053_s24  ;;  %v19234_v61 = vpop.f32.mrb[59].mxu0  ;;  %v19250_v18 = vpop.f32.mrb[57].mxu1  ;;  %v15921_v36 = vrot.slane %v24257_v12, 4 }
 0xb85   : > { %15784 = vrot.lane.b32.xlu1 %v15754_v26, %s20054_s25 }
 0xb86   : > { %v13617_v49 = vpop.f32.mrb[58].mxu1  ;;  %v24262_v19 = vpop.f32.mrb[60].mxu0 }
 0xb87   : > { %15782 = vrot.lane.b32.xlu0 %v15753_v16, %s20054_s25  ;;  %v19253_v1 = vpop.f32.mrb[59].mxu1  ;;  %v19260_v5 = vpop.f32.mrb[61].mxu0  ;;  %v15323_v4 = vrot.slane %v24262_v19, 4 }
 0xb89   : > { %15948 = vrot.lane.b32.xlu1 %v15920_v27, %s20053_s24 }
 0xb8a   : > { %v24269_v13 = vpop.f32.mrb[60].mxu1  ;;  %v24271_v14 = vpop.f32.mrb[62].mxu0 }
 0xb8b   : > { %15950 = vrot.lane.b32.xlu0 %v15921_v36, %s20053_s24  ;;  %v19279_v28 = vpop.f32.mrb[61].mxu1  ;;  %v19263_v58 = vpop.f32.mrb[63].mxu0  ;;  %v15324_v51 = vrot.slane %v24269_v13, 4 }
 0xb8d   : > { %16068 = vrot.lane.b32.xlu1 %v13524_v22, %s20054_s25 }
 0xb8e   : > { %v24276_v25 = vpop.f32.mrb[62].mxu1  ;;  %v13700_v38 = vpop.f32.mrb[64].mxu0 }
 0xb8f   : > { %16070 = vrot.lane.b32.xlu0 %v13617_v49, %s20054_s25  ;;  %v15342_v35 = vpop.permute.xlu0 %15341  ;;  %v19282_v0 = vpop.f32.mrb[63].mxu1  ;;  %v15755_v22 = vrot.slane %v13700_v38, 4 }
 0xb90   : > { %v19266_v44 = vpop.f32.mrb[65].mxu0  ;;  %v15412_v39 = vadd.f32 %v15342_v35, %v23989_v21 }
 0xb91   : > { %15355 = vrot.lane.b32.xlu1 %v15323_v4, %s20053_s24 }
 0xb92   : > { %v13793_v43 = vpop.f32.mrb[64].mxu1  ;;  %v24284_v9 = vpop.f32.mrb[66].mxu0 }
 0xb93   : > { %15357 = vrot.lane.b32.xlu0 %v15324_v51, %s20053_s24  ;;  %v15462_v50 = vpop.permute.xlu0 %15461  ;;  %v19285_v6 = vpop.f32.mrb[65].mxu1  ;;  %v15756_v47 = vrot.slane %v13793_v43, 4 }
 0xb94   : > { %v15532_v55 = vadd.f32 %v15462_v50, %v15412_v39  ;;  %v19269_v2 = vpop.f32.mrb[67].mxu0 }
 0xb95   : > { %v15653_v32 = vpop.permute.xlu1 %15652  ;;  %15475 = vrot.lane.b32.xlu1 %v24271_v14, %s20054_s25 }
 0xb96   : > { %v24290_v10 = vpop.f32.mrb[66].mxu1  ;;  %v13710_v48 = vpop.f32.mrb[68].mxu0  ;;  %v24292_v3 = vadd.f32 %v15557_v54, %v15532_v55  ;;  %v15724_v52 = vadd.f32 %v15653_v32, %v24018_v11  ;;  %v15922_v11 = vrot.slane %v24284_v9, 4 }
 0xb97   : > { %15477 = vrot.lane.b32.xlu0 %v24276_v25, %s20054_s25  ;;  %v19272_v21 = vpop.f32.mrb[69].mxu0  ;;  %v19288_v57 = vpop.f32.mrb[67].mxu1  ;;  %v15923_v16 = vrot.slane %v24290_v10, 4 }
 0xb99   : > { %v15773_v31 = vpop.permute.xlu1 %15772  ;;  %15668 = vrot.lane.b32.xlu1 %v13793_v43, %s20053_s24 }
 0xb9a   : > { %v15844_v7 = vadd.f32 %v15773_v31, %v15724_v52  ;;  %v13803_v56 = vpop.f32.mrb[68].mxu1  ;;  %v24298_v24 = vpop.f32.mrb[70].mxu0 }
 0xb9b   : > { %15666 = vrot.lane.b32.xlu0 %v13700_v38, %s20053_s24  ;;  %v19291_v33 = vpop.f32.mrb[69].mxu1  ;;  %v19298_v8 = vpop.f32.mrb[71].mxu0  ;;  %v15325_v28 = vrot.slane %v24298_v24, 4 }
 0xb9c   : > { %v24302_v26 = vadd.f32 %v15844_v7, %v24153_v62 }
 0xb9d   : > { %15788 = vrot.lane.b32.xlu1 %v15756_v47, %s20054_s25 }
 0xb9e   : > { %v24306_v61 = vpop.f32.mrb[70].mxu1  ;;  %v24308_v18 = vpop.f32.mrb[72].mxu0 }
 0xb9f   : > { %15786 = vrot.lane.b32.xlu0 %v15755_v22, %s20054_s25  ;;  %v19317_v27 = vpop.f32.mrb[71].mxu1  ;;  %v19301_v49 = vpop.f32.mrb[73].mxu0  ;;  %v15326_v38 = vrot.slane %v24306_v61, 4 }
 0xba1   : > { %15952 = vrot.lane.b32.xlu1 %v15922_v11, %s20053_s24 }
 0xba2   : > { %v24313_v36 = vpop.f32.mrb[72].mxu1  ;;  %v13886_v62 = vpop.f32.mrb[74].mxu0 }
 0xba3   : > { %15954 = vrot.lane.b32.xlu0 %v15923_v16, %s20053_s24  ;;  %v19320_v1 = vpop.f32.mrb[73].mxu1  ;;  %v19304_v5 = vpop.f32.mrb[75].mxu0  ;;  %v15757_v52 = vrot.slane %v13886_v62, 4 }
 0xba5   : > { %16072 = vrot.lane.b32.xlu1 %v13710_v48, %s20054_s25 }
 0xba6   : > { %v13979_v58 = vpop.f32.mrb[74].mxu1  ;;  %v24318_v4 = vpop.f32.mrb[76].mxu0 }
 0xba7   : > { %16074 = vrot.lane.b32.xlu0 %v13803_v56, %s20054_s25  ;;  %v19323_v35 = vpop.f32.mrb[75].mxu1  ;;  %v19307_v51 = vpop.f32.mrb[77].mxu0  ;;  %v15758_v2 = vrot.slane %v13979_v58, 4  ;;  %v15924_v47 = vrot.slane %v24318_v4, 4 }
 0xba9   : > { %15359 = vrot.lane.b32.xlu1 %v15325_v28, %s20053_s24 }
 0xbaa   : > { %v24323_v0 = vpop.f32.mrb[76].mxu1  ;;  %v13896_v44 = vpop.f32.mrb[78].mxu0 }
 0xbab   : > { %15361 = vrot.lane.b32.xlu0 %v15326_v38, %s20053_s24  ;;  %v19310_v39 = vpop.f32.mrb[79].mxu0  ;;  %v19326_v43 = vpop.f32.mrb[77].mxu1  ;;  %v15925_v56 = vrot.slane %v24323_v0, 4  ;;  %v15558_v38 = vrot.slane %v24136_v37, 4 }
 0xbad   : > { %15479 = vrot.lane.b32.xlu1 %v24308_v18, %s20054_s25 }
 0xbae   : > { %v13989_v50 = vpop.f32.mrb[78].mxu1  ;;  %v24328_v6 = vpop.f32.mrb[80].mxu0 }
 0xbaf   : > { %15481 = vrot.lane.b32.xlu0 %v24313_v36, %s20054_s25  ;;  %v19329_v54 = vpop.f32.mrb[79].mxu1  ;;  %v19336_v55 = vpop.f32.mrb[81].mxu0  ;;  %v15327_v5 = vrot.slane %v24328_v6, 4 }
 0xbb1   : > { %15672 = vrot.lane.b32.xlu1 %v13979_v58, %s20053_s24 }
 0xbb2   : > { %v24333_v32 = vpop.f32.mrb[80].mxu1  ;;  %v24335_v48 = vpop.f32.mrb[82].mxu0 }
 0xbb3   : > { %15670 = vrot.lane.b32.xlu0 %v13886_v62, %s20053_s24  ;;  %v19355_v21 = vpop.f32.mrb[81].mxu1  ;;  %v19339_v57 = vpop.f32.mrb[83].mxu0  ;;  %v15328_v51 = vrot.slane %v24333_v32, 4 }
 0xbb5   : > { %15792 = vrot.lane.b32.xlu1 %v15758_v2, %s20054_s25  ;;  %v15559_v2 = vrot.slane %v24194_v63, 4 }
 0xbb6   : > { %v24340_v31 = vpop.f32.mrb[82].mxu1  ;;  %v24342_v7 = vpop.f32.mrb[84].mxu0 }
 0xbb7   : > { %15790 = vrot.lane.b32.xlu0 %v15757_v52, %s20054_s25  ;;  %v19358_v33 = vpop.f32.mrb[83].mxu1  ;;  %v19342_v8 = vpop.f32.mrb[85].mxu0 }
 0xbb9   : > { %15956 = vrot.lane.b32.xlu1 %v15924_v47, %s20053_s24 }
 0xbba   : > { %v14165_v11 = vpop.f32.mrb[84].mxu1  ;;  %v24348_v16 = vpop.f32.mrb[86].mxu0 }
 0xbbb   : > { %v15344_v22 = vpop.permute.xlu1 %15343  ;;  %15958 = vrot.lane.b32.xlu0 %v15925_v56, %s20053_s24  ;;  %v19361_v27 = vpop.f32.mrb[85].mxu1 }
 0xbbc   : > { %v19345_v49 = vpop.f32.mrb[87].mxu0  ;;  %v15413_v62 = vadd.f32 %v15344_v22, %v24108_v41 }
 0xbbd   : > { %16076 = vrot.lane.b32.xlu1 %v13896_v44, %s20054_s25  ;;  %v15346_v1 = vpop.permute.xlu0 %15345 }
 0xbbe   : > { %v24353_v58 = vpop.f32.mrb[86].mxu1  ;;  %v24358_v39 = vpop.f32.mrb[88].mxu0  ;;  %v15414_v41 = vadd.f32 %v15346_v1, %v24120_v34 }
 0xbbf   : > { %v15464_v28 = vpop.permute.xlu1 %15463  ;;  %16078 = vrot.lane.b32.xlu0 %v13989_v50, %s20054_s25  ;;  %v19364_v43 = vpop.f32.mrb[87].mxu1 }
 0xbc0   : > { %v15533_v35 = vadd.f32 %v15464_v28, %v15413_v62  ;;  %v19348_v54 = vpop.f32.mrb[89].mxu0 }
 0xbc1   : > { %15363 = vrot.lane.b32.xlu1 %v15327_v5, %s20053_s24  ;;  %v15466_v44 = vpop.permute.xlu0 %15465  ;;  %v15760_v5 = vrot.slane %v14165_v11, 4 }
 0xbc2   : > { %v15606_v55 = vadd.f32 %v15558_v38, %v15533_v35  ;;  %v15534_v21 = vadd.f32 %v15466_v44, %v15414_v41  ;;  %v24363_v57 = vpop.f32.mrb[88].mxu1  ;;  %v24365_v37 = vpop.f32.mrb[90].mxu0 }
 0xbc3   : > { %v15657_v50 = vpop.permute.xlu1 %15656  ;;  %15365 = vrot.lane.b32.xlu0 %v15328_v51, %s20053_s24  ;;  %v19367_v52 = vpop.f32.mrb[89].mxu1 }
 0xbc4   : > { %v19374_v47 = vpop.f32.mrb[91].mxu0  ;;  %v24368_v56 = vadd.f32 %v15559_v2, %v15534_v21  ;;  %v15726_v33 = vadd.f32 %v15657_v50, %v15606_v55  ;;  %v15759_v55 = vrot.slane %v24342_v7, 4  ;;  %v15926_v2 = vrot.slane %v24348_v16, 4 }
 0xbc5   : > { %15483 = vrot.lane.b32.xlu1 %v24335_v48, %s20054_s25  ;;  %v15655_v34 = vpop.permute.xlu0 %15654  ;;  %v15927_v47 = vrot.slane %v24353_v58, 4 }
 0xbc6   : > { %v24372_v8 = vpop.f32.mrb[90].mxu1  ;;  %v24374_v63 = vpop.f32.mrb[92].mxu0  ;;  %v15725_v49 = vadd.f32 %v15655_v34, %v24292_v3 }
 0xbc7   : > { %v15777_v22 = vpop.permute.xlu1 %15776  ;;  %15485 = vrot.lane.b32.xlu0 %v24340_v31, %s20054_s25  ;;  %v19393_v27 = vpop.f32.mrb[91].mxu1 }
 0xbc8   : > { %v15846_v62 = vadd.f32 %v15777_v22, %v15726_v33  ;;  %v19377_v1 = vpop.f32.mrb[93].mxu0 }
 0xbc9   : > { %15676 = vrot.lane.b32.xlu1 %v14165_v11, %s20053_s24  ;;  %v15775_v28 = vpop.permute.xlu0 %15774 }
 0xbca   : > { %v15845_v38 = vadd.f32 %v15775_v28, %v15725_v49  ;;  %v24380_v35 = vpop.f32.mrb[92].mxu1  ;;  %v24382_v51 = vpop.f32.mrb[94].mxu0  ;;  %v24385_v43 = vadd.f32 %v15846_v62, %v24218_v42 }
 0xbcb   : > { %v15941_v41 = vpop.permute.xlu1 %15940  ;;  %15674 = vrot.lane.b32.xlu0 %v24342_v7, %s20053_s24  ;;  %v19396_v54 = vpop.f32.mrb[93].mxu1 }
 0xbcc   : > { %v15869_v3 = vadd.f32 %v15845_v38, %v24160_v17  ;;  %v19380_v44 = vpop.f32.mrb[95].mxu0  ;;  %v16012_v21 = vadd.f32 %v15941_v41, %v24302_v26 }
 0xbcd   : > { %15796 = vrot.lane.b32.xlu1 %v15760_v5, %s20054_s25  ;;  %v15943_v11 = vpop.permute.xlu0 %15942 }
 0xbce   : > { %v24394_v50 = vpop.f32.mrb[94].mxu1  ;;  %v24396_v42 = vpop.f32.mrb[96].mxu0  ;;  %v16013_v34 = vadd.f32 %v15943_v11, %v15869_v3  ;;  %v15329_v3 = vrot.slane %v24365_v37, 4 }
 0xbcf   : > { %v16061_v52 = vpop.permute.xlu1 %16060  ;;  %15794 = vrot.lane.b32.xlu0 %v15759_v55, %s20054_s25  ;;  %v19399_v17 = vpop.f32.mrb[95].mxu1 }
 0xbd0   : > { %v16132_v33 = vadd.f32 %v16061_v52, %v16012_v21  ;;  %v19383_v7 = vpop.f32.mrb[97].mxu0  ;;  %v15560_v52 = vrot.slane %v24202_v40, 4 }
 0xbd1   : > { %15960 = vrot.lane.b32.xlu1 %v15926_v2, %s20053_s24  ;;  %v16063_v22 = vpop.permute.xlu0 %16062 }
 0xbd2   : > { %v16163_v27 = vmul.f32 %v24280_v23, %v16132_v33  ;;  %v16133_v49 = vadd.f32 %v16063_v22, %v16013_v34  ;;  %v24402_v26 = vpop.f32.mrb[96].mxu1  ;;  %v24404_v62 = vpop.f32.mrb[98].mxu0 }
 0xbd3   : > { %v15348_v1 = vpop.permute.xlu1 %15347  ;;  %15962 = vrot.lane.b32.xlu0 %v15927_v47, %s20053_s24  ;;  %v19386_v5 = vpop.f32.mrb[99].mxu0 }
 0xbd4   : > { %v16194_v28 = vadd.f32 %v24266_v59, %v16163_v27  ;;  %v16164_v38 = vmul.f32 %v24280_v23, %v16133_v49  ;;  %v19402_v41 = vpop.f32.mrb[97].mxu1  ;;  %v15415_v11 = vadd.f32 %v15348_v1, %v24179_v53 }
 0xbd5   : > { %16080 = vrot.lane.b32.xlu1 %v24358_v39, %s20054_s25  ;;  %v15350_v54 = vpop.permute.xlu0 %15349  ;;  %v15330_v39 = vrot.slane %v24372_v8, 4 }
 0xbd6   : > { %vm16218_vm1 = vcmp.gt.f32.partialorder %v16194_v28, 0.0  ;;  %v16242_v44 = vmul.f32 0.2, %v16194_v28  ;;  %v16195_v55 = vadd.f32 %v24266_v59, %v16164_v38  ;;  %v24414_v2 = vpop.f32.mrb[98].mxu1  ;;  %v24416_v21 = vpop.f32.mrb[100].mxu0  ;;  %v15416_v47 = vadd.f32 %v15350_v54, %v24186_v30 }
 0xbd7   : > { %v15468_v17 = vpop.permute.xlu1 %15467  ;;  %16082 = vrot.lane.b32.xlu0 %v24363_v57, %s20054_s25  ;;  %v19405_v34 = vpop.f32.mrb[99].mxu1  ;;  %v15561_v30 = vrot.slane %v24242_v45, 4 }
 0xbd8   : > { %v16266_v33 = vsel %vm16218_vm1, %v16194_v28, %v16242_v44  ;;  %vm16219_vm10 = vcmp.gt.f32.partialorder %v16195_v55, 0.0  ;;  %v16243_v7 = vmul.f32 0.2, %v16195_v55  ;;  %v15535_v53 = vadd.f32 %v15468_v17, %v15415_v11  ;;  %v19412_v22 = vpop.f32.mrb[101].mxu0 }
 0xbd9   : > { %16290 = vst.msk [vmem:[%s20200_s28 + $0xf] sm:$0xf] %vm4123_vm6, %v16266_v33  ;;  %15367 = vrot.lane.b32.xlu1 %v15329_v3, %s20053_s24  ;;  %v15470_v40 = vpop.permute.xlu0 %15469  ;;  %v15762_v34 = vrot.slane %v24394_v50, 4 }
 0xbda   : > { %v16267_v27 = vsel %vm16219_vm10, %v16195_v55, %v16243_v7  ;;  %v15536_v49 = vadd.f32 %v15470_v40, %v15416_v47  ;;  %v15608_v1 = vadd.f32 %v15560_v52, %v15535_v53  ;;  %v24427_v57 = vpop.f32.mrb[100].mxu1  ;;  %v24429_v5 = vpop.f32.mrb[102].mxu0 }
 0xbdb   : > { %16291 = vst.msk [vmem:[%s20200_s28 + $0x27] sm:$0xf] %vm4123_vm6, %v16267_v27  ;;  %v15661_v28 = vpop.permute.xlu1 %15660  ;;  %15369 = vrot.lane.b32.xlu0 %v15330_v39, %s20053_s24  ;;  %v19431_v38 = vpop.f32.mrb[101].mxu1 }
 0xbdc   : > { %v24434_v41 = vadd.f32 %v15561_v30, %v15536_v49  ;;  %v19415_v54 = vpop.f32.mrb[103].mxu0  ;;  %v15728_v3 = vadd.f32 %v15661_v28, %v15608_v1  ;;  %v15761_v1 = vrot.slane %v24382_v51, 4  ;;  %v15928_v28 = vrot.slane %v24396_v42, 4 }
 0xbdd   : > { %15487 = vrot.lane.b32.xlu1 %v24374_v63, %s20054_s25  ;;  %v15659_v45 = vpop.permute.xlu0 %15658 }
 0xbde   : > { %v24438_v44 = vpop.f32.mrb[102].mxu1  ;;  %v24440_v55 = vpop.f32.mrb[104].mxu0  ;;  %v15727_v47 = vadd.f32 %v15659_v45, %v24368_v56 }
 0xbdf   : > { %v15781_v11 = vpop.permute.xlu1 %15780  ;;  %15489 = vrot.lane.b32.xlu0 %v24380_v35, %s20054_s25  ;;  %v19434_v52 = vpop.f32.mrb[103].mxu1 }
 0xbe0   : > { %v15848_v17 = vadd.f32 %v15781_v11, %v15728_v3  ;;  %v19418_v39 = vpop.f32.mrb[105].mxu0  ;;  %v15929_v3 = vrot.slane %v24402_v26, 4 }
 0xbe1   : > { %15680 = vrot.lane.b32.xlu1 %v24394_v50, %s20053_s24  ;;  %v15779_v33 = vpop.permute.xlu0 %15778 }
 0xbe2   : > { %v15847_v7 = vadd.f32 %v15779_v33, %v15727_v47  ;;  %v24448_v53 = vpop.f32.mrb[104].mxu1  ;;  %v24451_v22 = vadd.f32 %v15848_v17, %v24252_v15  ;;  %v24453_v40 = vpop.f32.mrb[106].mxu0 }
 0xbe3   : > { %v15945_v30 = vpop.permute.xlu1 %15944  ;;  %15678 = vrot.lane.b32.xlu0 %v24382_v51, %s20053_s24  ;;  %v19437_v56 = vpop.f32.mrb[105].mxu1 }
 0xbe4   : > { %v15871_v27 = vadd.f32 %v15847_v7, %v24224_v20  ;;  %v19421_v49 = vpop.f32.mrb[107].mxu0  ;;  %v16014_v15 = vadd.f32 %v15945_v30, %v24385_v43 }
 0xbe5   : > { %15800 = vrot.lane.b32.xlu1 %v15762_v34, %s20054_s25  ;;  %v15947_v50 = vpop.permute.xlu0 %15946 }
 0xbe6   : > { %v24462_v38 = vpop.f32.mrb[106].mxu1  ;;  %v24464_v54 = vpop.f32.mrb[108].mxu0  ;;  %v16015_v11 = vadd.f32 %v15947_v50, %v15871_v27 }
 0xbe7   : > { %v16065_v45 = vpop.permute.xlu1 %16064  ;;  %15798 = vrot.lane.b32.xlu0 %v15761_v1, %s20054_s25  ;;  %v19424_v20 = vpop.f32.mrb[109].mxu0  ;;  %v15331_v1 = vrot.slane %v24416_v21, 4 }
 0xbe8   : > { %v16134_v52 = vadd.f32 %v16065_v45, %v16014_v15  ;;  %v19440_v51 = vpop.f32.mrb[107].mxu1  ;;  %v15562_v20 = vrot.slane %v24247_v29, 4 }
 0xbe9   : > { %15964 = vrot.lane.b32.xlu1 %v15928_v28, %s20053_s24  ;;  %v16067_v47 = vpop.permute.xlu0 %16066 }
 0xbea   : > { %v16165_v17 = vmul.f32 %v24280_v23, %v16134_v52  ;;  %v16135_v39 = vadd.f32 %v16067_v47, %v16015_v11  ;;  %v24470_v43 = vpop.f32.mrb[108].mxu1  ;;  %v24472_v34 = vpop.f32.mrb[110].mxu0 }
 0xbeb   : > { %v15352_v33 = vpop.permute.xlu1 %15351  ;;  %15966 = vrot.lane.b32.xlu0 %v15929_v3, %s20053_s24  ;;  %v19443_v7 = vpop.f32.mrb[109].mxu1 }
 0xbec   : > { %v16196_v30 = vadd.f32 %v24266_v59, %v16165_v17  ;;  %v16166_v56 = vmul.f32 %v24280_v23, %v16135_v39  ;;  %v19450_v27 = vpop.f32.mrb[111].mxu0  ;;  %v15417_v15 = vadd.f32 %v15352_v33, %v24235_v46 }
 0xbed   : > { %16084 = vrot.lane.b32.xlu1 %v24404_v62, %s20054_s25  ;;  %v15354_v49 = vpop.permute.xlu0 %15353  ;;  %v15332_v62 = vrot.slane %v24427_v57, 4 }
 0xbee   : > { %vm16220_vm11 = vcmp.gt.f32.partialorder %v16196_v30, 0.0  ;;  %v16244_v50 = vmul.f32 0.2, %v16196_v30  ;;  %v16197_v28 = vadd.f32 %v24266_v59, %v16166_v56  ;;  %v24482_v45 = vpop.f32.mrb[110].mxu1  ;;  %v24484_v3 = vpop.f32.mrb[112].mxu0  ;;  %v15418_v11 = vadd.f32 %v15354_v49, %v24240_v60 }
 0xbef   : > { %v15472_v52 = vpop.permute.xlu1 %15471  ;;  %16086 = vrot.lane.b32.xlu0 %v24414_v2, %s20054_s25  ;;  %v19469_v51 = vpop.f32.mrb[111].mxu1  ;;  %v15563_v60 = vrot.slane %v24271_v14, 4 }
 0xbf0   : > { %v16268_v47 = vsel %vm16220_vm11, %v16196_v30, %v16244_v50  ;;  %vm16221_vm12 = vcmp.gt.f32.partialorder %v16197_v28, 0.0  ;;  %v16245_v17 = vmul.f32 0.2, %v16197_v28  ;;  %v15537_v46 = vadd.f32 %v15472_v52, %v15417_v15  ;;  %v19453_v39 = vpop.f32.mrb[113].mxu0 }
 0xbf1   : > { %16292 = vst.msk [vmem:[%s20200_s28 + $0x3f] sm:$0xf] %vm4123_vm6, %v16268_v47  ;;  %15371 = vrot.lane.b32.xlu1 %v15331_v1, %s20053_s24  ;;  %v15474_v29 = vpop.permute.xlu0 %15473 }
 0xbf2   : > { %v16269_v33 = vsel %vm16221_vm12, %v16197_v28, %v16245_v17  ;;  %v15538_v7 = vadd.f32 %v15474_v29, %v15418_v11  ;;  %v15610_v56 = vadd.f32 %v15562_v20, %v15537_v46  ;;  %v24495_v2 = vpop.f32.mrb[112].mxu1  ;;  %v24497_v27 = vpop.f32.mrb[114].mxu0  ;;  %v15764_v17 = vrot.slane %v24448_v53, 4 }
 0xbf3   : > { %16293 = vst.msk [vmem:[%s20200_s28 + $0x57] sm:$0xf] %vm4123_vm6, %v16269_v33  ;;  %v15665_v30 = vpop.permute.xlu1 %15664  ;;  %15373 = vrot.lane.b32.xlu0 %v15332_v62, %s20053_s24  ;;  %v19472_v49 = vpop.f32.mrb[113].mxu1 }
 0xbf4   : > { %v24502_v50 = vadd.f32 %v15563_v60, %v15538_v7  ;;  %v19456_v15 = vpop.f32.mrb[115].mxu0  ;;  %v15730_v1 = vadd.f32 %v15665_v30, %v15610_v56  ;;  %v15763_v49 = vrot.slane %v24440_v55, 4 }
 0xbf5   : > { %15491 = vrot.lane.b32.xlu1 %v24429_v5, %s20054_s25  ;;  %v15663_v14 = vpop.permute.xlu0 %15662 }
 0xbf6   : > { %v24506_v28 = vpop.f32.mrb[116].mxu0  ;;  %v15729_v52 = vadd.f32 %v15663_v14, %v24434_v41 }
 0xbf7   : > { %v15785_v20 = vpop.permute.xlu1 %15784  ;;  %15493 = vrot.lane.b32.xlu0 %v24438_v44, %s20054_s25  ;;  %v24510_v11 = vpop.f32.mrb[114].mxu1 }
 0xbf8   : > { %v15850_v62 = vadd.f32 %v15785_v20, %v15730_v1  ;;  %v19475_v51 = vpop.f32.mrb[115].mxu1  ;;  %v19459_v47 = vpop.f32.mrb[117].mxu0  ;;  %v15931_v20 = vrot.slane %v24462_v38, 4 }
 0xbf9   : > { %15684 = vrot.lane.b32.xlu1 %v24448_v53, %s20053_s24  ;;  %v15783_v46 = vpop.permute.xlu0 %15782 }
 0xbfa   : > { %v15849_v39 = vadd.f32 %v15783_v46, %v15729_v52  ;;  %v24517_v29 = vadd.f32 %v15850_v62, %v24284_v9  ;;  %v24519_v60 = vpop.f32.mrb[118].mxu0  ;;  %v15930_v9 = vrot.slane %v24453_v40, 4 }
 0xbfb   : > { %v15949_v33 = vpop.permute.xlu1 %15948  ;;  %15682 = vrot.lane.b32.xlu0 %v24440_v55, %s20053_s24  ;;  %v24523_v41 = vpop.f32.mrb[116].mxu1 }
 0xbfc   : > { %v15873_v7 = vadd.f32 %v15849_v39, %v24257_v12  ;;  %v19462_v56 = vpop.f32.mrb[119].mxu0  ;;  %v19478_v30 = vpop.f32.mrb[117].mxu1  ;;  %v16016_v15 = vadd.f32 %v15949_v33, %v24451_v22 }
 0xbfd   : > { %15804 = vrot.lane.b32.xlu1 %v15764_v17, %s20054_s25  ;;  %v15951_v53 = vpop.permute.xlu0 %15950 }
 0xbfe   : > { %v24530_v14 = vpop.f32.mrb[120].mxu0  ;;  %v16017_v12 = vadd.f32 %v15951_v53, %v15873_v7 }
 0xbff   : > { %24880 = vst [vmem:[#allocation8_spill] sm:$0xff] %v24530_v14  ;;  %v16069_v1 = vpop.permute.xlu1 %16068  ;;  %15802 = vrot.lane.b32.xlu0 %v15763_v49, %s20054_s25  ;;  %v24534_v52 = vpop.f32.mrb[118].mxu1 }
 0xc00   : > { %v16136_v62 = vadd.f32 %v16069_v1, %v16016_v15  ;;  %v19481_v51 = vpop.f32.mrb[119].mxu1  ;;  %v19488_v55 = vpop.f32.mrb[121].mxu0 }
 0xc01   : > { %15968 = vrot.lane.b32.xlu1 %v15930_v9, %s20053_s24  ;;  %v16071_v47 = vpop.permute.xlu0 %16070  ;;  %v15333_v9 = vrot.slane %v24472_v34, 4 }
 0xc02   : > { %v16167_v17 = vmul.f32 %v24280_v23, %v16136_v62  ;;  %v16137_v46 = vadd.f32 %v16071_v47, %v16017_v12  ;;  %v24538_v22 = vpop.f32.mrb[122].mxu0  ;;  %v15564_v62 = vrot.slane %v24276_v25, 4  ;;  %v15565_v25 = vrot.slane %v24308_v18, 4 }
 0xc03   : > { %v15356_v39 = vpop.permute.xlu1 %15355  ;;  %15970 = vrot.lane.b32.xlu0 %v15931_v20, %s20053_s24  ;;  %v24541_v33 = vpop.f32.mrb[120].mxu1 }
 0xc04   : > { %24881 = vst [vmem:[#allocation5_spill] sm:$0xff] %v24541_v33  ;;  %v16198_v56 = vadd.f32 %v24266_v59, %v16167_v17  ;;  %v16168_v7 = vmul.f32 %v24280_v23, %v16137_v46  ;;  %v19507_v30 = vpop.f32.mrb[121].mxu1  ;;  %v19491_v49 = vpop.f32.mrb[123].mxu0  ;;  %v15419_v20 = vadd.f32 %v15356_v39, %v24262_v19 }
 0xc05   : > { %16088 = vrot.lane.b32.xlu1 %v24464_v54, %s20054_s25  ;;  %v15358_v53 = vpop.permute.xlu0 %15357  ;;  %v15334_v54 = vrot.slane %v24482_v45, 4 }
 0xc06   : > { %vm16222_vm15 = vcmp.gt.f32.partialorder %v16198_v56, 0.0  ;;  %v16246_v15 = vmul.f32 0.2, %v16198_v56  ;;  %v16199_v1 = vadd.f32 %v24266_v59, %v16168_v7  ;;  %v24550_v12 = vpop.f32.mrb[124].mxu0  ;;  %v15420_v51 = vadd.f32 %v15358_v53, %v24269_v13 }
 0xc07   : > { %v15476_v55 = vpop.permute.xlu1 %15475  ;;  %16090 = vrot.lane.b32.xlu0 %v24470_v43, %s20054_s25  ;;  %v24557_v47 = vpop.f32.mrb[122].mxu1 }
 0xc08   : > { %v16270_v17 = vsel %vm16222_vm15, %v16198_v56, %v16246_v15  ;;  %vm16223_vm3 = vcmp.gt.f32.partialorder %v16199_v1, 0.0  ;;  %v16247_v46 = vmul.f32 0.2, %v16199_v1  ;;  %v15539_v7 = vadd.f32 %v15476_v55, %v15419_v20  ;;  %v19510_v19 = vpop.f32.mrb[123].mxu1  ;;  %v19494_v39 = vpop.f32.mrb[125].mxu0 }
 0xc09   : > { %16294 = vst.msk [vmem:[%s20200_s28 + $0x6f] sm:$0xf] %vm4123_vm6, %v16270_v17  ;;  %15375 = vrot.lane.b32.xlu1 %v15333_v9, %s20053_s24  ;;  %v15478_v13 = vpop.permute.xlu0 %15477  ;;  %v15766_v39 = vrot.slane %v24510_v11, 4 }
 0xc0a   : > { %v16271_v30 = vsel %vm16223_vm3, %v16199_v1, %v16247_v46  ;;  %v15540_v43 = vadd.f32 %v15478_v13, %v15420_v51  ;;  %v15612_v49 = vadd.f32 %v15564_v62, %v15539_v7  ;;  %v24563_v53 = vpop.f32.mrb[126].mxu0 }
 0xc0b   : > { %16295 = vst.msk [vmem:[%s20200_s28 + $0x87] sm:$0xf] %vm4123_vm6, %v16271_v30  ;;  %v15669_v56 = vpop.permute.xlu1 %15668  ;;  %15377 = vrot.lane.b32.xlu0 %v15334_v54, %s20053_s24  ;;  %v24568_v15 = vpop.f32.mrb[124].mxu1 }
 0xc0c   : > { %v24570_v20 = vadd.f32 %v15565_v25, %v15540_v43  ;;  %v19513_v55 = vpop.f32.mrb[125].mxu1  ;;  %v19497_v17 = vpop.f32.mrb[127].mxu0  ;;  %v15732_v9 = vadd.f32 %v15669_v56, %v15612_v49 }
 0xc0d   : > { %15495 = vrot.lane.b32.xlu1 %v24484_v3, %s20054_s25  ;;  %v15667_v18 = vpop.permute.xlu0 %15666  ;;  %v15765_v17 = vrot.slane %v24497_v27, 4 }
 0xc0e   : > { %v24574_v1 = vpop.f32.mrb[128].mxu0  ;;  %v15731_v54 = vadd.f32 %v15667_v18, %v24502_v50  ;;  %v15932_v18 = vrot.slane %v24506_v28, 4 }
 0xc0f   : > { %v15789_v62 = vpop.permute.xlu1 %15788  ;;  %15497 = vrot.lane.b32.xlu0 %v24495_v2, %s20054_s25  ;;  %v24578_v51 = vpop.f32.mrb[126].mxu1 }
 0xc10   : > { %v15852_v46 = vadd.f32 %v15789_v62, %v15732_v9  ;;  %v19500_v7 = vpop.f32.mrb[129].mxu0  ;;  %v19516_v19 = vpop.f32.mrb[127].mxu1 }
 0xc11   : > { %15688 = vrot.lane.b32.xlu1 %v24510_v11, %s20053_s24  ;;  %v15787_v13 = vpop.permute.xlu0 %15786 }
 0xc12   : > { %v15851_v25 = vadd.f32 %v15787_v13, %v15731_v54  ;;  %v24585_v30 = vadd.f32 %v15852_v46, %v24318_v4  ;;  %v24587_v43 = vpop.f32.mrb[130].mxu0  ;;  %v15933_v46 = vrot.slane %v24523_v41, 4 }
 0xc13   : > { %v15953_v49 = vpop.permute.xlu1 %15952  ;;  %15686 = vrot.lane.b32.xlu0 %v24497_v27, %s20053_s24  ;;  %v19526_v50 = vpop.f32.mrb[131].mxu0 }
 0xc14   : > { %v15875_v56 = vadd.f32 %v15851_v25, %v24290_v10  ;;  %v24592_v55 = vpop.f32.mrb[128].mxu1  ;;  %v16018_v9 = vadd.f32 %v15953_v49, %v24517_v29 }
 0xc15   : > { %15808 = vrot.lane.b32.xlu1 %v15766_v39, %s20054_s25  ;;  %v15955_v11 = vpop.permute.xlu0 %15954  ;;  %v19519_v4 = vpop.f32.mrb[129].mxu1 }
 0xc16   : > { %v24598_v62 = vpop.f32.mrb[132].mxu0  ;;  %v16019_v7 = vadd.f32 %v15955_v11, %v15875_v56 }
 0xc17   : > { %v16073_v54 = vpop.permute.xlu1 %16072  ;;  %15806 = vrot.lane.b32.xlu0 %v15765_v17, %s20054_s25  ;;  %v19529_v10 = vpop.f32.mrb[133].mxu0 }
 0xc18   : > { %v16138_v19 = vadd.f32 %v16073_v54, %v16018_v9  ;;  %v24602_v13 = vpop.f32.mrb[130].mxu1  ;;  %v15335_v9 = vrot.slane %v24530_v14, 4 }
 0xc19   : > { %15972 = vrot.lane.b32.xlu1 %v15932_v18, %s20053_s24  ;;  %v16075_v27 = vpop.permute.xlu0 %16074  ;;  %v19545_v39 = vpop.f32.mrb[131].mxu1 }
 0xc1a   : > { %v16169_v25 = vmul.f32 %v24280_v23, %v16138_v19  ;;  %v16139_v50 = vadd.f32 %v16075_v27, %v16019_v7  ;;  %v24606_v29 = vpop.f32.mrb[134].mxu0  ;;  %v15566_v27 = vrot.slane %v24313_v36, 4  ;;  %v15567_v36 = vrot.slane %v24335_v48, 4 }
 0xc1b   : > { %v15360_v49 = vpop.permute.xlu1 %15359  ;;  %15974 = vrot.lane.b32.xlu0 %v15933_v46, %s20053_s24  ;;  %v19532_v17 = vpop.f32.mrb[135].mxu0 }
 0xc1c   : > { %v16200_v4 = vadd.f32 %v24266_v59, %v16169_v25  ;;  %v16170_v56 = vmul.f32 %v24280_v23, %v16139_v50  ;;  %v24611_v11 = vpop.f32.mrb[132].mxu1  ;;  %v15421_v46 = vadd.f32 %v15360_v49, %v24298_v24 }
 0xc1d   : > { %16092 = vrot.lane.b32.xlu1 %v24519_v60, %s20054_s25  ;;  %v15362_v18 = vpop.permute.xlu0 %15361  ;;  %v19548_v54 = vpop.f32.mrb[133].mxu1  ;;  %v15336_v60 = vrot.slane %v24541_v33, 4 }
 0xc1e   : > { %vm16224_vm14 = vcmp.gt.f32.partialorder %v16200_v4, 0.0  ;;  %v16248_v10 = vmul.f32 0.2, %v16200_v4  ;;  %v16201_v7 = vadd.f32 %v24266_v59, %v16170_v56  ;;  %v24618_v19 = vpop.f32.mrb[136].mxu0  ;;  %v15422_v39 = vadd.f32 %v15362_v18, %v24306_v61 }
 0xc1f   : > { %v15480_v25 = vpop.permute.xlu1 %15479  ;;  %16094 = vrot.lane.b32.xlu0 %v24534_v52, %s20054_s25  ;;  %v19535_v50 = vpop.f32.mrb[137].mxu0 }
 0xc20   : > { %v16272_v17 = vsel %vm16224_vm14, %v16200_v4, %v16248_v10  ;;  %vm16225_vm4 = vcmp.gt.f32.partialorder %v16201_v7, 0.0  ;;  %v16249_v54 = vmul.f32 0.2, %v16201_v7  ;;  %v15541_v56 = vadd.f32 %v15480_v25, %v15421_v46  ;;  %v24625_v14 = vpop.f32.mrb[134].mxu1 }
 0xc21   : > { %16296 = vst.msk [vmem:[%s20200_s28 + $0x9f] sm:$0xf] %vm4123_vm6, %v16272_v17  ;;  %15379 = vrot.lane.b32.xlu1 %v15335_v9, %s20053_s24  ;;  %v15482_v24 = vpop.permute.xlu0 %15481  ;;  %v19551_v61 = vpop.f32.mrb[135].mxu1 }
 0xc22   : > { %v16273_v49 = vsel %vm16225_vm4, %v16201_v7, %v16249_v54  ;;  %v15542_v52 = vadd.f32 %v15482_v24, %v15422_v39  ;;  %v15614_v18 = vadd.f32 %v15566_v27, %v15541_v56  ;;  %v24631_v33 = vpop.f32.mrb[138].mxu0  ;;  %v15768_v56 = vrot.slane %v24568_v15, 4 }
 0xc23   : > { %16297 = vst.msk [vmem:[%s20200_s28 + $0xb7] sm:$0xf] %vm4123_vm6, %v16273_v49  ;;  %v15673_v4 = vpop.permute.xlu1 %15672  ;;  %15381 = vrot.lane.b32.xlu0 %v15336_v60, %s20053_s24  ;;  %v19538_v10 = vpop.f32.mrb[139].mxu0 }
 0xc24   : > { %v24636_v46 = vadd.f32 %v15567_v36, %v15542_v52  ;;  %v24638_v25 = vpop.f32.mrb[136].mxu1  ;;  %v15734_v7 = vadd.f32 %v15673_v4, %v15614_v18 }
 0xc25   : > { %15499 = vrot.lane.b32.xlu1 %v24538_v22, %s20054_s25  ;;  %v15671_v9 = vpop.permute.xlu0 %15670  ;;  %v19554_v48 = vpop.f32.mrb[137].mxu1 }
 0xc26   : > { %v15178_v39 = vpop.f32.mrb[140].mxu0  ;;  %v15733_v17 = vadd.f32 %v15671_v9, %v24570_v20  ;;  %v15767_v9 = vrot.slane %v24550_v12, 4  ;;  %v15934_v48 = vrot.slane %v24563_v53, 4 }
 0xc27   : > { %v15793_v27 = vpop.permute.xlu1 %15792  ;;  %15501 = vrot.lane.b32.xlu0 %v24557_v47, %s20054_s25  ;;  %v19564_v50 = vpop.f32.mrb[141].mxu0 }
 0xc28   : > { %v15854_v60 = vadd.f32 %v15793_v27, %v15734_v7  ;;  %v24645_v54 = vpop.f32.mrb[138].mxu1  ;;  %v15935_v50 = vrot.slane %v24578_v51, 4 }
 0xc29   : > { %15692 = vrot.lane.b32.xlu1 %v24568_v15, %s20053_s24  ;;  %v15791_v24 = vpop.permute.xlu0 %15790  ;;  %v19557_v61 = vpop.f32.mrb[139].mxu1 }
 0xc2a   : > { %v15853_v36 = vadd.f32 %v15791_v24, %v15733_v17  ;;  %v24651_v49 = vadd.f32 %v15854_v60, %v24348_v16  ;;  %v24653_v52 = vpop.f32.mrb[142].mxu0 }
 0xc2b   : > { %v15957_v18 = vpop.permute.xlu1 %15956  ;;  %15690 = vrot.lane.b32.xlu0 %v24550_v12, %s20053_s24  ;;  %v19567_v20 = vpop.f32.mrb[143].mxu0 }
 0xc2c   : > { %v15877_v4 = vadd.f32 %v15853_v36, %v24323_v0  ;;  %v15270_v10 = vpop.f32.mrb[140].mxu1  ;;  %v16020_v16 = vadd.f32 %v15957_v18, %v24585_v30 }
 0xc2d   : > { %15812 = vrot.lane.b32.xlu1 %v15768_v56, %s20054_s25  ;;  %v15959_v15 = vpop.permute.xlu0 %15958  ;;  %v19583_v7 = vpop.f32.mrb[141].mxu1 }
 0xc2e   : > { %v24662_v39 = vpop.f32.mrb[144].mxu0  ;;  %v16021_v0 = vadd.f32 %v15959_v15, %v15877_v4 }
 0xc2f   : > { %v16077_v27 = vpop.permute.xlu1 %16076  ;;  %15810 = vrot.lane.b32.xlu0 %v15767_v9, %s20054_s25  ;;  %v19570_v17 = vpop.f32.mrb[145].mxu0 }
 0xc30   : > { %v16140_v60 = vadd.f32 %v16077_v27, %v16020_v16  ;;  %v15274_v24 = vpop.f32.mrb[142].mxu1 }
 0xc31   : > { %15976 = vrot.lane.b32.xlu1 %v15934_v48, %s20053_s24  ;;  %v16079_v12 = vpop.permute.xlu0 %16078  ;;  %v19586_v56 = vpop.f32.mrb[143].mxu1  ;;  %v15337_v48 = vrot.slane %v24587_v43, 4 }
 0xc32   : > { %v16171_v61 = vmul.f32 %v24280_v23, %v16140_v60  ;;  %v16141_v36 = vadd.f32 %v16079_v12, %v16021_v0  ;;  %v24668_v20 = vpop.f32.mrb[146].mxu0  ;;  %v15568_v0 = vrot.slane %v24340_v31, 4  ;;  %v15569_v31 = vrot.slane %v24374_v63, 4 }
 0xc33   : > { %v15364_v30 = vpop.permute.xlu1 %15363  ;;  %15978 = vrot.lane.b32.xlu0 %v15935_v50, %s20053_s24  ;;  %v19573_v18 = vpop.f32.mrb[147].mxu0 }
 0xc34   : > { %v16202_v10 = vadd.f32 %v24266_v59, %v16171_v61  ;;  %v16172_v9 = vmul.f32 %v24280_v23, %v16141_v36  ;;  %v15278_v4 = vpop.f32.mrb[144].mxu1  ;;  %v15423_v50 = vadd.f32 %v15364_v30, %v24328_v6 }
 0xc35   : > { %16096 = vrot.lane.b32.xlu1 %v24574_v1, %s20054_s25  ;;  %v15366_v15 = vpop.permute.xlu0 %15365  ;;  %v19589_v7 = vpop.f32.mrb[145].mxu1  ;;  %v15338_v1 = vrot.slane %v24602_v13, 4 }
 0xc36   : > { %vm16226_vm0 = vcmp.gt.f32.partialorder %v16202_v10, 0.0  ;;  %v16250_v16 = vmul.f32 0.2, %v16202_v10  ;;  %v16203_v27 = vadd.f32 %v24266_v59, %v16172_v9  ;;  %v24678_v17 = vpop.f32.mrb[148].mxu0  ;;  %v15424_v60 = vadd.f32 %v15366_v15, %v24333_v32 }
 0xc37   : > { %v15484_v24 = vpop.permute.xlu1 %15483  ;;  %16098 = vrot.lane.b32.xlu0 %v24592_v55, %s20054_s25  ;;  %v19576_v12 = vpop.f32.mrb[149].mxu0 }
 0xc38   : > { %v16274_v56 = vsel %vm16226_vm0, %v16202_v10, %v16250_v16  ;;  %vm16227_vm5 = vcmp.gt.f32.partialorder %v16203_v27, 0.0  ;;  %v16251_v61 = vmul.f32 0.2, %v16203_v27  ;;  %v15543_v36 = vadd.f32 %v15484_v24, %v15423_v50  ;;  %v24685_v18 = vpop.f32.mrb[146].mxu1 }
 0xc39   : > { %16298 = vst.msk [vmem:[%s20200_s28 + $0xcf] sm:$0xf] %vm4123_vm6, %v16274_v56  ;;  %15383 = vrot.lane.b32.xlu1 %v15337_v48, %s20053_s24  ;;  %v15486_v6 = vpop.permute.xlu0 %15485  ;;  %v19592_v32 = vpop.f32.mrb[147].mxu1 }
 0xc3a   : > { %v16275_v30 = vsel %vm16227_vm5, %v16203_v27, %v16251_v61  ;;  %v15544_v55 = vadd.f32 %v15486_v6, %v15424_v60  ;;  %v15616_v9 = vadd.f32 %v15568_v0, %v15543_v36  ;;  %v15769_v61 = vrot.slane %v24606_v29, 4 }
 0xc3b   : > { %16299 = vst.msk [vmem:[%s20200_s28 + $0xe7] sm:$0xf] %vm4123_vm6, %v16275_v30  ;;  %v15677_v4 = vpop.permute.xlu1 %15676  ;;  %15385 = vrot.lane.b32.xlu0 %v15338_v1, %s20053_s24  ;;  %v15770_v1 = vrot.slane %v24625_v14, 4  ;;  %v15936_v6 = vrot.slane %v24618_v19, 4 }
 0xc3c   : > { %v24694_v10 = vadd.f32 %v15569_v31, %v15544_v55  ;;  %v24696_v15 = vpop.f32.mrb[148].mxu1  ;;  %v15736_v16 = vadd.f32 %v15677_v4, %v15616_v9  ;;  %v15937_v31 = vrot.slane %v24638_v25, 4 }
 0xc3d   : > { %15503 = vrot.lane.b32.xlu1 %v24598_v62, %s20054_s25  ;;  %v15675_v48 = vpop.permute.xlu0 %15674  ;;  %v19595_v7 = vpop.f32.mrb[149].mxu1 }
 0xc3e   : > { %v15735_v63 = vadd.f32 %v15675_v48, %v24636_v46  ;;  %v15938_v48 = vrot.slane %v24668_v20, 4 }
 0xc3f   : > { %v15797_v50 = vpop.permute.xlu1 %15796  ;;  %15505 = vrot.lane.b32.xlu0 %v24611_v11, %s20054_s25 }
 0xc40   : > { %v15856_v27 = vadd.f32 %v15797_v50, %v15736_v16 }
 0xc41   : > { %15696 = vrot.lane.b32.xlu1 %v24625_v14, %s20053_s24  ;;  %v15795_v0 = vpop.permute.xlu0 %15794 }
 0xc42   : > { %v15855_v60 = vadd.f32 %v15795_v0, %v15735_v63  ;;  %v24706_v24 = vadd.f32 %v15856_v27, %v24396_v42  ;;  %v15570_v63 = vrot.slane %v24380_v35, 4 }
 0xc43   : > { %v15961_v12 = vpop.permute.xlu1 %15960  ;;  %15694 = vrot.lane.b32.xlu0 %v24606_v29, %s20053_s24 }
 0xc44   : > { %v15879_v56 = vadd.f32 %v15855_v60, %v24353_v58  ;;  %v16022_v36 = vadd.f32 %v15961_v12, %v24651_v49 }
 0xc45   : > { %15816 = vrot.lane.b32.xlu1 %v15770_v1, %s20054_s25  ;;  %v15963_v46 = vpop.permute.xlu0 %15962 }
 0xc46   : > { %v16023_v42 = vadd.f32 %v15963_v46, %v15879_v56  ;;  %v15771_v46 = vrot.slane %v24662_v39, 4 }
 0xc47   : > { %v16081_v32 = vpop.permute.xlu1 %16080  ;;  %15814 = vrot.lane.b32.xlu0 %v15769_v61, %s20054_s25 }
 0xc48   : > { %v16142_v14 = vadd.f32 %v16081_v32, %v16022_v36 }
 0xc49   : > { %15980 = vrot.lane.b32.xlu1 %v15936_v6, %s20053_s24  ;;  %v16083_v30 = vpop.permute.xlu0 %16082 }
 0xc4a   : > { %v16173_v58 = vmul.f32 %v24280_v23, %v16142_v14  ;;  %v16143_v29 = vadd.f32 %v16083_v30, %v16023_v42 }
 0xc4b   : > { %v15368_v55 = vpop.permute.xlu1 %15367  ;;  %15982 = vrot.lane.b32.xlu0 %v15937_v31, %s20053_s24 }
 0xc4c   : > { %v16204_v49 = vadd.f32 %v24266_v59, %v16173_v58  ;;  %v16174_v9 = vmul.f32 %v24280_v23, %v16143_v29  ;;  %v15425_v50 = vadd.f32 %v15368_v55, %v24365_v37  ;;  %v15571_v37 = vrot.slane %v24429_v5, 4 }
 0xc4d   : > { %16100 = vrot.lane.b32.xlu1 %v24631_v33, %s20054_s25  ;;  %v15370_v4 = vpop.permute.xlu0 %15369  ;;  %v15939_v5 = vrot.slane %v24685_v18, 4 }
 0xc4e   : > { %vm16228_vm9 = vcmp.gt.f32.partialorder %v16204_v49, 0.0  ;;  %v16252_v7 = vmul.f32 0.2, %v16204_v49  ;;  %v16205_v16 = vadd.f32 %v24266_v59, %v16174_v9  ;;  %v15426_v27 = vadd.f32 %v15370_v4, %v24372_v8 }
 0xc4f   : > { %v15488_v0 = vpop.permute.xlu1 %15487  ;;  %16102 = vrot.lane.b32.xlu0 %v24645_v54, %s20054_s25 }
 0xc50   : > { %v16276_v60 = vsel %vm16228_vm9, %v16204_v49, %v16252_v7  ;;  %vm16229_vm7 = vcmp.gt.f32.partialorder %v16205_v16, 0.0  ;;  %v16253_v33 = vmul.f32 0.2, %v16205_v16  ;;  %v15545_v1 = vadd.f32 %v15488_v0, %v15425_v50 }
 0xc51   : > { %16300 = vst.msk [vmem:[%s20200_s28 + $0xff] sm:$0xf] %vm4123_vm6, %v16276_v60  ;;  %15984 = vrot.lane.b32.xlu1 %v15938_v48, %s20053_s24  ;;  %v15490_v12 = vpop.permute.xlu0 %15489 }
 0xc52   : > { %v16277_v56 = vsel %vm16229_vm7, %v16205_v16, %v16253_v33  ;;  %v15546_v61 = vadd.f32 %v15490_v12, %v15426_v27  ;;  %v15618_v35 = vadd.f32 %v15570_v63, %v15545_v1  ;;  %v15572_v27 = vrot.slane %v24438_v44, 4 }
 0xc53   : > { %16301 = vst.msk [vmem:[%s20200_s28 + $0x117] sm:$0xf] %vm4123_vm6, %v16277_v56  ;;  %v15681_v8 = vpop.permute.xlu1 %15680  ;;  %15698 = vrot.lane.b32.xlu0 %v24662_v39, %s20053_s24  ;;  %v15573_v56 = vrot.slane %v24484_v3, 4 }
 0xc54   : > { %v15619_v54 = vadd.f32 %v15571_v37, %v15546_v61  ;;  %v15738_v6 = vadd.f32 %v15681_v8, %v15618_v35 }
 0xc55   : > { %16104 = vrot.lane.b32.xlu1 %v24678_v17, %s20054_s25  ;;  %v15679_v36 = vpop.permute.xlu0 %15678 }
 0xc56   : > { %v15737_v42 = vadd.f32 %v15679_v36, %v24694_v10 }
 0xc57   : > { %v15801_v32 = vpop.permute.xlu1 %15800  ;;  %15818 = vrot.lane.b32.xlu0 %v15771_v46, %s20054_s25 }
 0xc58   : > { %v15858_v14 = vadd.f32 %v15801_v32, %v15738_v6 }
 0xc59   : > { %v15799_v31 = vpop.permute.xlu0 %15798 }
 0xc5a   : > { %v15857_v30 = vadd.f32 %v15799_v31, %v15737_v42  ;;  %v15882_v58 = vadd.f32 %v15858_v14, %v24453_v40 }
 0xc5b   : > { %v15965_v29 = vpop.permute.xlu1 %15964  ;;  %15986 = vrot.lane.b32.xlu0 %v15939_v5, %s20053_s24 }
 0xc5c   : > { %v15881_v39 = vadd.f32 %v15857_v30, %v24402_v26  ;;  %v16024_v55 = vadd.f32 %v15965_v29, %v24706_v24 }
 0xc5d   : > { %v15967_v17 = vpop.permute.xlu0 %15966 }
 0xc5e   : > { %v16025_v9 = vadd.f32 %v15967_v17, %v15881_v39 }
 0xc5f   : > { %v16085_v49 = vpop.permute.xlu1 %16084  ;;  %16106 = vrot.lane.b32.xlu0 %v24696_v15, %s20054_s25 }
 0xc60   : > { %v16144_v4 = vadd.f32 %v16085_v49, %v16024_v55 }
 0xc61   : > { %v16087_v10 = vpop.permute.xlu0 %16086 }
 0xc62   : > { %v16175_v48 = vmul.f32 %v24280_v23, %v16144_v4  ;;  %v16145_v7 = vadd.f32 %v16087_v10, %v16025_v9 }
 0xc63   : > { %v15372_v40 = vpop.permute.xlu1 %15371 }
 0xc64   : > { %v16206_v16 = vadd.f32 %v24266_v59, %v16175_v48  ;;  %v16176_v50 = vmul.f32 %v24280_v23, %v16145_v7  ;;  %v15427_v15 = vadd.f32 %v15372_v40, %v24416_v21  ;;  %v15574_v40 = vrot.slane %v24495_v2, 4 }
 0xc65   : > { %v15374_v26 = vpop.permute.xlu0 %15373 }
 0xc66   : > { %vm16230_vm13 = vcmp.gt.f32.partialorder %v16206_v16, 0.0  ;;  %v16254_v63 = vmul.f32 0.2, %v16206_v16  ;;  %v16207_v24 = vadd.f32 %v24266_v59, %v16176_v50  ;;  %v15428_v0 = vadd.f32 %v15374_v26, %v24427_v57 }
 0xc67   : > { %v15492_v60 = vpop.permute.xlu1 %15491 }
 0xc68   : > { %v16278_v33 = vsel %vm16230_vm13, %v16206_v16, %v16254_v63  ;;  %vm16231_vm2 = vcmp.gt.f32.partialorder %v16207_v24, 0.0  ;;  %v16255_v1 = vmul.f32 0.2, %v16207_v24  ;;  %v15547_v12 = vadd.f32 %v15492_v60, %v15427_v15 }
 0xc69   : > { %16302 = vst.msk [vmem:[%s20200_s28 + $0x12f] sm:$0xf] %vm4123_vm6, %v16278_v33  ;;  %v15494_v37 = vpop.permute.xlu0 %15493 }
 0xc6a   : > { %v16279_v61 = vsel %vm16231_vm2, %v16207_v24, %v16255_v1  ;;  %v15548_v35 = vadd.f32 %v15494_v37, %v15428_v0  ;;  %v15620_v8 = vadd.f32 %v15572_v27, %v15547_v12  ;;  %v15575_v27 = vrot.slane %v24538_v22, 4 }
 0xc6b   : > { %16303 = vst.msk [vmem:[%s20200_s28 + $0x147] sm:$0xf] %vm4123_vm6, %v16279_v61  ;;  %v15685_v21 = vpop.permute.xlu1 %15684 }
 0xc6c   : > { %v15621_v46 = vadd.f32 %v15573_v56, %v15548_v35  ;;  %v15740_v36 = vadd.f32 %v15685_v21, %v15620_v8 }
 0xc6d   : > { %v15683_v44 = vpop.permute.xlu0 %15682 }
 0xc6e   : > { %v15739_v6 = vadd.f32 %v15683_v44, %v15619_v54 }
 0xc6f   : > { %v15805_v57 = vpop.permute.xlu1 %15804 }
 0xc70   : > { %v15860_v32 = vadd.f32 %v15805_v57, %v15740_v36 }
 0xc71   : > { %v15803_v5 = vpop.permute.xlu0 %15802 }
 0xc72   : > { %v15859_v42 = vadd.f32 %v15803_v5, %v15739_v6  ;;  %v15884_v14 = vadd.f32 %v15860_v32, %v24506_v28 }
 0xc73   : > { %v15969_v31 = vpop.permute.xlu1 %15968 }
 0xc74   : > { %v15883_v30 = vadd.f32 %v15859_v42, %v24462_v38  ;;  %v16026_v29 = vadd.f32 %v15969_v31, %v15882_v58 }
 0xc75   : > { %v15971_v3 = vpop.permute.xlu0 %15970 }
 0xc76   : > { %v16027_v17 = vadd.f32 %v15971_v3, %v15883_v30 }
 0xc77   : > { %v16089_v39 = vpop.permute.xlu1 %16088 }
 0xc78   : > { %v16146_v55 = vadd.f32 %v16089_v39, %v16026_v29 }
 0xc79   : > { %v16091_v49 = vpop.permute.xlu0 %16090 }
 0xc7a   : > { %v16177_v9 = vmul.f32 %v24280_v23, %v16146_v55  ;;  %v16147_v4 = vadd.f32 %v16091_v49, %v16027_v17  ;;  %v15576_v17 = vrot.slane %v24557_v47, 4  ;;  %v24883_v55 = vld [vmem:[#allocation5_spill] sm:$0xff] }
 0xc7b   : > { %v15376_v10 = vpop.permute.xlu1 %15375 }
 0xc7c   : > { %v16208_v54 = vadd.f32 %v24266_v59, %v16177_v9  ;;  %v16178_v48 = vmul.f32 %v24280_v23, %v16147_v4  ;;  %v15429_v58 = vadd.f32 %v15376_v10, %v24472_v34 }
 0xc7d   : > { %v15378_v7 = vpop.permute.xlu0 %15377 }
 0xc7e   : > { %vm16232_vm8 = vcmp.gt.f32.partialorder %v16208_v54, 0.0  ;;  %v16256_v28 = vmul.f32 0.2, %v16208_v54  ;;  %v16209_v38 = vadd.f32 %v24266_v59, %v16178_v48  ;;  %v15430_v16 = vadd.f32 %v15378_v7, %v24482_v45 }
 0xc7f   : > { %v15496_v50 = vpop.permute.xlu1 %15495  ;;  %v15577_v7 = vrot.slane %v24598_v62, 4 }
 0xc80   : > { %v16280_v26 = vsel %vm16232_vm8, %v16208_v54, %v16256_v28  ;;  %vm16233_vm1 = vcmp.gt.f32.partialorder %v16209_v38, 0.0  ;;  %v16257_v63 = vmul.f32 0.2, %v16209_v38  ;;  %v15549_v24 = vadd.f32 %v15496_v50, %v15429_v58 }
 0xc81   : > { %16304 = vst.msk [vmem:[%s20200_s28 + $0x15f] sm:$0xf] %vm4123_vm6, %v16280_v26  ;;  %v15498_v15 = vpop.permute.xlu0 %15497 }
 0xc82   : > { %v16281_v0 = vsel %vm16233_vm1, %v16209_v38, %v16257_v63  ;;  %v15550_v60 = vadd.f32 %v15498_v15, %v15430_v16  ;;  %v15622_v33 = vadd.f32 %v15574_v40, %v15549_v24 }
 0xc83   : > { %16305 = vst.msk [vmem:[%s20200_s28 + $0x177] sm:$0xf] %vm4123_vm6, %v16281_v0  ;;  %v15689_v34 = vpop.permute.xlu1 %15688 }
 0xc84   : > { %v15623_v1 = vadd.f32 %v15575_v27, %v15550_v60  ;;  %v15742_v12 = vadd.f32 %v15689_v34, %v15622_v33 }
 0xc85   : > { %v15687_v2 = vpop.permute.xlu0 %15686 }
 0xc86   : > { %v15741_v37 = vadd.f32 %v15687_v2, %v15621_v46 }
 0xc87   : > { %v15809_v45 = vpop.permute.xlu1 %15808 }
 0xc88   : > { %v15862_v56 = vadd.f32 %v15809_v45, %v15742_v12 }
 0xc89   : > { %v15807_v61 = vpop.permute.xlu0 %15806 }
 0xc8a   : > { %v15861_v35 = vadd.f32 %v15807_v61, %v15741_v37  ;;  %v15886_v8 = vadd.f32 %v15862_v56, %v24563_v53 }
 0xc8b   : > { %v15973_v21 = vpop.permute.xlu1 %15972 }
 0xc8c   : > { %v15885_v44 = vadd.f32 %v15861_v35, %v24523_v41  ;;  %v16028_v36 = vadd.f32 %v15973_v21, %v15884_v14  ;;  %v24882_v14 = vld [vmem:[#allocation8_spill] sm:$0xff] }
 0xc8d   : > { %v15975_v22 = vpop.permute.xlu0 %15974 }
 0xc8e   : > { %v16029_v6 = vadd.f32 %v15975_v22, %v15885_v44  ;;  %v15578_v22 = vrot.slane %v24611_v11, 4 }
 0xc8f   : > { %v16093_v57 = vpop.permute.xlu1 %16092 }
 0xc90   : > { %v16148_v32 = vadd.f32 %v16093_v57, %v16028_v36 }
 0xc91   : > { %v16095_v5 = vpop.permute.xlu0 %16094 }
 0xc92   : > { %v16179_v42 = vmul.f32 %v24280_v23, %v16148_v32  ;;  %v16149_v31 = vadd.f32 %v16095_v5, %v16029_v6 }
 0xc93   : > { %v15380_v30 = vpop.permute.xlu1 %15379 }
 0xc94   : > { %v16210_v46 = vadd.f32 %v24266_v59, %v16179_v42  ;;  %v16180_v3 = vmul.f32 %v24280_v23, %v16149_v31  ;;  %v15431_v39 = vadd.f32 %v15380_v30, %v24882_v14  ;;  %v15579_v31 = vrot.slane %v24653_v52, 4 }
 0xc95   : > { %v15382_v29 = vpop.permute.xlu0 %15381 }
 0xc96   : > { %vm16234_vm10 = vcmp.gt.f32.partialorder %v16210_v46, 0.0  ;;  %v16258_v53 = vmul.f32 0.2, %v16210_v46  ;;  %v16211_v41 = vadd.f32 %v24266_v59, %v16180_v3  ;;  %v15432_v49 = vadd.f32 %v15382_v29, %v24883_v55 }
 0xc97   : > { %v15500_v9 = vpop.permute.xlu1 %15499 }
 0xc98   : > { %v16282_v4 = vsel %vm16234_vm10, %v16210_v46, %v16258_v53  ;;  %vm16235_vm11 = vcmp.gt.f32.partialorder %v16211_v41, 0.0  ;;  %v16259_v10 = vmul.f32 0.2, %v16211_v41  ;;  %v15551_v54 = vadd.f32 %v15500_v9, %v15431_v39 }
 0xc99   : > { %16306 = vst.msk [vmem:[%s20200_s28 + $0x18f] sm:$0xf] %vm4123_vm6, %v16282_v4  ;;  %v15502_v48 = vpop.permute.xlu0 %15501 }
 0xc9a   : > { %v16283_v28 = vsel %vm16235_vm11, %v16211_v41, %v16259_v10  ;;  %v15552_v38 = vadd.f32 %v15502_v48, %v15432_v49  ;;  %v15624_v58 = vadd.f32 %v15576_v17, %v15551_v54 }
 0xc9b   : > { %16307 = vst.msk [vmem:[%s20200_s28 + $0x1a7] sm:$0xf] %vm4123_vm6, %v16283_v28  ;;  %v15693_v40 = vpop.permute.xlu1 %15692 }
 0xc9c   : > { %v15625_v16 = vadd.f32 %v15577_v7, %v15552_v38  ;;  %v15744_v50 = vadd.f32 %v15693_v40, %v15624_v58 }
 0xc9d   : > { %v15691_v47 = vpop.permute.xlu0 %15690 }
 0xc9e   : > { %v15743_v63 = vadd.f32 %v15691_v47, %v15623_v1 }
 0xc9f   : > { %v15813_v26 = vpop.permute.xlu1 %15812 }
 0xca0   : > { %v15864_v24 = vadd.f32 %v15813_v26, %v15744_v50 }
 0xca1   : > { %v15811_v15 = vpop.permute.xlu0 %15810 }
 0xca2   : > { %v15863_v27 = vadd.f32 %v15811_v15, %v15743_v63  ;;  %v15888_v0 = vadd.f32 %v15864_v24, %v24618_v19 }
 0xca3   : > { %v15977_v60 = vpop.permute.xlu1 %15976 }
 0xca4   : > { %v15887_v33 = vadd.f32 %v15863_v27, %v24578_v51  ;;  %v16030_v34 = vadd.f32 %v15977_v60, %v15886_v8 }
 0xca5   : > { %v15979_v62 = vpop.permute.xlu0 %15978 }
 0xca6   : > { %v16031_v12 = vadd.f32 %v15979_v62, %v15887_v33 }
 0xca7   : > { %v16097_v2 = vpop.permute.xlu1 %16096 }
 0xca8   : > { %v16150_v45 = vadd.f32 %v16097_v2, %v16030_v34 }
 0xca9   : > { %v16099_v37 = vpop.permute.xlu0 %16098 }
 0xcaa   : > { %v16181_v56 = vmul.f32 %v24280_v23, %v16150_v45  ;;  %v16151_v61 = vadd.f32 %v16099_v37, %v16031_v12 }
 0xcab   : > { %v15384_v35 = vpop.permute.xlu1 %15383 }
 0xcac   : > { %v16212_v1 = vadd.f32 %v24266_v59, %v16181_v56  ;;  %v16182_v21 = vmul.f32 %v24280_v23, %v16151_v61  ;;  %v15433_v8 = vadd.f32 %v15384_v35, %v24587_v43 }
 0xcad   : > { %v15386_v44 = vpop.permute.xlu0 %15385 }
 0xcae   : > { %vm16236_vm12 = vcmp.gt.f32.partialorder %v16212_v1, 0.0  ;;  %v16260_v19 = vmul.f32 0.2, %v16212_v1  ;;  %v16213_v51 = vadd.f32 %v24266_v59, %v16182_v21  ;;  %v15434_v36 = vadd.f32 %v15386_v44, %v24602_v13 }
 0xcaf   : > { %v15504_v57 = vpop.permute.xlu1 %15503 }
 0xcb0   : > { %v16284_v6 = vsel %vm16236_vm12, %v16212_v1, %v16260_v19  ;;  %vm16237_vm15 = vcmp.gt.f32.partialorder %v16213_v51, 0.0  ;;  %v16261_v32 = vmul.f32 0.2, %v16213_v51  ;;  %v15553_v5 = vadd.f32 %v15504_v57, %v15433_v8 }
 0xcb1   : > { %16308 = vst.msk [vmem:[%s20200_s28 + $0x1bf] sm:$0xf] %vm4123_vm6, %v16284_v6  ;;  %v15506_v42 = vpop.permute.xlu0 %15505 }
 0xcb2   : > { %v16285_v30 = vsel %vm16237_vm15, %v16213_v51, %v16261_v32  ;;  %v15554_v46 = vadd.f32 %v15506_v42, %v15434_v36  ;;  %v15626_v3 = vadd.f32 %v15578_v22, %v15553_v5 }
 0xcb3   : > { %16309 = vst.msk [vmem:[%s20200_s28 + $0x1d7] sm:$0xf] %vm4123_vm6, %v16285_v30  ;;  %v15697_v43 = vpop.permute.xlu1 %15696 }
 0xcb4   : > { %v15627_v29 = vadd.f32 %v15579_v31, %v15554_v46  ;;  %v15746_v53 = vadd.f32 %v15697_v43, %v15626_v3 }
 0xcb5   : > { %v15695_v11 = vpop.permute.xlu0 %15694 }
 0xcb6   : > { %v15745_v41 = vadd.f32 %v15695_v11, %v15625_v16 }
 0xcb7   : > { %v15817_v13 = vpop.permute.xlu1 %15816 }
 0xcb8   : > { %v15866_v14 = vadd.f32 %v15817_v13, %v15746_v53 }
 0xcb9   : > { %v15815_v39 = vpop.permute.xlu0 %15814 }
 0xcba   : > { %v15865_v17 = vadd.f32 %v15815_v39, %v15745_v41  ;;  %v15890_v55 = vadd.f32 %v15866_v14, %v24668_v20 }
 0xcbb   : > { %v15981_v49 = vpop.permute.xlu1 %15980 }
 0xcbc   : > { %v15889_v9 = vadd.f32 %v15865_v17, %v24638_v25  ;;  %v16032_v4 = vadd.f32 %v15981_v49, %v15888_v0 }
 0xcbd   : > { %v15983_v52 = vpop.permute.xlu0 %15982 }
 0xcbe   : > { %v16033_v54 = vadd.f32 %v15983_v52, %v15889_v9 }
 0xcbf   : > { %v16101_v10 = vpop.permute.xlu1 %16100 }
 0xcc0   : > { %v16152_v48 = vadd.f32 %v16101_v10, %v16032_v4 }
 0xcc1   : > { %v16103_v7 = vpop.permute.xlu0 %16102 }
 0xcc2   : > { %v16183_v28 = vmul.f32 %v24280_v23, %v16152_v48  ;;  %v16153_v38 = vadd.f32 %v16103_v7, %v16033_v54 }
 0xcc3   : > { %v15985_v58 = vpop.permute.xlu1 %15984 }
 0xcc4   : > { %v16214_v40 = vadd.f32 %v24266_v59, %v16183_v28  ;;  %v16184_v16 = vmul.f32 %v24280_v23, %v16153_v38  ;;  %v16034_v50 = vadd.f32 %v15985_v58, %v15890_v55 }
 0xcc5   : > { %v15699_v47 = vpop.permute.xlu0 %15698 }
 0xcc6   : > { %vm16238_vm3 = vcmp.gt.f32.partialorder %v16214_v40, 0.0  ;;  %v16262_v20 = vmul.f32 0.2, %v16214_v40  ;;  %v16215_v25 = vadd.f32 %v24266_v59, %v16184_v16  ;;  %v15747_v26 = vadd.f32 %v15699_v47, %v15627_v29 }
 0xcc7   : > { %v16105_v63 = vpop.permute.xlu1 %16104 }
 0xcc8   : > { %v16286_v24 = vsel %vm16238_vm3, %v16214_v40, %v16262_v20  ;;  %vm16239_vm14 = vcmp.gt.f32.partialorder %v16215_v25, 0.0  ;;  %v16263_v15 = vmul.f32 0.2, %v16215_v25  ;;  %v16154_v27 = vadd.f32 %v16105_v63, %v16034_v50 }
 0xcc9   : > { %16310 = vst.msk [vmem:[%s20200_s28 + $0x1ef] sm:$0xf] %vm4123_vm6, %v16286_v24  ;;  %v15819_v0 = vpop.permute.xlu0 %15818 }
 0xcca   : > { %v16287_v60 = vsel %vm16239_vm14, %v16215_v25, %v16263_v15  ;;  %v16185_v33 = vmul.f32 %v24280_v23, %v16154_v27  ;;  %v15867_v62 = vadd.f32 %v15819_v0, %v15747_v26 }
 0xccb   : > { %16311 = vst.msk [vmem:[%s20200_s28 + $0x207] sm:$0xf] %vm4123_vm6, %v16287_v60 }
 0xccc   : > { %v16216_v34 = vadd.f32 %v24266_v59, %v16185_v33  ;;  %v15891_v2 = vadd.f32 %v15867_v62, %v24685_v18 }
 0xccd   : > { %v15987_v12 = vpop.permute.xlu0 %15986 }
 0xcce   : > { %vm16240_vm4 = vcmp.gt.f32.partialorder %v16216_v34, 0.0  ;;  %v16264_v45 = vmul.f32 0.2, %v16216_v34  ;;  %v16035_v56 = vadd.f32 %v15987_v12, %v15891_v2 }
 0xcd0   : > { %v16288_v37 = vsel %vm16240_vm4, %v16216_v34, %v16264_v45 }
 0xcd1   : > { %16312 = vst.msk [vmem:[%s20200_s28 + $0x21f] sm:$0xf] %vm4123_vm6, %v16288_v37  ;;  %v16107_v61 = vpop.permute.xlu0 %16106 }
 0xcd2   : > { %v16155_v35 = vadd.f32 %v16107_v61, %v16035_v56 }
 0xcd4   : > { %v16186_v1 = vmul.f32 %v24280_v23, %v16155_v35 }
 0xcd6   : > { %v16217_v21 = vadd.f32 %v24266_v59, %v16186_v1 }
 0xcd8   : > { %vm16241_vm0 = vcmp.gt.f32.partialorder %v16217_v21, 0.0  ;;  %v16265_v44 = vmul.f32 0.2, %v16217_v21 }
 0xcda   : > { %v16289_v19 = vsel %vm16241_vm0, %v16217_v21, %v16265_v44 }
 0xcdb   : > { %16313 = vst.msk [vmem:[%s20200_s28 + $0x237] sm:$0xf] %vm4123_vm6, %v16289_v19 }
 0xcdc PF: > { %s21_s17 = sadd.s32 1, %s20047_s17  }
 0xcdd   : > { %p18_p4 = scmp.ge.s32.totalorder %s21_s17, 4  }
 0xcdf   :  { %20 = sbr.rel (!%p18_p4) target bundleno = 1 (0x1), region = 126 }

</bundles_post_ra>
